<compile_context>
chip_gen: v7x
topology: tpu7x:2x2x1
jax: 0.10.0
libtpu: 0.0.40
codegen_flags: <defaults>
</compile_context>

<pallas_src>
import functools

import jax
import jax.numpy as jnp
import numpy as np
from jax.experimental import pallas as pl
from jax.experimental.pallas import tpu as pltpu


# ---------------------------------------------------------------------------
# Fused kernel: both GAT layers, all heads, TB graphs per grid step.
# ---------------------------------------------------------------------------
def fused_gat_kernel(x_ref, w1_ref, a1s_ref, a1d_ref, srep_ref, dsel_ref,
                     mbd1_ref, w2_ref, a2s_ref, a2d_ref, mbd2_ref, avg_ref,
                     logits_ref, logp_ref,
                     *, graphs, nodes, nheads, nhid, nclass, alpha):
    TB, N, H = graphs, nodes, nheads
    R, HN = TB * N, H * N
    srep = srep_ref[...]          # (HN, HN) bf16: per-head block of ones
    dsel = dsel_ref[...]          # (N, HN)  f32 : tiled identity (j == j' select)

    def gat_layer(x_bf, w_ref, asrc_ref, adst_ref, mbd_ref, out_dim, apply_elu):
        HO = H * out_dim
        # 1) all heads' linear projections in one MXU matmul over TB*N rows.
        h = jnp.dot(x_bf, w_ref[...], preferred_element_type=jnp.float32)      # (R, HO)
        h_bf = h.astype(jnp.bfloat16)
        # 2) all heads' attention logits, lane-concatenated as l = h*N + j.
        #    src[(b,i), h*N+j]  = a_src_h . h_i            (columns repeated over j)
        #    dst[(b,j), h*N+j'] = a_dst_h . h_j            -> keep j'==j, reduce over
        #    the graph's node (sublane) axis to get each graph's destination row.
        src = jnp.dot(h_bf, asrc_ref[...], preferred_element_type=jnp.float32)  # (R, HN)
        dst = jnp.dot(h_bf, adst_ref[...], preferred_element_type=jnp.float32)  # (R, HN)
        dst_row = jnp.sum(dst.reshape(TB, N, HN) * dsel[None],
                          axis=1, keepdims=True)                                # (TB,1,HN)
        e = src.reshape(TB, N, HN) + dst_row                                    # (TB,N,HN)
        e = jnp.where(e > 0, e, alpha * e)                                      # LeakyReLU
        e = e.reshape(R, HN)
        # 3) per-head softmax over j with NO lane shuffles: a per-row max cancels
        #    inside each head chunk; per-chunk denominators via one matmul with a
        #    0/1 block matrix (broadcast back onto every lane of the chunk).
        m = jnp.max(e, axis=-1, keepdims=True)
        p = jnp.exp(e - m)
        denom = jnp.dot(p.astype(jnp.bfloat16), srep,
                        preferred_element_type=jnp.float32)                     # (R, HN)
        att = p * pl.reciprocal(denom, approx=True)                             # (R, HN)
        # 4) block-diagonal aggregation:
        #      att_cat_b (N, H*N) @ [tile(h_b, (H,1)) * blockdiag] (H*N, H*O)
        #    -> head-concatenated output, lane-dense, no per-head matmuls/concats.
        h3 = h_bf.reshape(TB, N, HO)
        hblk = jnp.concatenate([h3] * H, axis=1) * mbd_ref[...][None]           # (TB,HN,HO)
        out = jax.lax.dot_general(
            att.astype(jnp.bfloat16).reshape(TB, N, HN), hblk,
            dimension_numbers=(((2,), (1,)), ((0,), (0,))),
            preferred_element_type=jnp.float32).reshape(R, HO)                  # (R, HO)
        if apply_elu:
            out = jnp.where(out > 0, out, jnp.exp(out) - 1.0)                   # ELU(1)
        return out

    x2 = x_ref[...].reshape(R, -1)                                              # (R, F) bf16
    x1 = gat_layer(x2, w1_ref, a1s_ref, a1d_ref, mbd1_ref, nhid, True)          # (R, H*nhid)
    o2 = gat_layer(x1.astype(jnp.bfloat16), w2_ref, a2s_ref, a2d_ref, mbd2_ref,
                   nclass, False)                                               # (R, H*nclass)
    # Head average folded into one small matmul (stays lane/sublane dense).
    logits = jnp.dot(o2.astype(jnp.bfloat16), avg_ref[...],
                     preferred_element_type=jnp.float32)                        # (R, nclass)
    # Fused log-softmax epilogue (no extra HBM round trip / XLA dispatch).
    mx = jnp.max(logits, axis=-1, keepdims=True)
    z = logits - mx
    lse = jnp.log(jnp.sum(jnp.exp(z), axis=-1, keepdims=True))
    logits_ref[...] = logits
    logp_ref[...] = z - lse


def gat_forward_fused(x, fused, *, alpha=0.2, tile_graphs=32):
    """Batched GAT forward. x: (B, N, F) -> (logits, log_probs), each (B, N, nclass)."""
    B, N, F = x.shape
    dsel = fused["DSEL"]
    assert dsel.shape[0] == N, "packed params were built for a different graph size"
    H = dsel.shape[1] // N
    nhid = fused["W1"].shape[1] // H
    nclass = fused["AVG"].shape[1]
    TB = min(tile_graphs, B)
    assert B % TB == 0, "batch of graphs must be divisible by the graph tile"

    kernel = functools.partial(fused_gat_kernel, graphs=TB, nodes=N, nheads=H,
                               nhid=nhid, nclass=nclass, alpha=alpha)
    weights = (fused["W1"], fused["A1_src"], fused["A1_dst"], fused["S_rep"],
               fused["DSEL"], fused["MBD1"], fused["W2"], fused["A2_src"],
               fused["A2_dst"], fused["MBD2"], fused["AVG"])

    def full_spec(w):
        nd = w.ndim
        return pl.BlockSpec(w.shape, lambda b, _nd=nd: (0,) * _nd)  # resident weights

    logits2, logp2 = pl.pallas_call(
        kernel,
        grid=(B // TB,),
        in_specs=[pl.BlockSpec((TB, N, F), lambda b: (b, 0, 0))]
                 + [full_spec(w) for w in weights],
        out_specs=[pl.BlockSpec((TB * N, nclass), lambda b: (b, 0)),
                   pl.BlockSpec((TB * N, nclass), lambda b: (b, 0))],
        out_shape=[jax.ShapeDtypeStruct((B * N, nclass), jnp.float32),
                   jax.ShapeDtypeStruct((B * N, nclass), jnp.float32)],
        compiler_params=pltpu.CompilerParams(
            dimension_semantics=("parallel",)),   # megacore-shard the batch axis (v7x)
    )(x.astype(jnp.bfloat16), *weights)
    return logits2.reshape(B, N, nclass), logp2.reshape(B, N, nclass)


# ---------------------------------------------------------------------------
# Host-side parameter repacking (torch layout -> fused lane-dense layout).
# ---------------------------------------------------------------------------
def fuse_gat_params(params, nodes):
    N = nodes
    W1, a1 = params["W1"], params["a1"]            # (H,F,nhid), (H,2*nhid,1)
    W2, a2 = params["W2"], params["a2"]            # (H,H*nhid,nclass), (H,2*nclass,1)
    H = W1.shape[0]
    nhid, nclass = W1.shape[2], W2.shape[2]
    eye_h = jnp.eye(H, dtype=jnp.float32)

    def w_all(W):                                  # [:, h*O+o] = W[h, :, o]
        _, Fin, O = W.shape
        return jnp.transpose(W, (1, 0, 2)).reshape(Fin, H * O)

    def a_rep(a_half):                             # (H,O) -> (H*O, H*N): [h*O+o, h'*N+j] = a[h,o]*(h==h')
        _, O = a_half.shape
        cols = (a_half[:, :, None] * eye_h[:, None, :]).reshape(H * O, H)
        return jnp.repeat(cols, N, axis=1)

    bf = lambda v: v.astype(jnp.bfloat16)
    s_rep = jnp.kron(eye_h, jnp.ones((N, N), jnp.float32))                      # (HN, HN)
    dsel = jnp.tile(jnp.eye(N, dtype=jnp.float32), (1, H))                      # (N, HN)
    mbd1 = jnp.kron(eye_h, jnp.ones((N, nhid), jnp.float32))                    # (HN, H*nhid)
    mbd2 = jnp.kron(eye_h, jnp.ones((N, nclass), jnp.float32))                  # (HN, H*nclass)
    avg = jnp.tile(jnp.eye(nclass, dtype=jnp.float32), (H, 1)) / H              # (H*nclass, nclass)

    return {
        "W1": bf(w_all(W1)),
        "A1_src": bf(a_rep(a1[:, :nhid, 0])), "A1_dst": bf(a_rep(a1[:, nhid:, 0])),
        "W2": bf(w_all(W2)),
        "A2_src": bf(a_rep(a2[:, :nclass, 0])), "A2_dst": bf(a_rep(a2[:, nclass:, 0])),
        "S_rep": bf(s_rep), "DSEL": dsel,
        "MBD1": bf(mbd1), "MBD2": bf(mbd2), "AVG": bf(avg),
    }


# ---------------------------------------------------------------------------
# GAT_ACTLayer.forward glue (top-k / sampling / gather) in plain JAX.
# ---------------------------------------------------------------------------
@functools.partial(jax.jit, static_argnames=("K", "deterministic"))
def gat_act_layer_forward(x, fused, *, K, available_actions=None,
                          deterministic=True, rng=None):
    logits, logp = gat_forward_fused(x, fused)                    # (B,N,nclass) each
    B, N, nclass = logits.shape
    # torch.gather(log(probs), dim=0, actions) indexes the NODE axis with class
    # indices; that is only well-defined when nclass <= N (here 8 == 8).
    assert nclass <= N, "gather(dim=0) semantics require nclass <= N"

    if available_actions is not None:
        logits = jnp.where(available_actions == 0, jnp.float32(-1e10), logits)
        logp = jax.nn.log_softmax(logits, axis=-1)                # re-derive masked log-probs

    if deterministic:
        actions = jax.lax.top_k(logp, K)[1]                       # mode(): top-K of probs
    else:
        # torch.multinomial(probs, K, replacement=False) via Gumbel top-k
        g = -jnp.log(-jnp.log(
            jax.random.uniform(rng, logp.shape, minval=1e-20, maxval=1.0)))
        actions = jax.lax.top_k(logp + g, K)[1]

    # Categorical_Topk_GAT.log_probs: out[b, i, k] = log(probs)[b, actions[b,i,k], k]
    b_idx = jnp.arange(B)[:, None, None]
    k_idx = jnp.arange(K)[None, None, :]
    action_log_probs = logp[b_idx, actions, k_idx]                # (B, N, K)
    return actions, action_log_probs


# ---------------------------------------------------------------------------
# Deterministic parameter init (xavier-uniform, shapes per GATLayer.__init__)
# ---------------------------------------------------------------------------
def init_params(key, num_inputs, num_outputs, nhid=16, nheads=8):
    def xavier(k, shape, fan_in, fan_out):
        bound = (6.0 / (fan_in + fan_out)) ** 0.5
        return jax.random.uniform(k, shape, jnp.float32, -bound, bound)

    k1, k2, k3, k4 = jax.random.split(key, 4)
    return {
        "W1": xavier(k1, (nheads, num_inputs, nhid), num_inputs, nhid),
        "a1": xavier(k2, (nheads, 2 * nhid, 1), 2 * nhid, 1),
        "W2": xavier(k3, (nheads, nhid * nheads, num_outputs), nhid * nheads, num_outputs),
        "a2": xavier(k4, (nheads, 2 * num_outputs, 1), 2 * num_outputs, 1),
    }


# Pure-JAX per-head reference of the torch module (single graph) for validation.
def gat_forward_ref(x, params, alpha=0.2):
    def layer(xin, W, a, concat):
        h = xin @ W
        O = W.shape[1]
        e = (h @ a[:O, :]) + (h @ a[O:, :]).T
        e = jnp.where(e > 0, e, alpha * e)
        att = jax.nn.softmax(e, axis=1)            # adj == ones
        hp = att @ h
        return jnp.where(hp > 0, hp, jnp.exp(hp) - 1.0) if concat else hp

    H = params["W1"].shape[0]
    x1 = jnp.concatenate(
        [layer(x, params["W1"][h], params["a1"][h], True) for h in range(H)], axis=1)
    outs = [layer(x1, params["W2"][h], params["a2"][h], False) for h in range(H)]
    return sum(outs) / H


# ---------------------------------------------------------------------------
if __name__ == "__main__":
    # B=64 graphs of N=8 nodes, 32 input features, 8 actions, K=3, nhid=16, 8 heads.
    B, N, NUM_INPUTS, NUM_OUTPUTS, K = 64, 8, 32, 8, 3

    key = jax.random.PRNGKey(0)
    kx, kp = jax.random.split(key)
    x = jax.random.normal(kx, (B, N, NUM_INPUTS), jnp.float32)
    params = init_params(kp, NUM_INPUTS, NUM_OUTPUTS, nhid=16, nheads=8)
    fused = fuse_gat_params(params, nodes=N)

    # Validate the fused batched kernel against the per-head f32 reference
    # (loose tolerance: kernel uses bf16 MXU inputs / approx reciprocal).
    logits_k, logp_k = jax.jit(gat_forward_fused)(x, fused)
    logits_k, logp_k = jax.block_until_ready((logits_k, logp_k))
    logits_ref = jax.block_until_ready(
        jax.vmap(lambda g: gat_forward_ref(g, params))(x))
    np.testing.assert_allclose(np.asarray(logits_k), np.asarray(logits_ref),
                               rtol=6e-2, atol=3e-2)
    np.testing.assert_allclose(np.asarray(logp_k),
                               np.asarray(jax.nn.log_softmax(logits_ref, axis=-1)),
                               rtol=6e-2, atol=3e-2)

    actions, action_log_probs = gat_act_layer_forward(
        x, fused, K=K, available_actions=None, deterministic=True)
    jax.block_until_ready((actions, action_log_probs))

    assert actions.shape == (B, N, K)
    assert action_log_probs.shape == (B, N, K)
    print("KERNEL_OK")
</pallas_src>

<mosaic_0001>
module attributes {stable_mosaic.version = 11 : i64} {
  func.func @fused_gat_kernel(%arg0: i32, %arg1: memref<32x8x32xbf16, #tpu.memory_space<vmem>>, %arg2: memref<32x128xbf16, #tpu.memory_space<vmem>>, %arg3: memref<128x64xbf16, #tpu.memory_space<vmem>>, %arg4: memref<128x64xbf16, #tpu.memory_space<vmem>>, %arg5: memref<64x64xbf16, #tpu.memory_space<vmem>>, %arg6: memref<8x64xf32, #tpu.memory_space<vmem>>, %arg7: memref<64x128xbf16, #tpu.memory_space<vmem>>, %arg8: memref<128x64xbf16, #tpu.memory_space<vmem>>, %arg9: memref<64x64xbf16, #tpu.memory_space<vmem>>, %arg10: memref<64x64xbf16, #tpu.memory_space<vmem>>, %arg11: memref<64x64xbf16, #tpu.memory_space<vmem>>, %arg12: memref<64x8xbf16, #tpu.memory_space<vmem>>, %arg13: memref<256x8xf32, #tpu.memory_space<vmem>>, %arg14: memref<256x8xf32, #tpu.memory_space<vmem>>) attributes {dimension_semantics = [#tpu.dimension_semantics<parallel>], iteration_bounds = array<i64: 2>, scalar_prefetch = 0 : i64, scratch_operands = 0 : i64, tpu.core_type = #tpu.core_type<tc>, window_params = [{transform_indices = @transform_0, window_bounds = array<i64: 32, 8, 32>}, {pipeline_mode = #tpu.pipeline_mode<synchronous>, transform_indices = @transform_1, window_bounds = array<i64: 32, 128>}, {pipeline_mode = #tpu.pipeline_mode<synchronous>, transform_indices = @transform_2, window_bounds = array<i64: 128, 64>}, {pipeline_mode = #tpu.pipeline_mode<synchronous>, transform_indices = @transform_3, window_bounds = array<i64: 128, 64>}, {pipeline_mode = #tpu.pipeline_mode<synchronous>, transform_indices = @transform_4, window_bounds = array<i64: 64, 64>}, {pipeline_mode = #tpu.pipeline_mode<synchronous>, transform_indices = @transform_5, window_bounds = array<i64: 8, 64>}, {pipeline_mode = #tpu.pipeline_mode<synchronous>, transform_indices = @transform_6, window_bounds = array<i64: 64, 128>}, {pipeline_mode = #tpu.pipeline_mode<synchronous>, transform_indices = @transform_7, window_bounds = array<i64: 128, 64>}, {pipeline_mode = #tpu.pipeline_mode<synchronous>, transform_indices = @transform_8, window_bounds = array<i64: 64, 64>}, {pipeline_mode = #tpu.pipeline_mode<synchronous>, transform_indices = @transform_9, window_bounds = array<i64: 64, 64>}, {pipeline_mode = #tpu.pipeline_mode<synchronous>, transform_indices = @transform_10, window_bounds = array<i64: 64, 64>}, {pipeline_mode = #tpu.pipeline_mode<synchronous>, transform_indices = @transform_11, window_bounds = array<i64: 64, 8>}, {transform_indices = @transform_12, window_bounds = array<i64: 256, 8>}, {transform_indices = @transform_13, window_bounds = array<i64: 256, 8>}]} {
    %c0 = arith.constant 0 : index
    %c0_0 = arith.constant 0 : index
    %0 = vector.load %arg5[%c0, %c0_0] : memref<64x64xbf16, #tpu.memory_space<vmem>>, vector<64x64xbf16>
    %c0_1 = arith.constant 0 : index
    %c0_2 = arith.constant 0 : index
    %1 = vector.load %arg6[%c0_1, %c0_2] : memref<8x64xf32, #tpu.memory_space<vmem>>, vector<8x64xf32>
    %c0_3 = arith.constant 0 : index
    %c0_4 = arith.constant 0 : index
    %c0_5 = arith.constant 0 : index
    %2 = vector.load %arg1[%c0_3, %c0_4, %c0_5] : memref<32x8x32xbf16, #tpu.memory_space<vmem>>, vector<32x8x32xbf16>
    %3 = vector.shape_cast %2 : vector<32x8x32xbf16> to vector<256x32xbf16>
    %c0_6 = arith.constant 0 : index
    %c0_7 = arith.constant 0 : index
    %4 = vector.load %arg2[%c0_6, %c0_7] : memref<32x128xbf16, #tpu.memory_space<vmem>>, vector<32x128xbf16>
    %cst = arith.constant dense<0.000000e+00> : vector<256x128xf32>
    %5 = tpu.matmul %3, %4, %cst {dimension_numbers = #tpu.dot_dimension_numbers<[1], [0], [0], [1], [0, 0, 1, 1], [], []>} : vector<256x32xbf16>, vector<32x128xbf16>, vector<256x128xf32> -> vector<256x128xf32>
    %6 = arith.truncf %5 : vector<256x128xf32> to vector<256x128xbf16>
    %c0_8 = arith.constant 0 : index
    %c0_9 = arith.constant 0 : index
    %7 = vector.load %arg3[%c0_8, %c0_9] : memref<128x64xbf16, #tpu.memory_space<vmem>>, vector<128x64xbf16>
    %cst_10 = arith.constant dense<0.000000e+00> : vector<256x64xf32>
    %8 = tpu.matmul %6, %7, %cst_10 {dimension_numbers = #tpu.dot_dimension_numbers<[1], [0], [0], [1], [0, 0, 1, 1], [], []>} : vector<256x128xbf16>, vector<128x64xbf16>, vector<256x64xf32> -> vector<256x64xf32>
    %c0_11 = arith.constant 0 : index
    %c0_12 = arith.constant 0 : index
    %9 = vector.load %arg4[%c0_11, %c0_12] : memref<128x64xbf16, #tpu.memory_space<vmem>>, vector<128x64xbf16>
    %cst_13 = arith.constant dense<0.000000e+00> : vector<256x64xf32>
    %10 = tpu.matmul %6, %9, %cst_13 {dimension_numbers = #tpu.dot_dimension_numbers<[1], [0], [0], [1], [0, 0, 1, 1], [], []>} : vector<256x128xbf16>, vector<128x64xbf16>, vector<256x64xf32> -> vector<256x64xf32>
    %11 = vector.shape_cast %10 : vector<256x64xf32> to vector<32x8x64xf32>
    %12 = vector.shape_cast %1 : vector<8x64xf32> to vector<1x8x64xf32>
    %13 = vector.broadcast %12 : vector<1x8x64xf32> to vector<32x8x64xf32>
    %14 = arith.mulf %11, %13 : vector<32x8x64xf32>
    %cst_14 = arith.constant dense<0.000000e+00> : vector<32x64xf32>
    %15 = vector.multi_reduction <add>, %14, %cst_14 [1] : vector<32x8x64xf32> to vector<32x64xf32>
    %16 = vector.shape_cast %15 : vector<32x64xf32> to vector<32x1x64xf32>
    %17 = vector.shape_cast %8 : vector<256x64xf32> to vector<32x8x64xf32>
    %18 = vector.broadcast %16 : vector<32x1x64xf32> to vector<32x8x64xf32>
    %19 = arith.addf %17, %18 : vector<32x8x64xf32>
    %cst_15 = arith.constant 0.000000e+00 : f32
    %20 = vector.broadcast %cst_15 : f32 to vector<32x8x64xf32>
    %21 = arith.cmpf ogt, %19, %20 : vector<32x8x64xf32>
    %cst_16 = arith.constant 2.000000e-01 : f32
    %22 = vector.broadcast %cst_16 : f32 to vector<32x8x64xf32>
    %23 = arith.mulf %22, %19 : vector<32x8x64xf32>
    %24 = arith.select %21, %19, %23 : vector<32x8x64xi1>, vector<32x8x64xf32>
    %25 = vector.shape_cast %24 : vector<32x8x64xf32> to vector<256x64xf32>
    %cst_17 = arith.constant dense<0xFF800000> : vector<256xf32>
    %26 = vector.multi_reduction <maximumf>, %25, %cst_17 [1] : vector<256x64xf32> to vector<256xf32>
    %27 = vector.shape_cast %26 : vector<256xf32> to vector<256x1xf32>
    %28 = vector.broadcast %27 : vector<256x1xf32> to vector<256x64xf32>
    %29 = arith.subf %25, %28 : vector<256x64xf32>
    %30 = math.exp %29 : vector<256x64xf32>
    %31 = arith.truncf %30 : vector<256x64xf32> to vector<256x64xbf16>
    %cst_18 = arith.constant dense<0.000000e+00> : vector<256x64xf32>
    %32 = tpu.matmul %31, %0, %cst_18 {dimension_numbers = #tpu.dot_dimension_numbers<[1], [0], [0], [1], [0, 0, 1, 1], [], []>} : vector<256x64xbf16>, vector<64x64xbf16>, vector<256x64xf32> -> vector<256x64xf32>
    %33 = tpu.reciprocal %32 {approx = true} : vector<256x64xf32> -> vector<256x64xf32>
    %34 = arith.mulf %30, %33 : vector<256x64xf32>
    %35 = vector.shape_cast %6 : vector<256x128xbf16> to vector<32x8x128xbf16>
    %36 = tpu.concatenate %35, %35, %35, %35, %35, %35, %35, %35 in 1 : vector<32x8x128xbf16>, vector<32x8x128xbf16>, vector<32x8x128xbf16>, vector<32x8x128xbf16>, vector<32x8x128xbf16>, vector<32x8x128xbf16>, vector<32x8x128xbf16>, vector<32x8x128xbf16> -> vector<32x64x128xbf16>
    %c0_19 = arith.constant 0 : index
    %c0_20 = arith.constant 0 : index
    %37 = vector.load %arg7[%c0_19, %c0_20] : memref<64x128xbf16, #tpu.memory_space<vmem>>, vector<64x128xbf16>
    %38 = vector.shape_cast %37 : vector<64x128xbf16> to vector<1x64x128xbf16>
    %39 = vector.broadcast %38 : vector<1x64x128xbf16> to vector<32x64x128xbf16>
    %40 = arith.mulf %36, %39 : vector<32x64x128xbf16>
    %41 = arith.truncf %34 : vector<256x64xf32> to vector<256x64xbf16>
    %42 = vector.shape_cast %41 : vector<256x64xbf16> to vector<32x8x64xbf16>
    %cst_21 = arith.constant dense<0.000000e+00> : vector<32x8x128xf32>
    %43 = tpu.matmul %42, %40, %cst_21 {dimension_numbers = #tpu.dot_dimension_numbers<[2], [1], [1], [2], [0, 0, 0, 1, 1, 2], [0], [0]>} : vector<32x8x64xbf16>, vector<32x64x128xbf16>, vector<32x8x128xf32> -> vector<32x8x128xf32>
    %44 = vector.shape_cast %43 : vector<32x8x128xf32> to vector<256x128xf32>
    %cst_22 = arith.constant 0.000000e+00 : f32
    %45 = vector.broadcast %cst_22 : f32 to vector<256x128xf32>
    %46 = arith.cmpf ogt, %44, %45 : vector<256x128xf32>
    %47 = math.exp %44 : vector<256x128xf32>
    %cst_23 = arith.constant 1.000000e+00 : f32
    %48 = vector.broadcast %cst_23 : f32 to vector<256x128xf32>
    %49 = arith.subf %47, %48 : vector<256x128xf32>
    %50 = arith.select %46, %44, %49 : vector<256x128xi1>, vector<256x128xf32>
    %51 = arith.truncf %50 : vector<256x128xf32> to vector<256x128xbf16>
    %c0_24 = arith.constant 0 : index
    %c0_25 = arith.constant 0 : index
    %52 = vector.load %arg8[%c0_24, %c0_25] : memref<128x64xbf16, #tpu.memory_space<vmem>>, vector<128x64xbf16>
    %cst_26 = arith.constant dense<0.000000e+00> : vector<256x64xf32>
    %53 = tpu.matmul %51, %52, %cst_26 {dimension_numbers = #tpu.dot_dimension_numbers<[1], [0], [0], [1], [0, 0, 1, 1], [], []>} : vector<256x128xbf16>, vector<128x64xbf16>, vector<256x64xf32> -> vector<256x64xf32>
    %54 = arith.truncf %53 : vector<256x64xf32> to vector<256x64xbf16>
    %c0_27 = arith.constant 0 : index
    %c0_28 = arith.constant 0 : index
    %55 = vector.load %arg9[%c0_27, %c0_28] : memref<64x64xbf16, #tpu.memory_space<vmem>>, vector<64x64xbf16>
    %cst_29 = arith.constant dense<0.000000e+00> : vector<256x64xf32>
    %56 = tpu.matmul %54, %55, %cst_29 {dimension_numbers = #tpu.dot_dimension_numbers<[1], [0], [0], [1], [0, 0, 1, 1], [], []>} : vector<256x64xbf16>, vector<64x64xbf16>, vector<256x64xf32> -> vector<256x64xf32>
    %c0_30 = arith.constant 0 : index
    %c0_31 = arith.constant 0 : index
    %57 = vector.load %arg10[%c0_30, %c0_31] : memref<64x64xbf16, #tpu.memory_space<vmem>>, vector<64x64xbf16>
    %cst_32 = arith.constant dense<0.000000e+00> : vector<256x64xf32>
    %58 = tpu.matmul %54, %57, %cst_32 {dimension_numbers = #tpu.dot_dimension_numbers<[1], [0], [0], [1], [0, 0, 1, 1], [], []>} : vector<256x64xbf16>, vector<64x64xbf16>, vector<256x64xf32> -> vector<256x64xf32>
    %59 = vector.shape_cast %58 : vector<256x64xf32> to vector<32x8x64xf32>
    %60 = vector.shape_cast %1 : vector<8x64xf32> to vector<1x8x64xf32>
    %61 = vector.broadcast %60 : vector<1x8x64xf32> to vector<32x8x64xf32>
    %62 = arith.mulf %59, %61 : vector<32x8x64xf32>
    %cst_33 = arith.constant dense<0.000000e+00> : vector<32x64xf32>
    %63 = vector.multi_reduction <add>, %62, %cst_33 [1] : vector<32x8x64xf32> to vector<32x64xf32>
    %64 = vector.shape_cast %63 : vector<32x64xf32> to vector<32x1x64xf32>
    %65 = vector.shape_cast %56 : vector<256x64xf32> to vector<32x8x64xf32>
    %66 = vector.broadcast %64 : vector<32x1x64xf32> to vector<32x8x64xf32>
    %67 = arith.addf %65, %66 : vector<32x8x64xf32>
    %cst_34 = arith.constant 0.000000e+00 : f32
    %68 = vector.broadcast %cst_34 : f32 to vector<32x8x64xf32>
    %69 = arith.cmpf ogt, %67, %68 : vector<32x8x64xf32>
    %cst_35 = arith.constant 2.000000e-01 : f32
    %70 = vector.broadcast %cst_35 : f32 to vector<32x8x64xf32>
    %71 = arith.mulf %70, %67 : vector<32x8x64xf32>
    %72 = arith.select %69, %67, %71 : vector<32x8x64xi1>, vector<32x8x64xf32>
    %73 = vector.shape_cast %72 : vector<32x8x64xf32> to vector<256x64xf32>
    %cst_36 = arith.constant dense<0xFF800000> : vector<256xf32>
    %74 = vector.multi_reduction <maximumf>, %73, %cst_36 [1] : vector<256x64xf32> to vector<256xf32>
    %75 = vector.shape_cast %74 : vector<256xf32> to vector<256x1xf32>
    %76 = vector.broadcast %75 : vector<256x1xf32> to vector<256x64xf32>
    %77 = arith.subf %73, %76 : vector<256x64xf32>
    %78 = math.exp %77 : vector<256x64xf32>
    %79 = arith.truncf %78 : vector<256x64xf32> to vector<256x64xbf16>
    %cst_37 = arith.constant dense<0.000000e+00> : vector<256x64xf32>
    %80 = tpu.matmul %79, %0, %cst_37 {dimension_numbers = #tpu.dot_dimension_numbers<[1], [0], [0], [1], [0, 0, 1, 1], [], []>} : vector<256x64xbf16>, vector<64x64xbf16>, vector<256x64xf32> -> vector<256x64xf32>
    %81 = tpu.reciprocal %80 {approx = true} : vector<256x64xf32> -> vector<256x64xf32>
    %82 = arith.mulf %78, %81 : vector<256x64xf32>
    %83 = vector.shape_cast %54 : vector<256x64xbf16> to vector<32x8x64xbf16>
    %84 = tpu.concatenate %83, %83, %83, %83, %83, %83, %83, %83 in 1 : vector<32x8x64xbf16>, vector<32x8x64xbf16>, vector<32x8x64xbf16>, vector<32x8x64xbf16>, vector<32x8x64xbf16>, vector<32x8x64xbf16>, vector<32x8x64xbf16>, vector<32x8x64xbf16> -> vector<32x64x64xbf16>
    %c0_38 = arith.constant 0 : index
    %c0_39 = arith.constant 0 : index
    %85 = vector.load %arg11[%c0_38, %c0_39] : memref<64x64xbf16, #tpu.memory_space<vmem>>, vector<64x64xbf16>
    %86 = vector.shape_cast %85 : vector<64x64xbf16> to vector<1x64x64xbf16>
    %87 = vector.broadcast %86 : vector<1x64x64xbf16> to vector<32x64x64xbf16>
    %88 = arith.mulf %84, %87 : vector<32x64x64xbf16>
    %89 = arith.truncf %82 : vector<256x64xf32> to vector<256x64xbf16>
    %90 = vector.shape_cast %89 : vector<256x64xbf16> to vector<32x8x64xbf16>
    %cst_40 = arith.constant dense<0.000000e+00> : vector<32x8x64xf32>
    %91 = tpu.matmul %90, %88, %cst_40 {dimension_numbers = #tpu.dot_dimension_numbers<[2], [1], [1], [2], [0, 0, 0, 1, 1, 2], [0], [0]>} : vector<32x8x64xbf16>, vector<32x64x64xbf16>, vector<32x8x64xf32> -> vector<32x8x64xf32>
    %92 = vector.shape_cast %91 : vector<32x8x64xf32> to vector<256x64xf32>
    %93 = arith.truncf %92 : vector<256x64xf32> to vector<256x64xbf16>
    %c0_41 = arith.constant 0 : index
    %c0_42 = arith.constant 0 : index
    %94 = vector.load %arg12[%c0_41, %c0_42] : memref<64x8xbf16, #tpu.memory_space<vmem>>, vector<64x8xbf16>
    %cst_43 = arith.constant dense<0.000000e+00> : vector<256x8xf32>
    %95 = tpu.matmul %93, %94, %cst_43 {dimension_numbers = #tpu.dot_dimension_numbers<[1], [0], [0], [1], [0, 0, 1, 1], [], []>} : vector<256x64xbf16>, vector<64x8xbf16>, vector<256x8xf32> -> vector<256x8xf32>
    %cst_44 = arith.constant dense<0xFF800000> : vector<256xf32>
    %96 = vector.multi_reduction <maximumf>, %95, %cst_44 [1] : vector<256x8xf32> to vector<256xf32>
    %97 = vector.shape_cast %96 : vector<256xf32> to vector<256x1xf32>
    %98 = vector.broadcast %97 : vector<256x1xf32> to vector<256x8xf32>
    %99 = arith.subf %95, %98 : vector<256x8xf32>
    %100 = math.exp %99 : vector<256x8xf32>
    %cst_45 = arith.constant dense<0.000000e+00> : vector<256xf32>
    %101 = vector.multi_reduction <add>, %100, %cst_45 [1] : vector<256x8xf32> to vector<256xf32>
    %102 = vector.shape_cast %101 : vector<256xf32> to vector<256x1xf32>
    %103 = math.log %102 : vector<256x1xf32>
    %c0_46 = arith.constant 0 : index
    %c0_47 = arith.constant 0 : index
    %104 = vector.load %arg13[%c0_46, %c0_47] : memref<256x8xf32, #tpu.memory_space<vmem>>, vector<256x8xf32>
    tpu.vector_store %arg13[%c0_46, %c0_47], %95 {strides = array<i32>} : memref<256x8xf32, #tpu.memory_space<vmem>>, vector<256x8xf32>,
    %105 = vector.broadcast %103 : vector<256x1xf32> to vector<256x8xf32>
    %106 = arith.subf %99, %105 : vector<256x8xf32>
    %c0_48 = arith.constant 0 : index
    %c0_49 = arith.constant 0 : index
    %107 = vector.load %arg14[%c0_48, %c0_49] : memref<256x8xf32, #tpu.memory_space<vmem>>, vector<256x8xf32>
    tpu.vector_store %arg14[%c0_48, %c0_49], %106 {strides = array<i32>} : memref<256x8xf32, #tpu.memory_space<vmem>>, vector<256x8xf32>,
    return
  }
  func.func @transform_0(%arg0: i32) -> (i32, i32, i32) {
    %c0_i32 = arith.constant 0 : i32
    %c0_i32_0 = arith.constant 0 : i32
    %c0_i32_1 = arith.constant 0 : i32
    return %arg0, %c0_i32, %c0_i32_0 : i32, i32, i32
  }
  func.func @transform_1(%arg0: i32) -> (i32, i32) {
    %c0_i32 = arith.constant 0 : i32
    %c0_i32_0 = arith.constant 0 : i32
    %c0_i32_1 = arith.constant 0 : i32
    return %c0_i32, %c0_i32_0 : i32, i32
  }
  func.func @transform_2(%arg0: i32) -> (i32, i32) {
    %c0_i32 = arith.constant 0 : i32
    %c0_i32_0 = arith.constant 0 : i32
    %c0_i32_1 = arith.constant 0 : i32
    return %c0_i32, %c0_i32_0 : i32, i32
  }
  func.func @transform_3(%arg0: i32) -> (i32, i32) {
    %c0_i32 = arith.constant 0 : i32
    %c0_i32_0 = arith.constant 0 : i32
    %c0_i32_1 = arith.constant 0 : i32
    return %c0_i32, %c0_i32_0 : i32, i32
  }
  func.func @transform_4(%arg0: i32) -> (i32, i32) {
    %c0_i32 = arith.constant 0 : i32
    %c0_i32_0 = arith.constant 0 : i32
    %c0_i32_1 = arith.constant 0 : i32
    return %c0_i32, %c0_i32_0 : i32, i32
  }
  func.func @transform_5(%arg0: i32) -> (i32, i32) {
    %c0_i32 = arith.constant 0 : i32
    %c0_i32_0 = arith.constant 0 : i32
    %c0_i32_1 = arith.constant 0 : i32
    return %c0_i32, %c0_i32_0 : i32, i32
  }
  func.func @transform_6(%arg0: i32) -> (i32, i32) {
    %c0_i32 = arith.constant 0 : i32
    %c0_i32_0 = arith.constant 0 : i32
    %c0_i32_1 = arith.constant 0 : i32
    return %c0_i32, %c0_i32_0 : i32, i32
  }
  func.func @transform_7(%arg0: i32) -> (i32, i32) {
    %c0_i32 = arith.constant 0 : i32
    %c0_i32_0 = arith.constant 0 : i32
    %c0_i32_1 = arith.constant 0 : i32
    return %c0_i32, %c0_i32_0 : i32, i32
  }
  func.func @transform_8(%arg0: i32) -> (i32, i32) {
    %c0_i32 = arith.constant 0 : i32
    %c0_i32_0 = arith.constant 0 : i32
    %c0_i32_1 = arith.constant 0 : i32
    return %c0_i32, %c0_i32_0 : i32, i32
  }
  func.func @transform_9(%arg0: i32) -> (i32, i32) {
    %c0_i32 = arith.constant 0 : i32
    %c0_i32_0 = arith.constant 0 : i32
    %c0_i32_1 = arith.constant 0 : i32
    return %c0_i32, %c0_i32_0 : i32, i32
  }
  func.func @transform_10(%arg0: i32) -> (i32, i32) {
    %c0_i32 = arith.constant 0 : i32
    %c0_i32_0 = arith.constant 0 : i32
    %c0_i32_1 = arith.constant 0 : i32
    return %c0_i32, %c0_i32_0 : i32, i32
  }
  func.func @transform_11(%arg0: i32) -> (i32, i32) {
    %c0_i32 = arith.constant 0 : i32
    %c0_i32_0 = arith.constant 0 : i32
    %c0_i32_1 = arith.constant 0 : i32
    return %c0_i32, %c0_i32_0 : i32, i32
  }
  func.func @transform_12(%arg0: i32) -> (i32, i32) {
    %c0_i32 = arith.constant 0 : i32
    %c0_i32_0 = arith.constant 0 : i32
    return %arg0, %c0_i32 : i32, i32
  }
  func.func @transform_13(%arg0: i32) -> (i32, i32) {
    %c0_i32 = arith.constant 0 : i32
    %c0_i32_0 = arith.constant 0 : i32
    return %arg0, %c0_i32 : i32, i32
  }
}

</mosaic_0001>

<bundles_post_ra>
// kernel: gat_forward_fused.1
= control target key start
LH: loop header
LB: loop body
LE: loop exit
PB: predicated region body
PF: predicated region fallthrough
CT: control target
= control target key end

     0   :  { %s11105_s25 = smov 0   ;;  %s14448_s0 = inlined_call_operand.vmem [shape: bf16[64,8,32], index: 0, kind: input, shape index: {}]   ;;  %s14449_s1 = inlined_call_operand.vmem [shape: bf16[32,128], index: 1, kind: input, shape index: {}]   ;;  %s14450_s2 = inlined_call_operand.vmem [shape: bf16[128,64], index: 2, kind: input, shape index: {}]   ;;  %s14451_s3 = inlined_call_operand.vmem [shape: bf16[128,64], index: 3, kind: input, shape index: {}]   ;;  %s14452_s4 = inlined_call_operand.vmem [shape: bf16[64,64], index: 4, kind: input, shape index: {}]   ;;  %s14453_s5 = inlined_call_operand.vmem [shape: f32[8,64], index: 5, kind: input, shape index: {}]   ;;  %s14454_s6 = inlined_call_operand.vmem [shape: bf16[64,128], index: 6, kind: input, shape index: {}]   ;;  %s14455_s7 = inlined_call_operand.vmem [shape: bf16[128,64], index: 7, kind: input, shape index: {}]   ;;  %s14456_s8 = inlined_call_operand.vmem [shape: bf16[64,64], index: 8, kind: input, shape index: {}]   ;;  %s14457_s9 = inlined_call_operand.vmem [shape: bf16[64,64], index: 9, kind: input, shape index: {}]   ;;  %s14458_s10 = inlined_call_operand.vmem [shape: bf16[64,64], index: 10, kind: input, shape index: {}]   ;;  %s14459_s11 = inlined_call_operand.vmem [shape: bf16[64,8], index: 11, kind: input, shape index: {}]   ;;  %s14460_s12 = inlined_call_operand.vmem [shape: f32[512,8], index: 12, kind: output, shape index: {0}]   ;;  %s14461_s13 = inlined_call_operand.vmem [shape: f32[512,8], index: 13, kind: output, shape index: {1}]  }
   0x1 LB: > { %s8291_s26 = sadd.s32 4294967295, %s11031_s25   ;;  %p8295_p0 = scmp.ge.s32.totalorder %s11031_s25, 1  ;;  %s11031_s25 = sphi %s11105_s25, %s24_s25  }
   0x2   : > { %p391_p1 = scmp.lt.s32.totalorder %s11031_s25, 3 }
   0x4   : > { %p392_p2 = pnand %p8295_p0, %p391_p1 }
   0x6   : > { %395 = sbr.rel (%p392_p2) target bundleno = 3208 (0xc88), region = 68 }
   0xd   : > { %v10490_v0 = vld [vmem:[%s14449_s1] sm:$0xff]   ;;  %s8296_s29 = sshll.u32 %s8291_s26, 5  ;;  %v10491_v1 = vld [vmem:[%s14449_s1 + $0x8] sm:$0xff]   ;;  %vm596_vm0 = vcmask 261120   ;;  %v10512_v8 = vld [vmem:[%s14451_s3 + $0x10] sm:$0xff]   ;;  %v14462_v34 = vmov 0.0  }
   0xe   : > { %p441_p3 = scmp.lt.s32.totalorder %s8296_s29, 63  ;;  %9328 = vmatprep.subr.bf16.mxu0 %v10490_v0  ;;  %10476 = vmatprep.subr.bf16.mxu1 %v10490_v0  ;;  %v10508_v2 = vld [vmem:[%s14451_s3] sm:$0xff]   ;;  %v10510_v4 = vld [vmem:[%s14451_s3 + $0x8] sm:$0xff]   ;;  %v10513_v19 = vld [vmem:[%s14450_s2 + $0x10] sm:$0xff]   ;;  %vm1304_vm1 = vcmask 523264  }
   0xf   : > { %9329 = vmatpush3.bf16.msra.mxu0 %v10490_v0  ;;  %10478 = vmatpush3.bf16.msra.mxu1 %v10490_v0  ;;  %v10509_v3 = vld [vmem:[%s14450_s2] sm:$0xff]   ;;  %v10511_v12 = vld [vmem:[%s14450_s2 + $0x8] sm:$0xff]   ;;  %v10514_v20 = vld [vmem:[%s14451_s3 + $0x18] sm:$0xff]  }
  0x10   : > { %s14696_s29 = smov (!%p441_p3, %s8296_s29), 63  ;;  %9330 = vmatprep.subr.bf16.mxu0 %v10491_v1  ;;  %10477 = vmatprep.subr.bf16.mxu1 %v10491_v1  ;;  %v10515_v21 = vld [vmem:[%s14450_s2 + $0x18] sm:$0xff]   ;;  %v10516_v22 = vld [vmem:[%s14451_s3 + $0x20] sm:$0xff]   ;;  %v10518_v27 = vld [vmem:[%s14451_s3 + $0x28] sm:$0xff]  }
  0x11   : > { %s8297_s19 = sshll.u32 %s14696_s29, 2  ;;  %v10517_v26 = vld [vmem:[%s14450_s2 + $0x20] sm:$0xff]   ;;  %v10519_v28 = vld [vmem:[%s14450_s2 + $0x28] sm:$0xff]   ;;  %v10520_v29 = vld [vmem:[%s14451_s3 + $0x30] sm:$0xff]   ;;  %s8299_s26 = sshll.u32 %s14696_s29, 3 }
  0x12   : > { %s11131_s22 = scalar_lea.vmem %s14448_s0, %s8297_s19  ;;  %v10521_v30 = vld [vmem:[%s14450_s2 + $0x30] sm:$0xff]   ;;  %v10522_v32 = vld [vmem:[%s14451_s3 + $0x38] sm:$0xff]   ;;  %v10524_v42 = vld [vmem:[%s14454_s6] sm:$0xff]   ;;  %s13956_s30 = scalar_lea.vmem %s14460_s12, %s8299_s26 }
  0x13   : > { %9331 = vmatpush3.bf16.msra.mxu0 %v10491_v1  ;;  %v10492_v5 = vld [vmem:[%s11131_s22] sm:$0xff]   ;;  %10479 = vmatpush3.bf16.msra.mxu1 %v10491_v1  ;;  %v10493_v6 = vld [vmem:[%s11131_s22 + $0x8] sm:$0xff]   ;;  %v10494_v7 = vld [vmem:[%s11131_s22 + $0x10] sm:$0xff]   ;;  %s14346_s16 = scalar_lea.vmem %s14461_s13, %s8299_s26 }
  0x14   : > { %9412 = vmatprep.subr.bf16.mxu0 %v10508_v2  ;;  %9364 = vmatprep.subr.bf16.mxu1 %v10509_v3  ;;  %v10495_v9 = vld [vmem:[%s11131_s22 + $0x18] sm:$0xff]   ;;  %v10496_v10 = vld [vmem:[%s11131_s22 + $0x20] sm:$0xff]   ;;  %v10501_v13 = vld [vmem:[%s11131_s22 + $0x48] sm:$0xff]  }
  0x15   : > { %9332 = vmatprep.mubr.msk.bf16.mxu0 %vm596_vm0, %v10492_v5  ;;  %v10500_v11 = vld [vmem:[%s11131_s22 + $0x40] sm:$0xff]   ;;  %v10502_v14 = vld [vmem:[%s11131_s22 + $0x50] sm:$0xff]   ;;  %v10497_v15 = vld [vmem:[%s11131_s22 + $0x28] sm:$0xff]  }
  0x16   : > { %9333 = vmatmul.mubr.msk.bf16.vlgmr.msra.gmra.mrb[0].mxu0 %vm596_vm0, %v10493_v6  ;;  %9348 = vmatprep.mubr.msk.bf16.mxu1 %vm596_vm0, %v10500_v11  ;;  %v10498_v16 = vld [vmem:[%s11131_s22 + $0x30] sm:$0xff]   ;;  %v10503_v17 = vld [vmem:[%s11131_s22 + $0x58] sm:$0xff]   ;;  %v10504_v18 = vld [vmem:[%s11131_s22 + $0x60] sm:$0xff]  }
  0x17   : > { %9336 = vmatprep.mubr.msk.bf16.mxu0 %vm596_vm0, %v10494_v7  ;;  %9413 = vmatpush3.bf16.msra.mxu0 %v10508_v2  ;;  %v10499_v23 = vld [vmem:[%s11131_s22 + $0x38] sm:$0xff]   ;;  %v10505_v24 = vld [vmem:[%s11131_s22 + $0x68] sm:$0xff]   ;;  %v10506_v25 = vld [vmem:[%s11131_s22 + $0x70] sm:$0xff]  }
  0x18   : > { %9414 = vmatprep.subr.bf16.mxu0 %v10510_v4  ;;  %9349 = vmatmul.mubr.msk.bf16.vlgmr.msra.gmra.mrb[0].mxu1 %vm596_vm0, %v10501_v13  ;;  %v10507_v31 = vld [vmem:[%s11131_s22 + $0x78] sm:$0xff]   ;;  %v10525_v45 = vld [vmem:[%s14454_s6 + $0x8] sm:$0xff]   ;;  %v10526_v57 = vld [vmem:[%s14454_s6 + $0x10] sm:$0xff]  }
  0x19   : > { %9352 = vmatprep.mubr.msk.bf16.mxu1 %vm596_vm0, %v10502_v14  ;;  %9365 = vmatpush3.bf16.msra.mxu1 %v10509_v3  ;;  %v10523_v33 = vld [vmem:[%s14450_s2 + $0x38] sm:$0xff]  }
  0x1a   : > { %9366 = vmatprep.subr.bf16.mxu1 %v10511_v12  ;;  %v10527_v61 = vld [vmem:[%s14454_s6 + $0x18] sm:$0xff]  }
  0x1b   : > { %9415 = vmatpush3.bf16.msra.mxu0 %v10510_v4 }
  0x1c   : > { %9416 = vmatprep.subr.bf16.mxu0 %v10512_v8 }
  0x1d   : > { %9367 = vmatpush3.bf16.msra.mxu1 %v10511_v12 }
  0x1e   : > { %9337 = vmatmul.mubr.msk.bf16.gmra.mrb[4].mxu0 %vm596_vm0, %v10495_v9  ;;  %9368 = vmatprep.subr.bf16.mxu1 %v10513_v19 }
  0x1f   : > { %9340 = vmatprep.mubr.msk.bf16.mxu0 %vm596_vm0, %v10496_v10  ;;  %9417 = vmatpush3.bf16.msra.mxu0 %v10512_v8 }
  0x20   : > { %9353 = vmatmul.mubr.msk.bf16.gmra.mrb[4].mxu1 %vm596_vm0, %v10503_v17  ;;  %9418 = vmatprep.subr.bf16.mxu0 %v10514_v20 }
  0x21   : > { %9356 = vmatprep.mubr.msk.bf16.mxu1 %vm596_vm0, %v10504_v18  ;;  %9369 = vmatpush3.bf16.msra.mxu1 %v10513_v19 }
  0x22   : > { %9370 = vmatprep.subr.bf16.mxu1 %v10515_v21 }
  0x23   : > { %9419 = vmatpush3.bf16.msra.mxu0 %v10514_v20 }
  0x24   : > { %9420 = vmatprep.subr.bf16.mxu0 %v10516_v22 }
  0x25   : > { %9371 = vmatpush3.bf16.msra.mxu1 %v10515_v21 }
  0x26   : > { %9341 = vmatmul.mubr.msk.bf16.gmra.mrb[8].mxu0 %vm596_vm0, %v10497_v15  ;;  %9372 = vmatprep.subr.bf16.mxu1 %v10517_v26 }
  0x27   : > { %9344 = vmatprep.mubr.msk.bf16.mxu0 %vm596_vm0, %v10498_v16  ;;  %9421 = vmatpush3.bf16.msra.mxu0 %v10516_v22 }
  0x28   : > { %9357 = vmatmul.mubr.msk.bf16.gmra.mrb[8].mxu1 %vm596_vm0, %v10505_v24  ;;  %9422 = vmatprep.subr.bf16.mxu0 %v10518_v27 }
  0x29   : > { %9360 = vmatprep.mubr.msk.bf16.mxu1 %vm596_vm0, %v10506_v25  ;;  %9373 = vmatpush3.bf16.msra.mxu1 %v10517_v26 }
  0x2a   : > { %9374 = vmatprep.subr.bf16.mxu1 %v10519_v28 }
  0x2b   : > { %9423 = vmatpush3.bf16.msra.mxu0 %v10518_v27 }
  0x2c   : > { %9424 = vmatprep.subr.bf16.mxu0 %v10520_v29 }
  0x2d   : > { %9375 = vmatpush3.bf16.msra.mxu1 %v10519_v28  ;;  %v10528_v28 = vld [vmem:[%s14452_s4] sm:$0xff]  }
  0x2e   : > { %9345 = vmatmul.mubr.msk.bf16.gmra.mrb[12].mxu0 %vm596_vm0, %v10499_v23  ;;  %9376 = vmatprep.subr.bf16.mxu1 %v10521_v30 }
  0x2f   : > { %9425 = vmatpush3.bf16.msra.mxu0 %v10520_v29  ;;  %v10529_v29 = vld [vmem:[%s14452_s4 + $0x8] sm:$0xff]  }
  0x30   : > { %9361 = vmatmul.mubr.msk.bf16.gmra.mrb[12].mxu1 %vm596_vm0, %v10507_v31  ;;  %9426 = vmatprep.subr.bf16.mxu0 %v10522_v32  ;;  %v11329_v31 = vld [vmem:[%s14453_s5] sm:$0xff] }
  0x31   : > { %9377 = vmatpush3.bf16.msra.mxu1 %v10521_v30  ;;  %v10530_v30 = vld [vmem:[%s14452_s4 + $0x10] sm:$0xff]  }
  0x32   : > { %9378 = vmatprep.subr.bf16.mxu1 %v10523_v33 }
  0x33   : > { %9427 = vmatpush3.bf16.msra.mxu0 %v10522_v32 }
  0x34   : > { %9512 = vmatprep.subr.bf16.mxu0 %v14462_v34 }
  0x35   : > { %9379 = vmatpush3.bf16.msra.mxu1 %v10523_v33 }
  0x36   : > { %9460 = vmatprep.subr.bf16.mxu1 %v10528_v28 }
  0xe9   : > { %v11208_v35 = vpop.f32.mrb[0].mxu0 }
  0xea   : > { %14535 = vst [vmem:[#allocation2_spill] sm:$0xff] %v11208_v35  ;;  %v11210_v36 = vpop.f32.mrb[1].mxu0 }
  0xeb   : > { %v11212_v37 = vpop.f32.mrb[2].mxu0  ;;  %v11225_v46 = vpop.f32.mrb[0].mxu1 }
  0xec   : > { %14536 = vst [vmem:[#allocation3_spill] sm:$0xff] %v11212_v37  ;;  %v807_v38 = vpack.c.bf16 %v11212_v37, %v11208_v35  ;;  %v682_v39 = vpop.f32.mrb[3].mxu0  ;;  %14538 = vst [vmem:[#allocation5_spill] sm:$0xff] %v11225_v46  ;;  %v11230_v48 = vpop.f32.mrb[1].mxu1 }
  0xed   : > { %v8691_v40 = vpack.c.bf16 %v682_v39, %v682_v39  ;;  %v806_v41 = vpack.c.bf16 %v682_v39, %v11210_v36  ;;  %14540 = vst [vmem:[#allocation7_spill] sm:$0xff] %v11230_v48  ;;  %v11234_v51 = vpop.f32.mrb[2].mxu1 }
  0xee   : > { %14542 = vst [vmem:[#allocation9_spill] sm:$0xff] %v11234_v51  ;;  %v11240_v54 = vpop.f32.mrb[3].mxu1  ;;  %v815_v55 = vpack.c.bf16 %v11234_v51, %v11225_v46 }
  0xef   : > { %9380 = vmatprep.mubr.bf16.mxu1 %v806_v41  ;;  %9428 = vmatprep.mubr.bf16.mxu0 %v806_v41  ;;  %v2375_v43 = vmul.bf16 %v10524_v42, %v8691_v40  ;;  %v2376_v50 = vmul.bf16 %v10525_v45, %v8691_v40  ;;  %14544 = vst [vmem:[#allocation11_spill] sm:$0xff] %v11240_v54 }
  0xf0   : > { %9381 = vmatmul.mubr.bf16.vlgmr.msra.gmra.mrb[16].mxu1 %v807_v38  ;;  %9429 = vmatmul.mubr.bf16.vlgmr.msra.gmra.mrb[16].mxu0 %v807_v38  ;;  %v814_v58 = vpack.c.bf16 %v11240_v54, %v11230_v48  ;;  %v2377_v59 = vmul.bf16 %v10526_v57, %v8691_v40  ;;  %v2378_v2 = vmul.bf16 %v10527_v61, %v8691_v40 }
  0xf1   : > { %v11220_v44 = vpop.f32.mrb[4].mxu0  ;;  %9513 = vmatpush3.bf16.msra.mxu0 %v2375_v43  ;;  %9461 = vmatpush3.bf16.msra.mxu1 %v10528_v28 }
  0xf2   : > { %14537 = vst [vmem:[#allocation4_spill] sm:$0xff] %v11220_v44  ;;  %v11227_v47 = vpop.f32.mrb[5].mxu0  ;;  %9514 = vmatprep.subr.bf16.mxu0 %v14462_v34  ;;  %9462 = vmatprep.subr.bf16.mxu1 %v10529_v29 }
  0xf3   : > { %14539 = vst [vmem:[#allocation6_spill] sm:$0xff] %v11227_v47  ;;  %v11232_v49 = vpop.f32.mrb[6].mxu0  ;;  %v11257_v62 = vpop.f32.mrb[4].mxu1 }
  0xf4   : > { %14541 = vst [vmem:[#allocation8_spill] sm:$0xff] %v11232_v49  ;;  %v11236_v52 = vpop.f32.mrb[7].mxu0  ;;  %v809_v53 = vpack.c.bf16 %v11232_v49, %v11220_v44  ;;  %14546 = vst [vmem:[#allocation13_spill] sm:$0xff] %v11257_v62  ;;  %v11262_v0 = vpop.f32.mrb[5].mxu1 }
  0xf5   : > { %14543 = vst [vmem:[#allocation10_spill] sm:$0xff] %v11236_v52  ;;  %9515 = vmatpush3.bf16.msra.mxu0 %v2376_v50  ;;  %v808_v56 = vpack.c.bf16 %v11236_v52, %v11227_v47  ;;  %14548 = vst [vmem:[#allocation15_spill] sm:$0xff] %v11262_v0  ;;  %v11266_v3 = vpop.f32.mrb[6].mxu1  ;;  %9463 = vmatpush3.bf16.msra.mxu1 %v10529_v29 }
  0xf6   : > { %9516 = vmatprep.subr.bf16.mxu0 %v14462_v34  ;;  %14550 = vst [vmem:[#allocation17_spill] sm:$0xff] %v11266_v3  ;;  %v11272_v6 = vpop.f32.mrb[7].mxu1  ;;  %v817_v7 = vpack.c.bf16 %v11266_v3, %v11257_v62  ;;  %9464 = vmatprep.subr.bf16.mxu1 %v10530_v30 }
  0xf7   : > { %9432 = vmatprep.mubr.bf16.mxu0 %v808_v56  ;;  %9384 = vmatprep.mubr.bf16.mxu1 %v808_v56  ;;  %14552 = vst [vmem:[#allocation19_spill] sm:$0xff] %v11272_v6  ;;  %v816_v9 = vpack.c.bf16 %v11272_v6, %v11262_v0 }
  0xf8   : > { %9433 = vmatmul.mubr.bf16.gmra.mrb[20].mxu0 %v809_v53  ;;  %9385 = vmatmul.mubr.bf16.gmra.mrb[20].mxu1 %v809_v53 }
  0xf9   : > { %v11252_v60 = vpop.f32.mrb[8].mxu0  ;;  %9517 = vmatpush3.bf16.msra.mxu0 %v2377_v59  ;;  %9465 = vmatpush3.bf16.msra.mxu1 %v10530_v30 }
  0xfa   : > { %14545 = vst [vmem:[#allocation12_spill] sm:$0xff] %v11252_v60  ;;  %v11259_v63 = vpop.f32.mrb[9].mxu0  ;;  %9518 = vmatprep.subr.bf16.mxu0 %v14462_v34 }
  0xfb   : > { %14547 = vst [vmem:[#allocation14_spill] sm:$0xff] %v11259_v63  ;;  %v11264_v1 = vpop.f32.mrb[10].mxu0  ;;  %v11283_v11 = vpop.f32.mrb[8].mxu1 }
  0xfc   : > { %14549 = vst [vmem:[#allocation16_spill] sm:$0xff] %v11264_v1  ;;  %v11268_v4 = vpop.f32.mrb[11].mxu0  ;;  %v811_v5 = vpack.c.bf16 %v11264_v1, %v11252_v60  ;;  %14554 = vst [vmem:[#allocation21_spill] sm:$0xff] %v11283_v11  ;;  %v11287_v13 = vpop.f32.mrb[9].mxu1 }
  0xfd   : > { %14551 = vst [vmem:[#allocation18_spill] sm:$0xff] %v11268_v4  ;;  %9519 = vmatpush3.bf16.msra.mxu0 %v2378_v2  ;;  %v810_v8 = vpack.c.bf16 %v11268_v4, %v11259_v63  ;;  %14556 = vst [vmem:[#allocation23_spill] sm:$0xff] %v11287_v13  ;;  %v11291_v15 = vpop.f32.mrb[10].mxu1 }
  0xfe   : > { %9536 = vmatprep.subr.bf16.mxu0 %v14462_v34  ;;  %14558 = vst [vmem:[#allocation25_spill] sm:$0xff] %v11291_v15  ;;  %v11297_v18 = vpop.f32.mrb[11].mxu1  ;;  %v819_v19 = vpack.c.bf16 %v11291_v15, %v11283_v11 }
  0xff   : > { %9436 = vmatprep.mubr.bf16.mxu0 %v810_v8  ;;  %9388 = vmatprep.mubr.bf16.mxu1 %v810_v8  ;;  %14560 = vst [vmem:[#allocation27_spill] sm:$0xff] %v11297_v18  ;;  %v818_v21 = vpack.c.bf16 %v11297_v18, %v11287_v13 }
 0x100   : > { %9437 = vmatmul.mubr.bf16.gmra.mrb[24].mxu0 %v811_v5  ;;  %9389 = vmatmul.mubr.bf16.gmra.mrb[24].mxu1 %v811_v5 }
 0x101   : > { %v11281_v10 = vpop.f32.mrb[12].mxu0 }
 0x102   : > { %14553 = vst [vmem:[#allocation20_spill] sm:$0xff] %v11281_v10  ;;  %v11285_v12 = vpop.f32.mrb[13].mxu0 }
 0x103   : > { %14555 = vst [vmem:[#allocation22_spill] sm:$0xff] %v11285_v12  ;;  %v11289_v14 = vpop.f32.mrb[14].mxu0  ;;  %v11305_v22 = vpop.f32.mrb[12].mxu1 }
 0x104   : > { %14557 = vst [vmem:[#allocation24_spill] sm:$0xff] %v11289_v14  ;;  %v11293_v16 = vpop.f32.mrb[15].mxu0  ;;  %v813_v17 = vpack.c.bf16 %v11289_v14, %v11281_v10  ;;  %14561 = vst [vmem:[#allocation28_spill] sm:$0xff] %v11305_v22  ;;  %v11307_v23 = vpop.f32.mrb[13].mxu1 }
 0x105   : > { %14559 = vst [vmem:[#allocation26_spill] sm:$0xff] %v11293_v16  ;;  %v812_v20 = vpack.c.bf16 %v11293_v16, %v11285_v12  ;;  %14562 = vst [vmem:[#allocation29_spill] sm:$0xff] %v11307_v23  ;;  %v11309_v24 = vpop.f32.mrb[14].mxu1 }
 0x106   : > { %14563 = vst [vmem:[#allocation30_spill] sm:$0xff] %v11309_v24  ;;  %v11311_v25 = vpop.f32.mrb[15].mxu1  ;;  %v821_v26 = vpack.c.bf16 %v11309_v24, %v11305_v22 }
 0x107   : > { %9440 = vmatprep.mubr.bf16.mxu0 %v812_v20  ;;  %9392 = vmatprep.mubr.bf16.mxu1 %v812_v20  ;;  %14564 = vst [vmem:[#allocation31_spill] sm:$0xff] %v11311_v25  ;;  %v820_v27 = vpack.c.bf16 %v11311_v25, %v11307_v23 }
 0x108   : > { %9441 = vmatmul.mubr.bf16.gmra.mrb[28].mxu0 %v813_v17  ;;  %9393 = vmatmul.mubr.bf16.gmra.mrb[28].mxu1 %v813_v17 }
 0x109   : > { %9444 = vmatprep.mubr.bf16.mxu0 %v814_v58  ;;  %9396 = vmatprep.mubr.bf16.mxu1 %v814_v58 }
 0x110   : > { %9445 = vmatmul.mubr.bf16.gmra.mrb[32].mxu0 %v815_v55  ;;  %9397 = vmatmul.mubr.bf16.gmra.mrb[32].mxu1 %v815_v55 }
 0x111   : > { %9448 = vmatprep.mubr.bf16.mxu0 %v816_v9  ;;  %9400 = vmatprep.mubr.bf16.mxu1 %v816_v9 }
 0x118   : > { %9449 = vmatmul.mubr.bf16.gmra.mrb[36].mxu0 %v817_v7  ;;  %9401 = vmatmul.mubr.bf16.gmra.mrb[36].mxu1 %v817_v7 }
 0x119   : > { %9452 = vmatprep.mubr.bf16.mxu0 %v818_v21  ;;  %9404 = vmatprep.mubr.bf16.mxu1 %v818_v21 }
 0x120   : > { %9453 = vmatmul.mubr.bf16.gmra.mrb[40].mxu0 %v819_v19  ;;  %9405 = vmatmul.mubr.bf16.gmra.mrb[40].mxu1 %v819_v19 }
 0x121   : > { %9456 = vmatprep.mubr.bf16.mxu0 %v820_v27  ;;  %9408 = vmatprep.mubr.bf16.mxu1 %v820_v27 }
 0x128   : > { %9457 = vmatmul.mubr.bf16.gmra.mrb[44].mxu0 %v821_v26  ;;  %9409 = vmatmul.mubr.bf16.gmra.mrb[44].mxu1 %v821_v26 }
 0x1c3   : > { %v11331_v32 = vpop.f32.mrb[16].mxu1  ;;  %v9430_v33 = vpop.f32.mrb[16].mxu0 }
 0x1c4   : > { %v1274_v38 = vmul.f32 %v9430_v33, %v11329_v31  ;;  %v11334_v39 = vpop.f32.mrb[17].mxu1  ;;  %v1145_v40 = vpop.f32.mrb[17].mxu0 }
 0x1c5   : > { %v1272_v41 = vmul.f32 %v1145_v40, %v11329_v31  ;;  %v11337_v42 = vpop.f32.mrb[18].mxu1  ;;  %v9431_v43 = vpop.f32.mrb[18].mxu0 }
 0x1c6   : > { %v1319_v45 = vsel %vm1304_vm1, %v1274_v38, 0.0  ;;  %v1275_v50 = vmul.f32 %v9431_v43, %v11329_v31  ;;  %v11341_v53 = vpop.f32.mrb[19].mxu1  ;;  %v1148_v55 = vpop.f32.mrb[19].mxu0 }
 0x1c7   : > { %v1320_v56 = vrot.slane %v1319_v45, 4  ;;  %v1305_v57 = vsel %vm1304_vm1, %v1272_v41, 0.0  ;;  %v1273_v58 = vmul.f32 %v1148_v55, %v11329_v31 }
 0x1c8   : > { %v1306_v59 = vrot.slane %v1305_v57, 4  ;;  %v1326_v61 = vsel %vm1304_vm1, %v1275_v50, 0.0 }
 0x1c9   : > { %v1321_v2 = vadd.f32 %v1320_v56, %v1319_v45  ;;  %v1327_v5 = vrot.slane %v1326_v61, 4  ;;  %v1312_v7 = vsel %vm1304_vm1, %v1273_v58, 0.0 }
 0x1ca   : > { %v1307_v8 = vadd.f32 %v1306_v59, %v1305_v57  ;;  %v1313_v9 = vrot.slane %v1312_v7, 4 }
 0x1cb   : > { %v1322_v17 = vrot.slane %v1321_v2, 2  ;;  %v1328_v19 = vadd.f32 %v1327_v5, %v1326_v61  ;;  %v9434_v20 = vpop.f32.mrb[20].mxu0  ;;  %v11347_v21 = vpop.f32.mrb[20].mxu1 }
 0x1cc   : > { %v1308_v26 = vrot.slane %v1307_v8, 2  ;;  %v1314_v27 = vadd.f32 %v1313_v9, %v1312_v7  ;;  %v1278_v28 = vmul.f32 %v9434_v20, %v11329_v31  ;;  %v1161_v29 = vpop.f32.mrb[21].mxu0  ;;  %v11350_v30 = vpop.f32.mrb[21].mxu1 }
 0x1cd   : > { %v1323_v33 = vadd.f32 %v1322_v17, %v1321_v2  ;;  %v1329_v38 = vrot.slane %v1328_v19, 2  ;;  %v1276_v40 = vmul.f32 %v1161_v29, %v11329_v31  ;;  %v9435_v41 = vpop.f32.mrb[22].mxu0  ;;  %v11353_v43 = vpop.f32.mrb[22].mxu1 }
 0x1ce   : > { %v1309_v45 = vadd.f32 %v1308_v26, %v1307_v8  ;;  %v1315_v50 = vrot.slane %v1314_v27, 2  ;;  %v1347_v55 = vsel %vm1304_vm1, %v1278_v28, 0.0  ;;  %v1279_v56 = vmul.f32 %v9435_v41, %v11329_v31  ;;  %v1164_v57 = vpop.f32.mrb[23].mxu0  ;;  %v11357_v58 = vpop.f32.mrb[23].mxu1 }
 0x1cf   : > { %v1324_v59 = vrot.slane %v1323_v33, 1  ;;  %v1330_v61 = vadd.f32 %v1329_v38, %v1328_v19  ;;  %v1348_v5 = vrot.slane %v1347_v55, 4  ;;  %v1333_v2 = vsel %vm1304_vm1, %v1276_v40, 0.0 }
 0x1d0   : > { %v1310_v7 = vrot.slane %v1309_v45, 1  ;;  %v1316_v9 = vadd.f32 %v1315_v50, %v1314_v27  ;;  %v1334_v17 = vrot.slane %v1333_v2, 4  ;;  %v1354_v20 = vsel %vm1304_vm1, %v1279_v56, 0.0 }
 0x1d1   : > { %v1331_v29 = vrot.slane %v1330_v61, 1  ;;  %v1349_v8 = vadd.f32 %v1348_v5, %v1347_v55  ;;  %v1355_v26 = vrot.slane %v1354_v20, 4  ;;  %v1277_v28 = vmul.f32 %v1164_v57, %v11329_v31 }
 0x1d2   : > { %v1317_v34 = vrot.slane %v1316_v9, 1  ;;  %v1335_v41 = vadd.f32 %v1334_v17, %v1333_v2  ;;  %v1325_v24 = vadd.f32 %v1324_v59, %v1323_v33  ;;  %v1311_v22 = vadd.f32 %v1310_v7, %v1309_v45 }
 0x1d3   : > { %v11362_v25 = vadd.f32 %v1331_v29, %v1330_v61  ;;  %v1350_v19 = vrot.slane %v1349_v8, 2  ;;  %v1356_v38 = vadd.f32 %v1355_v26, %v1354_v20  ;;  %v1340_v40 = vsel %vm1304_vm1, %v1277_v28, 0.0  ;;  %v9438_v23 = vpop.f32.mrb[24].mxu0  ;;  %v11365_v27 = vpop.f32.mrb[24].mxu1 }
 0x1d4   : > { %v11367_v50 = vadd.f32 %v1317_v34, %v1316_v9  ;;  %v1336_v56 = vrot.slane %v1335_v41, 2  ;;  %v1341_v55 = vrot.slane %v1340_v40, 4  ;;  %v1282_v5 = vmul.f32 %v9438_v23, %v11329_v31  ;;  %v1177_v57 = vpop.f32.mrb[25].mxu0  ;;  %v11370_v15 = vpop.f32.mrb[25].mxu1 }
 0x1d5   : > { %v1357_v33 = vrot.slane %v1356_v38, 2  ;;  %v1280_v45 = vmul.f32 %v1177_v57, %v11329_v31  ;;  %v9439_v59 = vpop.f32.mrb[26].mxu0  ;;  %v1531_v61 = vadd.f32 %v11331_v32, %v1325_v24  ;;  %v1351_v2 = vadd.f32 %v1350_v19, %v1349_v8  ;;  %v11374_v7 = vpop.f32.mrb[26].mxu1 }
 0x1d6   : > { %v1342_v17 = vadd.f32 %v1341_v55, %v1340_v40  ;;  %v1375_v34 = vsel %vm1304_vm1, %v1282_v5, 0.0  ;;  %v1283_v9 = vmul.f32 %v9439_v59, %v11329_v31  ;;  %v1180_v20 = vpop.f32.mrb[27].mxu0  ;;  %v1529_v23 = vadd.f32 %v1311_v22, %v11334_v39  ;;  %v11379_v29 = vpop.f32.mrb[27].mxu1 }
 0x1d7   : > { %v1376_v26 = vrot.slane %v1375_v34, 4  ;;  %v1361_v28 = vsel %vm1304_vm1, %v1280_v45, 0.0  ;;  %v1281_v57 = vmul.f32 %v1180_v20, %v11329_v31  ;;  %vm1563_vm2 = vcmp.gt.f32.partialorder %v1531_v61, 0.0 }
 0x1d8   : > { %v1343_v24 = vrot.slane %v1342_v17, 2  ;;  %v1362_v32 = vrot.slane %v1361_v28, 4  ;;  %v1382_v8 = vsel %vm1304_vm1, %v1283_v9, 0.0  ;;  %v1595_v19 = vmul.f32 0.2, %v1531_v61 }
 0x1d9   : > { %v11384_v40 = vadd.f32 %v1376_v26, %v1375_v34  ;;  %v1383_v55 = vrot.slane %v1382_v8, 4  ;;  %v1368_v5 = vsel %vm1304_vm1, %v1281_v57, 0.0  ;;  %v1352_v59 = vrot.slane %v1351_v2, 1 }
 0x1da   : > { %v11387_v22 = vadd.f32 %v1362_v32, %v1361_v28  ;;  %v1369_v39 = vrot.slane %v1368_v5, 4  ;;  %v11389_v11 = vsel %vm1563_vm2, %v1531_v61, %v1595_v19  ;;  %vm1561_vm3 = vcmp.gt.f32.partialorder %v1529_v23, 0.0 }
 0x1db   : > { %v11392_v20 = vadd.f32 %v1383_v55, %v1382_v8  ;;  %v1663_v9 = vsel %vm1304_vm1, %v11389_v11, -inf  ;;  %v1353_v18 = vadd.f32 %v1352_v59, %v1351_v2  ;;  %v9442_v34 = vpop.f32.mrb[28].mxu0  ;;  %v11396_v26 = vpop.f32.mrb[28].mxu1  ;;  %v1593_v28 = vmul.f32 0.2, %v1529_v23 }
 0x1dc   : > { %v11399_v13 = vadd.f32 %v1369_v39, %v1368_v5  ;;  %1664 = vmax.xlane.f32.xlu1 %v1663_v9  ;;  %v1337_v61 = vadd.f32 %v1336_v56, %v1335_v41  ;;  %v1193_v32 = vpop.f32.mrb[29].mxu0  ;;  %v11401_v19 = vpop.f32.mrb[29].mxu1  ;;  %v1286_v2 = vmul.f32 %v9442_v34, %v11329_v31  ;;  %v1358_v59 = vadd.f32 %v1357_v33, %v1356_v38 }
 0x1dd   : > { %v11405_v55 = vadd.f32 %v11347_v21, %v1353_v18  ;;  %v9443_v45 = vpop.f32.mrb[30].mxu0  ;;  %v11408_v3 = vpop.f32.mrb[30].mxu1  ;;  %v11412_v39 = vsel %vm1561_vm3, %v1529_v23, %v1593_v28  ;;  %v1284_v56 = vmul.f32 %v1193_v32, %v11329_v31  ;;  %v1344_v28 = vadd.f32 %v1343_v24, %v1342_v17 }
 0x1de   : > { %v1338_v41 = vrot.slane %v1337_v61, 1  ;;  %v1196_v9 = vpop.f32.mrb[31].mxu0  ;;  %v11415_v57 = vpop.f32.mrb[31].mxu1  ;;  %v1657_v21 = vsel %vm1304_vm1, %v11412_v39, -inf  ;;  %v1403_v38 = vsel %vm1304_vm1, %v1286_v2, 0.0  ;;  %v1359_v33 = vrot.slane %v1358_v59, 1 }
 0x1df   : > { %v11418_v18 = vmul.f32 0.2, %v11405_v55  ;;  %1658 = vmax.xlane.f32.xlu0 %v1657_v21  ;;  %v1404_v5 = vrot.slane %v1403_v38, 4  ;;  %v1389_v23 = vsel %vm1304_vm1, %v1284_v56, 0.0  ;;  %v1532_v62 = vadd.f32 %v11337_v42, %v11362_v25 }
 0x1e0   : > { %v1339_v34 = vadd.f32 %v1338_v41, %v1337_v61  ;;  %v1360_v8 = vadd.f32 %v1359_v33, %v1358_v59  ;;  %v1390_v32 = vrot.slane %v1389_v23, 4  ;;  %v1287_v6 = vmul.f32 %v9443_v45, %v11329_v31 }
 0x1e1   : > { %v11428_v51 = vadd.f32 %v1404_v5, %v1403_v38  ;;  %v1345_v46 = vrot.slane %v1344_v28, 1  ;;  %v1530_v2 = vadd.f32 %v11367_v50, %v11341_v53  ;;  %vm1564_vm4 = vcmp.gt.f32.partialorder %v1532_v62, 0.0 }
 0x1e2   : > { %v1533_v0 = vadd.f32 %v1339_v34, %v11350_v30  ;;  %v11433_v61 = vadd.f32 %v11353_v43, %v1360_v8  ;;  %v11435_v41 = vadd.f32 %v1390_v32, %v1389_v23  ;;  %v1596_v17 = vmul.f32 0.2, %v1532_v62 }
 0x1e3   : > { %v9446_v24 = vpop.f32.mrb[32].mxu0  ;;  %v11437_v59 = vpop.f32.mrb[32].mxu1  ;;  %v1346_v30 = vadd.f32 %v1345_v46, %v1344_v28  ;;  %v1410_v45 = vsel %vm1304_vm1, %v1287_v6, 0.0  ;;  %vm1562_vm5 = vcmp.gt.f32.partialorder %v1530_v2, 0.0  ;;  %v1594_v6 = vmul.f32 0.2, %v1530_v2 }
 0x1e4   : > { %v1597_v25 = vmul.f32 0.2, %v1533_v0  ;;  %v1209_v5 = vpop.f32.mrb[33].mxu0  ;;  %v11441_v56 = vpop.f32.mrb[33].mxu1  ;;  %v11444_v53 = vmul.f32 0.2, %v11433_v61  ;;  %v11447_v50 = vsel %vm1564_vm4, %v1532_v62, %v1596_v17  ;;  %v1285_v62 = vmul.f32 %v1196_v9, %v11329_v31 }
 0x1e5   : > { %v1411_v8 = vrot.slane %v1410_v45, 4  ;;  %v9447_v21 = vpop.f32.mrb[34].mxu0  ;;  %v11449_v38 = vpop.f32.mrb[34].mxu1  ;;  %v1534_v33 = vadd.f32 %v1346_v30, %v11357_v58  ;;  %v1666_v46 = vsel %vm1304_vm1, %v11447_v50, -inf  ;;  %v14565_v32 = vrot.slane %v11384_v40, 2 }
 0x1e6   : > { %v1212_v34 = vpop.f32.mrb[35].mxu0  ;;  %v11454_v23 = vpop.f32.mrb[35].mxu1  ;;  %1667 = vmax.xlane.f32.xlu1 %v1666_v46  ;;  %vm1565_vm6 = vcmp.gt.f32.partialorder %v1533_v0, 0.0  ;;  %v11462_v58 = vsel %vm1562_vm5, %v1530_v2, %v1594_v6  ;;  %v14566_v42 = vrot.slane %v11387_v22, 2  ;;  %v1396_v9 = vsel %vm1304_vm1, %v1285_v62, 0.0 }
 0x1e7   : > { %v11456_v28 = vadd.f32 %v1411_v8, %v1410_v45  ;;  %v1379_v17 = vadd.f32 %v14565_v32, %v11384_v40  ;;  %v1598_v43 = vmul.f32 0.2, %v1534_v33  ;;  %v11464_v30 = vsel %vm1565_vm6, %v1533_v0, %v1597_v25 }
 0x1e8   : > { %v1365_v54 = vadd.f32 %v14566_v42, %v11387_v22  ;;  %v1660_v45 = vsel %vm1304_vm1, %v11462_v58, -inf  ;;  %v1397_v40 = vrot.slane %v1396_v9, 4  ;;  %v1669_v2 = vsel %vm1304_vm1, %v11464_v30, -inf }
 0x1e9   : > { %v1380_v8 = vrot.slane %v1379_v17, 1  ;;  %1661 = vmax.xlane.f32.xlu0 %v1660_v45  ;;  %v1290_v0 = vmul.f32 %v9446_v24, %v11329_v31  ;;  %v14567_v22 = vrot.slane %v11392_v20, 2  ;;  %vm1566_vm7 = vcmp.gt.f32.partialorder %v1534_v33, 0.0 }
 0x1ea   : > { %v1366_v6 = vrot.slane %v1365_v54, 1  ;;  %v1288_v32 = vmul.f32 %v1209_v5, %v11329_v31  ;;  %v11484_v45 = vadd.f32 %v1397_v40, %v1396_v9  ;;  %v11487_v10 = vsel %vm1566_vm7, %v1534_v33, %v1598_v43 }
 0x1eb   : > { %v1381_v25 = vadd.f32 %v1380_v8, %v1379_v17  ;;  %v1386_v42 = vadd.f32 %v14567_v22, %v11392_v20  ;;  %v11480_v46 = vpop.f32.mrb[36].mxu0  ;;  %v11482_v62 = vpop.f32.mrb[36].mxu1  ;;  %v1431_v14 = vsel %vm1304_vm1, %v1290_v0, 0.0  ;;  %v1672_v22 = vsel %vm1304_vm1, %v11487_v10, -inf }
 0x1ec   : > { %v1367_v48 = vadd.f32 %v1366_v6, %v1365_v54  ;;  %v11489_v24 = vpop.f32.mrb[37].mxu0  ;;  %v11491_v17 = vpop.f32.mrb[37].mxu1  ;;  %v1432_v8 = vrot.slane %v1431_v14, 4  ;;  %1673 = vmax.xlane.f32.xlu1 %v1672_v22  ;;  %v1417_v33 = vsel %vm1304_vm1, %v1288_v32, 0.0  ;;  %vm1567_vm8 = vcmp.gt.f32.partialorder %v11405_v55, 0.0 }
 0x1ed   : > { %v11494_v20 = vadd.f32 %v11365_v27, %v1381_v25  ;;  %v1387_v5 = vrot.slane %v1386_v42, 1  ;;  %v11498_v16 = vpop.f32.mrb[38].mxu0  ;;  %v11500_v9 = vpop.f32.mrb[38].mxu1  ;;  %1670 = vmax.xlane.f32.xlu0 %v1669_v2  ;;  %v14568_v27 = vrot.slane %v11399_v13, 2  ;;  %v1418_v2 = vrot.slane %v1417_v33, 4 }
 0x1ee   : > { %v1537_v43 = vadd.f32 %v1367_v48, %v11370_v15  ;;  %v11508_v6 = vpop.f32.mrb[39].mxu0  ;;  %v11510_v0 = vpop.f32.mrb[39].mxu1  ;;  %v11515_v12 = vadd.f32 %v1432_v8, %v1431_v14  ;;  %v1291_v15 = vmul.f32 %v9447_v21, %v11329_v31  ;;  %v1289_v21 = vmul.f32 %v1212_v34, %v11329_v31 }
 0x1ef   : > { %v1372_v40 = vadd.f32 %v14568_v27, %v11399_v13  ;;  %v11513_v25 = vmul.f32 0.2, %v11494_v20  ;;  %v1388_v54 = vadd.f32 %v1387_v5, %v1386_v42  ;;  %v11523_v22 = vadd.f32 %v1418_v2, %v1417_v33 }
 0x1f0   : > { %v1601_v1 = vmul.f32 0.2, %v1537_v43  ;;  %v11527_v27 = vsel %vm1567_vm8, %v11405_v55, %v11418_v18  ;;  %v1438_v42 = vsel %vm1304_vm1, %v1291_v15, 0.0  ;;  %vm1568_vm9 = vcmp.gt.f32.partialorder %v11433_v61, 0.0 }
 0x1f1   : > { %v1373_v48 = vrot.slane %v1372_v40, 1  ;;  %v11521_v13 = vadd.f32 %v11374_v7, %v1388_v54  ;;  %v1675_v8 = vsel %vm1304_vm1, %v11527_v27, -inf  ;;  %v1439_v54 = vrot.slane %v1438_v42, 4 }
 0x1f2   : > { %1676 = vmax.xlane.f32.xlu0 %v1675_v8  ;;  %v1424_v18 = vsel %vm1304_vm1, %v1289_v21, 0.0  ;;  %vm1569_vm10 = vcmp.gt.f32.partialorder %v1537_v43, 0.0  ;;  %vm1571_vm12 = vcmp.gt.f32.partialorder %v11494_v20, 0.0 }
 0x1f3   : > { %v1374_v14 = vadd.f32 %v1373_v48, %v1372_v40  ;;  %v11534_v5 = vmul.f32 0.2, %v11521_v13  ;;  %v11538_v33 = vpop.f32.mrb[40].mxu0  ;;  %v11544_v40 = vsel %vm1568_vm9, %v11433_v61, %v11444_v53  ;;  %v11548_v2 = vpop.f32.mrb[40].mxu1  ;;  %v11550_v48 = vadd.f32 %v1439_v54, %v1438_v42 }
 0x1f4   : > { %v11546_v34 = vpop.f32.mrb[41].mxu0  ;;  %v1425_v15 = vrot.slane %v1424_v18, 4  ;;  %v1678_v8 = vsel %vm1304_vm1, %v11544_v40, -inf  ;;  %v11554_v7 = vsel %vm1569_vm10, %v1537_v43, %v1601_v1  ;;  %v14569_v53 = vrot.slane %v11428_v51, 2 }
 0x1f5   : > { %v1538_v55 = vadd.f32 %v1374_v14, %v11379_v29  ;;  %v11556_v29 = vpop.f32.mrb[42].mxu0  ;;  %v11558_v14 = vpop.f32.mrb[41].mxu1  ;;  %1679 = vmax.xlane.f32.xlu1 %v1678_v8  ;;  %v1681_v61 = vsel %vm1304_vm1, %v11554_v7, -inf  ;;  %v14570_v54 = vrot.slane %v11435_v41, 2  ;;  %v1294_v8 = vmul.f32 %v11480_v46, %v11329_v31 }
 0x1f6   : > { %v1407_v42 = vadd.f32 %v14569_v53, %v11428_v51  ;;  %v11568_v60 = vpop.f32.mrb[43].mxu0  ;;  %v11570_v1 = vpop.f32.mrb[42].mxu1  ;;  %v11573_v4 = vadd.f32 %v1425_v15, %v1424_v18  ;;  %1682 = vmax.xlane.f32.xlu0 %v1681_v61  ;;  %v1292_v46 = vmul.f32 %v11489_v24, %v11329_v31  ;;  %vm1572_vm13 = vcmp.gt.f32.partialorder %v11521_v13, 0.0 }
 0x1f7   : > { %v1602_v21 = vmul.f32 0.2, %v1538_v55  ;;  %v1393_v32 = vadd.f32 %v14570_v54, %v11435_v41  ;;  %vm1570_vm11 = vcmp.gt.f32.partialorder %v1538_v55, 0.0  ;;  %v11577_v63 = vpop.f32.mrb[43].mxu1  ;;  %v14571_v41 = vrot.slane %v11456_v28, 2 }
 0x1f8   : > { %v1408_v51 = vrot.slane %v1407_v42, 1  ;;  %v1459_v18 = vsel %vm1304_vm1, %v1294_v8, 0.0  ;;  %v1295_v8 = vmul.f32 %v11498_v16, %v11329_v31 }
 0x1f9   : > { %v1394_v53 = vrot.slane %v1393_v32, 1  ;;  %v11579_v49 = vsel %vm1570_vm11, %v1538_v55, %v1602_v21  ;;  %v1414_v54 = vadd.f32 %v14571_v41, %v11456_v28  ;;  %v1460_v52 = vrot.slane %v1459_v18, 4 }
 0x1fa   : > { %v1684_v15 = vsel %vm1304_vm1, %v11579_v49, -inf  ;;  %v1409_v61 = vadd.f32 %v1408_v51, %v1407_v42  ;;  %v1445_v21 = vsel %vm1304_vm1, %v1292_v46, 0.0  ;;  %v14572_v28 = vrot.slane %v11484_v45, 2 }
 0x1fb   : > { %v1395_v43 = vadd.f32 %v1394_v53, %v1393_v32  ;;  %1685 = vmax.xlane.f32.xlu1 %v1684_v15  ;;  %v1415_v55 = vrot.slane %v1414_v54, 1  ;;  %v11597_v44 = vpop.f32.mrb[44].mxu0  ;;  %v11599_v47 = vpop.f32.mrb[44].mxu1  ;;  %v11605_v42 = vadd.f32 %v1460_v52, %v1459_v18  ;;  %v1446_v15 = vrot.slane %v1445_v21, 4 }
 0x1fc   : > { %v1400_v41 = vadd.f32 %v14572_v28, %v11484_v45  ;;  %v11602_v24 = vadd.f32 %v11396_v26, %v1409_v61  ;;  %v11607_v53 = vpop.f32.mrb[45].mxu0  ;;  %v11609_v45 = vpop.f32.mrb[45].mxu1  ;;  %v1466_v46 = vsel %vm1304_vm1, %v1295_v8, 0.0  ;;  %v11614_v28 = vsel %vm1571_vm12, %v11494_v20, %v11513_v25 }
 0x1fd   : > { %v1541_v32 = vadd.f32 %v1395_v43, %v11401_v19  ;;  %v1416_v51 = vadd.f32 %v1415_v55, %v1414_v54  ;;  %14573 = vst [vmem:[#allocation32_spill] sm:$0xff] %v11614_v28  ;;  %v11616_v37 = vpop.f32.mrb[46].mxu0  ;;  %v11618_v26 = vpop.f32.mrb[46].mxu1  ;;  %v11629_v61 = vadd.f32 %v1446_v15, %v1445_v21  ;;  %v1467_v20 = vrot.slane %v1466_v46, 4 }
 0x1fe   : > { %v1401_v16 = vrot.slane %v1400_v41, 1  ;;  %v11621_v52 = vmul.f32 0.2, %v11602_v24  ;;  %v11627_v18 = vpop.f32.mrb[47].mxu0  ;;  %v1687_v25 = vsel %vm1304_vm1, %v11614_v28, -inf  ;;  %v11633_v8 = vpop.f32.mrb[47].mxu1  ;;  %v1293_v43 = vmul.f32 %v11508_v6, %v11329_v31 }
 0x1ff   : > { %v1605_v19 = vmul.f32 0.2, %v1541_v32  ;;  %v11625_v54 = vadd.f32 %v11408_v3, %v1416_v51  ;;  %1688 = vmax.xlane.f32.xlu0 %v1687_v25  ;;  %vm1573_vm14 = vcmp.gt.f32.partialorder %v1541_v32, 0.0  ;;  %v11647_v51 = vsel %vm1572_vm13, %v11521_v13, %v11534_v5 }
 0x200   : > { %v1402_v55 = vadd.f32 %v1401_v16, %v1400_v41  ;;  %v11643_v41 = vadd.f32 %v1467_v20, %v1466_v46  ;;  %14574 = vst [vmem:[#allocation33_spill] sm:$0xff] %v11647_v51  ;;  %v1452_v15 = vsel %vm1304_vm1, %v1293_v43, 0.0  ;;  %v1690_v16 = vsel %vm1304_vm1, %v11647_v51, -inf }
 0x201   : > { %v11636_v35 = vmul.f32 0.2, %v11625_v54  ;;  %v11652_v25 = vsel %vm1573_vm14, %v1541_v32, %v1605_v19  ;;  %v14576_v6 = vrot.slane %v11515_v12, 2  ;;  %v1453_v46 = vrot.slane %v1452_v15, 4  ;;  %1691 = vmax.xlane.f32.xlu1 %v1690_v16  ;;  %v10531_v19 = vld [vmem:[%s14452_s4 + $0x18] sm:$0xff]  }
 0x202   : > { %v1542_v21 = vadd.f32 %v1402_v55, %v11415_v57  ;;  %14575 = vst [vmem:[#allocation34_spill] sm:$0xff] %v11652_v25  ;;  %v1693_v13 = vsel %vm1304_vm1, %v11652_v25, -inf  ;;  %v14577_v43 = vrot.slane %v11523_v22, 2  ;;  %v1298_v32 = vmul.f32 %v11538_v33, %v11329_v31  ;;  %9466 = vmatprep.subr.bf16.mxu1 %v10531_v19 }
 0x203   : > { %v1435_v28 = vadd.f32 %v14576_v6, %v11515_v12  ;;  %1694 = vmax.xlane.f32.xlu0 %v1693_v13  ;;  %v1296_v12 = vmul.f32 %v11546_v34, %v11329_v31  ;;  %v11670_v20 = vadd.f32 %v1453_v46, %v1452_v15  ;;  %v14578_v16 = vrot.slane %v11550_v48, 2  ;;  %9467 = vmatpush3.bf16.msra.mxu1 %v10531_v19 }
 0x204   : > { %v1606_v3 = vmul.f32 0.2, %v1542_v21  ;;  %v1421_v55 = vadd.f32 %v14577_v43, %v11523_v22  ;;  %vm1574_vm15 = vcmp.gt.f32.partialorder %v1542_v21, 0.0  ;;  %v14579_v22 = vrot.slane %v11573_v4, 2 }
 0x205   : > { %v1436_v5 = vrot.slane %v1435_v28, 1  ;;  %v1442_v6 = vadd.f32 %v14578_v16, %v11550_v48  ;;  %v1487_v57 = vsel %vm1304_vm1, %v1298_v32, 0.0  ;;  %v1473_v34 = vsel %vm1304_vm1, %v1296_v12, 0.0 }
 0x206   : > { %v1428_v13 = vadd.f32 %v14579_v22, %v11573_v4  ;;  %v1422_v33 = vrot.slane %v1421_v55, 1  ;;  %v1455_v25 = vrot.slane %v11670_v20, 2  ;;  %v1488_v15 = vrot.slane %v1487_v57, 4 }
 0x207   : > { %v1437_v43 = vadd.f32 %v1436_v5, %v1435_v28  ;;  %v1474_v46 = vrot.slane %v1473_v34, 4  ;;  %v11681_v51 = vsel %vm1574_vm15, %v1542_v21, %v1606_v3  ;;  %v1443_v28 = vrot.slane %v1442_v6, 1 }
 0x208   : > { %v1423_v16 = vadd.f32 %v1422_v33, %v1421_v55  ;;  %v1696_v4 = vsel %vm1304_vm1, %v11681_v51, -inf  ;;  %v14580_v5 = vmov 0.0   ;;  %v11689_v32 = vadd.f32 %v1488_v15, %v1487_v57 }
 0x209   : > { %v11684_v48 = vadd.f32 %v11437_v59, %v1437_v43  ;;  %9500 = vmatprep.subr.bf16.mxu1 %v14580_v5  ;;  %v11691_v12 = vadd.f32 %v1474_v46, %v1473_v34  ;;  %1697 = vmax.xlane.f32.xlu1 %v1696_v4  ;;  %v1429_v22 = vrot.slane %v1428_v13, 1  ;;  %v1299_v3 = vmul.f32 %v11556_v29, %v11329_v31 }
 0x20a   : > { %v1545_v59 = vadd.f32 %v1423_v16, %v11441_v56  ;;  %v1444_v55 = vadd.f32 %v1443_v28, %v1442_v6  ;;  %v1297_v19 = vmul.f32 %v11568_v60, %v11329_v31  ;;  %vm1575_vm0 = vcmp.gt.f32.partialorder %v11602_v24, 0.0 }
 0x20b   : > { %v11696_v21 = vmul.f32 0.2, %v11684_v48  ;;  %v1430_v33 = vadd.f32 %v1429_v22, %v1428_v13  ;;  %v1494_v34 = vsel %vm1304_vm1, %v1299_v3, 0.0  ;;  %vm1576_vm2 = vcmp.gt.f32.partialorder %v11625_v54, 0.0 }
 0x20c   : > { %v1609_v15 = vmul.f32 0.2, %v1545_v59  ;;  %v11705_v46 = vadd.f32 %v11449_v38, %v1444_v55  ;;  %v1495_v29 = vrot.slane %v1494_v34, 4  ;;  %v1480_v4 = vsel %vm1304_vm1, %v1297_v19, 0.0 }
 0x20d   : > { %v1546_v56 = vadd.f32 %v1430_v33, %v11454_v23  ;;  %v1481_v6 = vrot.slane %v1480_v4, 4  ;;  %v11718_v16 = vsel %vm1575_vm0, %v11602_v24, %v11621_v52  ;;  %v11722_v38 = vsel %vm1576_vm2, %v11625_v54, %v11636_v35 }
 0x20e   : > { %v11712_v60 = vmul.f32 0.2, %v11705_v46  ;;  %v11714_v13 = vadd.f32 %v1495_v29, %v1494_v34  ;;  %v1699_v22 = vsel %vm1304_vm1, %v11718_v16, -inf  ;;  %v1702_v3 = vsel %vm1304_vm1, %v11722_v38, -inf }
 0x20f   : > { %v1610_v28 = vmul.f32 0.2, %v1546_v56  ;;  %v11724_v23 = vadd.f32 %v1481_v6, %v1480_v4  ;;  %1700 = vmax.xlane.f32.xlu0 %v1699_v22  ;;  %1703 = vmax.xlane.f32.xlu1 %v1702_v3  ;;  %vm1577_vm3 = vcmp.gt.f32.partialorder %v1545_v59, 0.0  ;;  %v14581_v24 = vrot.slane %v11605_v42, 2 }
 0x210   : > { %v14582_v35 = vrot.slane %v11629_v61, 2  ;;  %v11738_v33 = vsel %vm1577_vm3, %v1545_v59, %v1609_v15  ;;  %v1302_v34 = vmul.f32 %v11597_v44, %v11329_v31  ;;  %v1300_v29 = vmul.f32 %v11607_v53, %v11329_v31 }
 0x211   : > { %v1463_v52 = vadd.f32 %v14581_v24, %v11605_v42  ;;  %v1483_v19 = vrot.slane %v11724_v23, 2  ;;  %v1705_v4 = vsel %vm1304_vm1, %v11738_v33, -inf  ;;  %vm1578_vm4 = vcmp.gt.f32.partialorder %v1546_v56, 0.0 }
 0x212   : > { %v1449_v54 = vadd.f32 %v14582_v35, %v11629_v61  ;;  %v1515_v42 = vsel %vm1304_vm1, %v1302_v34, 0.0  ;;  %v1501_v61 = vsel %vm1304_vm1, %v1300_v29, 0.0  ;;  %v11748_v3 = vsel %vm1578_vm4, %v1546_v56, %v1610_v28 }
 0x213   : > { %v1464_v6 = vrot.slane %v1463_v52, 1  ;;  %14583 = vst [vmem:[#allocation35_spill] sm:$0xff] %v11748_v3  ;;  %v14584_v59 = vrot.slane %v11643_v41, 2  ;;  %1706 = vmax.xlane.f32.xlu0 %v1705_v4  ;;  %v1516_v53 = vrot.slane %v1515_v42, 4  ;;  %v1502_v35 = vrot.slane %v1501_v61, 4 }
 0x214   : > { %v1450_v22 = vrot.slane %v1449_v54, 1  ;;  %v1708_v55 = vsel %vm1304_vm1, %v11748_v3, -inf  ;;  %v1456_v34 = vadd.f32 %v1455_v25, %v11670_v20  ;;  %v1303_v56 = vmul.f32 %v11616_v37, %v11329_v31 }
 0x215   : > { %v1470_v15 = vadd.f32 %v14584_v59, %v11643_v41  ;;  %v1465_v44 = vadd.f32 %v1464_v6, %v1463_v52  ;;  %v1517_v29 = vadd.f32 %v1516_v53, %v1515_v42  ;;  %v1503_v52 = vadd.f32 %v1502_v35, %v1501_v61  ;;  %1709 = vmax.xlane.f32.xlu1 %v1708_v55 }
 0x216   : > { %v1451_v24 = vadd.f32 %v1450_v22, %v1449_v54  ;;  %v1457_v4 = vrot.slane %v1456_v34, 1  ;;  %v1522_v6 = vsel %vm1304_vm1, %v1303_v56, 0.0  ;;  %v1301_v22 = vmul.f32 %v11627_v18, %v11329_v31 }
 0x217   : > { %v1471_v57 = vrot.slane %v1470_v15, 1  ;;  %v1551_v28 = vadd.f32 %v11482_v62, %v1465_v44  ;;  %v1518_v25 = vrot.slane %v1517_v29, 2  ;;  %v1504_v20 = vrot.slane %v1503_v52, 2 }
 0x218   : > { %v1549_v41 = vadd.f32 %v1451_v24, %v11491_v17  ;;  %v1458_v3 = vadd.f32 %v1457_v4, %v1456_v34  ;;  %v1523_v62 = vrot.slane %v1522_v6, 4  ;;  %v1508_v17 = vsel %vm1304_vm1, %v1301_v22, 0.0 }
 0x219   : > { %v1472_v54 = vadd.f32 %v1471_v57, %v1470_v15  ;;  %v1615_v59 = vmul.f32 0.2, %v1551_v28  ;;  %v1509_v42 = vrot.slane %v1508_v17, 4  ;;  %vm1579_vm5 = vcmp.gt.f32.partialorder %v11684_v48, 0.0 }
 0x21a   : > { %v1613_v43 = vmul.f32 0.2, %v1549_v41  ;;  %vm1580_vm6 = vcmp.gt.f32.partialorder %v11705_v46, 0.0  ;;  %vm1581_vm7 = vcmp.gt.f32.partialorder %v1549_v41, 0.0  ;;  %v1550_v55 = vadd.f32 %v1458_v3, %v11510_v0 }
 0x21b   : > { %v1552_v37 = vadd.f32 %v11500_v9, %v1472_v54  ;;  %v1524_v31 = vadd.f32 %v1523_v62, %v1522_v6  ;;  %v11772_v18 = vsel %vm1579_vm5, %v11684_v48, %v11696_v21  ;;  %v1510_v61 = vadd.f32 %v1509_v42, %v1508_v17 }
 0x21c   : > { %v1711_v9 = vsel %vm1304_vm1, %v11772_v18, -inf  ;;  %v11778_v15 = vsel %vm1580_vm6, %v11705_v46, %v11712_v60  ;;  %v11780_v44 = vsel %vm1581_vm7, %v1549_v41, %v1613_v43  ;;  %v1614_v24 = vmul.f32 0.2, %v1550_v55 }
 0x21d   : > { %v1616_v57 = vmul.f32 0.2, %v1552_v37  ;;  %v1525_v53 = vrot.slane %v1524_v31, 2  ;;  %1712 = vmax.xlane.f32.xlu0 %v1711_v9  ;;  %v1714_v0 = vsel %vm1304_vm1, %v11778_v15, -inf  ;;  %v1717_v48 = vsel %vm1304_vm1, %v11780_v44, -inf }
 0x21e   : > { %v1511_v21 = vrot.slane %v1510_v61, 2  ;;  %1715 = vmax.xlane.f32.xlu1 %v1714_v0  ;;  %v14585_v3 = vrot.slane %v11689_v32, 2  ;;  %v14586_v46 = vrot.slane %v11691_v12, 2  ;;  %vm1582_vm8 = vcmp.gt.f32.partialorder %v1550_v55, 0.0 }
 0x21f   : > { %v11792_v60 = vsel %vm1582_vm8, %v1550_v55, %v1614_v24  ;;  %v14587_v34 = vrot.slane %v11714_v13, 2  ;;  %v1484_v41 = vadd.f32 %v1483_v19, %v11724_v23  ;;  %vm1583_vm9 = vcmp.gt.f32.partialorder %v1551_v28, 0.0 }
 0x220   : > { %v1491_v35 = vadd.f32 %v14585_v3, %v11689_v32  ;;  %v1477_v43 = vadd.f32 %v14586_v46, %v11691_v12  ;;  %v1720_v6 = vsel %vm1304_vm1, %v11792_v60, -inf  ;;  %v11800_v32 = vsel %vm1583_vm9, %v1551_v28, %v1615_v59 }
 0x221   : > { %v1498_v56 = vadd.f32 %v14587_v34, %v11714_v13  ;;  %1718 = vmax.xlane.f32.xlu0 %v1717_v48  ;;  %v1485_v12 = vrot.slane %v1484_v41, 1  ;;  %v1723_v62 = vsel %vm1304_vm1, %v11800_v32, -inf  ;;  %vm1584_vm10 = vcmp.gt.f32.partialorder %v1552_v37, 0.0 }
 0x222   : > { %v1492_v54 = vrot.slane %v1491_v35, 1  ;;  %v1478_v4 = vrot.slane %v1477_v43, 1  ;;  %1721 = vmax.xlane.f32.xlu1 %v1720_v6  ;;  %v11804_v13 = vsel %vm1584_vm10, %v1552_v37, %v1616_v57  ;;  %v1519_v23 = vadd.f32 %v1518_v25, %v1517_v29 }
 0x223   : > { %v1499_v22 = vrot.slane %v1498_v56, 1  ;;  %v1486_v55 = vadd.f32 %v1485_v12, %v1484_v41  ;;  %v1726_v9 = vsel %vm1304_vm1, %v11804_v13, -inf  ;;  %v1505_v28 = vadd.f32 %v1504_v20, %v1503_v52 }
 0x224   : > { %v1493_v17 = vadd.f32 %v1492_v54, %v1491_v35  ;;  %v1479_v42 = vadd.f32 %v1478_v4, %v1477_v43  ;;  %v1520_v0 = vrot.slane %v1519_v23, 1  ;;  %v1526_v48 = vadd.f32 %v1525_v53, %v1524_v31 }
 0x225   : > { %v1500_v19 = vadd.f32 %v1499_v22, %v1498_v56  ;;  %v1554_v35 = vadd.f32 %v1486_v55, %v11577_v63  ;;  %1724 = vmax.xlane.f32.xlu0 %v1723_v62  ;;  %v1506_v37 = vrot.slane %v1505_v28, 1  ;;  %v1512_v57 = vadd.f32 %v1511_v21, %v1510_v61 }
 0x226   : > { %v1555_v59 = vadd.f32 %v11548_v2, %v1493_v17  ;;  %v1553_v24 = vadd.f32 %v1479_v42, %v11558_v14  ;;  %1727 = vmax.xlane.f32.xlu1 %v1726_v9  ;;  %v1521_v46 = vadd.f32 %v1520_v0, %v1519_v23  ;;  %v1527_v31 = vrot.slane %v1526_v48, 1 }
 0x227   : > { %v1556_v3 = vadd.f32 %v11570_v1, %v1500_v19  ;;  %v1618_v52 = vmul.f32 0.2, %v1554_v35  ;;  %v1507_v20 = vadd.f32 %v1506_v37, %v1505_v28  ;;  %vm1586_vm12 = vcmp.gt.f32.partialorder %v1554_v35, 0.0 }
 0x228   : > { %v1619_v29 = vmul.f32 0.2, %v1555_v59  ;;  %v1617_v25 = vmul.f32 0.2, %v1553_v24  ;;  %vm1585_vm11 = vcmp.gt.f32.partialorder %v1553_v24, 0.0  ;;  %v1559_v14 = vadd.f32 %v11599_v47, %v1521_v46 }
 0x229   : > { %v1620_v43 = vmul.f32 0.2, %v1556_v3  ;;  %v1513_v1 = vrot.slane %v1512_v57, 1  ;;  %v1557_v61 = vadd.f32 %v1507_v20, %v11609_v45  ;;  %v11818_v53 = vsel %vm1586_vm12, %v1554_v35, %v1618_v52 }
 0x22a   : > { %v11812_v2 = vsel %vm1585_vm11, %v1553_v24, %v1617_v25  ;;  %vm1587_vm13 = vcmp.gt.f32.partialorder %v1555_v59, 0.0  ;;  %v1623_v21 = vmul.f32 0.2, %v1559_v14  ;;  %v1732_v34 = vsel %vm1304_vm1, %v11818_v53, -inf }
 0x22b   : > { %v1729_v63 = vsel %vm1304_vm1, %v11812_v2, -inf  ;;  %v1528_v56 = vadd.f32 %v1527_v31, %v1526_v48  ;;  %v1514_v41 = vadd.f32 %v1513_v1, %v1512_v57  ;;  %v1621_v54 = vmul.f32 0.2, %v1557_v61  ;;  %1733 = vmax.xlane.f32.xlu1 %v1732_v34 }
 0x22c   : > { %1730 = vmax.xlane.f32.xlu0 %v1729_v63  ;;  %v11822_v47 = vsel %vm1587_vm13, %v1555_v59, %v1619_v29  ;;  %vm1588_vm14 = vcmp.gt.f32.partialorder %v1556_v3, 0.0  ;;  %vm1589_vm15 = vcmp.gt.f32.partialorder %v1557_v61, 0.0  ;;  %vm1591_vm0 = vcmp.gt.f32.partialorder %v1559_v14, 0.0 }
 0x22d   : > { %v1560_v4 = vadd.f32 %v11618_v26, %v1528_v56  ;;  %v1558_v45 = vadd.f32 %v1514_v41, %v11633_v8  ;;  %v1735_v6 = vsel %vm1304_vm1, %v11822_v47, -inf  ;;  %v11828_v22 = vsel %vm1588_vm14, %v1556_v3, %v1620_v43 }
 0x22e   : > { %v1738_v12 = vsel %vm1304_vm1, %v11828_v22, -inf  ;;  %v11832_v62 = vsel %vm1589_vm15, %v1557_v61, %v1621_v54  ;;  %v11838_v23 = vsel %vm1591_vm0, %v1559_v14, %v1623_v21  ;;  %vm11034_vm4 = vmmov 0  }
 0x22f   : > { %v1624_v17 = vmul.f32 0.2, %v1560_v4  ;;  %v1622_v42 = vmul.f32 0.2, %v1558_v45  ;;  %vm1590_vm2 = vcmp.gt.f32.partialorder %v1558_v45, 0.0  ;;  %1739 = vmax.xlane.f32.xlu1 %v1738_v12  ;;  %v1741_v26 = vsel %vm1304_vm1, %v11832_v62, -inf  ;;  %9520 = vmatprep.mubr.msk.bf16.mxu0 %vm11034_vm4, %v14580_v5 }
 0x230   : > { %1736 = vmax.xlane.f32.xlu0 %v1735_v6  ;;  %vm1592_vm3 = vcmp.gt.f32.partialorder %v1560_v4, 0.0  ;;  %v1747_v9 = vsel %vm1304_vm1, %v11838_v23, -inf }
 0x231   : > { %v11836_v8 = vsel %vm1590_vm2, %v1558_v45, %v1622_v42  ;;  %v11842_v55 = vsel %vm1592_vm3, %v1560_v4, %v1624_v17 }
 0x232   : > { %v1744_v19 = vsel %vm1304_vm1, %v11836_v8, -inf  ;;  %v1750_v28 = vsel %vm1304_vm1, %v11842_v55, -inf }
 0x233   : > { %1745 = vmax.xlane.f32.xlu1 %v1744_v19 }
 0x234   : > { %1742 = vmax.xlane.f32.xlu0 %v1741_v26 }
 0x237   : > { %1751 = vmax.xlane.f32.xlu1 %v1750_v28 }
 0x238   : > { %1748 = vmax.xlane.f32.xlu0 %v1747_v9  ;;  %v11890_v9 = vld [vmem:[%s14454_s6 + $0x8] sm:$0xff]  }
 0x269   : > { %v1665_v59 = vpop.xlane.xlu1 %1664 }
 0x26a   : > { %v1755_v3 = vsub.f32 %v11389_v11, %v1665_v59  ;;  %v14588_v59 = vld [vmem:[#allocation32_spill] sm:$0xff] }
 0x26c   : > { %v1659_v24 = vpop.xlane.xlu0 %1658  ;;  %v1789_v46 = vmul.f32 1.442695, %v1755_v3 }
 0x26d   : > { %v1753_v0 = vsub.f32 %v11412_v39, %v1659_v24 }
 0x26f   : > { %v1785_v37 = vmul.f32 1.442695, %v1753_v0 }
 0x271   : > { %10556 = vpow2.f32 %v1785_v37 }
 0x273   : > { %v1668_v48 = vpop.xlane.xlu1 %1667 }
 0x274   : > { %v1756_v35 = vsub.f32 %v11447_v50, %v1668_v48 }
 0x276   : > { %v1791_v57 = vmul.f32 1.442695, %v1756_v35  ;;  %v1662_v29 = vpop.xlane.xlu0 %1661  ;;  %v14589_v35 = vld [vmem:[#allocation33_spill] sm:$0xff] }
 0x277   : > { %v1754_v25 = vsub.f32 %v11462_v58, %v1662_v29  ;;  %v11902_v29 = vld [vmem:[%s14454_s6 + $0x10] sm:$0xff]  }
 0x278   : > { %10558 = vpow2.f32 %v1791_v57 }
 0x279   : > { %v1787_v43 = vmul.f32 1.442695, %v1754_v25  ;;  %v1674_v20 = vpop.xlane.xlu1 %1673 }
 0x27a   : > { %v1671_v52 = vpop.xlane.xlu0 %1670  ;;  %v1758_v39 = vsub.f32 %v11487_v10, %v1674_v20  ;;  %v8690_v10 = vpack.c.bf16 %v11210_v36, %v11210_v36  ;;  %v11876_v36 = vld [vmem:[%s14454_s6] sm:$0xff]  }
 0x27b   : > { %10560 = vpow2.f32 %v1787_v43  ;;  %v1757_v14 = vsub.f32 %v11464_v30, %v1671_v52  ;;  %v11855_v61 = vpop.eup %10556  ;;  %v14590_v43 = vld [vmem:[#allocation34_spill] sm:$0xff] }
 0x27c   : > { %10562 = vpow2.f32 %v1789_v46  ;;  %v1795_v31 = vmul.f32 1.442695, %v1758_v39  ;;  %v2372_v28 = vmul.bf16 %v11890_v9, %v8690_v10  ;;  %v2373_v25 = vmul.bf16 %v11902_v29, %v8690_v10 }
 0x27d   : > { %v1793_v11 = vmul.f32 1.442695, %v1757_v14 }
 0x27f   : > { %10564 = vpow2.f32 %v1793_v11  ;;  %v1677_v50 = vpop.xlane.xlu0 %1676  ;;  %v11917_v11 = vld [vmem:[%s14454_s6 + $0x18] sm:$0xff]  }
 0x280   : > { %10566 = vpow2.f32 %v1795_v31  ;;  %v1759_v1 = vsub.f32 %v11527_v27, %v1677_v50  ;;  %v2374_v31 = vmul.bf16 %v11917_v11, %v8690_v10 }
 0x282   : > { %v1797_v58 = vmul.f32 1.442695, %v1759_v1  ;;  %v1680_v63 = vpop.xlane.xlu1 %1679  ;;  %v11858_v56 = vpop.eup %10558 }
 0x283   : > { %v1760_v21 = vsub.f32 %v11544_v40, %v1680_v63  ;;  %v1683_v34 = vpop.xlane.xlu0 %1682 }
 0x284   : > { %v1761_v30 = vsub.f32 %v11554_v7, %v1683_v34  ;;  %10568 = vpow2.f32 %v1797_v58  ;;  %v2371_v7 = vmul.bf16 %v11876_v36, %v8690_v10 }
 0x285   : > { %v11863_v41 = vpop.eup %10560  ;;  %v1799_v54 = vmul.f32 1.442695, %v1760_v21 }
 0x286   : > { %v11865_v4 = vpop.eup %10562  ;;  %v1801_v27 = vmul.f32 1.442695, %v1761_v30  ;;  %v1849_v6 = vpack.c.bf16 %v11863_v41, %v11855_v61 }
 0x287   : > { %v1850_v40 = vpack.c.bf16 %v11858_v56, %v11865_v4  ;;  %10570 = vpow2.f32 %v1799_v54 }
 0x288   : > { %v1686_v45 = vpop.xlane.xlu1 %1685  ;;  %9468 = vmatprep.mubr.msk.bf16.mxu1 %vm1304_vm1, %v1849_v6  ;;  %10572 = vpow2.f32 %v1801_v27 }
 0x289   : > { %v1762_v12 = vsub.f32 %v11579_v49, %v1686_v45  ;;  %v11879_v17 = vpop.eup %10564  ;;  %9469 = vmatmul.mubr.msk.bf16.vlgmr.msra.gmra.mrb[48].mxu1 %vm1304_vm1, %v1850_v40 }
 0x28a   : > { %v11882_v26 = vpop.eup %10566  ;;  %9501 = vmatpush3.bf16.msra.mxu1 %v2371_v7 }
 0x28b   : > { %v1803_v42 = vmul.f32 1.442695, %v1762_v12  ;;  %9502 = vmatprep.subr.bf16.mxu1 %v14580_v5  ;;  %v1851_v49 = vpack.c.bf16 %v11882_v26, %v11879_v17 }
 0x28c   : > { %v1689_v19 = vpop.xlane.xlu0 %1688 }
 0x28d   : > { %10574 = vpow2.f32 %v1803_v42  ;;  %v1763_v24 = vsub.f32 %v14588_v59, %v1689_v19  ;;  %9472 = vmatprep.mubr.msk.bf16.mxu1 %vm1304_vm1, %v1851_v49 }
 0x28e   : > { %9503 = vmatpush3.bf16.msra.mxu1 %v2372_v28  ;;  %v1692_v48 = vpop.xlane.xlu1 %1691  ;;  %v11896_v3 = vpop.eup %10568  ;;  %v14591_v28 = vld [vmem:[#allocation35_spill] sm:$0xff] }
 0x28f   : > { %v1805_v0 = vmul.f32 1.442695, %v1763_v24  ;;  %9504 = vmatprep.subr.bf16.mxu1 %v14580_v5  ;;  %v1764_v37 = vsub.f32 %v14589_v35, %v1692_v48 }
 0x290   : > { %v1695_v57 = vpop.xlane.xlu0 %1694 }
 0x291   : > { %v11905_v46 = vpop.eup %10570  ;;  %v1765_v52 = vsub.f32 %v14590_v43, %v1695_v57  ;;  %v1807_v20 = vmul.f32 1.442695, %v1764_v37  ;;  %10576 = vpow2.f32 %v1805_v0 }
 0x292   : > { %9505 = vmatpush3.bf16.msra.mxu1 %v2373_v25  ;;  %v1852_v14 = vpack.c.bf16 %v11905_v46, %v11896_v3  ;;  %v11911_v39 = vpop.eup %10572 }
 0x293   : > { %9506 = vmatprep.subr.bf16.mxu1 %v14580_v5  ;;  %10578 = vpow2.f32 %v1807_v20  ;;  %v1809_v1 = vmul.f32 1.442695, %v1765_v52 }
 0x294   : > { %9473 = vmatmul.mubr.msk.bf16.gmra.mrb[52].mxu1 %vm1304_vm1, %v1852_v14 }
 0x295   : > { %10580 = vpow2.f32 %v1809_v1 }
 0x296   : > { %v1698_v58 = vpop.xlane.xlu1 %1697  ;;  %9507 = vmatpush3.bf16.msra.mxu1 %v2374_v31 }
 0x297   : > { %v11920_v50 = vpop.eup %10574  ;;  %v1766_v63 = vsub.f32 %v11681_v51, %v1698_v58  ;;  %9524 = vmatprep.subr.bf16.mxu1 %v14580_v5 }
 0x298   : > { %v1853_v21 = vpack.c.bf16 %v11920_v50, %v11911_v39 }
 0x299   : > { %v1811_v34 = vmul.f32 1.442695, %v1766_v63 }
 0x29a   : > { %9476 = vmatprep.mubr.msk.bf16.mxu1 %vm1304_vm1, %v1853_v21 }
 0x29b   : > { %10582 = vpow2.f32 %v1811_v34  ;;  %v11927_v10 = vpop.eup %10576 }
 0x29c   : > { %v1701_v30 = vpop.xlane.xlu0 %1700  ;;  %v1704_v54 = vpop.xlane.xlu1 %1703 }
 0x29d   : > { %v1767_v27 = vsub.f32 %v11718_v16, %v1701_v30  ;;  %v1768_v45 = vsub.f32 %v11722_v38, %v1704_v54  ;;  %v11931_v51 = vpop.eup %10578 }
 0x29e   : > { %v1854_v12 = vpack.c.bf16 %v11931_v51, %v11927_v10 }
 0x29f   : > { %v1813_v6 = vmul.f32 1.442695, %v1767_v27  ;;  %v1815_v40 = vmul.f32 1.442695, %v1768_v45  ;;  %v11937_v19 = vpop.eup %10580 }
 0x2a0   : > { %v1707_v7 = vpop.xlane.xlu0 %1706  ;;  %9477 = vmatmul.mubr.msk.bf16.gmra.mrb[56].mxu1 %vm1304_vm1, %v1854_v12 }
 0x2a1   : > { %10584 = vpow2.f32 %v1813_v6  ;;  %v1769_v42 = vsub.f32 %v11738_v33, %v1707_v7 }
 0x2a2   : > { %10586 = vpow2.f32 %v1815_v40  ;;  %v1710_v49 = vpop.xlane.xlu1 %1709 }
 0x2a3   : > { %v1817_v16 = vmul.f32 1.442695, %v1769_v42  ;;  %v1770_v38 = vsub.f32 %v14591_v28, %v1710_v49 }
 0x2a5   : > { %v11940_v59 = vpop.eup %10582  ;;  %v1819_v24 = vmul.f32 1.442695, %v1770_v38  ;;  %10588 = vpow2.f32 %v1817_v16 }
 0x2a6   : > { %v1855_v0 = vpack.c.bf16 %v11940_v59, %v11937_v19 }
 0x2a7   : > { %10590 = vpow2.f32 %v1819_v24 }
 0x2a8   : > { %9480 = vmatprep.mubr.msk.bf16.mxu1 %vm1304_vm1, %v1855_v0 }
 0x2aa   : > { %v1713_v33 = vpop.xlane.xlu0 %1712 }
 0x2ab   : > { %v1771_v48 = vsub.f32 %v11772_v18, %v1713_v33  ;;  %v1716_v35 = vpop.xlane.xlu1 %1715  ;;  %v11946_v37 = vpop.eup %10584 }
 0x2ac   : > { %v1772_v57 = vsub.f32 %v11778_v15, %v1716_v35  ;;  %v11949_v25 = vpop.eup %10586 }
 0x2ad   : > { %v1821_v43 = vmul.f32 1.442695, %v1771_v48  ;;  %v1856_v14 = vpack.c.bf16 %v11949_v25, %v11946_v37 }
 0x2ae   : > { %v1823_v52 = vmul.f32 1.442695, %v1772_v57  ;;  %v1719_v20 = vpop.xlane.xlu0 %1718 }
 0x2af   : > { %10592 = vpow2.f32 %v1821_v43  ;;  %v1773_v31 = vsub.f32 %v11780_v44, %v1719_v20  ;;  %v1722_v1 = vpop.xlane.xlu1 %1721  ;;  %9481 = vmatmul.mubr.msk.bf16.gmra.mrb[60].mxu1 %vm1304_vm1, %v1856_v14  ;;  %v11956_v58 = vpop.eup %10588 }
 0x2b0   : > { %10594 = vpow2.f32 %v1823_v52  ;;  %v1774_v18 = vsub.f32 %v11792_v60, %v1722_v1 }
 0x2b1   : > { %v1825_v15 = vmul.f32 1.442695, %v1773_v31  ;;  %v11958_v63 = vpop.eup %10590 }
 0x2b2   : > { %v1827_v21 = vmul.f32 1.442695, %v1774_v18  ;;  %v1725_v34 = vpop.xlane.xlu0 %1724  ;;  %v1857_v44 = vpack.c.bf16 %v11958_v63, %v11956_v58 }
 0x2b3   : > { %10596 = vpow2.f32 %v1825_v15  ;;  %v1775_v30 = vsub.f32 %v11800_v32, %v1725_v34  ;;  %v1728_v54 = vpop.xlane.xlu1 %1727 }
 0x2b4   : > { %10598 = vpow2.f32 %v1827_v21  ;;  %v1776_v27 = vsub.f32 %v11804_v13, %v1728_v54  ;;  %9484 = vmatprep.mubr.msk.bf16.mxu1 %vm1304_vm1, %v1857_v44 }
 0x2b5   : > { %v1829_v60 = vmul.f32 1.442695, %v1775_v30 }
 0x2b6   : > { %v1831_v45 = vmul.f32 1.442695, %v1776_v27 }
 0x2b7   : > { %10600 = vpow2.f32 %v1829_v60 }
 0x2b8   : > { %10602 = vpow2.f32 %v1831_v45  ;;  %v1734_v12 = vpop.xlane.xlu1 %1733 }
 0x2b9   : > { %v1731_v6 = vpop.xlane.xlu0 %1730  ;;  %v11966_v7 = vpop.eup %10592  ;;  %v1778_v32 = vsub.f32 %v11818_v53, %v1734_v12 }
 0x2ba   : > { %v1777_v40 = vsub.f32 %v11812_v2, %v1731_v6  ;;  %v11969_v42 = vpop.eup %10594 }
 0x2bb   : > { %v1835_v16 = vmul.f32 1.442695, %v1778_v32  ;;  %v1858_v13 = vpack.c.bf16 %v11969_v42, %v11966_v7 }
 0x2bc   : > { %v1833_v49 = vmul.f32 1.442695, %v1777_v40  ;;  %v1740_v24 = vpop.xlane.xlu1 %1739 }
 0x2bd   : > { %v1737_v28 = vpop.xlane.xlu0 %1736  ;;  %v11974_v0 = vpop.eup %10596  ;;  %v1780_v2 = vsub.f32 %v11828_v22, %v1740_v24  ;;  %9485 = vmatmul.mubr.msk.bf16.gmra.mrb[64].mxu1 %vm1304_vm1, %v1858_v13 }
 0x2be   : > { %10604 = vpow2.f32 %v1833_v49  ;;  %v1779_v38 = vsub.f32 %v11822_v47, %v1737_v28  ;;  %v11978_v53 = vpop.eup %10598 }
 0x2bf   : > { %10606 = vpow2.f32 %v1835_v16  ;;  %v1839_v48 = vmul.f32 1.442695, %v1780_v2  ;;  %v1859_v57 = vpack.c.bf16 %v11978_v53, %v11974_v0  ;;  %v14592_v2 = vld [vmem:[#allocation2_spill] sm:$0xff] }
 0x2c0   : > { %v1837_v33 = vmul.f32 1.442695, %v1779_v38  ;;  %v1746_v47 = vpop.xlane.xlu1 %1745 }
 0x2c1   : > { %v1743_v35 = vpop.xlane.xlu0 %1742  ;;  %v11983_v52 = vpop.eup %10600  ;;  %v1782_v20 = vsub.f32 %v11836_v8, %v1746_v47  ;;  %9488 = vmatprep.mubr.msk.bf16.mxu1 %vm1304_vm1, %v1859_v57  ;;  %v14593_v47 = vld [vmem:[#allocation3_spill] sm:$0xff] }
 0x2c2   : > { %10608 = vpow2.f32 %v1837_v33  ;;  %v1781_v43 = vsub.f32 %v11832_v62, %v1743_v35  ;;  %v11987_v22 = vpop.eup %10602  ;;  %v8692_v33 = vpack.c.bf16 %v14592_v2, %v14592_v2 }
 0x2c3   : > { %10610 = vpow2.f32 %v1839_v48  ;;  %v1843_v31 = vmul.f32 1.442695, %v1782_v20  ;;  %v1860_v18 = vpack.c.bf16 %v11987_v22, %v11983_v52  ;;  %v8693_v20 = vpack.c.bf16 %v14593_v47, %v14593_v47 }
 0x2c4   : > { %v1841_v14 = vmul.f32 1.442695, %v1781_v43  ;;  %v1752_v62 = vpop.xlane.xlu1 %1751 }
 0x2c5   : > { %v1749_v1 = vpop.xlane.xlu0 %1748  ;;  %v1784_v21 = vsub.f32 %v11842_v55, %v1752_v62  ;;  %9489 = vmatmul.mubr.msk.bf16.gmra.mrb[68].mxu1 %vm1304_vm1, %v1860_v18  ;;  %v2379_v18 = vmul.bf16 %v11876_v36, %v8692_v33  ;;  %v2380_v62 = vmul.bf16 %v11890_v9, %v8692_v33 }
 0x2c6   : > { %10612 = vpow2.f32 %v1841_v14  ;;  %v1783_v15 = vsub.f32 %v11838_v23, %v1749_v1 }
 0x2c7   : > { %10614 = vpow2.f32 %v1843_v31  ;;  %v1847_v54 = vmul.f32 1.442695, %v1784_v21 }
 0x2c8   : > { %v11994_v8 = vpop.eup %10604  ;;  %v1845_v34 = vmul.f32 1.442695, %v1783_v15 }
 0x2c9   : > { %v11996_v30 = vpop.eup %10606 }
 0x2ca   : > { %10616 = vpow2.f32 %v1845_v34  ;;  %v1861_v44 = vpack.c.bf16 %v11996_v30, %v11994_v8 }
 0x2cb   : > { %10618 = vpow2.f32 %v1847_v54  ;;  %v2381_v54 = vmul.bf16 %v11902_v29, %v8692_v33 }
 0x2cc   : > { %v12000_v27 = vpop.eup %10608  ;;  %9492 = vmatprep.mubr.msk.bf16.mxu1 %vm1304_vm1, %v1861_v44 }
 0x2cd   : > { %v12003_v23 = vpop.eup %10610 }
 0x2ce   : > { %v1862_v55 = vpack.c.bf16 %v12003_v23, %v12000_v27 }
 0x2d0   : > { %v12007_v60 = vpop.eup %10612  ;;  %9493 = vmatmul.mubr.msk.bf16.gmra.mrb[72].mxu1 %vm1304_vm1, %v1862_v55 }
 0x2d1   : > { %v12010_v45 = vpop.eup %10614 }
 0x2d2   : > { %v1863_v6 = vpack.c.bf16 %v12010_v45, %v12007_v60 }
 0x2d4   : > { %v12014_v40 = vpop.eup %10616  ;;  %9496 = vmatprep.mubr.msk.bf16.mxu1 %vm1304_vm1, %v1863_v6 }
 0x2d5   : > { %v12017_v12 = vpop.eup %10618 }
 0x2d6   : > { %v1864_v32 = vpack.c.bf16 %v12017_v12, %v12014_v40 }
 0x2d8   : > { %9497 = vmatmul.mubr.msk.bf16.gmra.mrb[76].mxu1 %vm1304_vm1, %v1864_v32  ;;  %v2385_v32 = vmul.bf16 %v11902_v29, %v8693_v20 }
 0x2d9   : > { %9508 = vmatprep.mubr.msk.bf16.mxu1 %vm11034_vm4, %v14580_v5 }
 0x35c   : > { %v9470_v49 = vpop.f32.mrb[48].mxu1 }
 0x35d   : > { %v1971_v16 = vpop.f32.mrb[49].mxu1 }
 0x35e   : > { %10620 = vrcp.f32 %v1971_v16  ;;  %v9471_v28 = vpop.f32.mrb[50].mxu1 }
 0x35f   : > { %v1974_v13 = vpop.f32.mrb[51].mxu1 }
 0x360   : > { %10622 = vrcp.f32 %v1974_v13 }
 0x361   : > { %10624 = vrcp.f32 %v9470_v49 }
 0x362   : > { %10626 = vrcp.f32 %v9471_v28  ;;  %v14594_v28 = vld [vmem:[#allocation6_spill] sm:$0xff] }
 0x363   : > { %v8694_v13 = vpack.c.bf16 %v14594_v28, %v14594_v28 }
 0x367   : > { %v12026_v38 = vpop.f32.mrb[52].mxu1 }
 0x368   : > { %v10621_v24 = vpop.eup %10620  ;;  %v1987_v48 = vpop.f32.mrb[53].mxu1 }
 0x369   : > { %v2130_v35 = vmul.f32 %v10621_v24, %v11855_v61  ;;  %v12031_v57 = vpop.f32.mrb[54].mxu1  ;;  %v2383_v61 = vmul.bf16 %v11876_v36, %v8693_v20  ;;  %v2382_v24 = vmul.bf16 %v11917_v11, %v8692_v33  ;;  %10628 = vrcp.f32 %v1987_v48 }
 0x36a   : > { %v10623_v43 = vpop.eup %10622  ;;  %v1990_v14 = vpop.f32.mrb[55].mxu1  ;;  %v2388_v48 = vmul.bf16 %v11890_v9, %v8694_v13 }
 0x36b   : > { %v8722_v31 = vpack.c.bf16 %v2130_v35, %v2130_v35  ;;  %v2131_v1 = vmul.f32 %v10623_v43, %v11863_v41  ;;  %v2384_v41 = vmul.bf16 %v11890_v9, %v8693_v20  ;;  %v10625_v21 = vpop.eup %10624  ;;  %v14595_v35 = vld [vmem:[#allocation10_spill] sm:$0xff]  ;;  %10630 = vrcp.f32 %v1990_v14 }
 0x36c   : > { %v10627_v55 = vpop.eup %10626  ;;  %v2132_v49 = vmul.f32 %v10625_v21, %v11865_v4  ;;  %v8695_v43 = vpack.c.bf16 %v14595_v35, %v14595_v35  ;;  %v2386_v4 = vmul.bf16 %v11917_v11, %v8693_v20  ;;  %10632 = vrcp.f32 %v12026_v38 }
 0x36d   : > { %v8723_v15 = vpack.c.bf16 %v2131_v1, %v2131_v1  ;;  %9509 = vmatmul.mubr.msk.bf16.vlgmr.msra.gmra.mrb[80].mxu1 %vm1304_vm1, %v8722_v31  ;;  %v2133_v2 = vmul.f32 %v10627_v55, %v11858_v56  ;;  %v2387_v31 = vmul.bf16 %v11876_v36, %v8694_v13  ;;  %v14596_v55 = vld [vmem:[#allocation4_spill] sm:$0xff]  ;;  %10634 = vrcp.f32 %v12031_v57 }
 0x36e   : > { %9525 = vmatpush3.bf16.msra.mxu1 %v2379_v18  ;;  %9532 = vmatprep.mubr.msk.bf16.mxu1 %vm11034_vm4, %v14580_v5  ;;  %v8724_v47 = vpack.c.bf16 %v2132_v49, %v2132_v49  ;;  %v2391_v56 = vmul.bf16 %v11876_v36, %v8695_v43  ;;  %v2392_v14 = vmul.bf16 %v11890_v9, %v8695_v43 }
 0x36f   : > { %9521 = vmatmul.mubr.msk.bf16.vlgmr.msra.gmra.mrb[48].mxu0 %vm1304_vm1, %v8723_v15  ;;  %9526 = vmatprep.subr.bf16.mxu1 %v14580_v5  ;;  %v8725_v33 = vpack.c.bf16 %v2133_v2, %v2133_v2  ;;  %v2393_v21 = vmul.bf16 %v11902_v29, %v8695_v43  ;;  %v2390_v49 = vmul.bf16 %v11917_v11, %v8694_v13 }
 0x370   : > { %9537 = vmatpush3.bf16.msra.mxu0 %v2383_v61  ;;  %9544 = vmatprep.mubr.msk.bf16.mxu0 %vm11034_vm4, %v14580_v5  ;;  %v2389_v61 = vmul.bf16 %v11902_v29, %v8694_v13 }
 0x371   : > { %9538 = vmatprep.subr.bf16.mxu0 %v14580_v5 }
 0x372   : > { %9527 = vmatpush3.bf16.msra.mxu1 %v2380_v62 }
 0x373   : > { %9528 = vmatprep.subr.bf16.mxu1 %v14580_v5  ;;  %v12049_v34 = vpop.f32.mrb[56].mxu1  ;;  %v10629_v18 = vpop.eup %10628 }
 0x374   : > { %9539 = vmatpush3.bf16.msra.mxu0 %v2384_v41  ;;  %v12052_v44 = vpop.f32.mrb[57].mxu1 }
 0x375   : > { %9540 = vmatprep.subr.bf16.mxu0 %v14580_v5  ;;  %v12055_v6 = vpop.f32.mrb[58].mxu1  ;;  %v10631_v41 = vpop.eup %10630  ;;  %10636 = vrcp.f32 %v12052_v44 }
 0x376   : > { %9529 = vmatpush3.bf16.msra.mxu1 %v2381_v54  ;;  %v12059_v16 = vpop.f32.mrb[59].mxu1  ;;  %v2134_v54 = vmul.f32 %v10629_v18, %v11879_v17  ;;  %v2135_v28 = vmul.f32 %v10631_v41, %v11882_v26  ;;  %v2394_v17 = vmul.bf16 %v11917_v11, %v8695_v43 }
 0x377   : > { %9530 = vmatprep.subr.bf16.mxu1 %v14580_v5  ;;  %10638 = vrcp.f32 %v12059_v16 }
 0x378   : > { %9541 = vmatpush3.bf16.msra.mxu0 %v2385_v32  ;;  %v8696_v32 = vpack.c.bf16 %v14596_v55, %v14596_v55  ;;  %v8726_v35 = vpack.c.bf16 %v2134_v54, %v2134_v54  ;;  %v8727_v26 = vpack.c.bf16 %v2135_v28, %v2135_v28  ;;  %10640 = vrcp.f32 %v12049_v34 }
 0x379   : > { %9542 = vmatprep.subr.bf16.mxu0 %v14580_v5  ;;  %10642 = vrcp.f32 %v12055_v6 }
 0x37a   : > { %9531 = vmatpush3.bf16.msra.mxu1 %v2382_v24  ;;  %v14597_v24 = vld [vmem:[#allocation8_spill] sm:$0xff]  ;;  %v2395_v13 = vmul.bf16 %v11876_v36, %v8696_v32  ;;  %v2396_v43 = vmul.bf16 %v11890_v9, %v8696_v32 }
 0x37b   : > { %9548 = vmatprep.subr.bf16.mxu1 %v14580_v5  ;;  %v8697_v2 = vpack.c.bf16 %v14597_v24, %v14597_v24 }
 0x37c   : > { %9543 = vmatpush3.bf16.msra.mxu0 %v2386_v4 }
 0x37d   : > { %9533 = vmatmul.mubr.msk.bf16.vlgmr.msra.gmra.mrb[84].mxu1 %vm1304_vm1, %v8724_v47  ;;  %9560 = vmatprep.subr.bf16.mxu0 %v14580_v5  ;;  %v2399_v4 = vmul.bf16 %v11876_v36, %v8697_v2  ;;  %v2401_v18 = vmul.bf16 %v11902_v29, %v8697_v2 }
 0x37e   : > { %9549 = vmatpush3.bf16.msra.mxu1 %v2387_v31  ;;  %9556 = vmatprep.mubr.msk.bf16.mxu1 %vm11034_vm4, %v14580_v5 }
 0x37f   : > { %9545 = vmatmul.mubr.msk.bf16.vlgmr.msra.gmra.mrb[52].mxu0 %vm1304_vm1, %v8725_v33  ;;  %9550 = vmatprep.subr.bf16.mxu1 %v14580_v5  ;;  %v2400_v33 = vmul.bf16 %v11890_v9, %v8697_v2 }
 0x380   : > { %9561 = vmatpush3.bf16.msra.mxu0 %v2391_v56  ;;  %9568 = vmatprep.mubr.msk.bf16.mxu0 %vm11034_vm4, %v14580_v5  ;;  %v10633_v56 = vpop.eup %10632 }
 0x381   : > { %9562 = vmatprep.subr.bf16.mxu0 %v14580_v5 }
 0x382   : > { %v12083_v20 = vpop.f32.mrb[60].mxu1  ;;  %9551 = vmatpush3.bf16.msra.mxu1 %v2388_v48  ;;  %v2397_v48 = vmul.bf16 %v11902_v29, %v8696_v32 }
 0x383   : > { %v12086_v1 = vpop.f32.mrb[61].mxu1  ;;  %9552 = vmatprep.subr.bf16.mxu1 %v14580_v5 }
 0x384   : > { %v12089_v15 = vpop.f32.mrb[62].mxu1  ;;  %9563 = vmatpush3.bf16.msra.mxu0 %v2392_v14  ;;  %v10635_v14 = vpop.eup %10634  ;;  %10644 = vrcp.f32 %v12086_v1 }
 0x385   : > { %v12092_v62 = vpop.f32.mrb[63].mxu1  ;;  %9564 = vmatprep.subr.bf16.mxu0 %v14580_v5  ;;  %v2137_v28 = vmul.f32 %v10635_v14, %v11905_v46 }
 0x386   : > { %9553 = vmatpush3.bf16.msra.mxu1 %v2389_v61  ;;  %v2136_v61 = vmul.f32 %v10633_v56, %v11896_v3  ;;  %10646 = vrcp.f32 %v12092_v62 }
 0x387   : > { %9554 = vmatprep.subr.bf16.mxu1 %v14580_v5  ;;  %10648 = vrcp.f32 %v12083_v20 }
 0x388   : > { %9565 = vmatpush3.bf16.msra.mxu0 %v2393_v21  ;;  %v14598_v21 = vld [vmem:[#allocation14_spill] sm:$0xff]  ;;  %10650 = vrcp.f32 %v12089_v15 }
 0x389   : > { %9566 = vmatprep.subr.bf16.mxu0 %v14580_v5  ;;  %v8698_v54 = vpack.c.bf16 %v14598_v21, %v14598_v21 }
 0x38a   : > { %9555 = vmatpush3.bf16.msra.mxu1 %v2390_v49  ;;  %v2398_v49 = vmul.bf16 %v11917_v11, %v8696_v32  ;;  %v8729_v32 = vpack.c.bf16 %v2137_v28, %v2137_v28 }
 0x38b   : > { %9572 = vmatprep.subr.bf16.mxu1 %v14580_v5  ;;  %v2403_v46 = vmul.bf16 %v11876_v36, %v8698_v54  ;;  %v2404_v16 = vmul.bf16 %v11890_v9, %v8698_v54  ;;  %v2405_v14 = vmul.bf16 %v11902_v29, %v8698_v54 }
 0x38c   : > { %9567 = vmatpush3.bf16.msra.mxu0 %v2394_v17  ;;  %v14599_v17 = vld [vmem:[#allocation18_spill] sm:$0xff] }
 0x38d   : > { %9557 = vmatmul.mubr.msk.bf16.vlgmr.msra.gmra.mrb[88].mxu1 %vm1304_vm1, %v8726_v35  ;;  %9584 = vmatprep.subr.bf16.mxu0 %v14580_v5  ;;  %v8699_v3 = vpack.c.bf16 %v14599_v17, %v14599_v17 }
 0x38e   : > { %9573 = vmatpush3.bf16.msra.mxu1 %v2395_v13  ;;  %9580 = vmatprep.mubr.msk.bf16.mxu1 %vm11034_vm4, %v14580_v5  ;;  %v2402_v13 = vmul.bf16 %v11917_v11, %v8697_v2 }
 0x38f   : > { %9569 = vmatmul.mubr.msk.bf16.vlgmr.msra.gmra.mrb[56].mxu0 %vm1304_vm1, %v8727_v26  ;;  %9574 = vmatprep.subr.bf16.mxu1 %v14580_v5  ;;  %v8728_v26 = vpack.c.bf16 %v2136_v61, %v2136_v61  ;;  %v2407_v44 = vmul.bf16 %v11876_v36, %v8699_v3  ;;  %v2409_v61 = vmul.bf16 %v11902_v29, %v8699_v3 }
 0x390   : > { %v12115_v38 = vpop.f32.mrb[64].mxu1  ;;  %9585 = vmatpush3.bf16.msra.mxu0 %v2399_v4  ;;  %9592 = vmatprep.mubr.msk.bf16.mxu0 %vm11034_vm4, %v14580_v5 }
 0x391   : > { %v12119_v57 = vpop.f32.mrb[65].mxu1  ;;  %9586 = vmatprep.subr.bf16.mxu0 %v14580_v5 }
 0x392   : > { %v12124_v47 = vpop.f32.mrb[66].mxu1  ;;  %9575 = vmatpush3.bf16.msra.mxu1 %v2396_v43  ;;  %10652 = vrcp.f32 %v12119_v57 }
 0x393   : > { %v12127_v31 = vpop.f32.mrb[67].mxu1  ;;  %9576 = vmatprep.subr.bf16.mxu1 %v14580_v5 }
 0x394   : > { %9587 = vmatpush3.bf16.msra.mxu0 %v2400_v33  ;;  %v2408_v33 = vmul.bf16 %v11890_v9, %v8699_v3  ;;  %10654 = vrcp.f32 %v12127_v31 }
 0x395   : > { %9588 = vmatprep.subr.bf16.mxu0 %v14580_v5  ;;  %10656 = vrcp.f32 %v12115_v38  ;;  %v12327_v38 = vld [vmem:[%s14454_s6] sm:$0xff]  }
 0x396   : > { %9577 = vmatpush3.bf16.msra.mxu1 %v2397_v48  ;;  %v10637_v48 = vpop.eup %10636  ;;  %10658 = vrcp.f32 %v12124_v47  ;;  %v12341_v47 = vld [vmem:[%s14454_s6 + $0x8] sm:$0xff]  }
 0x397   : > { %9578 = vmatprep.subr.bf16.mxu1 %v14580_v5  ;;  %v2138_v21 = vmul.f32 %v10637_v48, %v11911_v39 }
 0x398   : > { %v12135_v41 = vpop.f32.mrb[68].mxu1  ;;  %9589 = vmatpush3.bf16.msra.mxu0 %v2401_v18  ;;  %v10639_v18 = vpop.eup %10638 }
 0x399   : > { %v12140_v55 = vpop.f32.mrb[69].mxu1  ;;  %9590 = vmatprep.subr.bf16.mxu0 %v14580_v5  ;;  %v8730_v48 = vpack.c.bf16 %v2138_v21, %v2138_v21 }
 0x39a   : > { %v12144_v24 = vpop.f32.mrb[70].mxu1  ;;  %9579 = vmatpush3.bf16.msra.mxu1 %v2398_v49  ;;  %v14600_v49 = vld [vmem:[#allocation12_spill] sm:$0xff]  ;;  %10660 = vrcp.f32 %v12140_v55 }
 0x39b   : > { %v12150_v35 = vpop.f32.mrb[71].mxu1  ;;  %9596 = vmatprep.subr.bf16.mxu1 %v14580_v5  ;;  %v8700_v28 = vpack.c.bf16 %v14600_v49, %v14600_v49 }
 0x39c   : > { %9591 = vmatpush3.bf16.msra.mxu0 %v2402_v13  ;;  %v2406_v13 = vmul.bf16 %v11917_v11, %v8698_v54  ;;  %10662 = vrcp.f32 %v12150_v35 }
 0x39d   : > { %9581 = vmatmul.mubr.msk.bf16.vlgmr.msra.gmra.mrb[92].mxu1 %vm1304_vm1, %v8728_v26  ;;  %9608 = vmatprep.subr.bf16.mxu0 %v14580_v5  ;;  %v2139_v26 = vmul.f32 %v10639_v18, %v11920_v50  ;;  %v2411_v50 = vmul.bf16 %v11876_v36, %v8700_v28  ;;  %v2412_v6 = vmul.bf16 %v11890_v9, %v8700_v28  ;;  %10664 = vrcp.f32 %v12135_v41 }
 0x39e   : > { %9597 = vmatpush3.bf16.msra.mxu1 %v2403_v46  ;;  %9604 = vmatprep.mubr.msk.bf16.mxu1 %vm11034_vm4, %v14580_v5  ;;  %v2413_v18 = vmul.bf16 %v11902_v29, %v8700_v28  ;;  %10666 = vrcp.f32 %v12144_v24 }
 0x39f   : > { %9593 = vmatmul.mubr.msk.bf16.vlgmr.msra.gmra.mrb[60].mxu0 %vm1304_vm1, %v8729_v32  ;;  %9598 = vmatprep.subr.bf16.mxu1 %v14580_v5  ;;  %v14601_v32 = vld [vmem:[#allocation16_spill] sm:$0xff]  ;;  %v8731_v54 = vpack.c.bf16 %v2139_v26, %v2139_v26 }
 0x3a0   : > { %9609 = vmatpush3.bf16.msra.mxu0 %v2407_v44  ;;  %9616 = vmatprep.mubr.msk.bf16.mxu0 %vm11034_vm4, %v14580_v5  ;;  %v8701_v44 = vpack.c.bf16 %v14601_v32, %v14601_v32  ;;  %v2414_v32 = vmul.bf16 %v11917_v11, %v8700_v28 }
 0x3a1   : > { %9610 = vmatprep.subr.bf16.mxu0 %v14580_v5 }
 0x3a2   : > { %9599 = vmatpush3.bf16.msra.mxu1 %v2404_v16  ;;  %v2410_v16 = vmul.bf16 %v11917_v11, %v8699_v3  ;;  %v2415_v34 = vmul.bf16 %v11876_v36, %v8701_v44  ;;  %v2416_v3 = vmul.bf16 %v11890_v9, %v8701_v44  ;;  %v2417_v21 = vmul.bf16 %v11902_v29, %v8701_v44 }
 0x3a3   : > { %v12163_v2 = vpop.f32.mrb[72].mxu1  ;;  %9600 = vmatprep.subr.bf16.mxu1 %v14580_v5 }
 0x3a4   : > { %v12168_v4 = vpop.f32.mrb[73].mxu1  ;;  %9611 = vmatpush3.bf16.msra.mxu0 %v2408_v33 }
 0x3a5   : > { %v12171_v43 = vpop.f32.mrb[74].mxu1  ;;  %9612 = vmatprep.subr.bf16.mxu0 %v14580_v5  ;;  %10668 = vrcp.f32 %v12168_v4 }
 0x3a6   : > { %v12174_v56 = vpop.f32.mrb[75].mxu1  ;;  %9601 = vmatpush3.bf16.msra.mxu1 %v2405_v14  ;;  %v10641_v14 = vpop.eup %10640 }
 0x3a7   : > { %9602 = vmatprep.subr.bf16.mxu1 %v14580_v5  ;;  %v2140_v49 = vmul.f32 %v10641_v14, %v11927_v10  ;;  %v2418_v10 = vmul.bf16 %v11917_v11, %v8701_v44  ;;  %10670 = vrcp.f32 %v12174_v56 }
 0x3a8   : > { %9613 = vmatpush3.bf16.msra.mxu0 %v2409_v61  ;;  %v10643_v61 = vpop.eup %10642  ;;  %10672 = vrcp.f32 %v12163_v2 }
 0x3a9   : > { %9614 = vmatprep.subr.bf16.mxu0 %v14580_v5  ;;  %v10645_v44 = vpop.eup %10644  ;;  %10674 = vrcp.f32 %v12171_v43 }
 0x3aa   : > { %9603 = vmatpush3.bf16.msra.mxu1 %v2406_v13  ;;  %v14602_v13 = vld [vmem:[#allocation22_spill] sm:$0xff] }
 0x3ab   : > { %v12184_v17 = vpop.f32.mrb[76].mxu1  ;;  %9620 = vmatprep.subr.bf16.mxu1 %v14580_v5  ;;  %v8702_v26 = vpack.c.bf16 %v14602_v13, %v14602_v13 }
 0x3ac   : > { %v12188_v46 = vpop.f32.mrb[77].mxu1  ;;  %9615 = vmatpush3.bf16.msra.mxu0 %v2410_v16  ;;  %v2141_v16 = vmul.f32 %v10643_v61, %v11931_v51  ;;  %v14604_v61 = vld [vmem:[#allocation20_spill] sm:$0xff] }
 0x3ad   : > { %v12194_v39 = vpop.f32.mrb[78].mxu1  ;;  %9605 = vmatmul.mubr.msk.bf16.vlgmr.msra.gmra.mrb[96].mxu1 %vm1304_vm1, %v8730_v48  ;;  %9632 = vmatprep.subr.bf16.mxu0 %v14580_v5  ;;  %v14603_v48 = vld [vmem:[#allocation26_spill] sm:$0xff]  ;;  %v2419_v28 = vmul.bf16 %v11876_v36, %v8702_v26  ;;  %v2420_v1 = vmul.bf16 %v11890_v9, %v8702_v26  ;;  %10676 = vrcp.f32 %v12188_v46 }
 0x3ae   : > { %v12197_v33 = vpop.f32.mrb[79].mxu1  ;;  %9621 = vmatpush3.bf16.msra.mxu1 %v2411_v50  ;;  %9628 = vmatprep.mubr.msk.bf16.mxu1 %vm11034_vm4, %v14580_v5  ;;  %v8703_v50 = vpack.c.bf16 %v14603_v48, %v14603_v48  ;;  %v8733_v51 = vpack.c.bf16 %v2141_v16, %v2141_v16 }
 0x3af   : > { %9617 = vmatmul.mubr.msk.bf16.vlgmr.msra.gmra.mrb[64].mxu0 %vm1304_vm1, %v8731_v54  ;;  %9622 = vmatprep.subr.bf16.mxu1 %v14580_v5  ;;  %v8732_v54 = vpack.c.bf16 %v2140_v49, %v2140_v49  ;;  %v2422_v49 = vmul.bf16 %v11917_v11, %v8702_v26 }
 0x3b0   : > { %9633 = vmatpush3.bf16.msra.mxu0 %v2415_v34  ;;  %9640 = vmatprep.mubr.msk.bf16.mxu0 %vm11034_vm4, %v14580_v5  ;;  %v2423_v34 = vmul.bf16 %v11876_v36, %v8703_v50  ;;  %v2424_v62 = vmul.bf16 %v11890_v9, %v8703_v50  ;;  %v2425_v14 = vmul.bf16 %v11902_v29, %v8703_v50 }
 0x3b1   : > { %9634 = vmatprep.subr.bf16.mxu0 %v14580_v5 }
 0x3b2   : > { %9623 = vmatpush3.bf16.msra.mxu1 %v2412_v6  ;;  %v2421_v6 = vmul.bf16 %v11902_v29, %v8702_v26 }
 0x3b3   : > { %9624 = vmatprep.subr.bf16.mxu1 %v14580_v5 }
 0x3b4   : > { %9635 = vmatpush3.bf16.msra.mxu0 %v2416_v3  ;;  %v10647_v3 = vpop.eup %10646  ;;  %10678 = vrcp.f32 %v12197_v33 }
 0x3b5   : > { %9636 = vmatprep.subr.bf16.mxu0 %v14580_v5  ;;  %v2143_v13 = vmul.f32 %v10647_v3, %v11940_v59  ;;  %v14607_v3 = vld [vmem:[#allocation11_spill] sm:$0xff] }
 0x3b6   : > { %9625 = vmatpush3.bf16.msra.mxu1 %v2413_v18  ;;  %v2142_v18 = vmul.f32 %v10645_v44, %v11937_v19  ;;  %v2426_v19 = vmul.bf16 %v11917_v11, %v8703_v50  ;;  %v10649_v50 = vpop.eup %10648 }
 0x3b7   : > { %9626 = vmatprep.subr.bf16.mxu1 %v14580_v5  ;;  %v8735_v59 = vpack.c.bf16 %v2143_v13, %v2143_v13 }
 0x3b8   : > { %9637 = vmatpush3.bf16.msra.mxu0 %v2417_v21  ;;  %v8704_v21 = vpack.c.bf16 %v14604_v61, %v14604_v61  ;;  %v8734_v48 = vpack.c.bf16 %v2142_v18, %v2142_v18 }
 0x3b9   : > { %9638 = vmatprep.subr.bf16.mxu0 %v14580_v5 }
 0x3ba   : > { %9627 = vmatpush3.bf16.msra.mxu1 %v2414_v32  ;;  %v14605_v32 = vld [vmem:[#allocation24_spill] sm:$0xff]  ;;  %v2427_v26 = vmul.bf16 %v11876_v36, %v8704_v21  ;;  %v2428_v20 = vmul.bf16 %v11890_v9, %v8704_v21  ;;  %v2430_v44 = vmul.bf16 %v11917_v11, %v8704_v21 }
 0x3bb   : > { %9644 = vmatprep.subr.bf16.mxu1 %v14580_v5  ;;  %v8705_v16 = vpack.c.bf16 %v14605_v32, %v14605_v32 }
 0x3bc   : > { %9639 = vmatpush3.bf16.msra.mxu0 %v2418_v10 }
 0x3bd   : > { %9629 = vmatmul.mubr.msk.bf16.vlgmr.msra.gmra.mrb[100].mxu1 %vm1304_vm1, %v8732_v54  ;;  %9656 = vmatprep.subr.bf16.mxu0 %v14580_v5  ;;  %v2431_v10 = vmul.bf16 %v11876_v36, %v8705_v16  ;;  %v2432_v15 = vmul.bf16 %v11890_v9, %v8705_v16  ;;  %v2429_v54 = vmul.bf16 %v11902_v29, %v8704_v21 }
 0x3be   : > { %9645 = vmatpush3.bf16.msra.mxu1 %v2419_v28  ;;  %9652 = vmatprep.mubr.msk.bf16.mxu1 %vm11034_vm4, %v14580_v5  ;;  %v10651_v28 = vpop.eup %10650 }
 0x3bf   : > { %9641 = vmatmul.mubr.msk.bf16.vlgmr.msra.gmra.mrb[68].mxu0 %vm1304_vm1, %v8733_v51  ;;  %9646 = vmatprep.subr.bf16.mxu1 %v14580_v5  ;;  %v2433_v51 = vmul.bf16 %v11902_v29, %v8705_v16 }
 0x3c0   : > { %9657 = vmatpush3.bf16.msra.mxu0 %v2423_v34  ;;  %9664 = vmatprep.mubr.msk.bf16.mxu0 %vm11034_vm4, %v14580_v5  ;;  %v2144_v34 = vmul.f32 %v10649_v50, %v11946_v37  ;;  %v2434_v37 = vmul.bf16 %v11917_v11, %v8705_v16 }
 0x3c1   : > { %9658 = vmatprep.subr.bf16.mxu0 %v14580_v5 }
 0x3c2   : > { %9647 = vmatpush3.bf16.msra.mxu1 %v2420_v1  ;;  %v14606_v1 = vld [vmem:[#allocation7_spill] sm:$0xff]  ;;  %v8736_v18 = vpack.c.bf16 %v2144_v34, %v2144_v34 }
 0x3c3   : > { %9648 = vmatprep.subr.bf16.mxu1 %v14580_v5 }
 0x3c4   : > { %9659 = vmatpush3.bf16.msra.mxu0 %v2424_v62  ;;  %v8706_v62 = vpack.c.bf16 %v14606_v1, %v14606_v1 }
 0x3c5   : > { %9660 = vmatprep.subr.bf16.mxu0 %v14580_v5 }
 0x3c6   : > { %9649 = vmatpush3.bf16.msra.mxu1 %v2421_v6  ;;  %v2145_v6 = vmul.f32 %v10651_v28, %v11949_v25  ;;  %v2435_v61 = vmul.bf16 %v11876_v36, %v8706_v62  ;;  %v2436_v57 = vmul.bf16 %v11890_v9, %v8706_v62  ;;  %v2437_v13 = vmul.bf16 %v11902_v29, %v8706_v62 }
 0x3c7   : > { %9650 = vmatprep.subr.bf16.mxu1 %v14580_v5 }
 0x3c8   : > { %9661 = vmatpush3.bf16.msra.mxu0 %v2425_v14  ;;  %v8707_v14 = vpack.c.bf16 %v14607_v3, %v14607_v3  ;;  %v8737_v25 = vpack.c.bf16 %v2145_v6, %v2145_v6  ;;  %v14610_v6 = vld [vmem:[#allocation15_spill] sm:$0xff] }
 0x3c9   : > { %9662 = vmatprep.subr.bf16.mxu0 %v14580_v5  ;;  %v8710_v3 = vpack.c.bf16 %v14610_v6, %v14610_v6 }
 0x3ca   : > { %9651 = vmatpush3.bf16.msra.mxu1 %v2422_v49  ;;  %v2439_v21 = vmul.bf16 %v11876_v36, %v8707_v14  ;;  %v2440_v31 = vmul.bf16 %v11890_v9, %v8707_v14  ;;  %v10653_v49 = vpop.eup %10652  ;;  %v2441_v16 = vmul.bf16 %v11902_v29, %v8707_v14 }
 0x3cb   : > { %9668 = vmatprep.subr.bf16.mxu1 %v14580_v5  ;;  %v10655_v32 = vpop.eup %10654 }
 0x3cc   : > { %9663 = vmatpush3.bf16.msra.mxu0 %v2426_v19  ;;  %v2146_v19 = vmul.f32 %v10653_v49, %v11956_v58  ;;  %v2442_v58 = vmul.bf16 %v11917_v11, %v8707_v14  ;;  %v10657_v34 = vpop.eup %10656 }
 0x3cd   : > { %9653 = vmatmul.mubr.msk.bf16.vlgmr.msra.gmra.mrb[104].mxu1 %vm1304_vm1, %v8734_v48  ;;  %9680 = vmatprep.subr.bf16.mxu0 %v14580_v5  ;;  %v14608_v48 = vld [vmem:[#allocation5_spill] sm:$0xff] }
 0x3ce   : > { %9669 = vmatpush3.bf16.msra.mxu1 %v2427_v26  ;;  %9676 = vmatprep.mubr.msk.bf16.mxu1 %vm11034_vm4, %v14580_v5  ;;  %v8708_v26 = vpack.c.bf16 %v14608_v48, %v14608_v48  ;;  %v8738_v50 = vpack.c.bf16 %v2146_v19, %v2146_v19  ;;  %v12390_v48 = vld [vmem:[%s14454_s6 + $0x18] sm:$0xff]  }
 0x3cf   : > { %9665 = vmatmul.mubr.msk.bf16.vlgmr.msra.gmra.mrb[72].mxu0 %vm1304_vm1, %v8735_v59  ;;  %9670 = vmatprep.subr.bf16.mxu1 %v14580_v5  ;;  %v2438_v59 = vmul.bf16 %v11917_v11, %v8706_v62 }
 0x3d0   : > { %9681 = vmatpush3.bf16.msra.mxu0 %v2431_v10  ;;  %9688 = vmatprep.mubr.msk.bf16.mxu0 %vm11034_vm4, %v14580_v5  ;;  %v2147_v10 = vmul.f32 %v10655_v32, %v11958_v63  ;;  %v2445_v1 = vmul.bf16 %v11902_v29, %v8708_v26  ;;  %v2446_v14 = vmul.bf16 %v11917_v11, %v8708_v26 }
 0x3d1   : > { %9682 = vmatprep.subr.bf16.mxu0 %v14580_v5 }
 0x3d2   : > { %9671 = vmatpush3.bf16.msra.mxu1 %v2428_v20  ;;  %v14609_v20 = vld [vmem:[#allocation9_spill] sm:$0xff]  ;;  %v8739_v63 = vpack.c.bf16 %v2147_v10, %v2147_v10 }
 0x3d3   : > { %9672 = vmatprep.subr.bf16.mxu1 %v14580_v5  ;;  %v14613_v10 = vld [vmem:[#allocation17_spill] sm:$0xff] }
 0x3d4   : > { %9683 = vmatpush3.bf16.msra.mxu0 %v2432_v15  ;;  %v8709_v15 = vpack.c.bf16 %v14609_v20, %v14609_v20 }
 0x3d5   : > { %9684 = vmatprep.subr.bf16.mxu0 %v14580_v5 }
 0x3d6   : > { %9673 = vmatpush3.bf16.msra.mxu1 %v2429_v54  ;;  %v2443_v54 = vmul.bf16 %v11876_v36, %v8708_v26  ;;  %v2447_v28 = vmul.bf16 %v12327_v38, %v8709_v15  ;;  %v2444_v36 = vmul.bf16 %v11890_v9, %v8708_v26  ;;  %v10659_v9 = vpop.eup %10658  ;;  %v2449_v62 = vmul.bf16 %v11902_v29, %v8709_v15 }
 0x3d7   : > { %9674 = vmatprep.subr.bf16.mxu1 %v14580_v5  ;;  %v2450_v29 = vmul.bf16 %v11917_v11, %v8709_v15  ;;  %v2452_v11 = vmul.bf16 %v12341_v47, %v8710_v3  ;;  %v10661_v35 = vpop.eup %10660  ;;  %v2454_v26 = vmul.bf16 %v12390_v48, %v8710_v3 }
 0x3d8   : > { %9685 = vmatpush3.bf16.msra.mxu0 %v2433_v51  ;;  %v2448_v51 = vmul.bf16 %v12341_v47, %v8709_v15  ;;  %v10663_v49 = vpop.eup %10662  ;;  %v2150_v32 = vmul.f32 %v10661_v35, %v11974_v0  ;;  %v8713_v0 = vpack.c.bf16 %v14613_v10, %v14613_v10  ;;  %v14617_v35 = vld [vmem:[#allocation25_spill] sm:$0xff] }
 0x3d9   : > { %9686 = vmatprep.subr.bf16.mxu0 %v14580_v5 }
 0x3da   : > { %9675 = vmatpush3.bf16.msra.mxu1 %v2430_v44  ;;  %v2148_v44 = vmul.f32 %v10657_v34, %v11966_v7  ;;  %v8742_v15 = vpack.c.bf16 %v2150_v32, %v2150_v32  ;;  %v2464_v24 = vmul.bf16 %v12341_v47, %v8713_v0  ;;  %v14614_v34 = vld [vmem:[#allocation23_spill] sm:$0xff] }
 0x3db   : > { %9692 = vmatprep.subr.bf16.mxu1 %v14580_v5 }
 0x3dc   : > { %9687 = vmatpush3.bf16.msra.mxu0 %v2434_v37  ;;  %v2149_v37 = vmul.f32 %v10659_v9, %v11969_v42  ;;  %v8740_v7 = vpack.c.bf16 %v2148_v44, %v2148_v44  ;;  %v14615_v44 = vld [vmem:[#allocation27_spill] sm:$0xff] }
 0x3dd   : > { %9677 = vmatmul.mubr.msk.bf16.vlgmr.msra.gmra.mrb[108].mxu1 %vm1304_vm1, %v8736_v18  ;;  %9704 = vmatprep.subr.bf16.mxu0 %v14580_v5  ;;  %v14611_v18 = vld [vmem:[#allocation19_spill] sm:$0xff]  ;;  %v8715_v6 = vpack.c.bf16 %v14615_v44, %v14615_v44 }
 0x3de   : > { %9693 = vmatpush3.bf16.msra.mxu1 %v2435_v61  ;;  %9700 = vmatprep.mubr.msk.bf16.mxu1 %vm11034_vm4, %v14580_v5  ;;  %v8711_v61 = vpack.c.bf16 %v14611_v18, %v14611_v18  ;;  %v8741_v42 = vpack.c.bf16 %v2149_v37, %v2149_v37 }
 0x3df   : > { %9689 = vmatmul.mubr.msk.bf16.vlgmr.msra.gmra.mrb[76].mxu0 %vm1304_vm1, %v8737_v25  ;;  %9694 = vmatprep.subr.bf16.mxu1 %v14580_v5  ;;  %v2451_v25 = vmul.bf16 %v12327_v38, %v8710_v3  ;;  %v2471_v37 = vmul.bf16 %v12327_v38, %v8715_v6  ;;  %v2472_v56 = vmul.bf16 %v12341_v47, %v8715_v6 }
 0x3e0   : > { %9705 = vmatpush3.bf16.msra.mxu0 %v2439_v21  ;;  %9712 = vmatprep.mubr.msk.bf16.mxu0 %vm11034_vm4, %v14580_v5  ;;  %v2455_v21 = vmul.bf16 %v12327_v38, %v8711_v61  ;;  %v2456_v55 = vmul.bf16 %v12341_v47, %v8711_v61  ;;  %v2458_v20 = vmul.bf16 %v12390_v48, %v8711_v61 }
 0x3e1   : > { %9706 = vmatprep.subr.bf16.mxu0 %v14580_v5 }
 0x3e2   : > { %9695 = vmatpush3.bf16.msra.mxu1 %v2436_v57  ;;  %v12378_v57 = vld [vmem:[%s14454_s6 + $0x10] sm:$0xff]  }
 0x3e3   : > { %9696 = vmatprep.subr.bf16.mxu1 %v14580_v5 }
 0x3e4   : > { %9707 = vmatpush3.bf16.msra.mxu0 %v2440_v31  ;;  %v2453_v31 = vmul.bf16 %v12378_v57, %v8710_v3 }
 0x3e5   : > { %9708 = vmatprep.subr.bf16.mxu0 %v14580_v5 }
 0x3e6   : > { %9697 = vmatpush3.bf16.msra.mxu1 %v2437_v13  ;;  %v2457_v13 = vmul.bf16 %v12378_v57, %v8711_v61 }
 0x3e7   : > { %9698 = vmatprep.subr.bf16.mxu1 %v14580_v5 }
 0x3e8   : > { %9709 = vmatpush3.bf16.msra.mxu0 %v2441_v16  ;;  %v14612_v16 = vld [vmem:[#allocation13_spill] sm:$0xff] }
 0x3e9   : > { %9710 = vmatprep.subr.bf16.mxu0 %v14580_v5  ;;  %v8712_v19 = vpack.c.bf16 %v14612_v16, %v14612_v16 }
 0x3ea   : > { %9699 = vmatpush3.bf16.msra.mxu1 %v2438_v59  ;;  %v2151_v59 = vmul.f32 %v10663_v49, %v11978_v53 }
 0x3eb   : > { %9716 = vmatprep.subr.bf16.mxu1 %v14580_v5  ;;  %v2460_v41 = vmul.bf16 %v12341_v47, %v8712_v19  ;;  %v2462_v9 = vmul.bf16 %v12390_v48, %v8712_v19 }
 0x3ec   : > { %9711 = vmatpush3.bf16.msra.mxu0 %v2442_v58  ;;  %v2459_v58 = vmul.bf16 %v12327_v38, %v8712_v19  ;;  %v8743_v53 = vpack.c.bf16 %v2151_v59, %v2151_v59 }
 0x3ed   : > { %9701 = vmatmul.mubr.msk.bf16.vlgmr.msra.gmra.mrb[112].mxu1 %vm1304_vm1, %v8738_v50  ;;  %9728 = vmatprep.subr.bf16.mxu0 %v14580_v5  ;;  %v2463_v50 = vmul.bf16 %v12327_v38, %v8713_v0 }
 0x3ee   : > { %9717 = vmatpush3.bf16.msra.mxu1 %v2443_v54  ;;  %9724 = vmatprep.mubr.msk.bf16.mxu1 %vm11034_vm4, %v14580_v5  ;;  %v10665_v54 = vpop.eup %10664 }
 0x3ef   : > { %9713 = vmatmul.mubr.msk.bf16.vlgmr.msra.gmra.mrb[80].mxu0 %vm1304_vm1, %v8739_v63  ;;  %9718 = vmatprep.subr.bf16.mxu1 %v14580_v5  ;;  %v2461_v63 = vmul.bf16 %v12378_v57, %v8712_v19 }
 0x3f0   : > { %9729 = vmatpush3.bf16.msra.mxu0 %v2447_v28  ;;  %9736 = vmatprep.mubr.msk.bf16.mxu0 %vm11034_vm4, %v14580_v5  ;;  %v10667_v28 = vpop.eup %10666 }
 0x3f1   : > { %9730 = vmatprep.subr.bf16.mxu0 %v14580_v5  ;;  %v10669_v18 = vpop.eup %10668 }
 0x3f2   : > { %9719 = vmatpush3.bf16.msra.mxu1 %v2444_v36  ;;  %v2465_v36 = vmul.bf16 %v12378_v57, %v8713_v0 }
 0x3f3   : > { %9720 = vmatprep.subr.bf16.mxu1 %v14580_v5 }
 0x3f4   : > { %9731 = vmatpush3.bf16.msra.mxu0 %v2448_v51  ;;  %v2152_v51 = vmul.f32 %v10665_v54, %v11983_v52  ;;  %v2466_v52 = vmul.bf16 %v12390_v48, %v8713_v0  ;;  %v14618_v0 = vld [vmem:[#allocation29_spill] sm:$0xff] }
 0x3f5   : > { %9732 = vmatprep.subr.bf16.mxu0 %v14580_v5 }
 0x3f6   : > { %9721 = vmatpush3.bf16.msra.mxu1 %v2445_v1  ;;  %v8714_v1 = vpack.c.bf16 %v14614_v34, %v14614_v34  ;;  %v8744_v3 = vpack.c.bf16 %v2152_v51, %v2152_v51 }
 0x3f7   : > { %9722 = vmatprep.subr.bf16.mxu1 %v14580_v5 }
 0x3f8   : > { %9733 = vmatpush3.bf16.msra.mxu0 %v2449_v62  ;;  %v2153_v62 = vmul.f32 %v10667_v28, %v11987_v22  ;;  %v2468_v4 = vmul.bf16 %v12341_v47, %v8714_v1  ;;  %v2469_v61 = vmul.bf16 %v12378_v57, %v8714_v1 }
 0x3f9   : > { %9734 = vmatprep.subr.bf16.mxu0 %v14580_v5 }
 0x3fa   : > { %9723 = vmatpush3.bf16.msra.mxu1 %v2446_v14  ;;  %v2467_v14 = vmul.bf16 %v12327_v38, %v8714_v1  ;;  %v8745_v22 = vpack.c.bf16 %v2153_v62, %v2153_v62 }
 0x3fb   : > { %9740 = vmatprep.subr.bf16.mxu1 %v14580_v5 }
 0x3fc   : > { %9735 = vmatpush3.bf16.msra.mxu0 %v2450_v29  ;;  %v10671_v29 = vpop.eup %10670 }
 0x3fd   : > { %9725 = vmatmul.mubr.msk.bf16.vlgmr.msra.gmra.mrb[116].mxu1 %vm1304_vm1, %v8740_v7  ;;  %9752 = vmatprep.subr.bf16.mxu0 %v14580_v5  ;;  %v2473_v7 = vmul.bf16 %v12378_v57, %v8715_v6  ;;  %v10673_v16 = vpop.eup %10672 }
 0x3fe   : > { %9741 = vmatpush3.bf16.msra.mxu1 %v2451_v25  ;;  %9748 = vmatprep.mubr.msk.bf16.mxu1 %vm11034_vm4, %v14580_v5  ;;  %v2154_v25 = vmul.f32 %v10669_v18, %v11994_v8  ;;  %v2474_v8 = vmul.bf16 %v12390_v48, %v8715_v6  ;;  %v2156_v10 = vmul.f32 %v10673_v16, %v12000_v27 }
 0x3ff   : > { %9737 = vmatmul.mubr.msk.bf16.vlgmr.msra.gmra.mrb[84].mxu0 %vm1304_vm1, %v8741_v42  ;;  %9742 = vmatprep.subr.bf16.mxu1 %v14580_v5  ;;  %v14616_v42 = vld [vmem:[#allocation21_spill] sm:$0xff] }
 0x400   : > { %9753 = vmatpush3.bf16.msra.mxu0 %v2455_v21  ;;  %9760 = vmatprep.mubr.msk.bf16.mxu0 %vm11034_vm4, %v14580_v5  ;;  %v8716_v21 = vpack.c.bf16 %v14616_v42, %v14616_v42  ;;  %v8746_v49 = vpack.c.bf16 %v2154_v25, %v2154_v25 }
 0x401   : > { %9754 = vmatprep.subr.bf16.mxu0 %v14580_v5 }
 0x402   : > { %9743 = vmatpush3.bf16.msra.mxu1 %v2452_v11  ;;  %v2470_v11 = vmul.bf16 %v12390_v48, %v8714_v1  ;;  %v2476_v2 = vmul.bf16 %v12341_v47, %v8716_v21  ;;  %v2477_v19 = vmul.bf16 %v12378_v57, %v8716_v21 }
 0x403   : > { %9744 = vmatprep.subr.bf16.mxu1 %v14580_v5 }
 0x404   : > { %9755 = vmatpush3.bf16.msra.mxu0 %v2456_v55  ;;  %v2155_v55 = vmul.f32 %v10671_v29, %v11996_v30  ;;  %v14621_v29 = vld [vmem:[#allocation30_spill] sm:$0xff] }
 0x405   : > { %9756 = vmatprep.subr.bf16.mxu0 %v14580_v5 }
 0x406   : > { %9745 = vmatpush3.bf16.msra.mxu1 %v2453_v31  ;;  %v8717_v31 = vpack.c.bf16 %v14617_v35, %v14617_v35  ;;  %v8747_v30 = vpack.c.bf16 %v2155_v55, %v2155_v55 }
 0x407   : > { %9746 = vmatprep.subr.bf16.mxu1 %v14580_v5 }
 0x408   : > { %9757 = vmatpush3.bf16.msra.mxu0 %v2457_v13  ;;  %v2475_v13 = vmul.bf16 %v12327_v38, %v8716_v21  ;;  %v2479_v32 = vmul.bf16 %v12327_v38, %v8717_v31  ;;  %v2480_v43 = vmul.bf16 %v12341_v47, %v8717_v31  ;;  %v2481_v59 = vmul.bf16 %v12378_v57, %v8717_v31 }
 0x409   : > { %9758 = vmatprep.subr.bf16.mxu0 %v14580_v5  ;;  %v2482_v27 = vmul.bf16 %v12390_v48, %v8717_v31 }
 0x40a   : > { %9747 = vmatpush3.bf16.msra.mxu1 %v2454_v26  ;;  %v10675_v26 = vpop.eup %10674 }
 0x40b   : > { %9764 = vmatprep.subr.bf16.mxu1 %v14580_v5  ;;  %v10677_v44 = vpop.eup %10676 }
 0x40c   : > { %9759 = vmatpush3.bf16.msra.mxu0 %v2458_v20  ;;  %v8718_v20 = vpack.c.bf16 %v14618_v0, %v14618_v0 }
 0x40d   : > { %9749 = vmatmul.mubr.msk.bf16.vlgmr.msra.gmra.mrb[120].mxu1 %vm1304_vm1, %v8742_v15  ;;  %9776 = vmatprep.subr.bf16.mxu0 %v14580_v5  ;;  %v2478_v15 = vmul.bf16 %v12390_v48, %v8716_v21 }
 0x40e   : > { %9765 = vmatpush3.bf16.msra.mxu1 %v2459_v58  ;;  %9772 = vmatprep.mubr.msk.bf16.mxu1 %vm11034_vm4, %v14580_v5  ;;  %v2157_v58 = vmul.f32 %v10675_v26, %v12003_v23  ;;  %v2484_v33 = vmul.bf16 %v12341_v47, %v8718_v20  ;;  %v2486_v18 = vmul.bf16 %v12390_v48, %v8718_v20 }
 0x40f   : > { %9761 = vmatmul.mubr.msk.bf16.vlgmr.msra.gmra.mrb[88].mxu0 %vm1304_vm1, %v8743_v53  ;;  %9766 = vmatprep.subr.bf16.mxu1 %v14580_v5  ;;  %v14619_v53 = vld [vmem:[#allocation31_spill] sm:$0xff] }
 0x410   : > { %9777 = vmatpush3.bf16.msra.mxu0 %v2463_v50  ;;  %9784 = vmatprep.mubr.msk.bf16.mxu0 %vm11034_vm4, %v14580_v5  ;;  %v8719_v50 = vpack.c.bf16 %v14619_v53, %v14619_v53  ;;  %v8749_v23 = vpack.c.bf16 %v2157_v58, %v2157_v58  ;;  %v10532_v53 = vld [vmem:[%s14455_s7] sm:$0xff]  }
 0x411   : > { %9778 = vmatprep.subr.bf16.mxu0 %v14580_v5 }
 0x412   : > { %9767 = vmatpush3.bf16.msra.mxu1 %v2460_v41  ;;  %v8748_v41 = vpack.c.bf16 %v2156_v10, %v2156_v10  ;;  %v2487_v54 = vmul.bf16 %v12327_v38, %v8719_v50  ;;  %v2488_v34 = vmul.bf16 %v12341_v47, %v8719_v50 }
 0x413   : > { %9768 = vmatprep.subr.bf16.mxu1 %v14580_v5 }
 0x414   : > { %9779 = vmatpush3.bf16.msra.mxu0 %v2464_v24  ;;  %v2483_v24 = vmul.bf16 %v12327_v38, %v8718_v20 }
 0x415   : > { %9780 = vmatprep.subr.bf16.mxu0 %v14580_v5 }
 0x416   : > { %9769 = vmatpush3.bf16.msra.mxu1 %v2461_v63 }
 0x417   : > { %9770 = vmatprep.subr.bf16.mxu1 %v14580_v5 }
 0x418   : > { %9781 = vmatpush3.bf16.msra.mxu0 %v2465_v36 }
 0x419   : > { %9782 = vmatprep.subr.bf16.mxu0 %v14580_v5 }
 0x41a   : > { %9771 = vmatpush3.bf16.msra.mxu1 %v2462_v9 }
 0x41b   : > { %9788 = vmatprep.subr.bf16.mxu1 %v14580_v5 }
 0x41c   : > { %9783 = vmatpush3.bf16.msra.mxu0 %v2466_v52  ;;  %v2485_v52 = vmul.bf16 %v12378_v57, %v8718_v20 }
 0x41d   : > { %9773 = vmatmul.mubr.msk.bf16.vlgmr.msra.gmra.mrb[124].mxu1 %vm1304_vm1, %v8744_v3  ;;  %9800 = vmatprep.subr.bf16.mxu0 %v14580_v5 }
 0x41e   : > { %9789 = vmatpush3.bf16.msra.mxu1 %v2467_v14  ;;  %9796 = vmatprep.mubr.msk.bf16.mxu1 %vm11034_vm4, %v14580_v5  ;;  %v10679_v14 = vpop.eup %10678 }
 0x41f   : > { %9785 = vmatmul.mubr.msk.bf16.vlgmr.msra.gmra.mrb[92].mxu0 %vm1304_vm1, %v8745_v22  ;;  %9790 = vmatprep.subr.bf16.mxu1 %v14580_v5  ;;  %v2489_v22 = vmul.bf16 %v12378_v57, %v8719_v50 }
 0x420   : > { %9801 = vmatpush3.bf16.msra.mxu0 %v2471_v37  ;;  %9808 = vmatprep.mubr.msk.bf16.mxu0 %vm11034_vm4, %v14580_v5  ;;  %v2158_v37 = vmul.f32 %v10677_v44, %v12007_v60  ;;  %v2490_v60 = vmul.bf16 %v12390_v48, %v8719_v50 }
 0x421   : > { %9802 = vmatprep.subr.bf16.mxu0 %v14580_v5 }
 0x422   : > { %9791 = vmatpush3.bf16.msra.mxu1 %v2468_v4  ;;  %v14620_v4 = vld [vmem:[#allocation28_spill] sm:$0xff]  ;;  %v8750_v25 = vpack.c.bf16 %v2158_v37, %v2158_v37  ;;  %v10537_v37 = vld [vmem:[%s14455_s7 + $0x28] sm:$0xff]  }
 0x423   : > { %9792 = vmatprep.subr.bf16.mxu1 %v14580_v5 }
 0x424   : > { %9803 = vmatpush3.bf16.msra.mxu0 %v2472_v56  ;;  %v12515_v56 = vpack.c.bf16 %v14620_v4, %v14620_v4 }
 0x425   : > { %9804 = vmatprep.subr.bf16.mxu0 %v14580_v5 }
 0x426   : > { %9793 = vmatpush3.bf16.msra.mxu1 %v2469_v61  ;;  %v2159_v61 = vmul.f32 %v10679_v14, %v12010_v45  ;;  %v2491_v45 = vmul.bf16 %v12327_v38, %v12515_v56  ;;  %v2492_v31 = vmul.bf16 %v12341_v47, %v12515_v56  ;;  %v2493_v0 = vmul.bf16 %v12378_v57, %v12515_v56 }
 0x427   : > { %9794 = vmatprep.subr.bf16.mxu1 %v14580_v5  ;;  %v2494_v50 = vmul.bf16 %v12390_v48, %v12515_v56 }
 0x428   : > { %9805 = vmatpush3.bf16.msra.mxu0 %v2473_v7  ;;  %v12522_v7 = vpack.c.bf16 %v14621_v29, %v14621_v29  ;;  %v8751_v21 = vpack.c.bf16 %v2159_v61, %v2159_v61  ;;  %v10538_v61 = vld [vmem:[%s14455_s7 + $0x30] sm:$0xff]  }
 0x429   : > { %9806 = vmatprep.subr.bf16.mxu0 %v14580_v5 }
 0x42a   : > { %9795 = vmatpush3.bf16.msra.mxu1 %v2470_v11 }
 0x42b   : > { %9812 = vmatprep.subr.bf16.mxu1 %v14580_v5 }
 0x42c   : > { %9807 = vmatpush3.bf16.msra.mxu0 %v2474_v8 }
 0x42d   : > { %9797 = vmatmul.mubr.msk.bf16.vlgmr.msra.gmra.mrb[128].mxu1 %vm1304_vm1, %v8746_v49  ;;  %9824 = vmatprep.subr.bf16.mxu0 %v14580_v5 }
 0x42e   : > { %9813 = vmatpush3.bf16.msra.mxu1 %v2475_v13  ;;  %9820 = vmatprep.mubr.msk.bf16.mxu1 %vm11034_vm4, %v14580_v5 }
 0x42f   : > { %9809 = vmatmul.mubr.msk.bf16.vlgmr.msra.gmra.mrb[96].mxu0 %vm1304_vm1, %v8747_v30  ;;  %9814 = vmatprep.subr.bf16.mxu1 %v14580_v5 }
 0x430   : > { %9825 = vmatpush3.bf16.msra.mxu0 %v2479_v32  ;;  %9832 = vmatprep.mubr.msk.bf16.mxu0 %vm11034_vm4, %v14580_v5 }
 0x431   : > { %9826 = vmatprep.subr.bf16.mxu0 %v14580_v5 }
 0x432   : > { %9815 = vmatpush3.bf16.msra.mxu1 %v2476_v2  ;;  %v2496_v2 = vmul.bf16 %v12341_v47, %v12522_v7  ;;  %v2497_v47 = vmul.bf16 %v12378_v57, %v12522_v7  ;;  %v2498_v57 = vmul.bf16 %v12390_v48, %v12522_v7  ;;  %v10534_v48 = vld [vmem:[%s14455_s7 + $0x10] sm:$0xff]  }
 0x433   : > { %9816 = vmatprep.subr.bf16.mxu1 %v14580_v5 }
 0x434   : > { %9827 = vmatpush3.bf16.msra.mxu0 %v2480_v43 }
 0x435   : > { %9828 = vmatprep.subr.bf16.mxu0 %v14580_v5 }
 0x436   : > { %9817 = vmatpush3.bf16.msra.mxu1 %v2477_v19 }
 0x437   : > { %9818 = vmatprep.subr.bf16.mxu1 %v14580_v5 }
 0x438   : > { %9829 = vmatpush3.bf16.msra.mxu0 %v2481_v59 }
 0x439   : > { %9830 = vmatprep.subr.bf16.mxu0 %v14580_v5 }
 0x43a   : > { %9819 = vmatpush3.bf16.msra.mxu1 %v2478_v15 }
 0x43b   : > { %9836 = vmatprep.subr.bf16.mxu1 %v14580_v5 }
 0x43c   : > { %9831 = vmatpush3.bf16.msra.mxu0 %v2482_v27 }
 0x43d   : > { %9821 = vmatmul.mubr.msk.bf16.vlgmr.msra.gmra.mrb[132].mxu1 %vm1304_vm1, %v8748_v41  ;;  %9848 = vmatprep.subr.bf16.mxu0 %v14580_v5 }
 0x43e   : > { %9837 = vmatpush3.bf16.msra.mxu1 %v2483_v24  ;;  %9844 = vmatprep.mubr.msk.bf16.mxu1 %vm11034_vm4, %v14580_v5 }
 0x43f   : > { %9833 = vmatmul.mubr.msk.bf16.vlgmr.msra.gmra.mrb[100].mxu0 %vm1304_vm1, %v8749_v23  ;;  %9838 = vmatprep.subr.bf16.mxu1 %v14580_v5 }
 0x440   : > { %9849 = vmatpush3.bf16.msra.mxu0 %v2487_v54  ;;  %v12499_v46 = vpop.f32.mrb[80].mxu1  ;;  %9856 = vmatprep.mubr.msk.bf16.mxu0 %vm11034_vm4, %v14580_v5 }
 0x441   : > { %v4003_v63 = vmul.f32 1.442695, %v12499_v46  ;;  %v9510_v28 = vpop.f32.mrb[81].mxu1  ;;  %9850 = vmatprep.subr.bf16.mxu0 %v14580_v5  ;;  %vm3971_vm5 = vcmp.gt.f32.partialorder %v12499_v46, 0.0 }
 0x442   : > { %9839 = vmatpush3.bf16.msra.mxu1 %v2484_v33  ;;  %v2635_v36 = vpop.f32.mrb[82].mxu1  ;;  %v2675_v51 = vpop.f32.mrb[48].mxu0 }
 0x443   : > { %10680 = vpow2.f32 %v4003_v63  ;;  %v4005_v1 = vmul.f32 1.442695, %v2675_v51  ;;  %v9511_v9 = vpop.f32.mrb[83].mxu1  ;;  %v9522_v62 = vpop.f32.mrb[49].mxu0  ;;  %9840 = vmatprep.subr.bf16.mxu1 %v14580_v5  ;;  %vm3972_vm6 = vcmp.gt.f32.partialorder %v2675_v51, 0.0 }
 0x444   : > { %9851 = vmatpush3.bf16.msra.mxu0 %v2488_v34  ;;  %v2678_v6 = vpop.f32.mrb[50].mxu0 }
 0x445   : > { %10682 = vpow2.f32 %v4005_v1  ;;  %v9523_v3 = vpop.f32.mrb[51].mxu0  ;;  %9852 = vmatprep.subr.bf16.mxu0 %v14580_v5 }
 0x446   : > { %9841 = vmatpush3.bf16.msra.mxu1 %v2485_v52  ;;  %10684 = vrcp.f32 %v12184_v17  ;;  %v2495_v17 = vmul.bf16 %v12327_v38, %v12522_v7  ;;  %v10535_v52 = vld [vmem:[%s14455_s7 + $0x18] sm:$0xff]  }
 0x447   : > { %9842 = vmatprep.subr.bf16.mxu1 %v14580_v5  ;;  %10686 = vrcp.f32 %v12194_v39 }
 0x448   : > { %9853 = vmatpush3.bf16.msra.mxu0 %v2489_v22  ;;  %v10536_v22 = vld [vmem:[%s14455_s7 + $0x20] sm:$0xff]  }
 0x449   : > { %9854 = vmatprep.subr.bf16.mxu0 %v14580_v5 }
 0x44a   : > { %9843 = vmatpush3.bf16.msra.mxu1 %v2486_v18 }
 0x44b   : > { %9860 = vmatprep.subr.bf16.mxu1 %v14580_v5 }
 0x44c   : > { %9855 = vmatpush3.bf16.msra.mxu0 %v2490_v60 }
 0x44d   : > { %v10681_v42 = vpop.eup %10680  ;;  %9845 = vmatmul.mubr.msk.bf16.vlgmr.msra.gmra.mrb[136].mxu1 %vm1304_vm1, %v8750_v25  ;;  %9872 = vmatprep.subr.bf16.mxu0 %v14580_v5 }
 0x44e   : > { %v8472_v11 = vadd.f32 -1.0, %v10681_v42  ;;  %9861 = vmatpush3.bf16.msra.mxu1 %v2491_v45  ;;  %9868 = vmatprep.mubr.msk.bf16.mxu1 %vm11034_vm4, %v14580_v5 }
 0x44f   : > { %v10683_v55 = vpop.eup %10682  ;;  %9857 = vmatmul.mubr.msk.bf16.vlgmr.msra.gmra.mrb[104].mxu0 %vm1304_vm1, %v8751_v21  ;;  %9862 = vmatprep.subr.bf16.mxu1 %v14580_v5 }
 0x450   : > { %v8473_v39 = vadd.f32 -1.0, %v10683_v55  ;;  %v2718_v35 = vpop.f32.mrb[84].mxu1  ;;  %9873 = vmatpush3.bf16.msra.mxu0 %v2495_v17  ;;  %9880 = vmatprep.mubr.msk.bf16.mxu0 %vm11034_vm4, %v14580_v5  ;;  %v4099_v49 = vsel %vm3971_vm5, %v12499_v46, %v8472_v11  ;;  %v10685_v59 = vpop.eup %10684 }
 0x451   : > { %v4007_v38 = vmul.f32 1.442695, %v2718_v35  ;;  %v9534_v8 = vpop.f32.mrb[85].mxu1  ;;  %9874 = vmatprep.subr.bf16.mxu0 %v14580_v5  ;;  %v10687_v15 = vpop.eup %10686  ;;  %v2160_v58 = vmul.f32 %v10685_v59, %v12014_v40  ;;  %v10533_v40 = vld [vmem:[%s14455_s7 + $0x8] sm:$0xff]   ;;  %vm3973_vm7 = vcmp.gt.f32.partialorder %v2718_v35, 0.0 }
 0x452   : > { %v4100_v13 = vsel %vm3972_vm6, %v2675_v51, %v8473_v39  ;;  %v2721_v30 = vpop.f32.mrb[86].mxu1  ;;  %v2761_v32 = vpop.f32.mrb[52].mxu0  ;;  %9863 = vmatpush3.bf16.msra.mxu1 %v2492_v31  ;;  %v2161_v27 = vmul.f32 %v10687_v15, %v12017_v12 }
 0x453   : > { %10688 = vpow2.f32 %v4007_v38  ;;  %v4009_v43 = vmul.f32 1.442695, %v2761_v32  ;;  %v9535_v16 = vpop.f32.mrb[87].mxu1  ;;  %v9546_v19 = vpop.f32.mrb[53].mxu0  ;;  %9864 = vmatprep.subr.bf16.mxu1 %v14580_v5  ;;  %v4131_v26 = vpack.c.bf16 %v4100_v13, %v4099_v49  ;;  %v8752_v41 = vpack.c.bf16 %v2160_v58, %v2160_v58  ;;  %v11012_v49 = vld [vmem:[%s14452_s4] sm:$0xff]  }
 0x454   : > { %v2764_v10 = vpop.f32.mrb[54].mxu0  ;;  %9875 = vmatpush3.bf16.msra.mxu0 %v2496_v2  ;;  %v8753_v23 = vpack.c.bf16 %v2161_v27, %v2161_v27  ;;  %vm3974_vm8 = vcmp.gt.f32.partialorder %v2761_v32, 0.0  ;;  %v11013_v2 = vld [vmem:[%s14452_s4 + $0x8] sm:$0xff]  }
 0x455   : > { %10690 = vpow2.f32 %v4009_v43  ;;  %v9547_v20 = vpop.f32.mrb[55].mxu0  ;;  %9876 = vmatprep.subr.bf16.mxu0 %v14580_v5 }
 0x456   : > { %9865 = vmatpush3.bf16.msra.mxu1 %v2493_v0 }
 0x457   : > { %9866 = vmatprep.subr.bf16.mxu1 %v14580_v5 }
 0x458   : > { %9877 = vmatpush3.bf16.msra.mxu0 %v2497_v47 }
 0x459   : > { %9878 = vmatprep.subr.bf16.mxu0 %v14580_v5 }
 0x45a   : > { %9867 = vmatpush3.bf16.msra.mxu1 %v2494_v50  ;;  %v11014_v50 = vld [vmem:[%s14452_s4 + $0x10] sm:$0xff]  }
 0x45b   : > { %9884 = vmatprep.subr.bf16.mxu1 %v10532_v53 }
 0x45c   : > { %9879 = vmatpush3.bf16.msra.mxu0 %v2498_v57 }
 0x45d   : > { %v10689_v24 = vpop.eup %10688  ;;  %9869 = vmatmul.mubr.msk.bf16.vlgmr.msra.gmra.mrb[140].mxu1 %vm1304_vm1, %v8752_v41  ;;  %v11015_v41 = vld [vmem:[%s14452_s4 + $0x18] sm:$0xff]  }
 0x45e   : > { %v8474_v54 = vadd.f32 -1.0, %v10689_v24  ;;  %9885 = vmatpush3.bf16.msra.mxu1 %v10532_v53  ;;  %9900 = vmatprep.mubr.bf16.mxu1 %v4131_v26 }
 0x45f   : > { %v10691_v12 = vpop.eup %10690  ;;  %9881 = vmatmul.mubr.msk.bf16.vlgmr.msra.gmra.mrb[108].mxu0 %vm1304_vm1, %v8753_v23  ;;  %9886 = vmatprep.subr.bf16.mxu1 %v10533_v40 }
 0x460   : > { %v8475_v46 = vadd.f32 -1.0, %v10691_v12  ;;  %v2804_v33 = vpop.f32.mrb[88].mxu1  ;;  %v4101_v36 = vsel %vm3973_vm7, %v2718_v35, %v8474_v54  ;;  %v10539_v35 = vld [vmem:[%s14455_s7 + $0x38] sm:$0xff]  }
 0x461   : > { %v4011_v63 = vmul.f32 1.442695, %v2804_v33  ;;  %v9558_v28 = vpop.f32.mrb[89].mxu1  ;;  %vm3975_vm9 = vcmp.gt.f32.partialorder %v2804_v33, 0.0 }
 0x462   : > { %v4102_v51 = vsel %vm3974_vm8, %v2761_v32, %v8475_v46  ;;  %v2807_v34 = vpop.f32.mrb[90].mxu1  ;;  %v2847_v1 = vpop.f32.mrb[56].mxu0  ;;  %9887 = vmatpush3.bf16.msra.mxu1 %v10533_v40 }
 0x463   : > { %v4132_v9 = vpack.c.bf16 %v4102_v51, %v4101_v36  ;;  %10692 = vpow2.f32 %v4011_v63  ;;  %v4013_v62 = vmul.f32 1.442695, %v2847_v1  ;;  %v9559_v44 = vpop.f32.mrb[91].mxu1  ;;  %v9570_v6 = vpop.f32.mrb[57].mxu0  ;;  %9888 = vmatprep.subr.bf16.mxu1 %v10534_v48  ;;  %vm3976_vm10 = vcmp.gt.f32.partialorder %v2847_v1, 0.0 }
 0x464   : > { %v2850_v3 = vpop.f32.mrb[58].mxu0 }
 0x465   : > { %10694 = vpow2.f32 %v4013_v62  ;;  %v9571_v14 = vpop.f32.mrb[59].mxu0 }
 0x466   : > { %9889 = vmatpush3.bf16.msra.mxu1 %v10534_v48 }
 0x467   : > { %9890 = vmatprep.subr.bf16.mxu1 %v10535_v52 }
 0x46a   : > { %9891 = vmatpush3.bf16.msra.mxu1 %v10535_v52 }
 0x46b   : > { %9892 = vmatprep.subr.bf16.mxu1 %v10536_v22 }
 0x46d   : > { %v10693_v4 = vpop.eup %10692 }
 0x46e   : > { %v8476_v56 = vadd.f32 -1.0, %v10693_v4  ;;  %9893 = vmatpush3.bf16.msra.mxu1 %v10536_v22 }
 0x46f   : > { %v10695_v18 = vpop.eup %10694  ;;  %9894 = vmatprep.subr.bf16.mxu1 %v10537_v37 }
 0x470   : > { %v8477_v29 = vadd.f32 -1.0, %v10695_v18  ;;  %v2890_v7 = vpop.f32.mrb[92].mxu1  ;;  %v4103_v45 = vsel %vm3975_vm9, %v2804_v33, %v8476_v56 }
 0x471   : > { %v4015_v60 = vmul.f32 1.442695, %v2890_v7  ;;  %v9582_v25 = vpop.f32.mrb[93].mxu1  ;;  %vm3977_vm11 = vcmp.gt.f32.partialorder %v2890_v7, 0.0 }
 0x472   : > { %v4104_v42 = vsel %vm3976_vm10, %v2847_v1, %v8477_v29  ;;  %v2893_v21 = vpop.f32.mrb[94].mxu1  ;;  %v2933_v11 = vpop.f32.mrb[60].mxu0  ;;  %9895 = vmatpush3.bf16.msra.mxu1 %v10537_v37 }
 0x473   : > { %10696 = vpow2.f32 %v4015_v60  ;;  %v4017_v17 = vmul.f32 1.442695, %v2933_v11  ;;  %v9583_v55 = vpop.f32.mrb[95].mxu1  ;;  %v9594_v39 = vpop.f32.mrb[61].mxu0  ;;  %9896 = vmatprep.subr.bf16.mxu1 %v10538_v61  ;;  %v4133_v31 = vpack.c.bf16 %v4104_v42, %v4103_v45  ;;  %vm3978_vm12 = vcmp.gt.f32.partialorder %v2933_v11, 0.0 }
 0x474   : > { %v2936_v38 = vpop.f32.mrb[62].mxu0 }
 0x475   : > { %10698 = vpow2.f32 %v4017_v17  ;;  %v9595_v8 = vpop.f32.mrb[63].mxu0 }
 0x476   : > { %9897 = vmatpush3.bf16.msra.mxu1 %v10538_v61 }
 0x477   : > { %9898 = vmatprep.subr.bf16.mxu1 %v10539_v35 }
 0x47a   : > { %9899 = vmatpush3.bf16.msra.mxu1 %v10539_v35 }
 0x47b   : > { %10012 = vmatprep.subr.bf16.mxu1 %v11012_v49 }
 0x47d   : > { %v10697_v13 = vpop.eup %10696  ;;  %9901 = vmatmul.mubr.bf16.vlgmr.msra.gmra.mrb[144].mxu1 %v4132_v9 }
 0x47e   : > { %v8478_v30 = vadd.f32 -1.0, %v10697_v13  ;;  %9904 = vmatprep.mubr.bf16.mxu1 %v4133_v31  ;;  %10013 = vmatpush3.bf16.msra.mxu1 %v11012_v49 }
 0x47f   : > { %v10699_v32 = vpop.eup %10698  ;;  %10014 = vmatprep.subr.bf16.mxu1 %v11013_v2 }
 0x480   : > { %v8479_v43 = vadd.f32 -1.0, %v10699_v32  ;;  %v2976_v16 = vpop.f32.mrb[96].mxu1  ;;  %v4105_v59 = vsel %vm3977_vm11, %v2890_v7, %v8478_v30 }
 0x481   : > { %v4019_v19 = vmul.f32 1.442695, %v2976_v16  ;;  %v9606_v26 = vpop.f32.mrb[97].mxu1  ;;  %vm3979_vm13 = vcmp.gt.f32.partialorder %v2976_v16, 0.0 }
 0x482   : > { %v4106_v10 = vsel %vm3978_vm12, %v2933_v11, %v8479_v43  ;;  %v2979_v0 = vpop.f32.mrb[98].mxu1  ;;  %v3019_v20 = vpop.f32.mrb[64].mxu0  ;;  %10015 = vmatpush3.bf16.msra.mxu1 %v11013_v2 }
 0x483   : > { %10700 = vpow2.f32 %v4019_v19  ;;  %v4021_v15 = vmul.f32 1.442695, %v3019_v20  ;;  %v9607_v47 = vpop.f32.mrb[99].mxu1  ;;  %v9618_v58 = vpop.f32.mrb[65].mxu0  ;;  %v4134_v53 = vpack.c.bf16 %v4106_v10, %v4105_v59  ;;  %10016 = vmatprep.subr.bf16.mxu1 %v11014_v50  ;;  %vm3980_vm14 = vcmp.gt.f32.partialorder %v3019_v20, 0.0 }
 0x484   : > { %v3022_v27 = vpop.f32.mrb[66].mxu0 }
 0x485   : > { %10702 = vpow2.f32 %v4021_v15  ;;  %v9619_v57 = vpop.f32.mrb[67].mxu0  ;;  %9905 = vmatmul.mubr.bf16.gmra.mrb[148].mxu1 %v4134_v53 }
 0x486   : > { %10017 = vmatpush3.bf16.msra.mxu1 %v11014_v50 }
 0x487   : > { %10018 = vmatprep.subr.bf16.mxu1 %v11015_v41 }
 0x48a   : > { %10019 = vmatpush3.bf16.msra.mxu1 %v11015_v41 }
 0x48b   : > { %10064 = vmatprep.subr.bf16.mxu1 %v14580_v5 }
 0x48d   : > { %v10701_v40 = vpop.eup %10700 }
 0x48e   : > { %v8480_v24 = vadd.f32 -1.0, %v10701_v40 }
 0x48f   : > { %v10703_v23 = vpop.eup %10702 }
 0x490   : > { %v8481_v54 = vadd.f32 -1.0, %v10703_v23  ;;  %v3062_v12 = vpop.f32.mrb[100].mxu1  ;;  %v4107_v33 = vsel %vm3979_vm13, %v2976_v16, %v8480_v24 }
 0x491   : > { %v4023_v48 = vmul.f32 1.442695, %v3062_v12  ;;  %v9630_v46 = vpop.f32.mrb[101].mxu1  ;;  %vm3981_vm15 = vcmp.gt.f32.partialorder %v3062_v12, 0.0 }
 0x492   : > { %v4108_v63 = vsel %vm3980_vm14, %v3019_v20, %v8481_v54  ;;  %v3065_v28 = vpop.f32.mrb[102].mxu1  ;;  %v3105_v36 = vpop.f32.mrb[68].mxu0  ;;  %v10541_v46 = vld [vmem:[%s14456_s8 + $0x8] sm:$0xff]  }
 0x493   : > { %10704 = vpow2.f32 %v4023_v48  ;;  %v4025_v51 = vmul.f32 1.442695, %v3105_v36  ;;  %v9631_v34 = vpop.f32.mrb[103].mxu1  ;;  %v9642_v1 = vpop.f32.mrb[69].mxu0  ;;  %v4135_v9 = vpack.c.bf16 %v4108_v63, %v4107_v33  ;;  %vm3982_vm0 = vcmp.gt.f32.partialorder %v3105_v36, 0.0  ;;  %v10540_v48 = vld [vmem:[%s14456_s8] sm:$0xff]  }
 0x494   : > { %v3108_v62 = vpop.f32.mrb[70].mxu0  ;;  %9932 = vmatprep.subr.bf16.mxu0 %v10540_v48  ;;  %v10542_v33 = vld [vmem:[%s14456_s8 + $0x10] sm:$0xff]  }
 0x495   : > { %10706 = vpow2.f32 %v4025_v51  ;;  %v9643_v44 = vpop.f32.mrb[71].mxu0  ;;  %9908 = vmatprep.mubr.bf16.mxu1 %v4135_v9  ;;  %9933 = vmatpush3.bf16.msra.mxu0 %v10540_v48 }
 0x496   : > { %9934 = vmatprep.subr.bf16.mxu0 %v10541_v46 }
 0x499   : > { %9935 = vmatpush3.bf16.msra.mxu0 %v10541_v46 }
 0x49a   : > { %9936 = vmatprep.subr.bf16.mxu0 %v10542_v33 }
 0x49d   : > { %v10705_v6 = vpop.eup %10704  ;;  %9937 = vmatpush3.bf16.msra.mxu0 %v10542_v33 }
 0x49e   : > { %v8482_v52 = vadd.f32 -1.0, %v10705_v6 }
 0x49f   : > { %v10707_v3 = vpop.eup %10706 }
 0x4a0   : > { %v8483_v14 = vadd.f32 -1.0, %v10707_v3  ;;  %v3148_v22 = vpop.f32.mrb[104].mxu1  ;;  %v4109_v56 = vsel %vm3981_vm15, %v3062_v12, %v8482_v52 }
 0x4a1   : > { %v4027_v37 = vmul.f32 1.442695, %v3148_v22  ;;  %v9654_v4 = vpop.f32.mrb[105].mxu1  ;;  %vm3983_vm2 = vcmp.gt.f32.partialorder %v3148_v22, 0.0 }
 0x4a2   : > { %v4110_v18 = vsel %vm3982_vm0, %v3105_v36, %v8483_v14  ;;  %v3151_v61 = vpop.f32.mrb[106].mxu1  ;;  %v3191_v29 = vpop.f32.mrb[72].mxu0 }
 0x4a3   : > { %10708 = vpow2.f32 %v4027_v37  ;;  %v4029_v7 = vmul.f32 1.442695, %v3191_v29  ;;  %v9655_v60 = vpop.f32.mrb[107].mxu1  ;;  %v9666_v25 = vpop.f32.mrb[73].mxu0  ;;  %v4136_v45 = vpack.c.bf16 %v4110_v18, %v4109_v56  ;;  %vm3984_vm3 = vcmp.gt.f32.partialorder %v3191_v29, 0.0  ;;  %v10543_v56 = vld [vmem:[%s14456_s8 + $0x18] sm:$0xff]  }
 0x4a4   : > { %v3194_v42 = vpop.f32.mrb[74].mxu0  ;;  %9938 = vmatprep.subr.bf16.mxu0 %v10543_v56 }
 0x4a5   : > { %10710 = vpow2.f32 %v4029_v7  ;;  %v9667_v21 = vpop.f32.mrb[75].mxu0  ;;  %9909 = vmatmul.mubr.bf16.gmra.mrb[152].mxu1 %v4136_v45  ;;  %9939 = vmatpush3.bf16.msra.mxu0 %v10543_v56 }
 0x4ad   : > { %v10709_v11 = vpop.eup %10708 }
 0x4ae   : > { %v8484_v17 = vadd.f32 -1.0, %v10709_v11 }
 0x4af   : > { %v10711_v55 = vpop.eup %10710 }
 0x4b0   : > { %v8485_v39 = vadd.f32 -1.0, %v10711_v55  ;;  %v3234_v35 = vpop.f32.mrb[108].mxu1  ;;  %v4111_v8 = vsel %vm3983_vm2, %v3148_v22, %v8484_v17 }
 0x4b1   : > { %v4031_v31 = vmul.f32 1.442695, %v3234_v35  ;;  %v9678_v38 = vpop.f32.mrb[109].mxu1  ;;  %vm3985_vm5 = vcmp.gt.f32.partialorder %v3234_v35, 0.0 }
 0x4b2   : > { %v4112_v49 = vsel %vm3984_vm3, %v3191_v29, %v8485_v39  ;;  %v3237_v13 = vpop.f32.mrb[110].mxu1  ;;  %v3277_v30 = vpop.f32.mrb[76].mxu0 }
 0x4b3   : > { %10712 = vpow2.f32 %v4031_v31  ;;  %v4033_v32 = vmul.f32 1.442695, %v3277_v30  ;;  %v9679_v2 = vpop.f32.mrb[111].mxu1  ;;  %v9690_v43 = vpop.f32.mrb[77].mxu0  ;;  %v4137_v16 = vpack.c.bf16 %v4112_v49, %v4111_v8  ;;  %vm3986_vm6 = vcmp.gt.f32.partialorder %v3277_v30, 0.0 }
 0x4b4   : > { %v3280_v19 = vpop.f32.mrb[78].mxu0 }
 0x4b5   : > { %10714 = vpow2.f32 %v4033_v32  ;;  %v9691_v26 = vpop.f32.mrb[79].mxu0  ;;  %9912 = vmatprep.mubr.bf16.mxu1 %v4137_v16 }
 0x4bd   : > { %v10713_v59 = vpop.eup %10712 }
 0x4be   : > { %v8486_v10 = vadd.f32 -1.0, %v10713_v59 }
 0x4bf   : > { %v10715_v0 = vpop.eup %10714 }
 0x4c0   : > { %v8487_v20 = vadd.f32 -1.0, %v10715_v0  ;;  %v3320_v15 = vpop.f32.mrb[112].mxu1  ;;  %v4113_v53 = vsel %vm3985_vm5, %v3234_v35, %v8486_v10 }
 0x4c1   : > { %v4035_v47 = vmul.f32 1.442695, %v3320_v15  ;;  %v9702_v58 = vpop.f32.mrb[113].mxu1  ;;  %vm3987_vm7 = vcmp.gt.f32.partialorder %v3320_v15, 0.0 }
 0x4c2   : > { %v4114_v50 = vsel %vm3986_vm6, %v3277_v30, %v8487_v20  ;;  %v3323_v27 = vpop.f32.mrb[114].mxu1  ;;  %v3363_v57 = vpop.f32.mrb[80].mxu0 }
 0x4c3   : > { %10716 = vpow2.f32 %v4035_v47  ;;  %v4037_v41 = vmul.f32 1.442695, %v3363_v57  ;;  %v9703_v40 = vpop.f32.mrb[115].mxu1  ;;  %v9714_v24 = vpop.f32.mrb[81].mxu0  ;;  %v4138_v23 = vpack.c.bf16 %v4114_v50, %v4113_v53  ;;  %vm3988_vm8 = vcmp.gt.f32.partialorder %v3363_v57, 0.0 }
 0x4c4   : > { %v3366_v54 = vpop.f32.mrb[82].mxu0 }
 0x4c5   : > { %10718 = vpow2.f32 %v4037_v41  ;;  %v9715_v12 = vpop.f32.mrb[83].mxu0  ;;  %9913 = vmatmul.mubr.bf16.gmra.mrb[156].mxu1 %v4138_v23 }
 0x4cd   : > { %v10717_v63 = vpop.eup %10716 }
 0x4ce   : > { %v8488_v28 = vadd.f32 -1.0, %v10717_v63 }
 0x4cf   : > { %v10719_v36 = vpop.eup %10718 }
 0x4d0   : > { %v8489_v51 = vadd.f32 -1.0, %v10719_v36  ;;  %v3406_v34 = vpop.f32.mrb[116].mxu1  ;;  %v4115_v62 = vsel %vm3987_vm7, %v3320_v15, %v8488_v28 }
 0x4d1   : > { %v4039_v1 = vmul.f32 1.442695, %v3406_v34  ;;  %v9726_v9 = vpop.f32.mrb[117].mxu1  ;;  %vm3989_vm9 = vcmp.gt.f32.partialorder %v3406_v34, 0.0 }
 0x4d2   : > { %v4116_v44 = vsel %vm3988_vm8, %v3363_v57, %v8489_v51  ;;  %v3409_v6 = vpop.f32.mrb[118].mxu1  ;;  %v3449_v52 = vpop.f32.mrb[84].mxu0 }
 0x4d3   : > { %10720 = vpow2.f32 %v4039_v1  ;;  %v4041_v3 = vmul.f32 1.442695, %v3449_v52  ;;  %v9727_v14 = vpop.f32.mrb[119].mxu1  ;;  %v9738_v22 = vpop.f32.mrb[85].mxu0  ;;  %v4139_v37 = vpack.c.bf16 %v4116_v44, %v4115_v62  ;;  %vm3990_vm10 = vcmp.gt.f32.partialorder %v3449_v52, 0.0 }
 0x4d4   : > { %v3452_v4 = vpop.f32.mrb[86].mxu0 }
 0x4d5   : > { %10722 = vpow2.f32 %v4041_v3  ;;  %v9739_v18 = vpop.f32.mrb[87].mxu0  ;;  %9916 = vmatprep.mubr.bf16.mxu1 %v4139_v37 }
 0x4dd   : > { %v10721_v61 = vpop.eup %10720 }
 0x4de   : > { %v8490_v29 = vadd.f32 -1.0, %v10721_v61 }
 0x4df   : > { %v10723_v7 = vpop.eup %10722 }
 0x4e0   : > { %v8491_v60 = vadd.f32 -1.0, %v10723_v7  ;;  %v3492_v25 = vpop.f32.mrb[120].mxu1  ;;  %v4117_v21 = vsel %vm3989_vm9, %v3406_v34, %v8490_v29 }
 0x4e1   : > { %v4043_v45 = vmul.f32 1.442695, %v3492_v25  ;;  %v9750_v42 = vpop.f32.mrb[121].mxu1  ;;  %vm3991_vm11 = vcmp.gt.f32.partialorder %v3492_v25, 0.0 }
 0x4e2   : > { %v4118_v11 = vsel %vm3990_vm10, %v3449_v52, %v8491_v60  ;;  %v3495_v17 = vpop.f32.mrb[122].mxu1  ;;  %v3535_v55 = vpop.f32.mrb[88].mxu0 }
 0x4e3   : > { %10724 = vpow2.f32 %v4043_v45  ;;  %v4045_v39 = vmul.f32 1.442695, %v3535_v55  ;;  %v9751_v35 = vpop.f32.mrb[123].mxu1  ;;  %v9762_v31 = vpop.f32.mrb[89].mxu0  ;;  %v4140_v38 = vpack.c.bf16 %v4118_v11, %v4117_v21  ;;  %vm3992_vm12 = vcmp.gt.f32.partialorder %v3535_v55, 0.0 }
 0x4e4   : > { %v3538_v8 = vpop.f32.mrb[90].mxu0 }
 0x4e5   : > { %10726 = vpow2.f32 %v4045_v39  ;;  %v9763_v49 = vpop.f32.mrb[91].mxu0  ;;  %9917 = vmatmul.mubr.bf16.gmra.mrb[160].mxu1 %v4140_v38 }
 0x4ed   : > { %v10725_v13 = vpop.eup %10724 }
 0x4ee   : > { %v8492_v30 = vadd.f32 -1.0, %v10725_v13 }
 0x4ef   : > { %v10727_v32 = vpop.eup %10726 }
 0x4f0   : > { %v8493_v2 = vadd.f32 -1.0, %v10727_v32  ;;  %v3578_v43 = vpop.f32.mrb[124].mxu1  ;;  %v4119_v26 = vsel %vm3991_vm11, %v3492_v25, %v8492_v30 }
 0x4f1   : > { %v4047_v16 = vmul.f32 1.442695, %v3578_v43  ;;  %v9774_v19 = vpop.f32.mrb[125].mxu1  ;;  %vm3993_vm13 = vcmp.gt.f32.partialorder %v3578_v43, 0.0 }
 0x4f2   : > { %v4120_v59 = vsel %vm3992_vm12, %v3535_v55, %v8493_v2  ;;  %v3581_v10 = vpop.f32.mrb[126].mxu1  ;;  %v3621_v0 = vpop.f32.mrb[92].mxu0 }
 0x4f3   : > { %10728 = vpow2.f32 %v4047_v16  ;;  %v4049_v20 = vmul.f32 1.442695, %v3621_v0  ;;  %v9775_v15 = vpop.f32.mrb[127].mxu1  ;;  %v9786_v47 = vpop.f32.mrb[93].mxu0  ;;  %v4141_v58 = vpack.c.bf16 %v4120_v59, %v4119_v26  ;;  %vm3994_vm14 = vcmp.gt.f32.partialorder %v3621_v0, 0.0 }
 0x4f4   : > { %v3624_v53 = vpop.f32.mrb[94].mxu0 }
 0x4f5   : > { %10730 = vpow2.f32 %v4049_v20  ;;  %v9787_v50 = vpop.f32.mrb[95].mxu0  ;;  %9920 = vmatprep.mubr.bf16.mxu1 %v4141_v58 }
 0x4fd   : > { %v10729_v27 = vpop.eup %10728 }
 0x4fe   : > { %v8494_v57 = vadd.f32 -1.0, %v10729_v27 }
 0x4ff   : > { %v10731_v41 = vpop.eup %10730 }
 0x500   : > { %v8495_v40 = vadd.f32 -1.0, %v10731_v41  ;;  %v3664_v24 = vpop.f32.mrb[128].mxu1  ;;  %v4121_v12 = vsel %vm3993_vm13, %v3578_v43, %v8494_v57 }
 0x501   : > { %v4051_v23 = vmul.f32 1.442695, %v3664_v24  ;;  %v9798_v54 = vpop.f32.mrb[129].mxu1  ;;  %vm3995_vm15 = vcmp.gt.f32.partialorder %v3664_v24, 0.0 }
 0x502   : > { %v4122_v48 = vsel %vm3994_vm14, %v3621_v0, %v8495_v40  ;;  %v3667_v46 = vpop.f32.mrb[130].mxu1  ;;  %v3707_v33 = vpop.f32.mrb[96].mxu0 }
 0x503   : > { %10732 = vpow2.f32 %v4051_v23  ;;  %v4053_v63 = vmul.f32 1.442695, %v3707_v33  ;;  %v9799_v28 = vpop.f32.mrb[131].mxu1  ;;  %v9810_v36 = vpop.f32.mrb[97].mxu0  ;;  %v4142_v51 = vpack.c.bf16 %v4122_v48, %v4121_v12  ;;  %vm3996_vm0 = vcmp.gt.f32.partialorder %v3707_v33, 0.0 }
 0x504   : > { %v3710_v34 = vpop.f32.mrb[98].mxu0 }
 0x505   : > { %10734 = vpow2.f32 %v4053_v63  ;;  %v9811_v1 = vpop.f32.mrb[99].mxu0  ;;  %9921 = vmatmul.mubr.bf16.gmra.mrb[164].mxu1 %v4142_v51 }
 0x50d   : > { %v10733_v9 = vpop.eup %10732 }
 0x50e   : > { %v8496_v62 = vadd.f32 -1.0, %v10733_v9 }
 0x50f   : > { %v10735_v44 = vpop.eup %10734 }
 0x510   : > { %v8497_v6 = vadd.f32 -1.0, %v10735_v44  ;;  %v3750_v52 = vpop.f32.mrb[132].mxu1  ;;  %v4123_v22 = vsel %vm3995_vm15, %v3664_v24, %v8496_v62 }
 0x511   : > { %v4055_v3 = vmul.f32 1.442695, %v3750_v52  ;;  %v9822_v14 = vpop.f32.mrb[133].mxu1  ;;  %vm3997_vm2 = vcmp.gt.f32.partialorder %v3750_v52, 0.0 }
 0x512   : > { %v4124_v37 = vsel %vm3996_vm0, %v3707_v33, %v8497_v6  ;;  %v3753_v4 = vpop.f32.mrb[134].mxu1  ;;  %v3793_v56 = vpop.f32.mrb[100].mxu0 }
 0x513   : > { %10736 = vpow2.f32 %v4055_v3  ;;  %v4057_v18 = vmul.f32 1.442695, %v3793_v56  ;;  %v9823_v61 = vpop.f32.mrb[135].mxu1  ;;  %v9834_v29 = vpop.f32.mrb[101].mxu0  ;;  %v4143_v7 = vpack.c.bf16 %v4124_v37, %v4123_v22  ;;  %vm3998_vm3 = vcmp.gt.f32.partialorder %v3793_v56, 0.0  ;;  %v10544_v22 = vld [vmem:[%s14457_s9] sm:$0xff]  }
 0x514   : > { %v3796_v60 = vpop.f32.mrb[102].mxu0  ;;  %v10545_v37 = vld [vmem:[%s14457_s9 + $0x8] sm:$0xff]   ;;  %9972 = vmatprep.subr.bf16.mxu0 %v10544_v22 }
 0x515   : > { %10738 = vpow2.f32 %v4057_v18  ;;  %v9835_v25 = vpop.f32.mrb[103].mxu0  ;;  %9924 = vmatprep.mubr.bf16.mxu1 %v4143_v7  ;;  %v10546_v60 = vld [vmem:[%s14457_s9 + $0x10] sm:$0xff]  }
 0x516   : > { %v10547_v25 = vld [vmem:[%s14457_s9 + $0x18] sm:$0xff]  }
 0x51d   : > { %v10737_v45 = vpop.eup %10736 }
 0x51e   : > { %v8498_v42 = vadd.f32 -1.0, %v10737_v45 }
 0x51f   : > { %v10739_v21 = vpop.eup %10738 }
 0x520   : > { %v8499_v11 = vadd.f32 -1.0, %v10739_v21  ;;  %v3836_v17 = vpop.f32.mrb[136].mxu1  ;;  %v4125_v35 = vsel %vm3997_vm2, %v3750_v52, %v8498_v42 }
 0x521   : > { %v4059_v55 = vmul.f32 1.442695, %v3836_v17  ;;  %v9846_v39 = vpop.f32.mrb[137].mxu1  ;;  %vm3999_vm5 = vcmp.gt.f32.partialorder %v3836_v17, 0.0 }
 0x522   : > { %v4126_v31 = vsel %vm3998_vm3, %v3793_v56, %v8499_v11  ;;  %v3839_v38 = vpop.f32.mrb[138].mxu1  ;;  %v3879_v8 = vpop.f32.mrb[104].mxu0 }
 0x523   : > { %10740 = vpow2.f32 %v4059_v55  ;;  %v4061_v49 = vmul.f32 1.442695, %v3879_v8  ;;  %v9847_v13 = vpop.f32.mrb[139].mxu1  ;;  %v9858_v30 = vpop.f32.mrb[105].mxu0  ;;  %v4144_v32 = vpack.c.bf16 %v4126_v31, %v4125_v35  ;;  %vm4000_vm6 = vcmp.gt.f32.partialorder %v3879_v8, 0.0 }
 0x524   : > { %v3882_v2 = vpop.f32.mrb[106].mxu0 }
 0x525   : > { %10742 = vpow2.f32 %v4061_v49  ;;  %v9859_v43 = vpop.f32.mrb[107].mxu0  ;;  %9925 = vmatmul.mubr.bf16.gmra.mrb[168].mxu1 %v4144_v32 }
 0x52d   : > { %v10741_v16 = vpop.eup %10740 }
 0x52e   : > { %v8500_v19 = vadd.f32 -1.0, %v10741_v16 }
 0x52f   : > { %v10743_v26 = vpop.eup %10742 }
 0x530   : > { %v8501_v59 = vadd.f32 -1.0, %v10743_v26  ;;  %v3922_v10 = vpop.f32.mrb[140].mxu1  ;;  %v4127_v15 = vsel %vm3999_vm5, %v3836_v17, %v8500_v19 }
 0x531   : > { %v4063_v0 = vmul.f32 1.442695, %v3922_v10  ;;  %v9870_v20 = vpop.f32.mrb[141].mxu1  ;;  %vm4001_vm7 = vcmp.gt.f32.partialorder %v3922_v10, 0.0 }
 0x532   : > { %v4128_v47 = vsel %vm4000_vm6, %v3879_v8, %v8501_v59  ;;  %v3925_v58 = vpop.f32.mrb[142].mxu1  ;;  %v3965_v53 = vpop.f32.mrb[108].mxu0 }
 0x533   : > { %10744 = vpow2.f32 %v4063_v0  ;;  %v4065_v50 = vmul.f32 1.442695, %v3965_v53  ;;  %v9871_v27 = vpop.f32.mrb[143].mxu1  ;;  %v9882_v57 = vpop.f32.mrb[109].mxu0  ;;  %v4145_v41 = vpack.c.bf16 %v4128_v47, %v4127_v15  ;;  %vm4002_vm8 = vcmp.gt.f32.partialorder %v3965_v53, 0.0 }
 0x534   : > { %v3968_v40 = vpop.f32.mrb[110].mxu0 }
 0x535   : > { %10746 = vpow2.f32 %v4065_v50  ;;  %v9883_v24 = vpop.f32.mrb[111].mxu0  ;;  %9928 = vmatprep.mubr.bf16.mxu1 %v4145_v41  ;;  %v10548_v41 = vld [vmem:[%s14458_s10] sm:$0xff]  }
 0x536   : > { %v10549_v24 = vld [vmem:[%s14458_s10 + $0x8] sm:$0xff]  }
 0x53d   : > { %v10745_v23 = vpop.eup %10744 }
 0x53e   : > { %v8502_v54 = vadd.f32 -1.0, %v10745_v23 }
 0x53f   : > { %v10747_v12 = vpop.eup %10746 }
 0x540   : > { %v8503_v48 = vadd.f32 -1.0, %v10747_v12  ;;  %v4129_v46 = vsel %vm4001_vm7, %v3922_v10, %v8502_v54  ;;  %v10550_v12 = vld [vmem:[%s14458_s10 + $0x10] sm:$0xff]  }
 0x542   : > { %v4130_v33 = vsel %vm4002_vm8, %v3965_v53, %v8503_v48 }
 0x543   : > { %v4146_v63 = vpack.c.bf16 %v4130_v33, %v4129_v46 }
 0x545   : > { %9929 = vmatmul.mubr.bf16.gmra.mrb[172].mxu1 %v4146_v63 }
 0x550   : > { %v12612_v28 = vpop.f32.mrb[144].mxu1 }
 0x551   : > { %14622 = vst [vmem:[#allocation32_spill] sm:$0xff] %v12612_v28  ;;  %v12614_v36 = vpop.f32.mrb[145].mxu1 }
 0x552   : > { %v12616_v51 = vpop.f32.mrb[146].mxu1  ;;  %v8754_v57 = vpack.c.bf16 %v12614_v36, %v12614_v36 }
 0x553   : > { %14623 = vst [vmem:[#allocation33_spill] sm:$0xff] %v12616_v51  ;;  %v12620_v34 = vpack.c.bf16 %v12616_v51, %v12612_v28  ;;  %v12622_v1 = vpop.f32.mrb[147].mxu1 }
 0x554   : > { %14624 = vst [vmem:[#allocation34_spill] sm:$0xff] %v12622_v1  ;;  %v12626_v9 = vpack.c.bf16 %v12622_v1, %v12614_v36  ;;  %v5895_v40 = vmul.bf16 %v10548_v41, %v8754_v57  ;;  %v5896_v54 = vmul.bf16 %v10549_v24, %v8754_v57  ;;  %v5897_v63 = vmul.bf16 %v10550_v12, %v8754_v57  ;;  %v10551_v36 = vld [vmem:[%s14458_s10 + $0x18] sm:$0xff]  }
 0x556   : > { %9940 = vmatprep.mubr.msk.bf16.mxu0 %vm1304_vm1, %v12626_v9 }
 0x557   : > { %9941 = vmatmul.mubr.msk.bf16.vlgmr.msra.gmra.mrb[112].mxu0 %vm1304_vm1, %v12620_v34 }
 0x558   : > { %v12632_v62 = vpop.f32.mrb[148].mxu1  ;;  %9973 = vmatpush3.bf16.msra.mxu0 %v10544_v22 }
 0x559   : > { %14625 = vst [vmem:[#allocation35_spill] sm:$0xff] %v12632_v62  ;;  %v12634_v44 = vpop.f32.mrb[149].mxu1  ;;  %9974 = vmatprep.subr.bf16.mxu0 %v10545_v37 }
 0x55a   : > { %14626 = vst [vmem:[#allocation2_spill] sm:$0xff] %v12634_v44  ;;  %v12636_v6 = vpop.f32.mrb[150].mxu1 }
 0x55b   : > { %14627 = vst [vmem:[#allocation3_spill] sm:$0xff] %v12636_v6  ;;  %v12640_v52 = vpack.c.bf16 %v12636_v6, %v12632_v62  ;;  %v12642_v3 = vpop.f32.mrb[151].mxu1 }
 0x55c   : > { %14628 = vst [vmem:[#allocation6_spill] sm:$0xff] %v12642_v3  ;;  %v12646_v14 = vpack.c.bf16 %v12642_v3, %v12634_v44  ;;  %9975 = vmatpush3.bf16.msra.mxu0 %v10545_v37 }
 0x55d   : > { %9976 = vmatprep.subr.bf16.mxu0 %v10546_v60 }
 0x55e   : > { %9944 = vmatprep.mubr.msk.bf16.mxu0 %vm1304_vm1, %v12646_v14 }
 0x55f   : > { %9945 = vmatmul.mubr.msk.bf16.gmra.mrb[116].mxu0 %vm1304_vm1, %v12640_v52 }
 0x560   : > { %9977 = vmatpush3.bf16.msra.mxu0 %v10546_v60 }
 0x561   : > { %9978 = vmatprep.subr.bf16.mxu0 %v10547_v25 }
 0x564   : > { %9979 = vmatpush3.bf16.msra.mxu0 %v10547_v25 }
 0x565   : > { %10052 = vmatprep.subr.bf16.mxu0 %v14580_v5 }
 0x578   : > { %v12658_v4 = vpop.f32.mrb[152].mxu1 }
 0x579   : > { %14629 = vst [vmem:[#allocation10_spill] sm:$0xff] %v12658_v4  ;;  %v12660_v56 = vpop.f32.mrb[153].mxu1 }
 0x57a   : > { %14630 = vst [vmem:[#allocation4_spill] sm:$0xff] %v12660_v56  ;;  %v12662_v18 = vpop.f32.mrb[154].mxu1 }
 0x57b   : > { %14631 = vst [vmem:[#allocation8_spill] sm:$0xff] %v12662_v18  ;;  %v12666_v61 = vpack.c.bf16 %v12662_v18, %v12658_v4  ;;  %v12668_v29 = vpop.f32.mrb[155].mxu1 }
 0x57c   : > { %14632 = vst [vmem:[#allocation14_spill] sm:$0xff] %v12668_v29  ;;  %v12672_v7 = vpack.c.bf16 %v12668_v29, %v12660_v56 }
 0x57e   : > { %9948 = vmatprep.mubr.msk.bf16.mxu0 %vm1304_vm1, %v12672_v7 }
 0x57f   : > { %9949 = vmatmul.mubr.msk.bf16.gmra.mrb[120].mxu0 %vm1304_vm1, %v12666_v61 }
 0x598   : > { %v12685_v45 = vpop.f32.mrb[156].mxu1 }
 0x599   : > { %14633 = vst [vmem:[#allocation18_spill] sm:$0xff] %v12685_v45  ;;  %v12687_v42 = vpop.f32.mrb[157].mxu1 }
 0x59a   : > { %14634 = vst [vmem:[#allocation12_spill] sm:$0xff] %v12687_v42  ;;  %v12689_v21 = vpop.f32.mrb[158].mxu1 }
 0x59b   : > { %14635 = vst [vmem:[#allocation16_spill] sm:$0xff] %v12689_v21  ;;  %v12693_v11 = vpack.c.bf16 %v12689_v21, %v12685_v45  ;;  %v12695_v17 = vpop.f32.mrb[159].mxu1 }
 0x59c   : > { %14636 = vst [vmem:[#allocation22_spill] sm:$0xff] %v12695_v17  ;;  %v12699_v55 = vpack.c.bf16 %v12695_v17, %v12687_v42 }
 0x59e   : > { %9952 = vmatprep.mubr.msk.bf16.mxu0 %vm1304_vm1, %v12699_v55 }
 0x59f   : > { %9953 = vmatmul.mubr.msk.bf16.gmra.mrb[124].mxu0 %vm1304_vm1, %v12693_v11 }
 0x5b8   : > { %v12705_v39 = vpop.f32.mrb[160].mxu1 }
 0x5b9   : > { %14637 = vst [vmem:[#allocation26_spill] sm:$0xff] %v12705_v39  ;;  %v12707_v35 = vpop.f32.mrb[161].mxu1 }
 0x5ba   : > { %14638 = vst [vmem:[#allocation20_spill] sm:$0xff] %v12707_v35  ;;  %v12709_v31 = vpop.f32.mrb[162].mxu1 }
 0x5bb   : > { %14639 = vst [vmem:[#allocation24_spill] sm:$0xff] %v12709_v31  ;;  %v12713_v38 = vpack.c.bf16 %v12709_v31, %v12705_v39  ;;  %v12715_v8 = vpop.f32.mrb[163].mxu1 }
 0x5bc   : > { %14640 = vst [vmem:[#allocation7_spill] sm:$0xff] %v12715_v8  ;;  %v4380_v49 = vpack.c.bf16 %v12715_v8, %v12707_v35 }
 0x5be   : > { %9956 = vmatprep.mubr.msk.bf16.mxu0 %vm1304_vm1, %v4380_v49 }
 0x5bf   : > { %9957 = vmatmul.mubr.msk.bf16.gmra.mrb[128].mxu0 %vm1304_vm1, %v12713_v38 }
 0x5d8   : > { %v12722_v13 = vpop.f32.mrb[164].mxu1 }
 0x5d9   : > { %14641 = vst [vmem:[#allocation11_spill] sm:$0xff] %v12722_v13  ;;  %v12724_v30 = vpop.f32.mrb[165].mxu1 }
 0x5da   : > { %14642 = vst [vmem:[#allocation5_spill] sm:$0xff] %v12724_v30  ;;  %v12726_v32 = vpop.f32.mrb[166].mxu1 }
 0x5db   : > { %14643 = vst [vmem:[#allocation9_spill] sm:$0xff] %v12726_v32  ;;  %v4383_v2 = vpack.c.bf16 %v12726_v32, %v12722_v13  ;;  %v12730_v43 = vpop.f32.mrb[167].mxu1 }
 0x5dc   : > { %14644 = vst [vmem:[#allocation15_spill] sm:$0xff] %v12730_v43  ;;  %v4382_v16 = vpack.c.bf16 %v12730_v43, %v12724_v30 }
 0x5de   : > { %9960 = vmatprep.mubr.msk.bf16.mxu0 %vm1304_vm1, %v4382_v16 }
 0x5df   : > { %9961 = vmatmul.mubr.msk.bf16.gmra.mrb[132].mxu0 %vm1304_vm1, %v4383_v2 }
 0x5f8   : > { %v12736_v19 = vpop.f32.mrb[168].mxu1 }
 0x5f9   : > { %14645 = vst [vmem:[#allocation19_spill] sm:$0xff] %v12736_v19  ;;  %v12738_v26 = vpop.f32.mrb[169].mxu1 }
 0x5fa   : > { %14646 = vst [vmem:[#allocation13_spill] sm:$0xff] %v12738_v26  ;;  %v12740_v59 = vpop.f32.mrb[170].mxu1 }
 0x5fb   : > { %14647 = vst [vmem:[#allocation17_spill] sm:$0xff] %v12740_v59  ;;  %v4385_v10 = vpack.c.bf16 %v12740_v59, %v12736_v19  ;;  %v12744_v0 = vpop.f32.mrb[171].mxu1 }
 0x5fc   : > { %14648 = vst [vmem:[#allocation23_spill] sm:$0xff] %v12744_v0  ;;  %v4384_v20 = vpack.c.bf16 %v12744_v0, %v12738_v26 }
 0x5fe   : > { %9964 = vmatprep.mubr.msk.bf16.mxu0 %vm1304_vm1, %v4384_v20 }
 0x5ff   : > { %9965 = vmatmul.mubr.msk.bf16.gmra.mrb[136].mxu0 %vm1304_vm1, %v4385_v10 }
 0x618   : > { %v12750_v15 = vpop.f32.mrb[172].mxu1 }
 0x619   : > { %14649 = vst [vmem:[#allocation27_spill] sm:$0xff] %v12750_v15  ;;  %v12752_v47 = vpop.f32.mrb[173].mxu1 }
 0x61a   : > { %14650 = vst [vmem:[#allocation21_spill] sm:$0xff] %v12752_v47  ;;  %v12754_v58 = vpop.f32.mrb[174].mxu1 }
 0x61b   : > { %14651 = vst [vmem:[#allocation25_spill] sm:$0xff] %v12754_v58  ;;  %v4387_v53 = vpack.c.bf16 %v12754_v58, %v12750_v15  ;;  %v12758_v50 = vpop.f32.mrb[175].mxu1  ;;  %v12876_v15 = vld [vmem:[%s14453_s5] sm:$0xff] }
 0x61c   : > { %14652 = vst [vmem:[#allocation29_spill] sm:$0xff] %v12758_v50  ;;  %v4386_v27 = vpack.c.bf16 %v12758_v50, %v12752_v47 }
 0x61e   : > { %9968 = vmatprep.mubr.msk.bf16.mxu0 %vm1304_vm1, %v4386_v27 }
 0x61f   : > { %9969 = vmatmul.mubr.msk.bf16.gmra.mrb[140].mxu0 %vm1304_vm1, %v4387_v53 }
 0x620   : > { %9980 = vmatprep.mubr.msk.bf16.mxu0 %vm1304_vm1, %v12626_v9  ;;  %v5898_v9 = vmul.bf16 %v10551_v36, %v8754_v57 }
 0x627   : > { %9981 = vmatmul.mubr.msk.bf16.vlgmr.msra.gmra.mrb[144].mxu0 %vm1304_vm1, %v12620_v34 }
 0x628   : > { %10053 = vmatpush3.bf16.msra.mxu0 %v5895_v40  ;;  %9984 = vmatprep.mubr.msk.bf16.mxu0 %vm1304_vm1, %v12646_v14 }
 0x629   : > { %10054 = vmatprep.subr.bf16.mxu0 %v14580_v5 }
 0x62a   : > { %v12779_v23 = vpop.f32.mrb[112].mxu0 }
 0x62b   : > { %v12784_v48 = vpop.f32.mrb[113].mxu0 }
 0x62c   : > { %10055 = vmatpush3.bf16.msra.mxu0 %v5896_v54  ;;  %v12786_v46 = vpop.f32.mrb[114].mxu0 }
 0x62d   : > { %v12788_v33 = vpop.f32.mrb[115].mxu0  ;;  %10056 = vmatprep.subr.bf16.mxu0 %v14580_v5 }
 0x62f   : > { %9985 = vmatmul.mubr.msk.bf16.gmra.mrb[148].mxu0 %vm1304_vm1, %v12640_v52 }
 0x630   : > { %10057 = vmatpush3.bf16.msra.mxu0 %v5897_v63  ;;  %9988 = vmatprep.mubr.msk.bf16.mxu0 %vm1304_vm1, %v12672_v7 }
 0x631   : > { %10058 = vmatprep.subr.bf16.mxu0 %v14580_v5 }
 0x632   : > { %v12799_v34 = vpop.f32.mrb[116].mxu0 }
 0x633   : > { %v12801_v14 = vpop.f32.mrb[117].mxu0 }
 0x634   : > { %10059 = vmatpush3.bf16.msra.mxu0 %v5898_v9  ;;  %v12803_v22 = vpop.f32.mrb[118].mxu0 }
 0x635   : > { %v12805_v37 = vpop.f32.mrb[119].mxu0  ;;  %10076 = vmatprep.subr.bf16.mxu0 %v14580_v5 }
 0x637   : > { %9989 = vmatmul.mubr.msk.bf16.gmra.mrb[152].mxu0 %vm1304_vm1, %v12666_v61 }
 0x638   : > { %9992 = vmatprep.mubr.msk.bf16.mxu0 %vm1304_vm1, %v12699_v55 }
 0x63f   : > { %9993 = vmatmul.mubr.msk.bf16.gmra.mrb[156].mxu0 %vm1304_vm1, %v12693_v11 }
 0x640   : > { %9996 = vmatprep.mubr.msk.bf16.mxu0 %vm1304_vm1, %v4380_v49 }
 0x647   : > { %9997 = vmatmul.mubr.msk.bf16.gmra.mrb[160].mxu0 %vm1304_vm1, %v12713_v38 }
 0x648   : > { %10000 = vmatprep.mubr.msk.bf16.mxu0 %vm1304_vm1, %v4382_v16 }
 0x64f   : > { %10001 = vmatmul.mubr.msk.bf16.gmra.mrb[164].mxu0 %vm1304_vm1, %v4383_v2 }
 0x650   : > { %10004 = vmatprep.mubr.msk.bf16.mxu0 %vm1304_vm1, %v4384_v20 }
 0x652   : > { %v12820_v52 = vpop.f32.mrb[120].mxu0 }
 0x653   : > { %v12822_v61 = vpop.f32.mrb[121].mxu0 }
 0x654   : > { %v12824_v7 = vpop.f32.mrb[122].mxu0 }
 0x655   : > { %v12826_v60 = vpop.f32.mrb[123].mxu0 }
 0x657   : > { %10005 = vmatmul.mubr.msk.bf16.gmra.mrb[168].mxu0 %vm1304_vm1, %v4385_v10 }
 0x658   : > { %10008 = vmatprep.mubr.msk.bf16.mxu0 %vm1304_vm1, %v4386_v27 }
 0x65f   : > { %10009 = vmatmul.mubr.msk.bf16.gmra.mrb[172].mxu0 %vm1304_vm1, %v4387_v53 }
 0x660   : > { %10060 = vmatprep.mubr.msk.bf16.mxu0 %vm11034_vm4, %v14580_v5 }
 0x672   : > { %v12833_v25 = vpop.f32.mrb[124].mxu0 }
 0x673   : > { %v12835_v11 = vpop.f32.mrb[125].mxu0 }
 0x674   : > { %v12837_v55 = vpop.f32.mrb[126].mxu0 }
 0x675   : > { %v12839_v38 = vpop.f32.mrb[127].mxu0 }
 0x692   : > { %v12841_v49 = vpop.f32.mrb[128].mxu0 }
 0x693   : > { %v12843_v2 = vpop.f32.mrb[129].mxu0 }
 0x694   : > { %v12845_v16 = vpop.f32.mrb[130].mxu0 }
 0x695   : > { %v12847_v10 = vpop.f32.mrb[131].mxu0 }
 0x6b2   : > { %v12849_v20 = vpop.f32.mrb[132].mxu0 }
 0x6b3   : > { %v12851_v53 = vpop.f32.mrb[133].mxu0 }
 0x6b4   : > { %v12853_v27 = vpop.f32.mrb[134].mxu0 }
 0x6b5   : > { %v12855_v57 = vpop.f32.mrb[135].mxu0 }
 0x6d2   : > { %v12857_v41 = vpop.f32.mrb[136].mxu0 }
 0x6d3   : > { %v12859_v40 = vpop.f32.mrb[137].mxu0 }
 0x6d4   : > { %v12861_v24 = vpop.f32.mrb[138].mxu0 }
 0x6d5   : > { %v12863_v54 = vpop.f32.mrb[139].mxu0 }
 0x6f2   : > { %v12865_v12 = vpop.f32.mrb[140].mxu0 }
 0x6f3   : > { %v12867_v63 = vpop.f32.mrb[141].mxu0 }
 0x6f4   : > { %v12869_v36 = vpop.f32.mrb[142].mxu0 }
 0x6f5   : > { %v12871_v9 = vpop.f32.mrb[143].mxu0 }
 0x6fa   : > { %v9982_v58 = vpop.f32.mrb[144].mxu0 }
 0x6fb   : > { %v4824_v50 = vmul.f32 %v12876_v15, %v9982_v58  ;;  %v4695_v47 = vpop.f32.mrb[145].mxu0 }
 0x6fc   : > { %v4822_v59 = vmul.f32 %v12876_v15, %v4695_v47  ;;  %v9983_v19 = vpop.f32.mrb[146].mxu0 }
 0x6fd   : > { %v4868_v0 = vsel %vm1304_vm1, %v4824_v50, 0.0  ;;  %v4825_v26 = vmul.f32 %v12876_v15, %v9983_v19  ;;  %v4698_v32 = vpop.f32.mrb[147].mxu0 }
 0x6fe   : > { %v4869_v13 = vrot.slane %v4868_v0, 4  ;;  %v4854_v43 = vsel %vm1304_vm1, %v4822_v59, 0.0  ;;  %v4823_v30 = vmul.f32 %v12876_v15, %v4698_v32 }
 0x6ff   : > { %v4855_v31 = vrot.slane %v4854_v43, 4  ;;  %v4875_v39 = vsel %vm1304_vm1, %v4825_v26, 0.0 }
 0x700   : > { %v4870_v8 = vadd.f32 %v4869_v13, %v4868_v0  ;;  %v4876_v35 = vrot.slane %v4875_v39, 4  ;;  %v4861_v58 = vsel %vm1304_vm1, %v4823_v30, 0.0 }
 0x701   : > { %v4856_v21 = vadd.f32 %v4855_v31, %v4854_v43  ;;  %v4862_v47 = vrot.slane %v4861_v58, 4 }
 0x702   : > { %v4871_v45 = vrot.slane %v4870_v8, 2  ;;  %v4877_v17 = vadd.f32 %v4876_v35, %v4875_v39  ;;  %v9986_v50 = vpop.f32.mrb[148].mxu0 }
 0x703   : > { %v4857_v42 = vrot.slane %v4856_v21, 2  ;;  %v4863_v19 = vadd.f32 %v4862_v47, %v4861_v58  ;;  %v4828_v18 = vmul.f32 %v12876_v15, %v9986_v50  ;;  %v4711_v4 = vpop.f32.mrb[149].mxu0 }
 0x704   : > { %v4872_v59 = vadd.f32 %v4871_v45, %v4870_v8  ;;  %v4878_v29 = vrot.slane %v4877_v17, 2  ;;  %v4826_v32 = vmul.f32 %v12876_v15, %v4711_v4  ;;  %v9987_v56 = vpop.f32.mrb[150].mxu0 }
 0x705   : > { %v4858_v26 = vadd.f32 %v4857_v42, %v4856_v21  ;;  %v4864_v13 = vrot.slane %v4863_v19, 2  ;;  %v4896_v0 = vsel %vm1304_vm1, %v4828_v18, 0.0  ;;  %v4829_v31 = vmul.f32 %v12876_v15, %v9987_v56  ;;  %v4714_v30 = vpop.f32.mrb[151].mxu0 }
 0x706   : > { %v4873_v43 = vrot.slane %v4872_v59, 1  ;;  %v4879_v39 = vadd.f32 %v4878_v29, %v4877_v17  ;;  %v4897_v35 = vrot.slane %v4896_v0, 4  ;;  %v4882_v58 = vsel %vm1304_vm1, %v4826_v32, 0.0 }
 0x707   : > { %v4859_v47 = vrot.slane %v4858_v26, 1  ;;  %v4865_v50 = vadd.f32 %v4864_v13, %v4863_v19  ;;  %v4883_v6 = vrot.slane %v4882_v58, 4  ;;  %v4903_v45 = vsel %vm1304_vm1, %v4829_v31, 0.0 }
 0x708   : > { %v4874_v8 = vadd.f32 %v4873_v43, %v4872_v59  ;;  %v4880_v4 = vrot.slane %v4879_v39, 1  ;;  %v4898_v62 = vadd.f32 %v4897_v35, %v4896_v0  ;;  %v4904_v42 = vrot.slane %v4903_v45, 4 }
 0x709   : > { %v4860_v21 = vadd.f32 %v4859_v47, %v4858_v26  ;;  %v4866_v3 = vrot.slane %v4865_v50, 1  ;;  %v4884_v18 = vadd.f32 %v4883_v6, %v4882_v58  ;;  %v4827_v56 = vmul.f32 %v12876_v15, %v4714_v30 }
 0x70a   : > { %v12893_v44 = vadd.f32 %v4880_v4, %v4879_v39  ;;  %v4899_v29 = vrot.slane %v4898_v62, 2  ;;  %v4905_v17 = vadd.f32 %v4904_v42, %v4903_v45  ;;  %v9990_v51 = vpop.f32.mrb[152].mxu0  ;;  %v12896_v32 = vadd.f32 %v12779_v23, %v4874_v8 }
 0x70b   : > { %v4867_v19 = vadd.f32 %v4866_v3, %v4865_v50  ;;  %v4885_v13 = vrot.slane %v4884_v18, 2  ;;  %v4889_v59 = vsel %vm1304_vm1, %v4827_v56, 0.0  ;;  %v4832_v0 = vmul.f32 %v12876_v15, %v9990_v51  ;;  %v4727_v31 = vpop.f32.mrb[153].mxu0 }
 0x70c   : > { %v4900_v26 = vadd.f32 %v4899_v29, %v4898_v62  ;;  %v4906_v43 = vrot.slane %v4905_v17, 2  ;;  %v4890_v6 = vrot.slane %v4889_v59, 4  ;;  %v4830_v30 = vmul.f32 %v12876_v15, %v4727_v31  ;;  %v9991_v39 = vpop.f32.mrb[154].mxu0 }
 0x70d   : > { %v4886_v35 = vadd.f32 %v4885_v13, %v4884_v18  ;;  %v4924_v58 = vsel %vm1304_vm1, %v4832_v0, 0.0  ;;  %v4833_v47 = vmul.f32 %v12876_v15, %v9991_v39  ;;  %v4730_v23 = vpop.f32.mrb[155].mxu0  ;;  %v5078_v3 = vadd.f32 %v4860_v21, %v12784_v48 }
 0x70e   : > { %v4901_v50 = vrot.slane %v4900_v26, 1  ;;  %v4907_v45 = vadd.f32 %v4906_v43, %v4905_v17  ;;  %v4891_v8 = vadd.f32 %v4890_v6, %v4889_v59  ;;  %v4925_v4 = vrot.slane %v4924_v58, 4 }
 0x70f   : > { %v4887_v51 = vrot.slane %v4886_v35, 1  ;;  %v4910_v62 = vsel %vm1304_vm1, %v4830_v30, 0.0  ;;  %v4931_v42 = vsel %vm1304_vm1, %v4833_v47, 0.0  ;;  %v4831_v56 = vmul.f32 %v12876_v15, %v4730_v23 }
 0x710   : > { %v12907_v29 = vadd.f32 %v4901_v50, %v4900_v26  ;;  %v4908_v18 = vrot.slane %v4907_v45, 1  ;;  %v4892_v13 = vrot.slane %v4891_v8, 2  ;;  %v4926_v0 = vadd.f32 %v4925_v4, %v4924_v58 }
 0x711   : > { %v12909_v31 = vadd.f32 %v4887_v51, %v4886_v35  ;;  %v4911_v39 = vrot.slane %v4910_v62, 4  ;;  %v4932_v48 = vrot.slane %v4931_v42, 4  ;;  %v4917_v21 = vsel %vm1304_vm1, %v4831_v56, 0.0 }
 0x712   : > { %v12912_v17 = vadd.f32 %v4908_v18, %v4907_v45  ;;  %v4893_v59 = vadd.f32 %v4892_v13, %v4891_v8  ;;  %v4927_v43 = vrot.slane %v4926_v0, 2  ;;  %v4918_v6 = vrot.slane %v4917_v21, 4  ;;  %v9994_v30 = vpop.f32.mrb[156].mxu0 }
 0x713   : > { %v4912_v47 = vadd.f32 %v4911_v39, %v4910_v62  ;;  %v4933_v28 = vadd.f32 %v4932_v48, %v4931_v42  ;;  %vm5110_vm9 = vcmp.gt.f32.partialorder %v5078_v3, 0.0  ;;  %v5142_v26 = vmul.f32 0.2, %v5078_v3  ;;  %v4743_v23 = vpop.f32.mrb[157].mxu0 }
 0x714   : > { %v4894_v50 = vrot.slane %v4893_v59, 1  ;;  %v4928_v5 = vadd.f32 %v4927_v43, %v4926_v0  ;;  %v4919_v58 = vadd.f32 %v4918_v6, %v4917_v21  ;;  %v4836_v35 = vmul.f32 %v12876_v15, %v9994_v30  ;;  %v9995_v4 = vpop.f32.mrb[158].mxu0 }
 0x715   : > { %v4913_v51 = vrot.slane %v4912_v47, 2  ;;  %v4934_v1 = vrot.slane %v4933_v28, 2  ;;  %v12915_v56 = vsel %vm5110_vm9, %v5078_v3, %v5142_v26  ;;  %v5079_v45 = vadd.f32 %v4867_v19, %v12788_v33  ;;  %v4746_v8 = vpop.f32.mrb[159].mxu0 }
 0x716   : > { %14653 = vst [vmem:[#allocation31_spill] sm:$0xff] %v12915_v56  ;;  %v12918_v18 = vadd.f32 %v4894_v50, %v4893_v59  ;;  %v4929_v62 = vrot.slane %v4928_v5, 1  ;;  %v4920_v42 = vrot.slane %v4919_v58, 2  ;;  %v5206_v13 = vsel %vm1304_vm1, %v12915_v56, -inf }
 0x717   : > { %v4914_v39 = vadd.f32 %v4913_v51, %v4912_v47  ;;  %v4935_v0 = vadd.f32 %v4934_v1, %v4933_v28  ;;  %5207 = vmax.xlane.f32.xlu0 %v5206_v13  ;;  %v4952_v48 = vsel %vm1304_vm1, %v4836_v35, 0.0  ;;  %vm5111_vm10 = vcmp.gt.f32.partialorder %v5079_v45, 0.0 }
 0x718   : > { %v12923_v21 = vadd.f32 %v4929_v62, %v4928_v5  ;;  %v4921_v3 = vadd.f32 %v4920_v42, %v4919_v58  ;;  %v4953_v43 = vrot.slane %v4952_v48, 4  ;;  %v5143_v6 = vmul.f32 0.2, %v5079_v45 }
 0x719   : > { %v4915_v33 = vrot.slane %v4914_v39, 1  ;;  %v4936_v19 = vrot.slane %v4935_v0, 1  ;;  %v4834_v59 = vmul.f32 %v12876_v15, %v4743_v23  ;;  %v4837_v30 = vmul.f32 %v12876_v15, %v9995_v4 }
 0x71a   : > { %v4922_v26 = vrot.slane %v4921_v3, 1  ;;  %v4954_v50 = vadd.f32 %v4953_v43, %v4952_v48  ;;  %v12927_v56 = vsel %vm5111_vm10, %v5079_v45, %v5143_v6  ;;  %vm5112_vm11 = vcmp.gt.f32.partialorder %v12896_v32, 0.0  ;;  %v9998_v28 = vpop.f32.mrb[160].mxu0 }
 0x71b   : > { %v12930_v1 = vadd.f32 %v4915_v33, %v4914_v39  ;;  %v12932_v5 = vadd.f32 %v4936_v19, %v4935_v0  ;;  %v5209_v47 = vsel %vm1304_vm1, %v12927_v56, -inf  ;;  %v4938_v58 = vsel %vm1304_vm1, %v4834_v59, 0.0  ;;  %v4759_v35 = vpop.f32.mrb[161].mxu0 }
 0x71c   : > { %v12937_v23 = vadd.f32 %v4922_v26, %v4921_v3  ;;  %v4955_v4 = vrot.slane %v4954_v50, 2  ;;  %5210 = vmax.xlane.f32.xlu1 %v5209_v47  ;;  %v4939_v51 = vrot.slane %v4938_v58, 4  ;;  %v4959_v45 = vsel %vm1304_vm1, %v4837_v30, 0.0  ;;  %v9999_v62 = vpop.f32.mrb[162].mxu0 }
 0x71d   : > { %v4960_v42 = vrot.slane %v4959_v45, 4  ;;  %v5144_v13 = vmul.f32 0.2, %v12896_v32  ;;  %v4835_v39 = vmul.f32 %v12876_v15, %v4746_v8  ;;  %v5081_v0 = vadd.f32 %v12786_v46, %v12893_v44  ;;  %v4762_v48 = vpop.f32.mrb[163].mxu0 }
 0x71e   : > { %v4956_v43 = vadd.f32 %v4955_v4, %v4954_v50  ;;  %v4940_v6 = vadd.f32 %v4939_v51, %v4938_v58  ;;  %v5082_v3 = vadd.f32 %v12909_v31, %v12801_v14  ;;  %v4840_v33 = vmul.f32 %v12876_v15, %v9998_v28 }
 0x71f   : > { %v4961_v19 = vadd.f32 %v4960_v42, %v4959_v45  ;;  %v12950_v59 = vsel %vm5112_vm11, %v12896_v32, %v5144_v13  ;;  %v4945_v30 = vsel %vm1304_vm1, %v4835_v39, 0.0  ;;  %vm5113_vm12 = vcmp.gt.f32.partialorder %v5081_v0, 0.0 }
 0x720   : > { %14654 = vst [vmem:[#allocation28_spill] sm:$0xff] %v12950_v59  ;;  %v4957_v8 = vrot.slane %v4956_v43, 1  ;;  %v4941_v26 = vrot.slane %v4940_v6, 2  ;;  %v5212_v44 = vsel %vm1304_vm1, %v12950_v59, -inf  ;;  %v4946_v46 = vrot.slane %v4945_v30, 4 }
 0x721   : > { %v4962_v50 = vrot.slane %v4961_v19, 2  ;;  %5213 = vmax.xlane.f32.xlu0 %v5212_v44  ;;  %v5145_v14 = vmul.f32 0.2, %v5081_v0  ;;  %vm5114_vm13 = vcmp.gt.f32.partialorder %v5082_v3, 0.0  ;;  %v5146_v31 = vmul.f32 0.2, %v5082_v3 }
 0x722   : > { %v12955_v28 = vadd.f32 %v4957_v8, %v4956_v43  ;;  %v4942_v47 = vadd.f32 %v4941_v26, %v4940_v6  ;;  %v4947_v58 = vadd.f32 %v4946_v46, %v4945_v30  ;;  %v4980_v32 = vsel %vm1304_vm1, %v4840_v33, 0.0  ;;  %v10002_v4 = vpop.f32.mrb[164].mxu0 }
 0x723   : > { %v4963_v51 = vadd.f32 %v4962_v50, %v4961_v19  ;;  %v12959_v45 = vsel %vm5113_vm12, %v5081_v0, %v5145_v14  ;;  %v12961_v42 = vsel %vm5114_vm13, %v5082_v3, %v5146_v31  ;;  %v4981_v13 = vrot.slane %v4980_v32, 4  ;;  %v12963_v39 = vpop.f32.mrb[165].mxu0 }
 0x724   : > { %14655 = vst [vmem:[#allocation30_spill] sm:$0xff] %v12961_v42  ;;  %v4943_v44 = vrot.slane %v4942_v47, 1  ;;  %v4948_v59 = vrot.slane %v4947_v58, 2  ;;  %v5215_v43 = vsel %vm1304_vm1, %v12959_v45, -inf  ;;  %v5218_v6 = vsel %vm1304_vm1, %v12961_v42, -inf  ;;  %v12969_v30 = vpop.f32.mrb[166].mxu0 }
 0x725   : > { %v4964_v33 = vrot.slane %v4963_v51, 1  ;;  %5216 = vmax.xlane.f32.xlu1 %v5215_v43  ;;  %5219 = vmax.xlane.f32.xlu0 %v5218_v6  ;;  %v4982_v0 = vadd.f32 %v4981_v13, %v4980_v32  ;;  %v5083_v3 = vadd.f32 %v12918_v18, %v12805_v37  ;;  %v4838_v19 = vmul.f32 %v12876_v15, %v4759_v35  ;;  %v12974_v8 = vpop.f32.mrb[167].mxu0 }
 0x726   : > { %v12976_v26 = vadd.f32 %v4943_v44, %v4942_v47  ;;  %v4949_v46 = vadd.f32 %v4948_v59, %v4947_v58  ;;  %v4841_v50 = vmul.f32 %v12876_v15, %v9999_v62  ;;  %v5084_v14 = vadd.f32 %v12799_v34, %v12907_v29 }
 0x727   : > { %v12981_v31 = vadd.f32 %v4964_v33, %v4963_v51  ;;  %v4983_v43 = vrot.slane %v4982_v0, 2  ;;  %vm5115_vm14 = vcmp.gt.f32.partialorder %v5083_v3, 0.0  ;;  %v5147_v32 = vmul.f32 0.2, %v5083_v3 }
 0x728   : > { %v4950_v13 = vrot.slane %v4949_v46, 1  ;;  %v4966_v37 = vsel %vm1304_vm1, %v4838_v19, 0.0  ;;  %v4987_v18 = vsel %vm1304_vm1, %v4841_v50, 0.0  ;;  %vm5116_vm15 = vcmp.gt.f32.partialorder %v5084_v14, 0.0 }
 0x729   : > { %v4984_v35 = vadd.f32 %v4983_v43, %v4982_v0  ;;  %v12985_v47 = vsel %vm5115_vm14, %v5083_v3, %v5147_v32  ;;  %v4967_v59 = vrot.slane %v4966_v37, 4  ;;  %v4988_v58 = vrot.slane %v4987_v18, 4 }
 0x72a   : > { %14656 = vst [vmem:[#allocation36_spill] sm:$0xff] %v12985_v47  ;;  %v12987_v62 = vadd.f32 %v4950_v13, %v4949_v46  ;;  %v5221_v34 = vsel %vm1304_vm1, %v12985_v47, -inf  ;;  %v5148_v29 = vmul.f32 0.2, %v5084_v14  ;;  %v4839_v51 = vmul.f32 %v12876_v15, %v4762_v48  ;;  %v12992_v44 = vpop.f32.mrb[168].mxu0 }
 0x72b   : > { %v4985_v6 = vrot.slane %v4984_v35, 1  ;;  %5222 = vmax.xlane.f32.xlu1 %v5221_v34  ;;  %v4968_v33 = vadd.f32 %v4967_v59, %v4966_v37  ;;  %v4989_v19 = vadd.f32 %v4988_v58, %v4987_v18  ;;  %v5085_v0 = vadd.f32 %v12803_v22, %v12912_v17  ;;  %v12996_v3 = vpop.f32.mrb[169].mxu0 }
 0x72c   : > { %v12999_v46 = vsel %vm5116_vm15, %v5084_v14, %v5148_v29  ;;  %v4973_v50 = vsel %vm1304_vm1, %v4839_v51, 0.0  ;;  %v5086_v43 = vadd.f32 %v12930_v1, %v12822_v61  ;;  %v4844_v48 = vmul.f32 %v12876_v15, %v10002_v4  ;;  %v13005_v32 = vpop.f32.mrb[170].mxu0 }
 0x72d   : > { %14657 = vst [vmem:[#allocation37_spill] sm:$0xff] %v12999_v46  ;;  %v13007_v13 = vadd.f32 %v4985_v6, %v4984_v35  ;;  %v4969_v37 = vrot.slane %v4968_v33, 2  ;;  %v4990_v18 = vrot.slane %v4989_v19, 2  ;;  %v5224_v22 = vsel %vm1304_vm1, %v12999_v46, -inf  ;;  %v13011_v17 = vpop.f32.mrb[171].mxu0 }
 0x72e   : > { %5225 = vmax.xlane.f32.xlu0 %v5224_v22  ;;  %v4974_v14 = vrot.slane %v4973_v50, 4  ;;  %vm5117_vm0 = vcmp.gt.f32.partialorder %v5085_v0, 0.0  ;;  %v5149_v59 = vmul.f32 0.2, %v5085_v0  ;;  %vm5118_vm2 = vcmp.gt.f32.partialorder %v5086_v43, 0.0 }
 0x72f   : > { %v4970_v58 = vadd.f32 %v4969_v37, %v4968_v33  ;;  %v4991_v61 = vadd.f32 %v4990_v18, %v4989_v19  ;;  %v5150_v1 = vmul.f32 0.2, %v5086_v43  ;;  %v5008_v4 = vsel %vm1304_vm1, %v4844_v48, 0.0 }
 0x730   : > { %v4975_v34 = vadd.f32 %v4974_v14, %v4973_v50  ;;  %v13014_v35 = vsel %vm5117_vm0, %v5085_v0, %v5149_v59  ;;  %v5009_v29 = vrot.slane %v5008_v4, 4  ;;  %v5087_v51 = vadd.f32 %v12937_v23, %v12826_v60 }
 0x731   : > { %v4971_v6 = vrot.slane %v4970_v58, 1  ;;  %v4992_v46 = vrot.slane %v4991_v61, 1  ;;  %v5227_v22 = vsel %vm1304_vm1, %v13014_v35, -inf  ;;  %v13020_v47 = vsel %vm5118_vm2, %v5086_v43, %v5150_v1 }
 0x732   : > { %v4976_v42 = vrot.slane %v4975_v34, 2  ;;  %5228 = vmax.xlane.f32.xlu1 %v5227_v22  ;;  %v5230_v33 = vsel %vm1304_vm1, %v13020_v47, -inf  ;;  %v5010_v19 = vadd.f32 %v5009_v29, %v5008_v4  ;;  %vm5119_vm3 = vcmp.gt.f32.partialorder %v5087_v51, 0.0  ;;  %v13024_v0 = vpop.f32.mrb[172].mxu0 }
 0x733   : > { %v13026_v50 = vadd.f32 %v4971_v6, %v4970_v58  ;;  %v13028_v48 = vadd.f32 %v4992_v46, %v4991_v61  ;;  %5231 = vmax.xlane.f32.xlu0 %v5230_v33  ;;  %v5151_v60 = vmul.f32 0.2, %v5087_v51  ;;  %v4842_v23 = vmul.f32 %v12876_v15, %v12963_v39  ;;  %v13032_v43 = vpop.f32.mrb[173].mxu0 }
 0x734   : > { %v4977_v37 = vadd.f32 %v4976_v42, %v4975_v34  ;;  %v5011_v18 = vrot.slane %v5010_v19, 2  ;;  %v4845_v14 = vmul.f32 %v12876_v15, %v12969_v30  ;;  %v5088_v59 = vadd.f32 %v12820_v52, %v12923_v21  ;;  %v13038_v1 = vpop.f32.mrb[174].mxu0 }
 0x735   : > { %v13040_v58 = vsel %vm5119_vm3, %v5087_v51, %v5151_v60  ;;  %v4994_v46 = vsel %vm1304_vm1, %v4842_v23, 0.0  ;;  %v4843_v61 = vmul.f32 %v12876_v15, %v12974_v8  ;;  %v5089_v39 = vadd.f32 %v12824_v7, %v12932_v5  ;;  %v13047_v42 = vpop.f32.mrb[175].mxu0 }
 0x736   : > { %v4978_v4 = vrot.slane %v4977_v37, 1  ;;  %v5012_v34 = vadd.f32 %v5011_v18, %v5010_v19  ;;  %v5233_v30 = vsel %vm1304_vm1, %v13040_v58, -inf  ;;  %v4995_v52 = vrot.slane %v4994_v46, 4 }
 0x737   : > { %5234 = vmax.xlane.f32.xlu1 %v5233_v30  ;;  %v5015_v21 = vsel %vm1304_vm1, %v4845_v14, 0.0  ;;  %vm5120_vm5 = vcmp.gt.f32.partialorder %v5088_v59, 0.0  ;;  %v5152_v29 = vmul.f32 0.2, %v5088_v59  ;;  %v5001_v51 = vsel %vm1304_vm1, %v4843_v61, 0.0 }
 0x738   : > { %v13053_v6 = vadd.f32 %v4978_v4, %v4977_v37  ;;  %v5013_v8 = vrot.slane %v5012_v34, 1  ;;  %v4996_v22 = vadd.f32 %v4995_v52, %v4994_v46  ;;  %v5016_v7 = vrot.slane %v5015_v21, 4 }
 0x739   : > { %v13055_v5 = vsel %vm5120_vm5, %v5088_v59, %v5152_v29  ;;  %v5002_v33 = vrot.slane %v5001_v51, 4  ;;  %vm5121_vm6 = vcmp.gt.f32.partialorder %v5089_v39, 0.0  ;;  %v5153_v19 = vmul.f32 0.2, %v5089_v39 }
 0x73a   : > { %v13057_v60 = vadd.f32 %v5013_v8, %v5012_v34  ;;  %v4997_v23 = vrot.slane %v4996_v22, 2  ;;  %v5017_v18 = vadd.f32 %v5016_v7, %v5015_v21  ;;  %v5236_v14 = vsel %vm1304_vm1, %v13055_v5, -inf }
 0x73b   : > { %5237 = vmax.xlane.f32.xlu0 %v5236_v14  ;;  %v5003_v30 = vadd.f32 %v5002_v33, %v5001_v51  ;;  %v13061_v61 = vsel %vm5121_vm6, %v5089_v39, %v5153_v19  ;;  %v5090_v37 = vadd.f32 %v12976_v26, %v12835_v11  ;;  %v4848_v59 = vmul.f32 %v12876_v15, %v12992_v44 }
 0x73c   : > { %v4998_v46 = vadd.f32 %v4997_v23, %v4996_v22  ;;  %v5018_v4 = vrot.slane %v5017_v18, 2  ;;  %v5239_v34 = vsel %vm1304_vm1, %v13061_v61, -inf  ;;  %v5091_v52 = vadd.f32 %v12987_v62, %v12839_v38 }
 0x73d   : > { %v5004_v21 = vrot.slane %v5003_v30, 2  ;;  %5240 = vmax.xlane.f32.xlu1 %v5239_v34  ;;  %vm5122_vm7 = vcmp.gt.f32.partialorder %v5090_v37, 0.0  ;;  %v5154_v29 = vmul.f32 0.2, %v5090_v37  ;;  %v5036_v39 = vsel %vm1304_vm1, %v4848_v59, 0.0 }
 0x73e   : > { %v4999_v51 = vrot.slane %v4998_v46, 1  ;;  %v5019_v8 = vadd.f32 %v5018_v4, %v5017_v18  ;;  %v5037_v11 = vrot.slane %v5036_v39, 4  ;;  %vm5123_vm8 = vcmp.gt.f32.partialorder %v5091_v52, 0.0 }
 0x73f   : > { %v5005_v26 = vadd.f32 %v5004_v21, %v5003_v30  ;;  %v13072_v44 = vsel %vm5122_vm7, %v5090_v37, %v5154_v29  ;;  %v5155_v22 = vmul.f32 0.2, %v5091_v52  ;;  %v4846_v7 = vmul.f32 %v12876_v15, %v12996_v3 }
 0x740   : > { %v13076_v33 = vadd.f32 %v4999_v51, %v4998_v46  ;;  %v5020_v38 = vrot.slane %v5019_v8, 1  ;;  %v5242_v62 = vsel %vm1304_vm1, %v13072_v44, -inf  ;;  %v5038_v19 = vadd.f32 %v5037_v11, %v5036_v39 }
 0x741   : > { %v5006_v23 = vrot.slane %v5005_v26, 1  ;;  %5243 = vmax.xlane.f32.xlu0 %v5242_v62  ;;  %v13080_v14 = vsel %vm5123_vm8, %v5091_v52, %v5155_v22  ;;  %v5022_v18 = vsel %vm1304_vm1, %v4846_v7, 0.0  ;;  %v4849_v30 = vmul.f32 %v12876_v15, %v13005_v32 }
 0x742   : > { %v13085_v37 = vadd.f32 %v5020_v38, %v5019_v8  ;;  %v5039_v59 = vrot.slane %v5038_v19, 2  ;;  %v5245_v3 = vsel %vm1304_vm1, %v13080_v14, -inf  ;;  %v5023_v46 = vrot.slane %v5022_v18, 4 }
 0x743   : > { %v13089_v4 = vadd.f32 %v5006_v23, %v5005_v26  ;;  %5246 = vmax.xlane.f32.xlu1 %v5245_v3  ;;  %v5043_v34 = vsel %vm1304_vm1, %v4849_v30, 0.0  ;;  %v5092_v52 = vadd.f32 %v12833_v25, %v12955_v28  ;;  %v4847_v21 = vmul.f32 %v12876_v15, %v13011_v17 }
 0x744   : > { %v5040_v29 = vadd.f32 %v5039_v59, %v5038_v19  ;;  %v5024_v32 = vadd.f32 %v5023_v46, %v5022_v18  ;;  %v5044_v39 = vrot.slane %v5043_v34, 4  ;;  %v5093_v51 = vadd.f32 %v12837_v55, %v12981_v31 }
 0x745   : > { %vm5124_vm9 = vcmp.gt.f32.partialorder %v5092_v52, 0.0  ;;  %v5156_v8 = vmul.f32 0.2, %v5092_v52  ;;  %v5029_v11 = vsel %vm1304_vm1, %v4847_v21, 0.0  ;;  %v5094_v26 = vadd.f32 %v13026_v50, %v12843_v2 }
 0x746   : > { %v5041_v22 = vrot.slane %v5040_v29, 1  ;;  %v5025_v7 = vrot.slane %v5024_v32, 2  ;;  %v5045_v38 = vadd.f32 %v5044_v39, %v5043_v34  ;;  %v5030_v25 = vrot.slane %v5029_v11, 4 }
 0x747   : > { %v13101_v28 = vsel %vm5124_vm9, %v5092_v52, %v5156_v8  ;;  %vm5125_vm10 = vcmp.gt.f32.partialorder %v5093_v51, 0.0  ;;  %v5157_v17 = vmul.f32 0.2, %v5093_v51  ;;  %vm5126_vm11 = vcmp.gt.f32.partialorder %v5094_v26, 0.0 }
 0x748   : > { %v13103_v62 = vadd.f32 %v5041_v22, %v5040_v29  ;;  %v5026_v19 = vadd.f32 %v5025_v7, %v5024_v32  ;;  %v5046_v55 = vrot.slane %v5045_v38, 2  ;;  %v5248_v31 = vsel %vm1304_vm1, %v13101_v28, -inf }
 0x749   : > { %5249 = vmax.xlane.f32.xlu0 %v5248_v31  ;;  %v5031_v23 = vadd.f32 %v5030_v25, %v5029_v11  ;;  %v13107_v18 = vsel %vm5125_vm10, %v5093_v51, %v5157_v17  ;;  %v5158_v2 = vmul.f32 0.2, %v5094_v26  ;;  %v4852_v50 = vmul.f32 %v12876_v15, %v13024_v0 }
 0x74a   : > { %v5027_v30 = vrot.slane %v5026_v19, 1  ;;  %v5047_v59 = vadd.f32 %v5046_v55, %v5045_v38  ;;  %v5251_v3 = vsel %vm1304_vm1, %v13107_v18, -inf  ;;  %v5095_v46 = vadd.f32 %v13053_v6, %v12847_v10 }
 0x74b   : > { %v5032_v34 = vrot.slane %v5031_v23, 2  ;;  %5252 = vmax.xlane.f32.xlu1 %v5251_v3  ;;  %v13116_v52 = vsel %vm5126_vm11, %v5094_v26, %v5158_v2  ;;  %v5064_v21 = vsel %vm1304_vm1, %v4852_v50, 0.0  ;;  %v4850_v29 = vmul.f32 %v12876_v15, %v13032_v43 }
 0x74c   : > { %v13121_v32 = vadd.f32 %v5027_v30, %v5026_v19  ;;  %v5048_v0 = vrot.slane %v5047_v59, 1  ;;  %v5254_v39 = vsel %vm1304_vm1, %v13116_v52, -inf  ;;  %v5065_v51 = vrot.slane %v5064_v21, 4 }
 0x74d   : > { %v5033_v8 = vadd.f32 %v5032_v34, %v5031_v23  ;;  %5255 = vmax.xlane.f32.xlu0 %v5254_v39  ;;  %vm5127_vm12 = vcmp.gt.f32.partialorder %v5095_v46, 0.0  ;;  %v5159_v10 = vmul.f32 0.2, %v5095_v46  ;;  %v5050_v6 = vsel %vm1304_vm1, %v4850_v29, 0.0 }
 0x74e   : > { %v13126_v11 = vadd.f32 %v5048_v0, %v5047_v59  ;;  %v5066_v26 = vadd.f32 %v5065_v51, %v5064_v21  ;;  %v5051_v22 = vrot.slane %v5050_v6, 4  ;;  %v4853_v43 = vmul.f32 %v12876_v15, %v13038_v1 }
 0x74f   : > { %v5034_v7 = vrot.slane %v5033_v8, 1  ;;  %v13130_v38 = vsel %vm5127_vm12, %v5095_v46, %v5159_v10  ;;  %v5096_v25 = vadd.f32 %v12841_v49, %v13007_v13  ;;  %v4851_v17 = vmul.f32 %v12876_v15, %v13047_v42 }
 0x750   : > { %v5067_v19 = vrot.slane %v5066_v26, 2  ;;  %v5257_v55 = vsel %vm1304_vm1, %v13130_v38, -inf  ;;  %v5052_v31 = vadd.f32 %v5051_v22, %v5050_v6  ;;  %v5071_v23 = vsel %vm1304_vm1, %v4853_v43, 0.0 }
 0x751   : > { %v5035_v2 = vadd.f32 %v5034_v7, %v5033_v8  ;;  %5258 = vmax.xlane.f32.xlu1 %v5257_v55  ;;  %v5072_v50 = vrot.slane %v5071_v23, 4  ;;  %vm5128_vm13 = vcmp.gt.f32.partialorder %v5096_v25, 0.0  ;;  %v5160_v1 = vmul.f32 0.2, %v5096_v25 }
 0x752   : > { %v5068_v30 = vadd.f32 %v5067_v19, %v5066_v26  ;;  %v5053_v59 = vrot.slane %v5052_v31, 2  ;;  %v5057_v3 = vsel %vm1304_vm1, %v4851_v17, 0.0  ;;  %v5097_v49 = vadd.f32 %v12845_v16, %v13028_v48 }
 0x753   : > { %v5073_v15 = vadd.f32 %v5072_v50, %v5071_v23  ;;  %v13142_v13 = vsel %vm5128_vm13, %v5096_v25, %v5160_v1  ;;  %v5058_v42 = vrot.slane %v5057_v3, 4  ;;  %v5098_v46 = vadd.f32 %v13076_v33, %v12851_v53 }
 0x754   : > { %v5069_v34 = vrot.slane %v5068_v30, 1  ;;  %v5054_v21 = vadd.f32 %v5053_v59, %v5052_v31  ;;  %v5260_v29 = vsel %vm1304_vm1, %v13142_v13, -inf  ;;  %vm5129_vm14 = vcmp.gt.f32.partialorder %v5097_v49, 0.0 }
 0x755   : > { %v5074_v0 = vrot.slane %v5073_v15, 2  ;;  %5261 = vmax.xlane.f32.xlu0 %v5260_v29  ;;  %v5059_v39 = vadd.f32 %v5058_v42, %v5057_v3  ;;  %v5161_v51 = vmul.f32 0.2, %v5097_v49  ;;  %vm5130_vm15 = vcmp.gt.f32.partialorder %v5098_v46, 0.0 }
 0x756   : > { %v5070_v8 = vadd.f32 %v5069_v34, %v5068_v30  ;;  %v5055_v16 = vrot.slane %v5054_v21, 1  ;;  %v5162_v48 = vmul.f32 0.2, %v5098_v46  ;;  %v5099_v10 = vadd.f32 %v13089_v4, %v12855_v57 }
 0x757   : > { %v5075_v6 = vadd.f32 %v5074_v0, %v5073_v15  ;;  %v5060_v26 = vrot.slane %v5059_v39, 2  ;;  %v13150_v53 = vsel %vm5129_vm14, %v5097_v49, %v5161_v51  ;;  %v5100_v33 = vadd.f32 %v12849_v20, %v13057_v60 }
 0x758   : > { %v5056_v22 = vadd.f32 %v5055_v16, %v5054_v21  ;;  %v5263_v43 = vsel %vm1304_vm1, %v13150_v53, -inf  ;;  %v13156_v7 = vsel %vm5130_vm15, %v5098_v46, %v5162_v48  ;;  %vm5131_vm0 = vcmp.gt.f32.partialorder %v5099_v10, 0.0 }
 0x759   : > { %v5076_v25 = vrot.slane %v5075_v6, 1  ;;  %v5061_v17 = vadd.f32 %v5060_v26, %v5059_v39  ;;  %5264 = vmax.xlane.f32.xlu1 %v5263_v43  ;;  %v5266_v57 = vsel %vm1304_vm1, %v13156_v7, -inf  ;;  %v5163_v4 = vmul.f32 0.2, %v5099_v10 }
 0x75a   : > { %5267 = vmax.xlane.f32.xlu0 %v5266_v57  ;;  %vm5132_vm2 = vcmp.gt.f32.partialorder %v5100_v33, 0.0  ;;  %v5164_v19 = vmul.f32 0.2, %v5100_v33  ;;  %v5101_v20 = vadd.f32 %v12853_v27, %v13085_v37  ;;  %v5102_v60 = vadd.f32 %v13121_v32, %v12859_v40 }
 0x75b   : > { %v5077_v55 = vadd.f32 %v5076_v25, %v5075_v6  ;;  %v5062_v31 = vrot.slane %v5061_v17, 1  ;;  %v13164_v23 = vsel %vm5131_vm0, %v5099_v10, %v5163_v4  ;;  %v5103_v50 = vadd.f32 %v5035_v2, %v12863_v54 }
 0x75c   : > { %v5269_v1 = vsel %vm1304_vm1, %v13164_v23, -inf  ;;  %v13169_v30 = vsel %vm5132_vm2, %v5100_v33, %v5164_v19  ;;  %vm5133_vm3 = vcmp.gt.f32.partialorder %v5101_v20, 0.0  ;;  %v5165_v59 = vmul.f32 0.2, %v5101_v20 }
 0x75d   : > { %v5063_v3 = vadd.f32 %v5062_v31, %v5061_v17  ;;  %5270 = vmax.xlane.f32.xlu1 %v5269_v1  ;;  %v5272_v27 = vsel %vm1304_vm1, %v13169_v30, -inf  ;;  %vm5134_vm5 = vcmp.gt.f32.partialorder %v5102_v60, 0.0  ;;  %v5166_v40 = vmul.f32 0.2, %v5102_v60  ;;  %v14658_v17 = vld [vmem:[#allocation31_spill] sm:$0xff]  ;;  %v14659_v31 = vld [vmem:[#allocation28_spill] sm:$0xff] }
 0x75e   : > { %5273 = vmax.xlane.f32.xlu0 %v5272_v27  ;;  %v13173_v37 = vsel %vm5133_vm3, %v5101_v20, %v5165_v59  ;;  %vm5135_vm6 = vcmp.gt.f32.partialorder %v5103_v50, 0.0  ;;  %v5167_v32 = vmul.f32 0.2, %v5103_v50  ;;  %v5104_v54 = vadd.f32 %v12857_v41, %v13103_v62 }
 0x75f   : > { %v5275_v2 = vsel %vm1304_vm1, %v13173_v37, -inf  ;;  %v13179_v49 = vsel %vm5134_vm5, %v5102_v60, %v5166_v40  ;;  %v5105_v15 = vadd.f32 %v12861_v24, %v13126_v11  ;;  %v5106_v42 = vadd.f32 %v5056_v22, %v12867_v63  ;;  %v14660_v40 = vld [vmem:[#allocation30_spill] sm:$0xff] }
 0x760   : > { %v5278_v46 = vsel %vm1304_vm1, %v13179_v49, -inf  ;;  %v13186_v34 = vsel %vm5135_vm6, %v5103_v50, %v5167_v32  ;;  %vm5136_vm7 = vcmp.gt.f32.partialorder %v5104_v54, 0.0  ;;  %v5168_v21 = vmul.f32 0.2, %v5104_v54 }
 0x761   : > { %5276 = vmax.xlane.f32.xlu1 %v5275_v2  ;;  %v5281_v41 = vsel %vm1304_vm1, %v13186_v34, -inf  ;;  %vm5137_vm8 = vcmp.gt.f32.partialorder %v5105_v15, 0.0  ;;  %v5169_v62 = vmul.f32 0.2, %v5105_v15  ;;  %vm5138_vm9 = vcmp.gt.f32.partialorder %v5106_v42, 0.0 }
 0x762   : > { %5279 = vmax.xlane.f32.xlu0 %v5278_v46  ;;  %v13190_v29 = vsel %vm5136_vm7, %v5104_v54, %v5168_v21  ;;  %v5170_v24 = vmul.f32 0.2, %v5106_v42  ;;  %v5107_v63 = vadd.f32 %v5063_v3, %v12871_v9  ;;  %v5108_v11 = vadd.f32 %v12865_v12, %v5070_v8  ;;  %v14661_v46 = vld [vmem:[#allocation36_spill] sm:$0xff] }
 0x763   : > { %v5109_v0 = vadd.f32 %v12869_v36, %v5077_v55  ;;  %v5284_v16 = vsel %vm1304_vm1, %v13190_v29, -inf  ;;  %v13199_v48 = vsel %vm5137_vm8, %v5105_v15, %v5169_v62 }
 0x764   : > { %v13195_v39 = vsel %vm5138_vm9, %v5106_v42, %v5170_v24  ;;  %vm5139_vm10 = vcmp.gt.f32.partialorder %v5107_v63, 0.0  ;;  %v5171_v51 = vmul.f32 0.2, %v5107_v63  ;;  %v5172_v10 = vmul.f32 0.2, %v5108_v11 }
 0x765   : > { %5282 = vmax.xlane.f32.xlu1 %v5281_v41  ;;  %v5290_v6 = vsel %vm1304_vm1, %v13195_v39, -inf  ;;  %vm5140_vm11 = vcmp.gt.f32.partialorder %v5108_v11, 0.0  ;;  %v5287_v12 = vsel %vm1304_vm1, %v13199_v48, -inf  ;;  %v5173_v36 = vmul.f32 0.2, %v5109_v0 }
 0x766   : > { %5285 = vmax.xlane.f32.xlu0 %v5284_v16  ;;  %v13203_v9 = vsel %vm5139_vm10, %v5107_v63, %v5171_v51  ;;  %v13209_v26 = vsel %vm5140_vm11, %v5108_v11, %v5172_v10  ;;  %vm5141_vm12 = vcmp.gt.f32.partialorder %v5109_v0, 0.0  ;;  %v14663_v11 = vld [vmem:[#allocation34_spill] sm:$0xff] }
 0x767   : > { %v5293_v8 = vsel %vm1304_vm1, %v13203_v9, -inf  ;;  %v5296_v33 = vsel %vm1304_vm1, %v13209_v26, -inf  ;;  %v13213_v22 = vsel %vm5141_vm12, %v5109_v0, %v5173_v36  ;;  %v8755_v0 = vpack.c.bf16 %v14663_v11, %v14663_v11 }
 0x768   : > { %v5299_v43 = vsel %vm1304_vm1, %v13213_v22, -inf }
 0x769   : > { %5288 = vmax.xlane.f32.xlu1 %v5287_v12 }
 0x76a   : > { %5291 = vmax.xlane.f32.xlu0 %v5290_v6 }
 0x76d   : > { %5294 = vmax.xlane.f32.xlu1 %v5293_v8 }
 0x76e   : > { %5297 = vmax.xlane.f32.xlu0 %v5296_v33 }
 0x771   : > { %5300 = vmax.xlane.f32.xlu1 %v5299_v43 }
 0x7a4   : > { %v5208_v25 = vpop.xlane.xlu0 %5207 }
 0x7a5   : > { %v5302_v57 = vsub.f32 %v14658_v17, %v5208_v25  ;;  %v13244_v25 = vld [vmem:[%s14458_s10] sm:$0xff]  }
 0x7a6   : > { %v5899_v17 = vmul.bf16 %v13244_v25, %v8755_v0 }
 0x7a7   : > { %v5334_v4 = vmul.f32 1.442695, %v5302_v57 }
 0x7a9   : > { %v5211_v19 = vpop.xlane.xlu1 %5210  ;;  %10748 = vpow2.f32 %v5334_v4 }
 0x7aa   : > { %v5303_v20 = vsub.f32 %v12927_v56, %v5211_v19  ;;  %v14664_v19 = vmov 0.0  }
 0x7ac   : > { %v5336_v60 = vmul.f32 1.442695, %v5303_v20 }
 0x7ae   : > { %10750 = vpow2.f32 %v5336_v60  ;;  %v5214_v55 = vpop.xlane.xlu0 %5213 }
 0x7af   : > { %v5304_v50 = vsub.f32 %v14659_v31, %v5214_v55  ;;  %v13257_v55 = vld [vmem:[%s14458_s10 + $0x8] sm:$0xff]  }
 0x7b0   : > { %v5900_v31 = vmul.bf16 %v13257_v55, %v8755_v0 }
 0x7b1   : > { %v5338_v1 = vmul.f32 1.442695, %v5304_v50 }
 0x7b2   : > { %v5217_v59 = vpop.xlane.xlu1 %5216  ;;  %v5220_v3 = vpop.xlane.xlu0 %5219 }
 0x7b3   : > { %v5305_v27 = vsub.f32 %v12959_v45, %v5217_v59  ;;  %v5306_v32 = vsub.f32 %v14660_v40, %v5220_v3  ;;  %10752 = vpow2.f32 %v5338_v1  ;;  %v13222_v2 = vpop.eup %10748  ;;  %v14662_v45 = vld [vmem:[#allocation37_spill] sm:$0xff]  ;;  %v13269_v40 = vld [vmem:[%s14458_s10 + $0x10] sm:$0xff]  }
 0x7b5   : > { %v5340_v54 = vmul.f32 1.442695, %v5305_v27  ;;  %v5342_v56 = vmul.f32 1.442695, %v5306_v32  ;;  %v5901_v32 = vmul.bf16 %v13269_v40, %v8755_v0 }
 0x7b7   : > { %10754 = vpow2.f32 %v5340_v54 }
 0x7b8   : > { %v13224_v15 = vpop.eup %10750  ;;  %v5223_v42 = vpop.xlane.xlu1 %5222  ;;  %10756 = vpow2.f32 %v5342_v56 }
 0x7b9   : > { %v5307_v21 = vsub.f32 %v14661_v46, %v5223_v42  ;;  %v5398_v41 = vpack.c.bf16 %v13224_v15, %v13222_v2 }
 0x7bb   : > { %v5344_v62 = vmul.f32 1.442695, %v5307_v21  ;;  %v5226_v24 = vpop.xlane.xlu0 %5225  ;;  %10020 = vmatprep.mubr.msk.bf16.mxu1 %vm1304_vm1, %v5398_v41  ;;  %v13283_v41 = vld [vmem:[%s14458_s10 + $0x18] sm:$0xff]  }
 0x7bc   : > { %v5308_v63 = vsub.f32 %v14662_v45, %v5226_v24 }
 0x7bd   : > { %10758 = vpow2.f32 %v5344_v62  ;;  %v13233_v10 = vpop.eup %10752  ;;  %v5902_v62 = vmul.bf16 %v13283_v41, %v8755_v0 }
 0x7be   : > { %v5346_v51 = vmul.f32 1.442695, %v5308_v63 }
 0x7bf   : > { %v5229_v16 = vpop.xlane.xlu1 %5228 }
 0x7c0   : > { %v5309_v6 = vsub.f32 %v13014_v35, %v5229_v16  ;;  %v5232_v12 = vpop.xlane.xlu0 %5231  ;;  %10760 = vpow2.f32 %v5346_v51 }
 0x7c1   : > { %v13236_v36 = vpop.eup %10754  ;;  %v5310_v8 = vsub.f32 %v13020_v47, %v5232_v12 }
 0x7c2   : > { %v5399_v33 = vpack.c.bf16 %v13236_v36, %v13233_v10  ;;  %v5348_v43 = vmul.f32 1.442695, %v5309_v6  ;;  %v13249_v47 = vpop.eup %10756 }
 0x7c3   : > { %v5350_v57 = vmul.f32 1.442695, %v5310_v8 }
 0x7c4   : > { %10762 = vpow2.f32 %v5348_v43  ;;  %v5235_v35 = vpop.xlane.xlu1 %5234  ;;  %10021 = vmatmul.mubr.msk.bf16.vlgmr.msra.gmra.mrb[176].mxu1 %vm1304_vm1, %v5399_v33 }
 0x7c5   : > { %v5311_v4 = vsub.f32 %v13040_v58, %v5235_v35  ;;  %10065 = vmatpush3.bf16.msra.mxu1 %v5899_v17  ;;  %10764 = vpow2.f32 %v5350_v57 }
 0x7c6   : > { %10066 = vmatprep.subr.bf16.mxu1 %v14664_v19 }
 0x7c7   : > { %v13252_v20 = vpop.eup %10758  ;;  %v5352_v60 = vmul.f32 1.442695, %v5311_v4 }
 0x7c8   : > { %v5238_v50 = vpop.xlane.xlu0 %5237  ;;  %v5400_v58 = vpack.c.bf16 %v13252_v20, %v13249_v47 }
 0x7c9   : > { %10766 = vpow2.f32 %v5352_v60  ;;  %v5312_v1 = vsub.f32 %v13055_v5, %v5238_v50  ;;  %10067 = vmatpush3.bf16.msra.mxu1 %v5900_v31 }
 0x7ca   : > { %v5241_v59 = vpop.xlane.xlu1 %5240  ;;  %10024 = vmatprep.mubr.msk.bf16.mxu1 %vm1304_vm1, %v5400_v58  ;;  %10068 = vmatprep.subr.bf16.mxu1 %v14664_v19  ;;  %v13272_v54 = vpop.eup %10760 }
 0x7cb   : > { %v5354_v3 = vmul.f32 1.442695, %v5312_v1  ;;  %v5313_v27 = vsub.f32 %v13061_v61, %v5241_v59 }
 0x7cd   : > { %v5356_v56 = vmul.f32 1.442695, %v5313_v27  ;;  %10069 = vmatpush3.bf16.msra.mxu1 %v5901_v32  ;;  %10768 = vpow2.f32 %v5354_v3 }
 0x7ce   : > { %v13274_v5 = vpop.eup %10762  ;;  %v5244_v42 = vpop.xlane.xlu0 %5243  ;;  %10070 = vmatprep.subr.bf16.mxu1 %v14664_v19 }
 0x7cf   : > { %10770 = vpow2.f32 %v5356_v56  ;;  %v5314_v61 = vsub.f32 %v13072_v44, %v5244_v42  ;;  %v5401_v46 = vpack.c.bf16 %v13274_v5, %v13272_v54  ;;  %v13288_v63 = vpop.eup %10764 }
 0x7d0   : > { %v5247_v21 = vpop.xlane.xlu1 %5246 }
 0x7d1   : > { %v5358_v24 = vmul.f32 1.442695, %v5314_v61  ;;  %v5315_v45 = vsub.f32 %v13080_v14, %v5247_v21  ;;  %10025 = vmatmul.mubr.msk.bf16.gmra.mrb[180].mxu1 %vm1304_vm1, %v5401_v46 }
 0x7d2   : > { %10071 = vmatpush3.bf16.msra.mxu1 %v5902_v62 }
 0x7d3   : > { %v13290_v44 = vpop.eup %10766  ;;  %v5360_v11 = vmul.f32 1.442695, %v5315_v45  ;;  %10088 = vmatprep.subr.bf16.mxu1 %v14664_v19  ;;  %10772 = vpow2.f32 %v5358_v24 }
 0x7d4   : > { %v5402_v51 = vpack.c.bf16 %v13290_v44, %v13288_v63 }
 0x7d5   : > { %10774 = vpow2.f32 %v5360_v11 }
 0x7d6   : > { %v5250_v16 = vpop.xlane.xlu0 %5249  ;;  %10028 = vmatprep.mubr.msk.bf16.mxu1 %vm1304_vm1, %v5402_v51 }
 0x7d7   : > { %v5316_v14 = vsub.f32 %v13101_v28, %v5250_v16  ;;  %v13297_v0 = vpop.eup %10768 }
 0x7d8   : > { %v5253_v6 = vpop.xlane.xlu1 %5252 }
 0x7d9   : > { %v13299_v12 = vpop.eup %10770  ;;  %v5362_v8 = vmul.f32 1.442695, %v5316_v14  ;;  %v5317_v33 = vsub.f32 %v13107_v18, %v5253_v6 }
 0x7da   : > { %v5256_v43 = vpop.xlane.xlu0 %5255  ;;  %v5403_v17 = vpack.c.bf16 %v13299_v12, %v13297_v0 }
 0x7db   : > { %v5364_v57 = vmul.f32 1.442695, %v5317_v33  ;;  %v5318_v35 = vsub.f32 %v13116_v52, %v5256_v43  ;;  %10776 = vpow2.f32 %v5362_v8 }
 0x7dc   : > { %10029 = vmatmul.mubr.msk.bf16.gmra.mrb[184].mxu1 %vm1304_vm1, %v5403_v17 }
 0x7dd   : > { %10778 = vpow2.f32 %v5364_v57  ;;  %v13306_v28 = vpop.eup %10772  ;;  %v5366_v4 = vmul.f32 1.442695, %v5318_v35 }
 0x7de   : > { %v5259_v60 = vpop.xlane.xlu1 %5258 }
 0x7df   : > { %v13308_v31 = vpop.eup %10774  ;;  %v5319_v50 = vsub.f32 %v13130_v38, %v5259_v60  ;;  %10780 = vpow2.f32 %v5366_v4 }
 0x7e0   : > { %v5404_v18 = vpack.c.bf16 %v13308_v31, %v13306_v28 }
 0x7e1   : > { %v5368_v58 = vmul.f32 1.442695, %v5319_v50 }
 0x7e2   : > { %v5262_v1 = vpop.xlane.xlu0 %5261  ;;  %10032 = vmatprep.mubr.msk.bf16.mxu1 %vm1304_vm1, %v5404_v18 }
 0x7e3   : > { %10782 = vpow2.f32 %v5368_v58  ;;  %v5320_v52 = vsub.f32 %v13142_v13, %v5262_v1 }
 0x7e5   : > { %v13315_v59 = vpop.eup %10776  ;;  %v5370_v3 = vmul.f32 1.442695, %v5320_v52 }
 0x7e6   : > { %v5265_v27 = vpop.xlane.xlu1 %5264 }
 0x7e7   : > { %v13317_v32 = vpop.eup %10778  ;;  %v5321_v56 = vsub.f32 %v13150_v53, %v5265_v27  ;;  %v5268_v38 = vpop.xlane.xlu0 %5267  ;;  %10784 = vpow2.f32 %v5370_v3 }
 0x7e8   : > { %v5322_v42 = vsub.f32 %v13156_v7, %v5268_v38  ;;  %v5405_v61 = vpack.c.bf16 %v13317_v32, %v13315_v59 }
 0x7e9   : > { %v5372_v46 = vmul.f32 1.442695, %v5321_v56  ;;  %v13325_v45 = vpop.eup %10780 }
 0x7ea   : > { %v5374_v21 = vmul.f32 1.442695, %v5322_v42  ;;  %v5271_v62 = vpop.xlane.xlu1 %5270  ;;  %10033 = vmatmul.mubr.msk.bf16.gmra.mrb[188].mxu1 %vm1304_vm1, %v5405_v61 }
 0x7eb   : > { %10786 = vpow2.f32 %v5372_v46  ;;  %v5323_v13 = vsub.f32 %v13164_v23, %v5271_v62  ;;  %v5274_v24 = vpop.xlane.xlu0 %5273 }
 0x7ec   : > { %v5324_v53 = vsub.f32 %v13169_v30, %v5274_v24  ;;  %10788 = vpow2.f32 %v5374_v21 }
 0x7ed   : > { %v13328_v11 = vpop.eup %10782  ;;  %v5376_v7 = vmul.f32 1.442695, %v5323_v13 }
 0x7ee   : > { %v5378_v51 = vmul.f32 1.442695, %v5324_v53  ;;  %v5277_v16 = vpop.xlane.xlu1 %5276  ;;  %v5406_v14 = vpack.c.bf16 %v13328_v11, %v13325_v45 }
 0x7ef   : > { %10790 = vpow2.f32 %v5376_v7  ;;  %v5325_v6 = vsub.f32 %v13173_v37, %v5277_v16  ;;  %v5280_v8 = vpop.xlane.xlu0 %5279 }
 0x7f0   : > { %v5326_v23 = vsub.f32 %v13179_v49, %v5280_v8  ;;  %10036 = vmatprep.mubr.msk.bf16.mxu1 %vm1304_vm1, %v5406_v14  ;;  %10792 = vpow2.f32 %v5378_v51 }
 0x7f1   : > { %v5380_v33 = vmul.f32 1.442695, %v5325_v6  ;;  %v13336_v35 = vpop.eup %10784 }
 0x7f2   : > { %v5382_v30 = vmul.f32 1.442695, %v5326_v23  ;;  %v5283_v43 = vpop.xlane.xlu1 %5282 }
 0x7f3   : > { %10794 = vpow2.f32 %v5380_v33  ;;  %v5327_v17 = vsub.f32 %v13186_v34, %v5283_v43  ;;  %v5286_v57 = vpop.xlane.xlu0 %5285 }
 0x7f4   : > { %v5328_v4 = vsub.f32 %v13190_v29, %v5286_v57  ;;  %10796 = vpow2.f32 %v5382_v30 }
 0x7f5   : > { %v13339_v60 = vpop.eup %10786  ;;  %v5384_v37 = vmul.f32 1.442695, %v5327_v17 }
 0x7f6   : > { %v5386_v50 = vmul.f32 1.442695, %v5328_v4  ;;  %v5289_v49 = vpop.xlane.xlu1 %5288  ;;  %v5407_v18 = vpack.c.bf16 %v13339_v60, %v13336_v35  ;;  %v13344_v52 = vpop.eup %10788 }
 0x7f7   : > { %10798 = vpow2.f32 %v5384_v37  ;;  %v5329_v58 = vsub.f32 %v13199_v48, %v5289_v49  ;;  %v5292_v1 = vpop.xlane.xlu0 %5291  ;;  %v14665_v49 = vld [vmem:[#allocation32_spill] sm:$0xff] }
 0x7f8   : > { %10037 = vmatmul.mubr.msk.bf16.gmra.mrb[192].mxu1 %vm1304_vm1, %v5407_v18  ;;  %v5330_v34 = vsub.f32 %v13195_v39, %v5292_v1  ;;  %10800 = vpow2.f32 %v5386_v50  ;;  %v8756_v18 = vpack.c.bf16 %v14665_v49, %v14665_v49 }
 0x7f9   : > { %v13348_v29 = vpop.eup %10790  ;;  %v5388_v3 = vmul.f32 1.442695, %v5329_v58 }
 0x7fa   : > { %v5390_v27 = vmul.f32 1.442695, %v5330_v34  ;;  %v5295_v56 = vpop.xlane.xlu1 %5294  ;;  %v5408_v38 = vpack.c.bf16 %v13348_v29, %v13344_v52  ;;  %v13353_v61 = vpop.eup %10792 }
 0x7fb   : > { %10802 = vpow2.f32 %v5388_v3  ;;  %v5331_v42 = vsub.f32 %v13203_v9, %v5295_v56  ;;  %v5298_v48 = vpop.xlane.xlu0 %5297  ;;  %v14666_v3 = vld [vmem:[#allocation33_spill] sm:$0xff] }
 0x7fc   : > { %10040 = vmatprep.mubr.msk.bf16.mxu1 %vm1304_vm1, %v5408_v38  ;;  %v5332_v46 = vsub.f32 %v13209_v26, %v5298_v48  ;;  %10804 = vpow2.f32 %v5390_v27  ;;  %v8757_v27 = vpack.c.bf16 %v14666_v3, %v14666_v3 }
 0x7fd   : > { %v13357_v39 = vpop.eup %10794  ;;  %v5392_v21 = vmul.f32 1.442695, %v5331_v42 }
 0x7fe   : > { %v5394_v62 = vmul.f32 1.442695, %v5332_v46  ;;  %v5301_v13 = vpop.xlane.xlu1 %5300  ;;  %v5409_v24 = vpack.c.bf16 %v13357_v39, %v13353_v61  ;;  %v13362_v9 = vpop.eup %10796 }
 0x7ff   : > { %10806 = vpow2.f32 %v5392_v21  ;;  %v5333_v53 = vsub.f32 %v13213_v22, %v5301_v13  ;;  %v5903_v21 = vmul.bf16 %v13244_v25, %v8756_v18  ;;  %v5908_v13 = vmul.bf16 %v13257_v55, %v8757_v27 }
 0x800   : > { %10041 = vmatmul.mubr.msk.bf16.gmra.mrb[196].mxu1 %vm1304_vm1, %v5409_v24  ;;  %10808 = vpow2.f32 %v5394_v62 }
 0x801   : > { %v13365_v7 = vpop.eup %10798  ;;  %v5396_v51 = vmul.f32 1.442695, %v5333_v53 }
 0x802   : > { %v5410_v26 = vpack.c.bf16 %v13365_v7, %v13362_v9  ;;  %v13369_v16 = vpop.eup %10800 }
 0x803   : > { %10810 = vpow2.f32 %v5396_v51  ;;  %v5905_v51 = vmul.bf16 %v13269_v40, %v8756_v18 }
 0x804   : > { %10044 = vmatprep.mubr.msk.bf16.mxu1 %vm1304_vm1, %v5410_v26 }
 0x805   : > { %v13372_v14 = vpop.eup %10802 }
 0x806   : > { %v5411_v22 = vpack.c.bf16 %v13372_v14, %v13369_v16  ;;  %v13376_v6 = vpop.eup %10804 }
 0x808   : > { %10045 = vmatmul.mubr.msk.bf16.gmra.mrb[200].mxu1 %vm1304_vm1, %v5411_v22 }
 0x809   : > { %v13379_v8 = vpop.eup %10806 }
 0x80a   : > { %v5412_v23 = vpack.c.bf16 %v13379_v8, %v13376_v6  ;;  %v13383_v33 = vpop.eup %10808 }
 0x80c   : > { %10048 = vmatprep.mubr.msk.bf16.mxu1 %vm1304_vm1, %v5412_v23 }
 0x80d   : > { %v13386_v30 = vpop.eup %10810 }
 0x80e   : > { %v5413_v43 = vpack.c.bf16 %v13386_v30, %v13383_v33 }
 0x810   : > { %10049 = vmatmul.mubr.msk.bf16.gmra.mrb[204].mxu1 %vm1304_vm1, %v5413_v43  ;;  %v5909_v43 = vmul.bf16 %v13269_v40, %v8757_v27 }
 0x811   : > { %10072 = vmatprep.mubr.msk.bf16.mxu1 %vm11034_vm4, %v14664_v19 }
 0x897   : > { %v10022_v17 = vpop.f32.mrb[176].mxu1 }
 0x898   : > { %v5496_v57 = vpop.f32.mrb[177].mxu1 }
 0x899   : > { %10812 = vrcp.f32 %v5496_v57  ;;  %v10023_v4 = vpop.f32.mrb[178].mxu1 }
 0x89a   : > { %v5499_v37 = vpop.f32.mrb[179].mxu1 }
 0x89b   : > { %10814 = vrcp.f32 %v5499_v37 }
 0x89c   : > { %10816 = vrcp.f32 %v10022_v17 }
 0x89d   : > { %10818 = vrcp.f32 %v10023_v4  ;;  %v14667_v4 = vld [vmem:[#allocation2_spill] sm:$0xff] }
 0x89e   : > { %v8758_v37 = vpack.c.bf16 %v14667_v4, %v14667_v4 }
 0x8a3   : > { %v10813_v50 = vpop.eup %10812 }
 0x8a4   : > { %v5655_v58 = vmul.f32 %v10813_v50, %v13222_v2  ;;  %v13396_v1 = vpop.f32.mrb[180].mxu1  ;;  %v5907_v2 = vmul.bf16 %v13244_v25, %v8757_v27  ;;  %v5906_v50 = vmul.bf16 %v13283_v41, %v8756_v18 }
 0x8a5   : > { %v10815_v34 = vpop.eup %10814  ;;  %v5512_v56 = vpop.f32.mrb[181].mxu1 }
 0x8a6   : > { %v8786_v38 = vpack.c.bf16 %v5655_v58, %v5655_v58  ;;  %v5656_v42 = vmul.f32 %v10815_v34, %v13224_v15  ;;  %v13401_v48 = vpop.f32.mrb[182].mxu1  ;;  %v5904_v15 = vmul.bf16 %v13257_v55, %v8756_v18  ;;  %v10817_v24 = vpop.eup %10816  ;;  %v14668_v58 = vld [vmem:[#allocation6_spill] sm:$0xff]  ;;  %10820 = vrcp.f32 %v5512_v56 }
 0x8a7   : > { %v5515_v46 = vpop.f32.mrb[183].mxu1  ;;  %v10819_v22 = vpop.eup %10818  ;;  %v5657_v17 = vmul.f32 %v10817_v24, %v13233_v10  ;;  %v8759_v34 = vpack.c.bf16 %v14668_v58, %v14668_v58  ;;  %v5910_v10 = vmul.bf16 %v13283_v41, %v8757_v27  ;;  %v5912_v27 = vmul.bf16 %v13257_v55, %v8758_v37 }
 0x8a8   : > { %v8787_v62 = vpack.c.bf16 %v5656_v42, %v5656_v42  ;;  %10061 = vmatmul.mubr.msk.bf16.vlgmr.msra.gmra.mrb[176].mxu0 %vm1304_vm1, %v8786_v38  ;;  %v5658_v49 = vmul.f32 %v10819_v22, %v13236_v36  ;;  %10822 = vrcp.f32 %v5515_v46  ;;  %v5911_v38 = vmul.bf16 %v13244_v25, %v8758_v37  ;;  %v14669_v22 = vld [vmem:[#allocation35_spill] sm:$0xff] }
 0x8a9   : > { %10077 = vmatpush3.bf16.msra.mxu0 %v5903_v21  ;;  %10084 = vmatprep.mubr.msk.bf16.mxu0 %vm11034_vm4, %v14664_v19  ;;  %v8788_v3 = vpack.c.bf16 %v5657_v17, %v5657_v17  ;;  %v5915_v36 = vmul.bf16 %v13244_v25, %v8759_v34  ;;  %v5916_v42 = vmul.bf16 %v13257_v55, %v8759_v34  ;;  %10824 = vrcp.f32 %v13396_v1 }
 0x8aa   : > { %10073 = vmatmul.mubr.msk.bf16.vlgmr.msra.gmra.mrb[208].mxu1 %vm1304_vm1, %v8787_v62  ;;  %10078 = vmatprep.subr.bf16.mxu0 %v14664_v19  ;;  %v8789_v18 = vpack.c.bf16 %v5658_v49, %v5658_v49  ;;  %v5917_v24 = vmul.bf16 %v13269_v40, %v8759_v34  ;;  %v5914_v17 = vmul.bf16 %v13283_v41, %v8758_v37  ;;  %10826 = vrcp.f32 %v13401_v48 }
 0x8ab   : > { %10089 = vmatpush3.bf16.msra.mxu1 %v5907_v2  ;;  %10096 = vmatprep.mubr.msk.bf16.mxu1 %vm11034_vm4, %v14664_v19  ;;  %v5913_v2 = vmul.bf16 %v13269_v40, %v8758_v37 }
 0x8ac   : > { %10090 = vmatprep.subr.bf16.mxu1 %v14664_v19 }
 0x8ad   : > { %10079 = vmatpush3.bf16.msra.mxu0 %v5904_v15 }
 0x8ae   : > { %10080 = vmatprep.subr.bf16.mxu0 %v14664_v19 }
 0x8af   : > { %v13416_v53 = vpop.f32.mrb[184].mxu1  ;;  %10091 = vmatpush3.bf16.msra.mxu1 %v5908_v13 }
 0x8b0   : > { %v13419_v26 = vpop.f32.mrb[185].mxu1  ;;  %10092 = vmatprep.subr.bf16.mxu1 %v14664_v19  ;;  %v10821_v21 = vpop.eup %10820 }
 0x8b1   : > { %v13422_v23 = vpop.f32.mrb[186].mxu1  ;;  %10081 = vmatpush3.bf16.msra.mxu0 %v5905_v51  ;;  %v5659_v51 = vmul.f32 %v10821_v21, %v13249_v47  ;;  %v5918_v47 = vmul.bf16 %v13283_v41, %v8759_v34  ;;  %10828 = vrcp.f32 %v13419_v26 }
 0x8b2   : > { %v13426_v57 = vpop.f32.mrb[187].mxu1  ;;  %10082 = vmatprep.subr.bf16.mxu0 %v14664_v19  ;;  %v10823_v13 = vpop.eup %10822 }
 0x8b3   : > { %10093 = vmatpush3.bf16.msra.mxu1 %v5909_v43  ;;  %v8760_v43 = vpack.c.bf16 %v14669_v22, %v14669_v22  ;;  %v5660_v4 = vmul.f32 %v10823_v13, %v13252_v20  ;;  %v8790_v58 = vpack.c.bf16 %v5659_v51, %v5659_v51  ;;  %v14671_v13 = vld [vmem:[#allocation4_spill] sm:$0xff]  ;;  %10830 = vrcp.f32 %v13426_v57 }
 0x8b4   : > { %10094 = vmatprep.subr.bf16.mxu1 %v14664_v19  ;;  %10832 = vrcp.f32 %v13416_v53 }
 0x8b5   : > { %10083 = vmatpush3.bf16.msra.mxu0 %v5906_v50  ;;  %v14670_v50 = vld [vmem:[#allocation3_spill] sm:$0xff]  ;;  %v5919_v37 = vmul.bf16 %v13244_v25, %v8760_v43  ;;  %v8791_v20 = vpack.c.bf16 %v5660_v4, %v5660_v4  ;;  %v5920_v48 = vmul.bf16 %v13257_v55, %v8760_v43  ;;  %v5922_v22 = vmul.bf16 %v13283_v41, %v8760_v43 }
 0x8b6   : > { %10100 = vmatprep.subr.bf16.mxu0 %v14664_v19  ;;  %v8761_v49 = vpack.c.bf16 %v14670_v50, %v14670_v50  ;;  %v14672_v50 = vld [vmem:[#allocation14_spill] sm:$0xff]  ;;  %10834 = vrcp.f32 %v13422_v23 }
 0x8b7   : > { %10095 = vmatpush3.bf16.msra.mxu1 %v5910_v10 }
 0x8b8   : > { %10085 = vmatmul.mubr.msk.bf16.vlgmr.msra.gmra.mrb[180].mxu0 %vm1304_vm1, %v8788_v3  ;;  %10112 = vmatprep.subr.bf16.mxu1 %v14664_v19  ;;  %v5923_v10 = vmul.bf16 %v13244_v25, %v8761_v49  ;;  %v5925_v21 = vmul.bf16 %v13269_v40, %v8761_v49 }
 0x8b9   : > { %10101 = vmatpush3.bf16.msra.mxu0 %v5911_v38  ;;  %10108 = vmatprep.mubr.msk.bf16.mxu0 %vm11034_vm4, %v14664_v19  ;;  %v5924_v38 = vmul.bf16 %v13257_v55, %v8761_v49 }
 0x8ba   : > { %10097 = vmatmul.mubr.msk.bf16.vlgmr.msra.gmra.mrb[212].mxu1 %vm1304_vm1, %v8789_v18  ;;  %10102 = vmatprep.subr.bf16.mxu0 %v14664_v19 }
 0x8bb   : > { %10113 = vmatpush3.bf16.msra.mxu1 %v5915_v36  ;;  %10120 = vmatprep.mubr.msk.bf16.mxu1 %vm11034_vm4, %v14664_v19  ;;  %v10825_v36 = vpop.eup %10824 }
 0x8bc   : > { %10114 = vmatprep.subr.bf16.mxu1 %v14664_v19 }
 0x8bd   : > { %v13450_v56 = vpop.f32.mrb[188].mxu1  ;;  %10103 = vmatpush3.bf16.msra.mxu0 %v5912_v27  ;;  %v5921_v27 = vmul.bf16 %v13269_v40, %v8760_v43 }
 0x8be   : > { %v13453_v46 = vpop.f32.mrb[189].mxu1  ;;  %10104 = vmatprep.subr.bf16.mxu0 %v14664_v19 }
 0x8bf   : > { %v13456_v62 = vpop.f32.mrb[190].mxu1  ;;  %10115 = vmatpush3.bf16.msra.mxu1 %v5916_v42  ;;  %v10827_v42 = vpop.eup %10826  ;;  %10836 = vrcp.f32 %v13453_v46 }
 0x8c0   : > { %v13459_v15 = vpop.f32.mrb[191].mxu1  ;;  %10116 = vmatprep.subr.bf16.mxu1 %v14664_v19 }
 0x8c1   : > { %10105 = vmatpush3.bf16.msra.mxu0 %v5913_v2  ;;  %v5661_v2 = vmul.f32 %v10825_v36, %v13272_v54  ;;  %10838 = vrcp.f32 %v13459_v15 }
 0x8c2   : > { %10106 = vmatprep.subr.bf16.mxu0 %v14664_v19  ;;  %10840 = vrcp.f32 %v13450_v56 }
 0x8c3   : > { %10117 = vmatpush3.bf16.msra.mxu1 %v5917_v24  ;;  %v8762_v24 = vpack.c.bf16 %v14671_v13, %v14671_v13  ;;  %10842 = vrcp.f32 %v13456_v62 }
 0x8c4   : > { %10118 = vmatprep.subr.bf16.mxu1 %v14664_v19 }
 0x8c5   : > { %10107 = vmatpush3.bf16.msra.mxu0 %v5914_v17  ;;  %v5662_v17 = vmul.f32 %v10827_v42, %v13274_v5  ;;  %v5927_v5 = vmul.bf16 %v13244_v25, %v8762_v24  ;;  %v5928_v57 = vmul.bf16 %v13257_v55, %v8762_v24  ;;  %v5929_v42 = vmul.bf16 %v13269_v40, %v8762_v24 }
 0x8c6   : > { %10124 = vmatprep.subr.bf16.mxu0 %v14664_v19 }
 0x8c7   : > { %10119 = vmatpush3.bf16.msra.mxu1 %v5918_v47  ;;  %v8763_v47 = vpack.c.bf16 %v14672_v50, %v14672_v50  ;;  %v8793_v43 = vpack.c.bf16 %v5662_v17, %v5662_v17 }
 0x8c8   : > { %10109 = vmatmul.mubr.msk.bf16.vlgmr.msra.gmra.mrb[184].mxu0 %vm1304_vm1, %v8790_v58  ;;  %10136 = vmatprep.subr.bf16.mxu1 %v14664_v19  ;;  %v5926_v58 = vmul.bf16 %v13283_v41, %v8761_v49 }
 0x8c9   : > { %10125 = vmatpush3.bf16.msra.mxu0 %v5919_v37  ;;  %10132 = vmatprep.mubr.msk.bf16.mxu0 %vm11034_vm4, %v14664_v19  ;;  %v5931_v26 = vmul.bf16 %v13244_v25, %v8763_v47 }
 0x8ca   : > { %10121 = vmatmul.mubr.msk.bf16.vlgmr.msra.gmra.mrb[216].mxu1 %vm1304_vm1, %v8791_v20  ;;  %10126 = vmatprep.subr.bf16.mxu0 %v14664_v19  ;;  %v8792_v20 = vpack.c.bf16 %v5661_v2, %v5661_v2  ;;  %v5933_v2 = vmul.bf16 %v13269_v40, %v8763_v47 }
 0x8cb   : > { %v13484_v1 = vpop.f32.mrb[192].mxu1  ;;  %10137 = vmatpush3.bf16.msra.mxu1 %v5923_v10  ;;  %10144 = vmatprep.mubr.msk.bf16.mxu1 %vm11034_vm4, %v14664_v19 }
 0x8cc   : > { %v13489_v34 = vpop.f32.mrb[193].mxu1  ;;  %10138 = vmatprep.subr.bf16.mxu1 %v14664_v19 }
 0x8cd   : > { %v13492_v3 = vpop.f32.mrb[194].mxu1  ;;  %10127 = vmatpush3.bf16.msra.mxu0 %v5920_v48  ;;  %10844 = vrcp.f32 %v13489_v34 }
 0x8ce   : > { %v13495_v18 = vpop.f32.mrb[195].mxu1  ;;  %10128 = vmatprep.subr.bf16.mxu0 %v14664_v19 }
 0x8cf   : > { %10139 = vmatpush3.bf16.msra.mxu1 %v5924_v38  ;;  %v5932_v38 = vmul.bf16 %v13257_v55, %v8763_v47  ;;  %10846 = vrcp.f32 %v13495_v18 }
 0x8d0   : > { %10140 = vmatprep.subr.bf16.mxu1 %v14664_v19  ;;  %10848 = vrcp.f32 %v13484_v1  ;;  %v13694_v1 = vld [vmem:[%s14458_s10] sm:$0xff]  }
 0x8d1   : > { %10129 = vmatpush3.bf16.msra.mxu0 %v5921_v27  ;;  %v10829_v27 = vpop.eup %10828  ;;  %10850 = vrcp.f32 %v13492_v3  ;;  %v13708_v3 = vld [vmem:[%s14458_s10 + $0x8] sm:$0xff]  }
 0x8d2   : > { %10130 = vmatprep.subr.bf16.mxu0 %v14664_v19  ;;  %v5663_v13 = vmul.f32 %v10829_v27, %v13288_v63 }
 0x8d3   : > { %v13505_v51 = vpop.f32.mrb[196].mxu1  ;;  %10141 = vmatpush3.bf16.msra.mxu1 %v5925_v21  ;;  %v10831_v21 = vpop.eup %10830 }
 0x8d4   : > { %v13509_v4 = vpop.f32.mrb[197].mxu1  ;;  %10142 = vmatprep.subr.bf16.mxu1 %v14664_v19  ;;  %v8794_v27 = vpack.c.bf16 %v5663_v13, %v5663_v13 }
 0x8d5   : > { %v13515_v54 = vpop.f32.mrb[198].mxu1  ;;  %10131 = vmatpush3.bf16.msra.mxu0 %v5922_v22  ;;  %v14673_v22 = vld [vmem:[#allocation10_spill] sm:$0xff]  ;;  %10852 = vrcp.f32 %v13509_v4 }
 0x8d6   : > { %v13518_v37 = vpop.f32.mrb[199].mxu1  ;;  %10148 = vmatprep.subr.bf16.mxu0 %v14664_v19  ;;  %v8764_v17 = vpack.c.bf16 %v14673_v22, %v14673_v22 }
 0x8d7   : > { %10143 = vmatpush3.bf16.msra.mxu1 %v5926_v58  ;;  %v5930_v58 = vmul.bf16 %v13283_v41, %v8762_v24  ;;  %10854 = vrcp.f32 %v13518_v37 }
 0x8d8   : > { %10133 = vmatmul.mubr.msk.bf16.vlgmr.msra.gmra.mrb[188].mxu0 %vm1304_vm1, %v8792_v20  ;;  %10160 = vmatprep.subr.bf16.mxu1 %v14664_v19  ;;  %v5664_v20 = vmul.f32 %v10831_v21, %v13290_v44  ;;  %v5935_v44 = vmul.bf16 %v13244_v25, %v8764_v17  ;;  %v5936_v23 = vmul.bf16 %v13257_v55, %v8764_v17  ;;  %10856 = vrcp.f32 %v13505_v51 }
 0x8d9   : > { %10149 = vmatpush3.bf16.msra.mxu0 %v5927_v5  ;;  %10156 = vmatprep.mubr.msk.bf16.mxu0 %vm11034_vm4, %v14664_v19  ;;  %v5937_v21 = vmul.bf16 %v13269_v40, %v8764_v17  ;;  %10858 = vrcp.f32 %v13515_v54 }
 0x8da   : > { %10145 = vmatmul.mubr.msk.bf16.vlgmr.msra.gmra.mrb[220].mxu1 %vm1304_vm1, %v8793_v43  ;;  %10150 = vmatprep.subr.bf16.mxu0 %v14664_v19  ;;  %v14674_v43 = vld [vmem:[#allocation8_spill] sm:$0xff]  ;;  %v8795_v24 = vpack.c.bf16 %v5664_v20, %v5664_v20 }
 0x8db   : > { %v13530_v49 = vpop.f32.mrb[200].mxu1  ;;  %10161 = vmatpush3.bf16.msra.mxu1 %v5931_v26  ;;  %10168 = vmatprep.mubr.msk.bf16.mxu1 %vm11034_vm4, %v14664_v19  ;;  %v8765_v26 = vpack.c.bf16 %v14674_v43, %v14674_v43  ;;  %v5938_v43 = vmul.bf16 %v13283_v41, %v8764_v17 }
 0x8dc   : > { %v13535_v10 = vpop.f32.mrb[201].mxu1  ;;  %10162 = vmatprep.subr.bf16.mxu1 %v14664_v19 }
 0x8dd   : > { %v13538_v48 = vpop.f32.mrb[202].mxu1  ;;  %10151 = vmatpush3.bf16.msra.mxu0 %v5928_v57  ;;  %v5934_v57 = vmul.bf16 %v13283_v41, %v8763_v47  ;;  %v5939_v53 = vmul.bf16 %v13244_v25, %v8765_v26  ;;  %v5940_v47 = vmul.bf16 %v13257_v55, %v8765_v26  ;;  %v5941_v13 = vmul.bf16 %v13269_v40, %v8765_v26 }
 0x8de   : > { %v13541_v36 = vpop.f32.mrb[203].mxu1  ;;  %10152 = vmatprep.subr.bf16.mxu0 %v14664_v19  ;;  %10860 = vrcp.f32 %v13535_v10 }
 0x8df   : > { %10163 = vmatpush3.bf16.msra.mxu1 %v5932_v38  ;;  %10862 = vrcp.f32 %v13541_v36 }
 0x8e0   : > { %10164 = vmatprep.subr.bf16.mxu1 %v14664_v19 }
 0x8e1   : > { %10153 = vmatpush3.bf16.msra.mxu0 %v5929_v42  ;;  %v10833_v42 = vpop.eup %10832  ;;  %10864 = vrcp.f32 %v13530_v49 }
 0x8e2   : > { %10154 = vmatprep.subr.bf16.mxu0 %v14664_v19  ;;  %v5665_v22 = vmul.f32 %v10833_v42, %v13297_v0  ;;  %v5942_v0 = vmul.bf16 %v13283_v41, %v8765_v26 }
 0x8e3   : > { %v13551_v50 = vpop.f32.mrb[204].mxu1  ;;  %10165 = vmatpush3.bf16.msra.mxu1 %v5933_v2  ;;  %v10835_v2 = vpop.eup %10834  ;;  %10866 = vrcp.f32 %v13538_v48 }
 0x8e4   : > { %v13555_v5 = vpop.f32.mrb[205].mxu1  ;;  %10166 = vmatprep.subr.bf16.mxu1 %v14664_v19  ;;  %v10837_v26 = vpop.eup %10836 }
 0x8e5   : > { %v13561_v63 = vpop.f32.mrb[206].mxu1  ;;  %10155 = vmatpush3.bf16.msra.mxu0 %v5930_v58  ;;  %v14675_v58 = vld [vmem:[#allocation12_spill] sm:$0xff]  ;;  %10868 = vrcp.f32 %v13555_v5 }
 0x8e6   : > { %v13564_v38 = vpop.f32.mrb[207].mxu1  ;;  %10172 = vmatprep.subr.bf16.mxu0 %v14664_v19  ;;  %v8766_v20 = vpack.c.bf16 %v14675_v58, %v14675_v58 }
 0x8e7   : > { %10167 = vmatpush3.bf16.msra.mxu1 %v5934_v57  ;;  %v5666_v57 = vmul.f32 %v10835_v2, %v13299_v12  ;;  %v14677_v2 = vld [vmem:[#allocation18_spill] sm:$0xff] }
 0x8e8   : > { %10157 = vmatmul.mubr.msk.bf16.vlgmr.msra.gmra.mrb[192].mxu0 %vm1304_vm1, %v8794_v27  ;;  %10184 = vmatprep.subr.bf16.mxu1 %v14664_v19  ;;  %v14676_v27 = vld [vmem:[#allocation22_spill] sm:$0xff]  ;;  %v5943_v17 = vmul.bf16 %v13244_v25, %v8766_v20  ;;  %v5944_v46 = vmul.bf16 %v13257_v55, %v8766_v20 }
 0x8e9   : > { %10173 = vmatpush3.bf16.msra.mxu0 %v5935_v44  ;;  %10180 = vmatprep.mubr.msk.bf16.mxu0 %vm11034_vm4, %v14664_v19  ;;  %v8767_v44 = vpack.c.bf16 %v14676_v27, %v14676_v27  ;;  %v8797_v12 = vpack.c.bf16 %v5666_v57, %v5666_v57 }
 0x8ea   : > { %10169 = vmatmul.mubr.msk.bf16.vlgmr.msra.gmra.mrb[224].mxu1 %vm1304_vm1, %v8795_v24  ;;  %10174 = vmatprep.subr.bf16.mxu0 %v14664_v19  ;;  %v8796_v24 = vpack.c.bf16 %v5665_v22, %v5665_v22  ;;  %v5946_v22 = vmul.bf16 %v13283_v41, %v8766_v20 }
 0x8eb   : > { %10185 = vmatpush3.bf16.msra.mxu1 %v5939_v53  ;;  %10192 = vmatprep.mubr.msk.bf16.mxu1 %vm11034_vm4, %v14664_v19  ;;  %v5947_v53 = vmul.bf16 %v13244_v25, %v8767_v44  ;;  %v5948_v15 = vmul.bf16 %v13257_v55, %v8767_v44  ;;  %v5949_v42 = vmul.bf16 %v13269_v40, %v8767_v44 }
 0x8ec   : > { %10186 = vmatprep.subr.bf16.mxu1 %v14664_v19 }
 0x8ed   : > { %10175 = vmatpush3.bf16.msra.mxu0 %v5936_v23  ;;  %v5945_v23 = vmul.bf16 %v13269_v40, %v8766_v20 }
 0x8ee   : > { %10176 = vmatprep.subr.bf16.mxu0 %v14664_v19 }
 0x8ef   : > { %10187 = vmatpush3.bf16.msra.mxu1 %v5940_v47  ;;  %v10839_v47 = vpop.eup %10838  ;;  %10870 = vrcp.f32 %v13564_v38 }
 0x8f0   : > { %10188 = vmatprep.subr.bf16.mxu1 %v14664_v19  ;;  %v5668_v58 = vmul.f32 %v10839_v47, %v13308_v31  ;;  %v14680_v47 = vld [vmem:[#allocation7_spill] sm:$0xff] }
 0x8f1   : > { %10177 = vmatpush3.bf16.msra.mxu0 %v5937_v21  ;;  %v5667_v21 = vmul.f32 %v10837_v26, %v13306_v28  ;;  %v5950_v28 = vmul.bf16 %v13283_v41, %v8767_v44  ;;  %v10841_v44 = vpop.eup %10840  ;;  %10872 = vrcp.f32 %v13551_v50 }
 0x8f2   : > { %10178 = vmatprep.subr.bf16.mxu0 %v14664_v19  ;;  %v8799_v31 = vpack.c.bf16 %v5668_v58, %v5668_v58 }
 0x8f3   : > { %10189 = vmatpush3.bf16.msra.mxu1 %v5941_v13  ;;  %v8768_v13 = vpack.c.bf16 %v14677_v2, %v14677_v2  ;;  %v8798_v27 = vpack.c.bf16 %v5667_v21, %v5667_v21 }
 0x8f4   : > { %10190 = vmatprep.subr.bf16.mxu1 %v14664_v19 }
 0x8f5   : > { %10179 = vmatpush3.bf16.msra.mxu0 %v5938_v43  ;;  %v14678_v43 = vld [vmem:[#allocation16_spill] sm:$0xff]  ;;  %v5951_v20 = vmul.bf16 %v13244_v25, %v8768_v13  ;;  %v5952_v56 = vmul.bf16 %v13257_v55, %v8768_v13  ;;  %v5954_v26 = vmul.bf16 %v13283_v41, %v8768_v13 }
 0x8f6   : > { %10196 = vmatprep.subr.bf16.mxu0 %v14664_v19  ;;  %v8769_v57 = vpack.c.bf16 %v14678_v43, %v14678_v43 }
 0x8f7   : > { %10191 = vmatpush3.bf16.msra.mxu1 %v5942_v0 }
 0x8f8   : > { %10181 = vmatmul.mubr.msk.bf16.vlgmr.msra.gmra.mrb[196].mxu0 %vm1304_vm1, %v8796_v24  ;;  %10208 = vmatprep.subr.bf16.mxu1 %v14664_v19  ;;  %v5955_v0 = vmul.bf16 %v13244_v25, %v8769_v57  ;;  %v5956_v62 = vmul.bf16 %v13257_v55, %v8769_v57  ;;  %v5953_v24 = vmul.bf16 %v13269_v40, %v8768_v13 }
 0x8f9   : > { %10197 = vmatpush3.bf16.msra.mxu0 %v5943_v17  ;;  %10204 = vmatprep.mubr.msk.bf16.mxu0 %vm11034_vm4, %v14664_v19  ;;  %v10843_v17 = vpop.eup %10842  ;;  %10874 = vrcp.f32 %v13561_v63 }
 0x8fa   : > { %10193 = vmatmul.mubr.msk.bf16.vlgmr.msra.gmra.mrb[228].mxu1 %vm1304_vm1, %v8797_v12  ;;  %10198 = vmatprep.subr.bf16.mxu0 %v14664_v19  ;;  %v5957_v12 = vmul.bf16 %v13269_v40, %v8769_v57 }
 0x8fb   : > { %10209 = vmatpush3.bf16.msra.mxu1 %v5947_v53  ;;  %10216 = vmatprep.mubr.msk.bf16.mxu1 %vm11034_vm4, %v14664_v19  ;;  %v5669_v53 = vmul.f32 %v10841_v44, %v13315_v59  ;;  %v5958_v59 = vmul.bf16 %v13283_v41, %v8769_v57 }
 0x8fc   : > { %10210 = vmatprep.subr.bf16.mxu1 %v14664_v19 }
 0x8fd   : > { %10199 = vmatpush3.bf16.msra.mxu0 %v5944_v46  ;;  %v14679_v46 = vld [vmem:[#allocation20_spill] sm:$0xff]  ;;  %v8800_v21 = vpack.c.bf16 %v5669_v53, %v5669_v53 }
 0x8fe   : > { %10200 = vmatprep.subr.bf16.mxu0 %v14664_v19 }
 0x8ff   : > { %10211 = vmatpush3.bf16.msra.mxu1 %v5948_v15  ;;  %v8770_v15 = vpack.c.bf16 %v14679_v46, %v14679_v46 }
 0x900   : > { %10212 = vmatprep.subr.bf16.mxu1 %v14664_v19 }
 0x901   : > { %10201 = vmatpush3.bf16.msra.mxu0 %v5945_v23  ;;  %v5670_v23 = vmul.f32 %v10843_v17, %v13317_v32  ;;  %v5959_v2 = vmul.bf16 %v13244_v25, %v8770_v15  ;;  %v5960_v34 = vmul.bf16 %v13257_v55, %v8770_v15  ;;  %v5961_v58 = vmul.bf16 %v13269_v40, %v8770_v15 }
 0x902   : > { %10202 = vmatprep.subr.bf16.mxu0 %v14664_v19 }
 0x903   : > { %10213 = vmatpush3.bf16.msra.mxu1 %v5949_v42  ;;  %v8771_v42 = vpack.c.bf16 %v14680_v47, %v14680_v47  ;;  %v8801_v32 = vpack.c.bf16 %v5670_v23, %v5670_v23  ;;  %v14683_v23 = vld [vmem:[#allocation5_spill] sm:$0xff] }
 0x904   : > { %10214 = vmatprep.subr.bf16.mxu1 %v14664_v19  ;;  %v8774_v47 = vpack.c.bf16 %v14683_v23, %v14683_v23 }
 0x905   : > { %10203 = vmatpush3.bf16.msra.mxu0 %v5946_v22  ;;  %v5963_v13 = vmul.bf16 %v13244_v25, %v8771_v42  ;;  %v5964_v18 = vmul.bf16 %v13257_v55, %v8771_v42  ;;  %v10845_v22 = vpop.eup %10844  ;;  %v5965_v57 = vmul.bf16 %v13269_v40, %v8771_v42 }
 0x906   : > { %10220 = vmatprep.subr.bf16.mxu0 %v14664_v19  ;;  %v10847_v43 = vpop.eup %10846 }
 0x907   : > { %10215 = vmatpush3.bf16.msra.mxu1 %v5950_v28  ;;  %v5671_v28 = vmul.f32 %v10845_v22, %v13325_v45  ;;  %v5966_v45 = vmul.bf16 %v13283_v41, %v8771_v42  ;;  %v10849_v53 = vpop.eup %10848 }
 0x908   : > { %10205 = vmatmul.mubr.msk.bf16.vlgmr.msra.gmra.mrb[200].mxu0 %vm1304_vm1, %v8798_v27  ;;  %10232 = vmatprep.subr.bf16.mxu1 %v14664_v19  ;;  %v14681_v27 = vld [vmem:[#allocation26_spill] sm:$0xff] }
 0x909   : > { %10221 = vmatpush3.bf16.msra.mxu0 %v5951_v20  ;;  %10228 = vmatprep.mubr.msk.bf16.mxu0 %vm11034_vm4, %v14664_v19  ;;  %v8772_v20 = vpack.c.bf16 %v14681_v27, %v14681_v27  ;;  %v8802_v44 = vpack.c.bf16 %v5671_v28, %v5671_v28  ;;  %v13757_v27 = vld [vmem:[%s14458_s10 + $0x18] sm:$0xff]  }
 0x90a   : > { %10217 = vmatmul.mubr.msk.bf16.vlgmr.msra.gmra.mrb[232].mxu1 %vm1304_vm1, %v8799_v31  ;;  %10222 = vmatprep.subr.bf16.mxu0 %v14664_v19  ;;  %v5962_v31 = vmul.bf16 %v13283_v41, %v8770_v15 }
 0x90b   : > { %10233 = vmatpush3.bf16.msra.mxu1 %v5955_v0  ;;  %10240 = vmatprep.mubr.msk.bf16.mxu1 %vm11034_vm4, %v14664_v19  ;;  %v5672_v0 = vmul.f32 %v10847_v43, %v13328_v11  ;;  %v5969_v46 = vmul.bf16 %v13269_v40, %v8772_v20  ;;  %v5970_v42 = vmul.bf16 %v13283_v41, %v8772_v20 }
 0x90c   : > { %10234 = vmatprep.subr.bf16.mxu1 %v14664_v19 }
 0x90d   : > { %10223 = vmatpush3.bf16.msra.mxu0 %v5952_v56  ;;  %v14682_v56 = vld [vmem:[#allocation24_spill] sm:$0xff]  ;;  %v8803_v11 = vpack.c.bf16 %v5672_v0, %v5672_v0  ;;  %v14686_v0 = vld [vmem:[#allocation9_spill] sm:$0xff] }
 0x90e   : > { %10224 = vmatprep.subr.bf16.mxu0 %v14664_v19 }
 0x90f   : > { %10235 = vmatpush3.bf16.msra.mxu1 %v5956_v62  ;;  %v8773_v62 = vpack.c.bf16 %v14682_v56, %v14682_v56 }
 0x910   : > { %10236 = vmatprep.subr.bf16.mxu1 %v14664_v19 }
 0x911   : > { %10225 = vmatpush3.bf16.msra.mxu0 %v5953_v24  ;;  %v5967_v24 = vmul.bf16 %v13244_v25, %v8772_v20  ;;  %v5971_v17 = vmul.bf16 %v13694_v1, %v8773_v62  ;;  %v5968_v25 = vmul.bf16 %v13257_v55, %v8772_v20  ;;  %v10851_v55 = vpop.eup %10850  ;;  %v5973_v15 = vmul.bf16 %v13269_v40, %v8773_v62 }
 0x912   : > { %10226 = vmatprep.subr.bf16.mxu0 %v14664_v19  ;;  %v5974_v40 = vmul.bf16 %v13283_v41, %v8773_v62  ;;  %v5976_v41 = vmul.bf16 %v13708_v3, %v8774_v47  ;;  %v10853_v37 = vpop.eup %10852  ;;  %v5978_v20 = vmul.bf16 %v13757_v27, %v8774_v47 }
 0x913   : > { %10237 = vmatpush3.bf16.msra.mxu1 %v5957_v12  ;;  %v5972_v12 = vmul.bf16 %v13708_v3, %v8773_v62  ;;  %v10855_v22 = vpop.eup %10854  ;;  %v5675_v43 = vmul.f32 %v10853_v37, %v13344_v52  ;;  %v8777_v52 = vpack.c.bf16 %v14686_v0, %v14686_v0  ;;  %v14690_v37 = vld [vmem:[#allocation17_spill] sm:$0xff] }
 0x914   : > { %10238 = vmatprep.subr.bf16.mxu1 %v14664_v19 }
 0x915   : > { %10227 = vmatpush3.bf16.msra.mxu0 %v5954_v26  ;;  %v5673_v26 = vmul.f32 %v10849_v53, %v13336_v35  ;;  %v8806_v62 = vpack.c.bf16 %v5675_v43, %v5675_v43  ;;  %v5988_v54 = vmul.bf16 %v13708_v3, %v8777_v52  ;;  %v14687_v53 = vld [vmem:[#allocation13_spill] sm:$0xff] }
 0x916   : > { %10244 = vmatprep.subr.bf16.mxu0 %v14664_v19 }
 0x917   : > { %10239 = vmatpush3.bf16.msra.mxu1 %v5958_v59  ;;  %v5674_v59 = vmul.f32 %v10851_v55, %v13339_v60  ;;  %v8804_v35 = vpack.c.bf16 %v5673_v26, %v5673_v26  ;;  %v14688_v26 = vld [vmem:[#allocation23_spill] sm:$0xff] }
 0x918   : > { %10229 = vmatmul.mubr.msk.bf16.vlgmr.msra.gmra.mrb[204].mxu0 %vm1304_vm1, %v8800_v21  ;;  %10256 = vmatprep.subr.bf16.mxu1 %v14664_v19  ;;  %v14684_v21 = vld [vmem:[#allocation15_spill] sm:$0xff]  ;;  %v8779_v23 = vpack.c.bf16 %v14688_v26, %v14688_v26 }
 0x919   : > { %10245 = vmatpush3.bf16.msra.mxu0 %v5959_v2  ;;  %10252 = vmatprep.mubr.msk.bf16.mxu0 %vm11034_vm4, %v14664_v19  ;;  %v8775_v2 = vpack.c.bf16 %v14684_v21, %v14684_v21  ;;  %v8805_v60 = vpack.c.bf16 %v5674_v59, %v5674_v59 }
 0x91a   : > { %10241 = vmatmul.mubr.msk.bf16.vlgmr.msra.gmra.mrb[236].mxu1 %vm1304_vm1, %v8801_v32  ;;  %10246 = vmatprep.subr.bf16.mxu0 %v14664_v19  ;;  %v5975_v32 = vmul.bf16 %v13694_v1, %v8774_v47  ;;  %v5995_v59 = vmul.bf16 %v13694_v1, %v8779_v23  ;;  %v5996_v36 = vmul.bf16 %v13708_v3, %v8779_v23 }
 0x91b   : > { %10257 = vmatpush3.bf16.msra.mxu1 %v5963_v13  ;;  %10264 = vmatprep.mubr.msk.bf16.mxu1 %vm11034_vm4, %v14664_v19  ;;  %v5979_v13 = vmul.bf16 %v13694_v1, %v8775_v2  ;;  %v5980_v4 = vmul.bf16 %v13708_v3, %v8775_v2  ;;  %v5982_v56 = vmul.bf16 %v13757_v27, %v8775_v2 }
 0x91c   : > { %10258 = vmatprep.subr.bf16.mxu1 %v14664_v19 }
 0x91d   : > { %10247 = vmatpush3.bf16.msra.mxu0 %v5960_v34  ;;  %v13745_v34 = vld [vmem:[%s14458_s10 + $0x10] sm:$0xff]  }
 0x91e   : > { %10248 = vmatprep.subr.bf16.mxu0 %v14664_v19 }
 0x91f   : > { %10259 = vmatpush3.bf16.msra.mxu1 %v5964_v18  ;;  %v5977_v18 = vmul.bf16 %v13745_v34, %v8774_v47 }
 0x920   : > { %10260 = vmatprep.subr.bf16.mxu1 %v14664_v19 }
 0x921   : > { %10249 = vmatpush3.bf16.msra.mxu0 %v5961_v58  ;;  %v5981_v58 = vmul.bf16 %v13745_v34, %v8775_v2 }
 0x922   : > { %10250 = vmatprep.subr.bf16.mxu0 %v14664_v19 }
 0x923   : > { %10261 = vmatpush3.bf16.msra.mxu1 %v5965_v57  ;;  %v14685_v57 = vld [vmem:[#allocation11_spill] sm:$0xff] }
 0x924   : > { %10262 = vmatprep.subr.bf16.mxu1 %v14664_v19  ;;  %v8776_v28 = vpack.c.bf16 %v14685_v57, %v14685_v57 }
 0x925   : > { %10251 = vmatpush3.bf16.msra.mxu0 %v5962_v31  ;;  %v5676_v31 = vmul.f32 %v10855_v22, %v13348_v29 }
 0x926   : > { %10268 = vmatprep.subr.bf16.mxu0 %v14664_v19  ;;  %v5984_v51 = vmul.bf16 %v13708_v3, %v8776_v28  ;;  %v5986_v55 = vmul.bf16 %v13757_v27, %v8776_v28 }
 0x927   : > { %10263 = vmatpush3.bf16.msra.mxu1 %v5966_v45  ;;  %v5983_v45 = vmul.bf16 %v13694_v1, %v8776_v28  ;;  %v8807_v29 = vpack.c.bf16 %v5676_v31, %v5676_v31 }
 0x928   : > { %10253 = vmatmul.mubr.msk.bf16.vlgmr.msra.gmra.mrb[208].mxu0 %vm1304_vm1, %v8802_v44  ;;  %10280 = vmatprep.subr.bf16.mxu1 %v14664_v19  ;;  %v5987_v44 = vmul.bf16 %v13694_v1, %v8777_v52 }
 0x929   : > { %10269 = vmatpush3.bf16.msra.mxu0 %v5967_v24  ;;  %10276 = vmatprep.mubr.msk.bf16.mxu0 %vm11034_vm4, %v14664_v19  ;;  %v10857_v24 = vpop.eup %10856 }
 0x92a   : > { %10265 = vmatmul.mubr.msk.bf16.vlgmr.msra.gmra.mrb[240].mxu1 %vm1304_vm1, %v8803_v11  ;;  %10270 = vmatprep.subr.bf16.mxu0 %v14664_v19  ;;  %v5985_v11 = vmul.bf16 %v13745_v34, %v8776_v28 }
 0x92b   : > { %10281 = vmatpush3.bf16.msra.mxu1 %v5971_v17  ;;  %10288 = vmatprep.mubr.msk.bf16.mxu1 %vm11034_vm4, %v14664_v19  ;;  %v10859_v17 = vpop.eup %10858 }
 0x92c   : > { %10282 = vmatprep.subr.bf16.mxu1 %v14664_v19  ;;  %v10861_v21 = vpop.eup %10860 }
 0x92d   : > { %10271 = vmatpush3.bf16.msra.mxu0 %v5968_v25  ;;  %v5989_v25 = vmul.bf16 %v13745_v34, %v8777_v52 }
 0x92e   : > { %10272 = vmatprep.subr.bf16.mxu0 %v14664_v19 }
 0x92f   : > { %10283 = vmatpush3.bf16.msra.mxu1 %v5972_v12  ;;  %v5677_v12 = vmul.f32 %v10857_v24, %v13353_v61  ;;  %v5990_v61 = vmul.bf16 %v13757_v27, %v8777_v52  ;;  %v14691_v52 = vld [vmem:[#allocation21_spill] sm:$0xff] }
 0x930   : > { %10284 = vmatprep.subr.bf16.mxu1 %v14664_v19 }
 0x931   : > { %10273 = vmatpush3.bf16.msra.mxu0 %v5969_v46  ;;  %v8778_v46 = vpack.c.bf16 %v14687_v53, %v14687_v53  ;;  %v8808_v47 = vpack.c.bf16 %v5677_v12, %v5677_v12 }
 0x932   : > { %10274 = vmatprep.subr.bf16.mxu0 %v14664_v19 }
 0x933   : > { %10285 = vmatpush3.bf16.msra.mxu1 %v5973_v15  ;;  %v5678_v15 = vmul.f32 %v10859_v17, %v13357_v39  ;;  %v5992_v10 = vmul.bf16 %v13708_v3, %v8778_v46  ;;  %v5993_v2 = vmul.bf16 %v13745_v34, %v8778_v46 }
 0x934   : > { %10286 = vmatprep.subr.bf16.mxu1 %v14664_v19 }
 0x935   : > { %10275 = vmatpush3.bf16.msra.mxu0 %v5970_v42  ;;  %v5991_v42 = vmul.bf16 %v13694_v1, %v8778_v46  ;;  %v8809_v39 = vpack.c.bf16 %v5678_v15, %v5678_v15 }
 0x936   : > { %10292 = vmatprep.subr.bf16.mxu0 %v14664_v19 }
 0x937   : > { %10287 = vmatpush3.bf16.msra.mxu1 %v5974_v40  ;;  %v10863_v40 = vpop.eup %10862 }
 0x938   : > { %10277 = vmatmul.mubr.msk.bf16.vlgmr.msra.gmra.mrb[212].mxu0 %vm1304_vm1, %v8804_v35  ;;  %10304 = vmatprep.subr.bf16.mxu1 %v14664_v19  ;;  %v5997_v35 = vmul.bf16 %v13745_v34, %v8779_v23  ;;  %v10865_v57 = vpop.eup %10864 }
 0x939   : > { %10293 = vmatpush3.bf16.msra.mxu0 %v5975_v32  ;;  %10300 = vmatprep.mubr.msk.bf16.mxu0 %vm11034_vm4, %v14664_v19  ;;  %v5679_v32 = vmul.f32 %v10861_v21, %v13362_v9  ;;  %v5998_v9 = vmul.bf16 %v13757_v27, %v8779_v23  ;;  %v5681_v0 = vmul.f32 %v10865_v57, %v13369_v16 }
 0x93a   : > { %10289 = vmatmul.mubr.msk.bf16.vlgmr.msra.gmra.mrb[244].mxu1 %vm1304_vm1, %v8805_v60  ;;  %10294 = vmatprep.subr.bf16.mxu0 %v14664_v19  ;;  %v14689_v60 = vld [vmem:[#allocation19_spill] sm:$0xff] }
 0x93b   : > { %10305 = vmatpush3.bf16.msra.mxu1 %v5979_v13  ;;  %10312 = vmatprep.mubr.msk.bf16.mxu1 %vm11034_vm4, %v14664_v19  ;;  %v8780_v13 = vpack.c.bf16 %v14689_v60, %v14689_v60  ;;  %v8810_v22 = vpack.c.bf16 %v5679_v32, %v5679_v32 }
 0x93c   : > { %10306 = vmatprep.subr.bf16.mxu1 %v14664_v19 }
 0x93d   : > { %10295 = vmatpush3.bf16.msra.mxu0 %v5976_v41  ;;  %v5994_v41 = vmul.bf16 %v13757_v27, %v8778_v46  ;;  %v6000_v49 = vmul.bf16 %v13708_v3, %v8780_v13  ;;  %v6001_v28 = vmul.bf16 %v13745_v34, %v8780_v13 }
 0x93e   : > { %10296 = vmatprep.subr.bf16.mxu0 %v14664_v19 }
 0x93f   : > { %10307 = vmatpush3.bf16.msra.mxu1 %v5980_v4  ;;  %v5680_v4 = vmul.f32 %v10863_v40, %v13365_v7 }
 0x940   : > { %10308 = vmatprep.subr.bf16.mxu1 %v14664_v19 }
 0x941   : > { %10297 = vmatpush3.bf16.msra.mxu0 %v5977_v18  ;;  %v8781_v18 = vpack.c.bf16 %v14690_v37, %v14690_v37  ;;  %v8811_v43 = vpack.c.bf16 %v5680_v4, %v5680_v4 }
 0x942   : > { %10298 = vmatprep.subr.bf16.mxu0 %v14664_v19 }
 0x943   : > { %10309 = vmatpush3.bf16.msra.mxu1 %v5981_v58  ;;  %v5999_v58 = vmul.bf16 %v13694_v1, %v8780_v13  ;;  %v6003_v7 = vmul.bf16 %v13694_v1, %v8781_v18  ;;  %v6004_v48 = vmul.bf16 %v13708_v3, %v8781_v18  ;;  %v6005_v31 = vmul.bf16 %v13745_v34, %v8781_v18 }
 0x944   : > { %10310 = vmatprep.subr.bf16.mxu1 %v14664_v19  ;;  %v6006_v16 = vmul.bf16 %v13757_v27, %v8781_v18 }
 0x945   : > { %10299 = vmatpush3.bf16.msra.mxu0 %v5978_v20  ;;  %v10867_v20 = vpop.eup %10866 }
 0x946   : > { %10316 = vmatprep.subr.bf16.mxu0 %v14664_v19  ;;  %v10869_v15 = vpop.eup %10868 }
 0x947   : > { %10311 = vmatpush3.bf16.msra.mxu1 %v5982_v56  ;;  %v8782_v56 = vpack.c.bf16 %v14691_v52, %v14691_v52 }
 0x948   : > { %10301 = vmatmul.mubr.msk.bf16.vlgmr.msra.gmra.mrb[216].mxu0 %vm1304_vm1, %v8806_v62  ;;  %10328 = vmatprep.subr.bf16.mxu1 %v14664_v19  ;;  %v6002_v62 = vmul.bf16 %v13757_v27, %v8780_v13 }
 0x949   : > { %10317 = vmatpush3.bf16.msra.mxu0 %v5983_v45  ;;  %10324 = vmatprep.mubr.msk.bf16.mxu0 %vm11034_vm4, %v14664_v19  ;;  %v5682_v45 = vmul.f32 %v10867_v20, %v13372_v14  ;;  %v6008_v38 = vmul.bf16 %v13708_v3, %v8782_v56  ;;  %v6009_v23 = vmul.bf16 %v13745_v34, %v8782_v56 }
 0x94a   : > { %10313 = vmatmul.mubr.msk.bf16.vlgmr.msra.gmra.mrb[248].mxu1 %vm1304_vm1, %v8807_v29  ;;  %10318 = vmatprep.subr.bf16.mxu0 %v14664_v19  ;;  %v14692_v29 = vld [vmem:[#allocation29_spill] sm:$0xff] }
 0x94b   : > { %10329 = vmatpush3.bf16.msra.mxu1 %v5987_v44  ;;  %10336 = vmatprep.mubr.msk.bf16.mxu1 %vm11034_vm4, %v14664_v19  ;;  %v8783_v44 = vpack.c.bf16 %v14692_v29, %v14692_v29  ;;  %v8813_v24 = vpack.c.bf16 %v5682_v45, %v5682_v45 }
 0x94c   : > { %10330 = vmatprep.subr.bf16.mxu1 %v14664_v19 }
 0x94d   : > { %10319 = vmatpush3.bf16.msra.mxu0 %v5984_v51  ;;  %v8812_v51 = vpack.c.bf16 %v5681_v0, %v5681_v0  ;;  %v6011_v14 = vmul.bf16 %v13694_v1, %v8783_v44  ;;  %v6012_v12 = vmul.bf16 %v13708_v3, %v8783_v44 }
 0x94e   : > { %10320 = vmatprep.subr.bf16.mxu0 %v14664_v19 }
 0x94f   : > { %10331 = vmatpush3.bf16.msra.mxu1 %v5988_v54  ;;  %v6007_v54 = vmul.bf16 %v13694_v1, %v8782_v56 }
 0x950   : > { %10332 = vmatprep.subr.bf16.mxu1 %v14664_v19 }
 0x951   : > { %10321 = vmatpush3.bf16.msra.mxu0 %v5985_v11 }
 0x952   : > { %10322 = vmatprep.subr.bf16.mxu0 %v14664_v19 }
 0x953   : > { %10333 = vmatpush3.bf16.msra.mxu1 %v5989_v25 }
 0x954   : > { %10334 = vmatprep.subr.bf16.mxu1 %v14664_v19 }
 0x955   : > { %10323 = vmatpush3.bf16.msra.mxu0 %v5986_v55 }
 0x956   : > { %10340 = vmatprep.subr.bf16.mxu0 %v14664_v19 }
 0x957   : > { %10335 = vmatpush3.bf16.msra.mxu1 %v5990_v61 }
 0x958   : > { %10325 = vmatmul.mubr.msk.bf16.vlgmr.msra.gmra.mrb[220].mxu0 %vm1304_vm1, %v8808_v47  ;;  %10352 = vmatprep.subr.bf16.mxu1 %v14664_v19  ;;  %v10871_v47 = vpop.eup %10870 }
 0x959   : > { %10341 = vmatpush3.bf16.msra.mxu0 %v5991_v42  ;;  %10348 = vmatprep.mubr.msk.bf16.mxu0 %vm11034_vm4, %v14664_v19  ;;  %v6013_v42 = vmul.bf16 %v13745_v34, %v8783_v44  ;;  %v5684_v21 = vmul.f32 %v10871_v47, %v13379_v8 }
 0x95a   : > { %10337 = vmatmul.mubr.msk.bf16.vlgmr.msra.gmra.mrb[252].mxu1 %vm1304_vm1, %v8809_v39  ;;  %10342 = vmatprep.subr.bf16.mxu0 %v14664_v19  ;;  %v5683_v39 = vmul.f32 %v10869_v15, %v13376_v6  ;;  %v6014_v6 = vmul.bf16 %v13757_v27, %v8783_v44  ;;  %v10555_v44 = vld [vmem:[%s14459_s11 + $0x18] sm:$0xff]  }
 0x95b   : > { %10353 = vmatpush3.bf16.msra.mxu1 %v5995_v59  ;;  %10360 = vmatprep.mubr.msk.bf16.mxu1 %vm11034_vm4, %v14664_v19  ;;  %v14693_v59 = vld [vmem:[#allocation27_spill] sm:$0xff]  ;;  %v8815_v60 = vpack.c.bf16 %v5684_v21, %v5684_v21 }
 0x95c   : > { %10354 = vmatprep.subr.bf16.mxu1 %v14664_v19 }
 0x95d   : > { %10343 = vmatpush3.bf16.msra.mxu0 %v5992_v10  ;;  %v8784_v10 = vpack.c.bf16 %v14693_v59, %v14693_v59 }
 0x95e   : > { %10344 = vmatprep.subr.bf16.mxu0 %v14664_v19 }
 0x95f   : > { %10355 = vmatpush3.bf16.msra.mxu1 %v5996_v36  ;;  %v6010_v36 = vmul.bf16 %v13757_v27, %v8782_v56  ;;  %v6015_v32 = vmul.bf16 %v13694_v1, %v8784_v10  ;;  %v6016_v63 = vmul.bf16 %v13708_v3, %v8784_v10 }
 0x960   : > { %10356 = vmatprep.subr.bf16.mxu1 %v14664_v19 }
 0x961   : > { %10345 = vmatpush3.bf16.msra.mxu0 %v5993_v2  ;;  %v14694_v2 = vld [vmem:[#allocation25_spill] sm:$0xff] }
 0x962   : > { %10346 = vmatprep.subr.bf16.mxu0 %v14664_v19  ;;  %v8785_v40 = vpack.c.bf16 %v14694_v2, %v14694_v2 }
 0x963   : > { %10357 = vmatpush3.bf16.msra.mxu1 %v5997_v35  ;;  %v8814_v35 = vpack.c.bf16 %v5683_v39, %v5683_v39 }
 0x964   : > { %10358 = vmatprep.subr.bf16.mxu1 %v14664_v19  ;;  %v6019_v8 = vmul.bf16 %v13694_v1, %v8785_v40  ;;  %v6020_v1 = vmul.bf16 %v13708_v3, %v8785_v40  ;;  %v10552_v3 = vld [vmem:[%s14459_s11] sm:$0xff]  }
 0x965   : > { %10347 = vmatpush3.bf16.msra.mxu0 %v5994_v41 }
 0x966   : > { %10364 = vmatprep.subr.bf16.mxu0 %v14664_v19 }
 0x967   : > { %10359 = vmatpush3.bf16.msra.mxu1 %v5998_v9 }
 0x968   : > { %10349 = vmatmul.mubr.msk.bf16.vlgmr.msra.gmra.mrb[224].mxu0 %vm1304_vm1, %v8810_v22  ;;  %10376 = vmatprep.subr.bf16.mxu1 %v14664_v19  ;;  %v10873_v22 = vpop.eup %10872 }
 0x969   : > { %10365 = vmatpush3.bf16.msra.mxu0 %v5999_v58  ;;  %10372 = vmatprep.mubr.msk.bf16.mxu0 %vm11034_vm4, %v14664_v19  ;;  %v5685_v57 = vmul.f32 %v10873_v22, %v13383_v33  ;;  %v10553_v33 = vld [vmem:[%s14459_s11 + $0x8] sm:$0xff]  }
 0x96a   : > { %10361 = vmatmul.mubr.msk.bf16.vlgmr.msra.gmra.mrb[0].mxu1 %vm1304_vm1, %v8811_v43  ;;  %10366 = vmatprep.subr.bf16.mxu0 %v14664_v19  ;;  %v6017_v43 = vmul.bf16 %v13745_v34, %v8784_v10 }
 0x96b   : > { %10377 = vmatpush3.bf16.msra.mxu1 %v6003_v7  ;;  %10384 = vmatprep.mubr.msk.bf16.mxu1 %vm11034_vm4, %v14664_v19  ;;  %v8816_v0 = vpack.c.bf16 %v5685_v57, %v5685_v57 }
 0x96c   : > { %10378 = vmatprep.subr.bf16.mxu1 %v14664_v19 }
 0x96d   : > { %10367 = vmatpush3.bf16.msra.mxu0 %v6000_v49  ;;  %v10875_v49 = vpop.eup %10874 }
 0x96e   : > { %10368 = vmatprep.subr.bf16.mxu0 %v14664_v19  ;;  %v5686_v20 = vmul.f32 %v10875_v49, %v13386_v30 }
 0x96f   : > { %10379 = vmatpush3.bf16.msra.mxu1 %v6004_v48  ;;  %v6021_v48 = vmul.bf16 %v13745_v34, %v8785_v40 }
 0x970   : > { %10380 = vmatprep.subr.bf16.mxu1 %v14664_v19  ;;  %v8817_v34 = vpack.c.bf16 %v5686_v20, %v5686_v20 }
 0x971   : > { %10369 = vmatpush3.bf16.msra.mxu0 %v6001_v28  ;;  %v6018_v28 = vmul.bf16 %v13757_v27, %v8784_v10 }
 0x972   : > { %10370 = vmatprep.subr.bf16.mxu0 %v14664_v19 }
 0x973   : > { %10381 = vmatpush3.bf16.msra.mxu1 %v6005_v31  ;;  %v6022_v31 = vmul.bf16 %v13757_v27, %v8785_v40 }
 0x974   : > { %10382 = vmatprep.subr.bf16.mxu1 %v14664_v19 }
 0x975   : > { %10371 = vmatpush3.bf16.msra.mxu0 %v6002_v62 }
 0x976   : > { %10388 = vmatprep.subr.bf16.mxu0 %v14664_v19 }
 0x977   : > { %10383 = vmatpush3.bf16.msra.mxu1 %v6006_v16 }
 0x978   : > { %10373 = vmatmul.mubr.msk.bf16.vlgmr.msra.gmra.mrb[228].mxu0 %vm1304_vm1, %v8812_v51  ;;  %10400 = vmatprep.subr.bf16.mxu1 %v14664_v19 }
 0x979   : > { %10389 = vmatpush3.bf16.msra.mxu0 %v6007_v54  ;;  %10396 = vmatprep.mubr.msk.bf16.mxu0 %vm11034_vm4, %v14664_v19 }
 0x97a   : > { %10385 = vmatmul.mubr.msk.bf16.vlgmr.msra.gmra.mrb[4].mxu1 %vm1304_vm1, %v8813_v24  ;;  %10390 = vmatprep.subr.bf16.mxu0 %v14664_v19 }
 0x97b   : > { %10401 = vmatpush3.bf16.msra.mxu1 %v6011_v14  ;;  %v13866_v5 = vpop.f32.mrb[176].mxu0  ;;  %10408 = vmatprep.mubr.msk.bf16.mxu1 %vm11034_vm4, %v14664_v19 }
 0x97c   : > { %v10062_v11 = vpop.f32.mrb[177].mxu0  ;;  %10402 = vmatprep.subr.bf16.mxu1 %v14664_v19 }
 0x97d   : > { %10391 = vmatpush3.bf16.msra.mxu0 %v6008_v38  ;;  %v6159_v17 = vpop.f32.mrb[178].mxu0  ;;  %v13872_v25 = vpop.f32.mrb[208].mxu1 }
 0x97e   : > { %v7495_v53 = vpack.c.bf16 %v13872_v25, %v13866_v5  ;;  %v10063_v46 = vpop.f32.mrb[179].mxu0  ;;  %v10074_v55 = vpop.f32.mrb[209].mxu1  ;;  %10392 = vmatprep.subr.bf16.mxu0 %v14664_v19 }
 0x97f   : > { %10403 = vmatpush3.bf16.msra.mxu1 %v6012_v12  ;;  %v6202_v26 = vpop.f32.mrb[210].mxu1 }
 0x980   : > { %v10075_v61 = vpop.f32.mrb[211].mxu1  ;;  %10404 = vmatprep.subr.bf16.mxu1 %v14664_v19 }
 0x981   : > { %10393 = vmatpush3.bf16.msra.mxu0 %v6009_v23 }
 0x982   : > { %10394 = vmatprep.subr.bf16.mxu0 %v14664_v19 }
 0x983   : > { %10405 = vmatpush3.bf16.msra.mxu1 %v6013_v42 }
 0x984   : > { %10406 = vmatprep.subr.bf16.mxu1 %v14664_v19 }
 0x985   : > { %10395 = vmatpush3.bf16.msra.mxu0 %v6010_v36 }
 0x986   : > { %10412 = vmatprep.subr.bf16.mxu0 %v14664_v19 }
 0x987   : > { %10407 = vmatpush3.bf16.msra.mxu1 %v6014_v6 }
 0x988   : > { %10397 = vmatmul.mubr.msk.bf16.vlgmr.msra.gmra.mrb[232].mxu0 %vm1304_vm1, %v8814_v35  ;;  %10424 = vmatprep.subr.bf16.mxu1 %v14664_v19 }
 0x989   : > { %10413 = vmatpush3.bf16.msra.mxu0 %v6015_v32  ;;  %10420 = vmatprep.mubr.msk.bf16.mxu0 %vm11034_vm4, %v14664_v19 }
 0x98a   : > { %10409 = vmatmul.mubr.msk.bf16.vlgmr.msra.gmra.mrb[8].mxu1 %vm1304_vm1, %v8815_v60  ;;  %10414 = vmatprep.subr.bf16.mxu0 %v14664_v19 }
 0x98b   : > { %v6242_v50 = vpop.f32.mrb[180].mxu0  ;;  %10425 = vmatpush3.bf16.msra.mxu1 %v6019_v8  ;;  %10432 = vmatprep.mubr.msk.bf16.mxu1 %vm11034_vm4, %v14664_v19  ;;  %vm7752_vm4 = vcmask 64512  }
 0x98c   : > { %v10086_v13 = vpop.f32.mrb[181].mxu0  ;;  %10426 = vmatprep.subr.bf16.mxu1 %v14664_v19 }
 0x98d   : > { %v6245_v41 = vpop.f32.mrb[182].mxu0  ;;  %v6285_v4 = vpop.f32.mrb[212].mxu1  ;;  %10415 = vmatpush3.bf16.msra.mxu0 %v6016_v63 }
 0x98e   : > { %v7496_v37 = vpack.c.bf16 %v6285_v4, %v6242_v50  ;;  %v10087_v18 = vpop.f32.mrb[183].mxu0  ;;  %v10098_v9 = vpop.f32.mrb[213].mxu1  ;;  %10416 = vmatprep.subr.bf16.mxu0 %v14664_v19 }
 0x98f   : > { %v6288_v58 = vpop.f32.mrb[214].mxu1  ;;  %10427 = vmatpush3.bf16.msra.mxu1 %v6020_v1 }
 0x990   : > { %v10099_v7 = vpop.f32.mrb[215].mxu1  ;;  %10428 = vmatprep.subr.bf16.mxu1 %v14664_v19 }
 0x991   : > { %10417 = vmatpush3.bf16.msra.mxu0 %v6017_v43 }
 0x992   : > { %10418 = vmatprep.subr.bf16.mxu0 %v14664_v19 }
 0x993   : > { %10429 = vmatpush3.bf16.msra.mxu1 %v6021_v48 }
 0x994   : > { %10430 = vmatprep.subr.bf16.mxu1 %v14664_v19  ;;  %v10554_v19 = vld [vmem:[%s14459_s11 + $0x10] sm:$0xff]  }
 0x995   : > { %10419 = vmatpush3.bf16.msra.mxu0 %v6018_v28 }
 0x996   : > { %10436 = vmatprep.subr.bf16.mxu0 %v10552_v3 }
 0x997   : > { %10431 = vmatpush3.bf16.msra.mxu1 %v6022_v31 }
 0x998   : > { %10421 = vmatmul.mubr.msk.bf16.vlgmr.msra.gmra.mrb[236].mxu0 %vm1304_vm1, %v8816_v0 }
 0x999   : > { %10437 = vmatpush3.bf16.msra.mxu0 %v10552_v3  ;;  %10444 = vmatprep.mubr.msk.bf16.mxu0 %vm1304_vm1, %v7495_v53 }
 0x99a   : > { %10433 = vmatmul.mubr.msk.bf16.vlgmr.msra.gmra.mrb[12].mxu1 %vm1304_vm1, %v8817_v34  ;;  %10438 = vmatprep.subr.bf16.mxu0 %v10553_v33 }
 0x99b   : > { %v6328_v30 = vpop.f32.mrb[184].mxu0 }
 0x99c   : > { %v10110_v27 = vpop.f32.mrb[185].mxu0 }
 0x99d   : > { %v6331_v52 = vpop.f32.mrb[186].mxu0  ;;  %v6371_v56 = vpop.f32.mrb[216].mxu1  ;;  %10439 = vmatpush3.bf16.msra.mxu0 %v10553_v33 }
 0x99e   : > { %v7497_v62 = vpack.c.bf16 %v6371_v56, %v6328_v30  ;;  %v10111_v45 = vpop.f32.mrb[187].mxu0  ;;  %v10122_v29 = vpop.f32.mrb[217].mxu1  ;;  %10440 = vmatprep.subr.bf16.mxu0 %v10554_v19 }
 0x99f   : > { %v6374_v16 = vpop.f32.mrb[218].mxu1 }
 0x9a0   : > { %v10123_v51 = vpop.f32.mrb[219].mxu1 }
 0x9a1   : > { %10441 = vmatpush3.bf16.msra.mxu0 %v10554_v19 }
 0x9a2   : > { %10442 = vmatprep.subr.bf16.mxu0 %v10555_v44 }
 0x9a5   : > { %10443 = vmatpush3.bf16.msra.mxu0 %v10555_v44 }
 0x9a8   : > { %10445 = vmatmul.mubr.msk.bf16.vlgmr.msra.gmra.mrb[240].mxu0 %vm1304_vm1, %v7496_v37 }
 0x9a9   : > { %10448 = vmatprep.mubr.msk.bf16.mxu0 %vm1304_vm1, %v7497_v62 }
 0x9ab   : > { %v6414_v54 = vpop.f32.mrb[188].mxu0 }
 0x9ac   : > { %v10134_v24 = vpop.f32.mrb[189].mxu0 }
 0x9ad   : > { %v6417_v14 = vpop.f32.mrb[190].mxu0  ;;  %v6457_v5 = vpop.f32.mrb[220].mxu1 }
 0x9ae   : > { %v7498_v38 = vpack.c.bf16 %v6457_v5, %v6414_v54  ;;  %v10135_v11 = vpop.f32.mrb[191].mxu0  ;;  %v10146_v17 = vpop.f32.mrb[221].mxu1 }
 0x9af   : > { %v6460_v25 = vpop.f32.mrb[222].mxu1 }
 0x9b0   : > { %v10147_v12 = vpop.f32.mrb[223].mxu1  ;;  %10449 = vmatmul.mubr.msk.bf16.gmra.mrb[244].mxu0 %vm1304_vm1, %v7498_v38 }
 0x9bb   : > { %v6500_v53 = vpop.f32.mrb[192].mxu0 }
 0x9bc   : > { %v10158_v46 = vpop.f32.mrb[193].mxu0 }
 0x9bd   : > { %v6503_v55 = vpop.f32.mrb[194].mxu0  ;;  %v6543_v15 = vpop.f32.mrb[224].mxu1 }
 0x9be   : > { %v7499_v26 = vpack.c.bf16 %v6543_v15, %v6500_v53  ;;  %v10159_v23 = vpop.f32.mrb[195].mxu0  ;;  %v10170_v61 = vpop.f32.mrb[225].mxu1 }
 0x9bf   : > { %v6546_v47 = vpop.f32.mrb[226].mxu1 }
 0x9c0   : > { %v10171_v42 = vpop.f32.mrb[227].mxu1  ;;  %10452 = vmatprep.mubr.msk.bf16.mxu0 %vm1304_vm1, %v7499_v26 }
 0x9cb   : > { %v6586_v39 = vpop.f32.mrb[196].mxu0 }
 0x9cc   : > { %v10182_v59 = vpop.f32.mrb[197].mxu0 }
 0x9cd   : > { %v6589_v10 = vpop.f32.mrb[198].mxu0  ;;  %v6629_v36 = vpop.f32.mrb[228].mxu1 }
 0x9ce   : > { %v7500_v21 = vpack.c.bf16 %v6629_v36, %v6586_v39  ;;  %v10183_v2 = vpop.f32.mrb[199].mxu0  ;;  %v10194_v40 = vpop.f32.mrb[229].mxu1 }
 0x9cf   : > { %v6632_v6 = vpop.f32.mrb[230].mxu1 }
 0x9d0   : > { %v10195_v35 = vpop.f32.mrb[231].mxu1  ;;  %10453 = vmatmul.mubr.msk.bf16.gmra.mrb[248].mxu0 %vm1304_vm1, %v7500_v21 }
 0x9db   : > { %v6672_v32 = vpop.f32.mrb[200].mxu0 }
 0x9dc   : > { %v10206_v60 = vpop.f32.mrb[201].mxu0 }
 0x9dd   : > { %v6675_v8 = vpop.f32.mrb[202].mxu0  ;;  %v6715_v50 = vpop.f32.mrb[232].mxu1 }
 0x9de   : > { %v7501_v63 = vpack.c.bf16 %v6715_v50, %v6672_v32  ;;  %v10207_v13 = vpop.f32.mrb[203].mxu0  ;;  %v10218_v41 = vpop.f32.mrb[233].mxu1 }
 0x9df   : > { %v6718_v4 = vpop.f32.mrb[234].mxu1 }
 0x9e0   : > { %v10219_v1 = vpop.f32.mrb[235].mxu1  ;;  %10456 = vmatprep.mubr.msk.bf16.mxu0 %vm1304_vm1, %v7501_v63 }
 0x9eb   : > { %v6758_v37 = vpop.f32.mrb[204].mxu0 }
 0x9ec   : > { %v10230_v18 = vpop.f32.mrb[205].mxu0 }
 0x9ed   : > { %v6761_v9 = vpop.f32.mrb[206].mxu0  ;;  %v6801_v22 = vpop.f32.mrb[236].mxu1 }
 0x9ee   : > { %v7502_v58 = vpack.c.bf16 %v6801_v22, %v6758_v37  ;;  %v10231_v43 = vpop.f32.mrb[207].mxu0  ;;  %v10242_v7 = vpop.f32.mrb[237].mxu1 }
 0x9ef   : > { %v6804_v49 = vpop.f32.mrb[238].mxu1 }
 0x9f0   : > { %v10243_v48 = vpop.f32.mrb[239].mxu1  ;;  %10457 = vmatmul.mubr.msk.bf16.gmra.mrb[252].mxu0 %vm1304_vm1, %v7502_v58 }
 0x9fb   : > { %v6844_v57 = vpop.f32.mrb[208].mxu0 }
 0x9fc   : > { %v10254_v3 = vpop.f32.mrb[209].mxu0 }
 0x9fd   : > { %v6847_v28 = vpop.f32.mrb[210].mxu0  ;;  %v6887_v20 = vpop.f32.mrb[240].mxu1 }
 0x9fe   : > { %v7503_v31 = vpack.c.bf16 %v6887_v20, %v6844_v57  ;;  %v10255_v0 = vpop.f32.mrb[211].mxu0  ;;  %v10266_v33 = vpop.f32.mrb[241].mxu1 }
 0x9ff   : > { %v6890_v34 = vpop.f32.mrb[242].mxu1 }
 0xa00   : > { %v10267_v19 = vpop.f32.mrb[243].mxu1  ;;  %10460 = vmatprep.mubr.msk.bf16.mxu0 %vm1304_vm1, %v7503_v31 }
 0xa0b   : > { %v6930_v30 = vpop.f32.mrb[212].mxu0 }
 0xa0c   : > { %v10278_v27 = vpop.f32.mrb[213].mxu0 }
 0xa0d   : > { %v6933_v52 = vpop.f32.mrb[214].mxu0  ;;  %v6973_v56 = vpop.f32.mrb[244].mxu1 }
 0xa0e   : > { %v7504_v62 = vpack.c.bf16 %v6973_v56, %v6930_v30  ;;  %v10279_v45 = vpop.f32.mrb[215].mxu0  ;;  %v10290_v29 = vpop.f32.mrb[245].mxu1 }
 0xa0f   : > { %v6976_v44 = vpop.f32.mrb[246].mxu1 }
 0xa10   : > { %v10291_v16 = vpop.f32.mrb[247].mxu1  ;;  %10461 = vmatmul.mubr.msk.bf16.gmra.mrb[0].mxu0 %vm1304_vm1, %v7504_v62 }
 0xa1b   : > { %v7016_v51 = vpop.f32.mrb[216].mxu0 }
 0xa1c   : > { %v10302_v54 = vpop.f32.mrb[217].mxu0 }
 0xa1d   : > { %v7019_v24 = vpop.f32.mrb[218].mxu0  ;;  %v7059_v14 = vpop.f32.mrb[248].mxu1 }
 0xa1e   : > { %v7505_v5 = vpack.c.bf16 %v7059_v14, %v7016_v51  ;;  %v10303_v38 = vpop.f32.mrb[219].mxu0  ;;  %v10314_v11 = vpop.f32.mrb[249].mxu1 }
 0xa1f   : > { %v7062_v17 = vpop.f32.mrb[250].mxu1 }
 0xa20   : > { %v10315_v25 = vpop.f32.mrb[251].mxu1  ;;  %10464 = vmatprep.mubr.msk.bf16.mxu0 %vm1304_vm1, %v7505_v5 }
 0xa2b   : > { %v7102_v12 = vpop.f32.mrb[220].mxu0 }
 0xa2c   : > { %v10326_v53 = vpop.f32.mrb[221].mxu0 }
 0xa2d   : > { %v7105_v46 = vpop.f32.mrb[222].mxu0  ;;  %v7145_v55 = vpop.f32.mrb[252].mxu1 }
 0xa2e   : > { %v7506_v15 = vpack.c.bf16 %v7145_v55, %v7102_v12  ;;  %v10327_v26 = vpop.f32.mrb[223].mxu0  ;;  %v10338_v23 = vpop.f32.mrb[253].mxu1 }
 0xa2f   : > { %v7148_v61 = vpop.f32.mrb[254].mxu1 }
 0xa30   : > { %v10339_v47 = vpop.f32.mrb[255].mxu1  ;;  %10465 = vmatmul.mubr.msk.bf16.gmra.mrb[4].mxu0 %vm1304_vm1, %v7506_v15 }
 0xa3b   : > { %v7188_v42 = vpop.f32.mrb[224].mxu0 }
 0xa3c   : > { %v10350_v39 = vpop.f32.mrb[225].mxu0 }
 0xa3d   : > { %v7191_v59 = vpop.f32.mrb[226].mxu0  ;;  %v7231_v10 = vpop.f32.mrb[0].mxu1 }
 0xa3e   : > { %v7507_v36 = vpack.c.bf16 %v7231_v10, %v7188_v42  ;;  %v10351_v21 = vpop.f32.mrb[227].mxu0  ;;  %v10362_v2 = vpop.f32.mrb[1].mxu1 }
 0xa3f   : > { %v7234_v40 = vpop.f32.mrb[2].mxu1 }
 0xa40   : > { %v10363_v6 = vpop.f32.mrb[3].mxu1  ;;  %10468 = vmatprep.mubr.msk.bf16.mxu0 %vm1304_vm1, %v7507_v36 }
 0xa4b   : > { %v7274_v35 = vpop.f32.mrb[228].mxu0 }
 0xa4c   : > { %v10374_v32 = vpop.f32.mrb[229].mxu0 }
 0xa4d   : > { %v7277_v60 = vpop.f32.mrb[230].mxu0  ;;  %v7317_v8 = vpop.f32.mrb[4].mxu1 }
 0xa4e   : > { %v7508_v50 = vpack.c.bf16 %v7317_v8, %v7274_v35  ;;  %v10375_v63 = vpop.f32.mrb[231].mxu0  ;;  %v10386_v13 = vpop.f32.mrb[5].mxu1 }
 0xa4f   : > { %v7320_v41 = vpop.f32.mrb[6].mxu1 }
 0xa50   : > { %v10387_v4 = vpop.f32.mrb[7].mxu1  ;;  %10469 = vmatmul.mubr.msk.bf16.gmra.mrb[8].mxu0 %vm1304_vm1, %v7508_v50 }
 0xa5b   : > { %v7360_v1 = vpop.f32.mrb[232].mxu0 }
 0xa5c   : > { %v10398_v37 = vpop.f32.mrb[233].mxu0 }
 0xa5d   : > { %v7363_v18 = vpop.f32.mrb[234].mxu0  ;;  %v7403_v9 = vpop.f32.mrb[8].mxu1 }
 0xa5e   : > { %v7509_v22 = vpack.c.bf16 %v7403_v9, %v7360_v1  ;;  %v10399_v58 = vpop.f32.mrb[235].mxu0  ;;  %v10410_v43 = vpop.f32.mrb[9].mxu1 }
 0xa5f   : > { %v7406_v7 = vpop.f32.mrb[10].mxu1 }
 0xa60   : > { %v10411_v49 = vpop.f32.mrb[11].mxu1  ;;  %10472 = vmatprep.mubr.msk.bf16.mxu0 %vm1304_vm1, %v7509_v22 }
 0xa6b   : > { %v7446_v48 = vpop.f32.mrb[236].mxu0 }
 0xa6c   : > { %v10422_v57 = vpop.f32.mrb[237].mxu0 }
 0xa6d   : > { %v7449_v3 = vpop.f32.mrb[238].mxu0  ;;  %v7489_v28 = vpop.f32.mrb[12].mxu1 }
 0xa6e   : > { %v7510_v20 = vpack.c.bf16 %v7489_v28, %v7446_v48  ;;  %v10423_v31 = vpop.f32.mrb[239].mxu0  ;;  %v10434_v0 = vpop.f32.mrb[13].mxu1 }
 0xa6f   : > { %v7492_v33 = vpop.f32.mrb[14].mxu1 }
 0xa70   : > { %v10435_v34 = vpop.f32.mrb[15].mxu1  ;;  %10473 = vmatmul.mubr.msk.bf16.gmra.mrb[12].mxu0 %vm1304_vm1, %v7510_v20 }
 0xa7b   : > { %v13958_v19 = vpop.f32.mrb[240].mxu0 }
 0xa7c   : > { %8107 = vst.msk [vmem:[%s13956_s30 + $0x10] sm:$0xff] %vm7752_vm4, %v13958_v19  ;;  %v13963_v30 = vpop.f32.mrb[241].mxu0  ;;  %v7759_v27 = vsel %vm7752_vm4, %v13958_v19, -inf }
 0xa7d   : > { %8105 = vst.msk [vmem:[%s13956_s30] sm:$0xff] %vm7752_vm4, %v13963_v30  ;;  %7760 = vmax.xlane.f32.xlu0 %v7759_v27  ;;  %v13970_v52 = vpop.f32.mrb[242].mxu0  ;;  %v7753_v45 = vsel %vm7752_vm4, %v13963_v30, -inf }
 0xa7e   : > { %8108 = vst.msk [vmem:[%s13956_s30 + $0x18] sm:$0xff] %vm7752_vm4, %v13970_v52  ;;  %v13975_v56 = vpop.f32.mrb[243].mxu0  ;;  %v7762_v62 = vsel %vm7752_vm4, %v13970_v52, -inf }
 0xa7f   : > { %8106 = vst.msk [vmem:[%s13956_s30 + $0x8] sm:$0xff] %vm7752_vm4, %v13975_v56  ;;  %7763 = vmax.xlane.f32.xlu1 %v7762_v62  ;;  %v7756_v29 = vsel %vm7752_vm4, %v13975_v56, -inf }
 0xa81   : > { %7754 = vmax.xlane.f32.xlu0 %v7753_v45 }
 0xa83   : > { %7757 = vmax.xlane.f32.xlu1 %v7756_v29  ;;  %v13986_v44 = vpop.f32.mrb[244].mxu0 }
 0xa84   : > { %8111 = vst.msk [vmem:[%s13956_s30 + $0x30] sm:$0xff] %vm7752_vm4, %v13986_v44  ;;  %v13991_v16 = vpop.f32.mrb[245].mxu0  ;;  %v7771_v51 = vsel %vm7752_vm4, %v13986_v44, -inf }
 0xa85   : > { %8109 = vst.msk [vmem:[%s13956_s30 + $0x20] sm:$0xff] %vm7752_vm4, %v13991_v16  ;;  %7772 = vmax.xlane.f32.xlu0 %v7771_v51  ;;  %v13998_v54 = vpop.f32.mrb[246].mxu0  ;;  %v7765_v5 = vsel %vm7752_vm4, %v13991_v16, -inf }
 0xa86   : > { %8112 = vst.msk [vmem:[%s13956_s30 + $0x38] sm:$0xff] %vm7752_vm4, %v13998_v54  ;;  %v14003_v24 = vpop.f32.mrb[247].mxu0  ;;  %v7774_v14 = vsel %vm7752_vm4, %v13998_v54, -inf }
 0xa87   : > { %8110 = vst.msk [vmem:[%s13956_s30 + $0x28] sm:$0xff] %vm7752_vm4, %v14003_v24  ;;  %7775 = vmax.xlane.f32.xlu1 %v7774_v14  ;;  %v7768_v38 = vsel %vm7752_vm4, %v14003_v24, -inf }
 0xa89   : > { %7766 = vmax.xlane.f32.xlu0 %v7765_v5 }
 0xa8b   : > { %7769 = vmax.xlane.f32.xlu1 %v7768_v38 }
 0xaa3   : > { %v14014_v11 = vpop.f32.mrb[248].mxu0 }
 0xaa4   : > { %8115 = vst.msk [vmem:[%s13956_s30 + $0x50] sm:$0xff] %vm7752_vm4, %v14014_v11  ;;  %v14019_v17 = vpop.f32.mrb[249].mxu0  ;;  %v7783_v25 = vsel %vm7752_vm4, %v14014_v11, -inf }
 0xaa5   : > { %8113 = vst.msk [vmem:[%s13956_s30 + $0x40] sm:$0xff] %vm7752_vm4, %v14019_v17  ;;  %7784 = vmax.xlane.f32.xlu0 %v7783_v25  ;;  %v14026_v12 = vpop.f32.mrb[250].mxu0  ;;  %v7777_v55 = vsel %vm7752_vm4, %v14019_v17, -inf }
 0xaa6   : > { %8116 = vst.msk [vmem:[%s13956_s30 + $0x58] sm:$0xff] %vm7752_vm4, %v14026_v12  ;;  %v14031_v53 = vpop.f32.mrb[251].mxu0  ;;  %v7786_v46 = vsel %vm7752_vm4, %v14026_v12, -inf }
 0xaa7   : > { %8114 = vst.msk [vmem:[%s13956_s30 + $0x48] sm:$0xff] %vm7752_vm4, %v14031_v53  ;;  %7787 = vmax.xlane.f32.xlu1 %v7786_v46  ;;  %v7780_v15 = vsel %vm7752_vm4, %v14031_v53, -inf }
 0xaa9   : > { %7778 = vmax.xlane.f32.xlu0 %v7777_v55 }
 0xaab   : > { %7781 = vmax.xlane.f32.xlu1 %v7780_v15 }
 0xac3   : > { %v14042_v26 = vpop.f32.mrb[252].mxu0 }
 0xac4   : > { %8119 = vst.msk [vmem:[%s13956_s30 + $0x70] sm:$0xff] %vm7752_vm4, %v14042_v26  ;;  %v14047_v23 = vpop.f32.mrb[253].mxu0  ;;  %v7795_v61 = vsel %vm7752_vm4, %v14042_v26, -inf }
 0xac5   : > { %8117 = vst.msk [vmem:[%s13956_s30 + $0x60] sm:$0xff] %vm7752_vm4, %v14047_v23  ;;  %7796 = vmax.xlane.f32.xlu0 %v7795_v61  ;;  %v14054_v47 = vpop.f32.mrb[254].mxu0  ;;  %v7789_v59 = vsel %vm7752_vm4, %v14047_v23, -inf }
 0xac6   : > { %8120 = vst.msk [vmem:[%s13956_s30 + $0x78] sm:$0xff] %vm7752_vm4, %v14054_v47  ;;  %v14059_v42 = vpop.f32.mrb[255].mxu0  ;;  %v7798_v39 = vsel %vm7752_vm4, %v14054_v47, -inf }
 0xac7   : > { %8118 = vst.msk [vmem:[%s13956_s30 + $0x68] sm:$0xff] %vm7752_vm4, %v14059_v42  ;;  %7799 = vmax.xlane.f32.xlu1 %v7798_v39  ;;  %v7792_v10 = vsel %vm7752_vm4, %v14059_v42, -inf }
 0xac9   : > { %7790 = vmax.xlane.f32.xlu0 %v7789_v59 }
 0xacb   : > { %7793 = vmax.xlane.f32.xlu1 %v7792_v10 }
 0xae3   : > { %v14070_v36 = vpop.f32.mrb[0].mxu0 }
 0xae4   : > { %8123 = vst.msk [vmem:[%s13956_s30 + $0x90] sm:$0xff] %vm7752_vm4, %v14070_v36  ;;  %v14075_v21 = vpop.f32.mrb[1].mxu0  ;;  %v7807_v2 = vsel %vm7752_vm4, %v14070_v36, -inf }
 0xae5   : > { %8121 = vst.msk [vmem:[%s13956_s30 + $0x80] sm:$0xff] %vm7752_vm4, %v14075_v21  ;;  %7808 = vmax.xlane.f32.xlu0 %v7807_v2  ;;  %v14082_v40 = vpop.f32.mrb[2].mxu0  ;;  %v7801_v32 = vsel %vm7752_vm4, %v14075_v21, -inf }
 0xae6   : > { %8124 = vst.msk [vmem:[%s13956_s30 + $0x98] sm:$0xff] %vm7752_vm4, %v14082_v40  ;;  %v14087_v6 = vpop.f32.mrb[3].mxu0  ;;  %v7810_v35 = vsel %vm7752_vm4, %v14082_v40, -inf }
 0xae7   : > { %8122 = vst.msk [vmem:[%s13956_s30 + $0x88] sm:$0xff] %vm7752_vm4, %v14087_v6  ;;  %7811 = vmax.xlane.f32.xlu1 %v7810_v35  ;;  %v7804_v60 = vsel %vm7752_vm4, %v14087_v6, -inf }
 0xae9   : > { %7802 = vmax.xlane.f32.xlu0 %v7801_v32 }
 0xaeb   : > { %7805 = vmax.xlane.f32.xlu1 %v7804_v60 }
 0xb03   : > { %v14098_v8 = vpop.f32.mrb[4].mxu0 }
 0xb04   : > { %8127 = vst.msk [vmem:[%s13956_s30 + $0xb0] sm:$0xff] %vm7752_vm4, %v14098_v8  ;;  %v14103_v50 = vpop.f32.mrb[5].mxu0  ;;  %v7819_v63 = vsel %vm7752_vm4, %v14098_v8, -inf }
 0xb05   : > { %8125 = vst.msk [vmem:[%s13956_s30 + $0xa0] sm:$0xff] %vm7752_vm4, %v14103_v50  ;;  %7820 = vmax.xlane.f32.xlu0 %v7819_v63  ;;  %v14110_v13 = vpop.f32.mrb[6].mxu0  ;;  %v7813_v1 = vsel %vm7752_vm4, %v14103_v50, -inf }
 0xb06   : > { %8128 = vst.msk [vmem:[%s13956_s30 + $0xb8] sm:$0xff] %vm7752_vm4, %v14110_v13  ;;  %v14115_v41 = vpop.f32.mrb[7].mxu0  ;;  %v7822_v4 = vsel %vm7752_vm4, %v14110_v13, -inf }
 0xb07   : > { %8126 = vst.msk [vmem:[%s13956_s30 + $0xa8] sm:$0xff] %vm7752_vm4, %v14115_v41  ;;  %7823 = vmax.xlane.f32.xlu1 %v7822_v4  ;;  %v7816_v37 = vsel %vm7752_vm4, %v14115_v41, -inf }
 0xb09   : > { %7814 = vmax.xlane.f32.xlu0 %v7813_v1 }
 0xb0a   : > { %v7761_v48 = vpop.xlane.xlu0 %7760 }
 0xb0b   : > { %7817 = vmax.xlane.f32.xlu1 %v7816_v37  ;;  %v14161_v62 = vsub.f32 %v13958_v19, %v7761_v48 }
 0xb0c   : > { %v7764_v3 = vpop.xlane.xlu1 %7763 }
 0xb0d   : > { %v14165_v51 = vsub.f32 %v13970_v52, %v7764_v3 }
 0xb0e   : > { %v7755_v28 = vpop.xlane.xlu0 %7754 }
 0xb0f   : > { %v14155_v33 = vsub.f32 %v13963_v30, %v7755_v28  ;;  %v7885_v30 = vmul.f32 1.442695, %v14161_v62  ;;  %v7887_v19 = vmul.f32 1.442695, %v14165_v51 }
 0xb10   : > { %v7758_v20 = vpop.xlane.xlu1 %7757 }
 0xb11   : > { %v14158_v34 = vsub.f32 %v13975_v56, %v7758_v20  ;;  %v7881_v45 = vmul.f32 1.442695, %v14155_v33 }
 0xb12   : > { %v7773_v31 = vpop.xlane.xlu0 %7772 }
 0xb13   : > { %v7883_v14 = vmul.f32 1.442695, %v14158_v34  ;;  %10876 = vpow2.f32 %v7881_v45  ;;  %v14179_v46 = vsub.f32 %v13986_v44, %v7773_v31 }
 0xb14   : > { %v7776_v0 = vpop.xlane.xlu1 %7775 }
 0xb15   : > { %10878 = vpow2.f32 %v7883_v14  ;;  %v14195_v44 = vsub.f32 %v13998_v54, %v7776_v0  ;;  %v7893_v35 = vmul.f32 1.442695, %v14179_v46 }
 0xb16   : > { %v7767_v27 = vpop.xlane.xlu0 %7766  ;;  %10880 = vpow2.f32 %v7885_v30 }
 0xb17   : > { %v14170_v56 = vsub.f32 %v13991_v16, %v7767_v27  ;;  %10882 = vpow2.f32 %v7887_v19  ;;  %v7895_v63 = vmul.f32 1.442695, %v14195_v44 }
 0xb18   : > { %v7770_v29 = vpop.xlane.xlu1 %7769 }
 0xb19   : > { %v14174_v25 = vsub.f32 %v14003_v24, %v7770_v29  ;;  %v7889_v55 = vmul.f32 1.442695, %v14170_v56 }
 0xb1b   : > { %v7891_v39 = vmul.f32 1.442695, %v14174_v25  ;;  %10884 = vpow2.f32 %v7889_v55 }
 0xb1d   : > { %v10877_v60 = vpop.eup %10876  ;;  %10886 = vpow2.f32 %v7891_v39 }
 0xb1e   : > { %10888 = vpow2.f32 %v7893_v35 }
 0xb1f   : > { %v10879_v37 = vpop.eup %10878  ;;  %10890 = vpow2.f32 %v7895_v63 }
 0xb23   : > { %v14126_v18 = vpop.f32.mrb[8].mxu0 }
 0xb24   : > { %8131 = vst.msk [vmem:[%s13956_s30 + $0xd0] sm:$0xff] %vm7752_vm4, %v14126_v18  ;;  %v14131_v9 = vpop.f32.mrb[9].mxu0  ;;  %v7831_v22 = vsel %vm7752_vm4, %v14126_v18, -inf }
 0xb25   : > { %8129 = vst.msk [vmem:[%s13956_s30 + $0xc0] sm:$0xff] %vm7752_vm4, %v14131_v9  ;;  %7832 = vmax.xlane.f32.xlu0 %v7831_v22  ;;  %v14138_v58 = vpop.f32.mrb[10].mxu0  ;;  %v7825_v49 = vsel %vm7752_vm4, %v14131_v9, -inf }
 0xb26   : > { %8132 = vst.msk [vmem:[%s13956_s30 + $0xd8] sm:$0xff] %vm7752_vm4, %v14138_v58  ;;  %v14143_v43 = vpop.f32.mrb[11].mxu0  ;;  %v7834_v7 = vsel %vm7752_vm4, %v14138_v58, -inf }
 0xb27   : > { %8130 = vst.msk [vmem:[%s13956_s30 + $0xc8] sm:$0xff] %vm7752_vm4, %v14143_v43  ;;  %7835 = vmax.xlane.f32.xlu1 %v7834_v7  ;;  %v7828_v57 = vsel %vm7752_vm4, %v14143_v43, -inf  ;;  %v7945_v7 = vsel %vm7752_vm4, %v10877_v60, 0.0 }
 0xb29   : > { %7826 = vmax.xlane.f32.xlu0 %v7825_v49  ;;  %v10881_v49 = vpop.eup %10880 }
 0xb2a   : > { %v10883_v3 = vpop.eup %10882 }
 0xb2b   : > { %7829 = vmax.xlane.f32.xlu1 %v7828_v57  ;;  %v7948_v57 = vsel %vm7752_vm4, %v10879_v37, 0.0  ;;  %v10885_v20 = vpop.eup %10884  ;;  %v7954_v27 = vsel %vm7752_vm4, %v10883_v3, 0.0 }
 0xb2c   : > { %v10887_v45 = vpop.eup %10886  ;;  %v7957_v30 = vsel %vm7752_vm4, %v10885_v20, 0.0 }
 0xb32   : > { %v7785_v5 = vpop.xlane.xlu0 %7784 }
 0xb34   : > { %v7788_v38 = vpop.xlane.xlu1 %7787 }
 0xb35   : > { %v14226_v48 = vsub.f32 %v14026_v12, %v7788_v38  ;;  %v10889_v38 = vpop.eup %10888 }
 0xb36   : > { %v7779_v15 = vpop.xlane.xlu0 %7778 }
 0xb37   : > { %v14210_v54 = vsub.f32 %v14019_v17, %v7779_v15  ;;  %v14221_v17 = vsub.f32 %v14014_v11, %v7785_v5  ;;  %v7951_v11 = vsel %vm7752_vm4, %v10881_v49, 0.0  ;;  %v7903_v31 = vmul.f32 1.442695, %v14226_v48 }
 0xb38   : > { %v7782_v10 = vpop.xlane.xlu1 %7781  ;;  %v7960_v15 = vsel %vm7752_vm4, %v10887_v45, 0.0 }
 0xb39   : > { %v14216_v4 = vsub.f32 %v14031_v53, %v7782_v10  ;;  %v7897_v22 = vmul.f32 1.442695, %v14210_v54  ;;  %v7901_v28 = vmul.f32 1.442695, %v14221_v17 }
 0xb3b   : > { %v7899_v53 = vmul.f32 1.442695, %v14216_v4  ;;  %10892 = vpow2.f32 %v7897_v22 }
 0xb3d   : > { %10894 = vpow2.f32 %v7899_v53 }
 0xb3e   : > { %10896 = vpow2.f32 %v7901_v28 }
 0xb3f   : > { %10898 = vpow2.f32 %v7903_v31 }
 0xb43   : > { %v14176_v52 = vpop.f32.mrb[12].mxu0 }
 0xb44   : > { %8135 = vst.msk [vmem:[%s13956_s30 + $0xf0] sm:$0xff] %vm7752_vm4, %v14176_v52  ;;  %v14185_v16 = vpop.f32.mrb[13].mxu0  ;;  %v7843_v32 = vsel %vm7752_vm4, %v14176_v52, -inf }
 0xb45   : > { %8133 = vst.msk [vmem:[%s13956_s30 + $0xe0] sm:$0xff] %vm7752_vm4, %v14185_v16  ;;  %v14190_v24 = vpop.f32.mrb[14].mxu0  ;;  %v7837_v61 = vsel %vm7752_vm4, %v14185_v16, -inf }
 0xb46   : > { %8136 = vst.msk [vmem:[%s13956_s30 + $0xf8] sm:$0xff] %vm7752_vm4, %v14190_v24  ;;  %7838 = vmax.xlane.f32.xlu0 %v7837_v61  ;;  %v14201_v59 = vpop.f32.mrb[15].mxu0  ;;  %v7846_v1 = vsel %vm7752_vm4, %v14190_v24, -inf  ;;  %v10891_v61 = vpop.eup %10890 }
 0xb47   : > { %8134 = vst.msk [vmem:[%s13956_s30 + $0xe8] sm:$0xff] %vm7752_vm4, %v14201_v59  ;;  %v7840_v2 = vsel %vm7752_vm4, %v14201_v59, -inf  ;;  %v10893_v35 = vpop.eup %10892 }
 0xb48   : > { %7841 = vmax.xlane.f32.xlu1 %v7840_v2  ;;  %v7963_v2 = vsel %vm7752_vm4, %v10889_v38, 0.0  ;;  %v10895_v60 = vpop.eup %10894  ;;  %v7969_v63 = vsel %vm7752_vm4, %v10893_v35, 0.0 }
 0xb4a   : > { %7844 = vmax.xlane.f32.xlu0 %v7843_v32 }
 0xb4c   : > { %7847 = vmax.xlane.f32.xlu1 %v7846_v1  ;;  %v10897_v1 = vpop.eup %10896 }
 0xb4d   : > { %v10899_v37 = vpop.eup %10898  ;;  %v7975_v22 = vsel %vm7752_vm4, %v10897_v1, 0.0 }
 0xb4e   : > { %7946 = vadd.xlane.f32.xlu0 %v7945_v7  ;;  %v7978_v49 = vsel %vm7752_vm4, %v10899_v37, 0.0 }
 0xb50   : > { %7949 = vadd.xlane.f32.xlu1 %v7948_v57 }
 0xb52   : > { %v7797_v0 = vpop.xlane.xlu0 %7796  ;;  %7952 = vadd.xlane.f32.xlu0 %v7951_v11 }
 0xb53   : > { %v14234_v12 = vsub.f32 %v14042_v26, %v7797_v0 }
 0xb54   : > { %v7800_v29 = vpop.xlane.xlu1 %7799  ;;  %7955 = vadd.xlane.f32.xlu1 %v7954_v27 }
 0xb55   : > { %v7909_v14 = vmul.f32 1.442695, %v14234_v12  ;;  %v14239_v5 = vsub.f32 %v14054_v47, %v7800_v29 }
 0xb56   : > { %v7791_v19 = vpop.xlane.xlu0 %7790  ;;  %7958 = vadd.xlane.f32.xlu0 %v7957_v30 }
 0xb57   : > { %v7911_v26 = vmul.f32 1.442695, %v14239_v5  ;;  %v14244_v55 = vsub.f32 %v14047_v23, %v7791_v19  ;;  %10900 = vpow2.f32 %v7909_v14  ;;  %v7966_v23 = vsel %vm7752_vm4, %v10891_v61, 0.0 }
 0xb58   : > { %v7794_v39 = vpop.xlane.xlu1 %7793  ;;  %7961 = vadd.xlane.f32.xlu1 %v7960_v15 }
 0xb59   : > { %v7905_v47 = vmul.f32 1.442695, %v14244_v55  ;;  %v14249_v10 = vsub.f32 %v14059_v42, %v7794_v39  ;;  %10902 = vpow2.f32 %v7911_v26  ;;  %v7972_v42 = vsel %vm7752_vm4, %v10895_v60, 0.0 }
 0xb5a   : > { %7964 = vadd.xlane.f32.xlu0 %v7963_v2 }
 0xb5b   : > { %v7907_v32 = vmul.f32 1.442695, %v14249_v10  ;;  %10904 = vpow2.f32 %v7905_v47 }
 0xb5c   : > { %7967 = vadd.xlane.f32.xlu1 %v7966_v23 }
 0xb5d   : > { %10906 = vpow2.f32 %v7907_v32 }
 0xb5e   : > { %7970 = vadd.xlane.f32.xlu0 %v7969_v63 }
 0xb60   : > { %7973 = vadd.xlane.f32.xlu1 %v7972_v42 }
 0xb61   : > { %v10901_v7 = vpop.eup %10900 }
 0xb62   : > { %7976 = vadd.xlane.f32.xlu0 %v7975_v22  ;;  %v7987_v57 = vsel %vm7752_vm4, %v10901_v7, 0.0 }
 0xb63   : > { %v10903_v53 = vpop.eup %10902 }
 0xb64   : > { %7979 = vadd.xlane.f32.xlu1 %v7978_v49  ;;  %v7990_v28 = vsel %vm7752_vm4, %v10903_v53, 0.0 }
 0xb65   : > { %v10905_v3 = vpop.eup %10904 }
 0xb66   : > { %7988 = vadd.xlane.f32.xlu0 %v7987_v57  ;;  %v7981_v20 = vsel %vm7752_vm4, %v10905_v3, 0.0 }
 0xb67   : > { %v10907_v11 = vpop.eup %10906 }
 0xb68   : > { %7991 = vadd.xlane.f32.xlu1 %v7990_v28  ;;  %v7984_v31 = vsel %vm7752_vm4, %v10907_v11, 0.0 }
 0xb6a   : > { %7982 = vadd.xlane.f32.xlu0 %v7981_v20 }
 0xb6c   : > { %7985 = vadd.xlane.f32.xlu1 %v7984_v31 }
 0xb72   : > { %v7809_v0 = vpop.xlane.xlu0 %7808 }
 0xb73   : > { %v14263_v27 = vsub.f32 %v14070_v36, %v7809_v0 }
 0xb74   : > { %v7812_v45 = vpop.xlane.xlu1 %7811 }
 0xb75   : > { %v7917_v29 = vmul.f32 1.442695, %v14263_v27  ;;  %v14267_v14 = vsub.f32 %v14082_v40, %v7812_v45 }
 0xb76   : > { %v7803_v30 = vpop.xlane.xlu0 %7802 }
 0xb77   : > { %10908 = vpow2.f32 %v7917_v29  ;;  %v7919_v38 = vmul.f32 1.442695, %v14267_v14  ;;  %v14271_v19 = vsub.f32 %v14075_v21, %v7803_v30 }
 0xb78   : > { %v7806_v26 = vpop.xlane.xlu1 %7805 }
 0xb79   : > { %10910 = vpow2.f32 %v7919_v38  ;;  %v7913_v15 = vmul.f32 1.442695, %v14271_v19  ;;  %v14275_v36 = vsub.f32 %v14087_v6, %v7806_v26 }
 0xb7b   : > { %10912 = vpow2.f32 %v7913_v15  ;;  %v7915_v61 = vmul.f32 1.442695, %v14275_v36 }
 0xb7d   : > { %10914 = vpow2.f32 %v7915_v61 }
 0xb81   : > { %v10909_v40 = vpop.eup %10908 }
 0xb82   : > { %v7999_v39 = vsel %vm7752_vm4, %v10909_v40, 0.0 }
 0xb83   : > { %v10911_v47 = vpop.eup %10910  ;;  %8000 = vadd.xlane.f32.xlu0 %v7999_v39 }
 0xb84   : > { %v8002_v2 = vsel %vm7752_vm4, %v10911_v47, 0.0 }
 0xb85   : > { %v10913_v21 = vpop.eup %10912  ;;  %8003 = vadd.xlane.f32.xlu1 %v8002_v2 }
 0xb86   : > { %v7993_v35 = vsel %vm7752_vm4, %v10913_v21, 0.0 }
 0xb87   : > { %v10915_v32 = vpop.eup %10914  ;;  %7994 = vadd.xlane.f32.xlu0 %v7993_v35 }
 0xb88   : > { %v7996_v6 = vsel %vm7752_vm4, %v10915_v32, 0.0 }
 0xb89   : > { %7997 = vadd.xlane.f32.xlu1 %v7996_v6 }
 0xb92   : > { %v7821_v23 = vpop.xlane.xlu0 %7820 }
 0xb93   : > { %v14283_v60 = vsub.f32 %v14098_v8, %v7821_v23 }
 0xb94   : > { %v7824_v63 = vpop.xlane.xlu1 %7823 }
 0xb95   : > { %v7925_v1 = vmul.f32 1.442695, %v14283_v60  ;;  %v14287_v42 = vsub.f32 %v14110_v13, %v7824_v63 }
 0xb96   : > { %v7815_v37 = vpop.xlane.xlu0 %7814 }
 0xb97   : > { %10916 = vpow2.f32 %v7925_v1  ;;  %v7927_v22 = vmul.f32 1.442695, %v14287_v42  ;;  %v14291_v7 = vsub.f32 %v14103_v50, %v7815_v37 }
 0xb98   : > { %v7818_v49 = vpop.xlane.xlu1 %7817 }
 0xb99   : > { %10918 = vpow2.f32 %v7927_v22  ;;  %v7921_v53 = vmul.f32 1.442695, %v14291_v7  ;;  %v14295_v8 = vsub.f32 %v14115_v41, %v7818_v49 }
 0xb9b   : > { %10920 = vpow2.f32 %v7921_v53  ;;  %v7923_v57 = vmul.f32 1.442695, %v14295_v8 }
 0xb9d   : > { %10922 = vpow2.f32 %v7923_v57 }
 0xba1   : > { %v10917_v13 = vpop.eup %10916 }
 0xba2   : > { %v8011_v3 = vsel %vm7752_vm4, %v10917_v13, 0.0 }
 0xba3   : > { %v10919_v28 = vpop.eup %10918  ;;  %8012 = vadd.xlane.f32.xlu0 %v8011_v3 }
 0xba4   : > { %v8014_v11 = vsel %vm7752_vm4, %v10919_v28, 0.0 }
 0xba5   : > { %v10921_v50 = vpop.eup %10920  ;;  %8015 = vadd.xlane.f32.xlu1 %v8014_v11 }
 0xba6   : > { %v8005_v20 = vsel %vm7752_vm4, %v10921_v50, 0.0 }
 0xba7   : > { %v10923_v31 = vpop.eup %10922  ;;  %8006 = vadd.xlane.f32.xlu0 %v8005_v20 }
 0xba8   : > { %v8008_v41 = vsel %vm7752_vm4, %v10923_v31, 0.0 }
 0xba9   : > { %8009 = vadd.xlane.f32.xlu1 %v8008_v41 }
 0xbb2   : > { %v7833_v0 = vpop.xlane.xlu0 %7832 }
 0xbb3   : > { %v14303_v45 = vsub.f32 %v14126_v18, %v7833_v0 }
 0xbb4   : > { %v7836_v29 = vpop.xlane.xlu1 %7835 }
 0xbb5   : > { %v7933_v30 = vmul.f32 1.442695, %v14303_v45  ;;  %v14307_v38 = vsub.f32 %v14138_v58, %v7836_v29 }
 0xbb6   : > { %v7827_v26 = vpop.xlane.xlu0 %7826 }
 0xbb7   : > { %10924 = vpow2.f32 %v7933_v30  ;;  %v7935_v15 = vmul.f32 1.442695, %v14307_v38  ;;  %v14311_v61 = vsub.f32 %v14131_v9, %v7827_v26 }
 0xbb8   : > { %v7830_v40 = vpop.xlane.xlu1 %7829 }
 0xbb9   : > { %10926 = vpow2.f32 %v7935_v15  ;;  %v7929_v39 = vmul.f32 1.442695, %v14311_v61  ;;  %v14315_v18 = vsub.f32 %v14143_v43, %v7830_v40 }
 0xbbb   : > { %10928 = vpow2.f32 %v7929_v39  ;;  %v7931_v47 = vmul.f32 1.442695, %v14315_v18 }
 0xbbd   : > { %10930 = vpow2.f32 %v7931_v47 }
 0xbc1   : > { %v10925_v58 = vpop.eup %10924 }
 0xbc2   : > { %v8023_v2 = vsel %vm7752_vm4, %v10925_v58, 0.0 }
 0xbc3   : > { %v10927_v21 = vpop.eup %10926  ;;  %8024 = vadd.xlane.f32.xlu0 %v8023_v2 }
 0xbc4   : > { %v8026_v35 = vsel %vm7752_vm4, %v10927_v21, 0.0 }
 0xbc5   : > { %v10929_v9 = vpop.eup %10928  ;;  %8027 = vadd.xlane.f32.xlu1 %v8026_v35 }
 0xbc6   : > { %v8017_v32 = vsel %vm7752_vm4, %v10929_v9, 0.0 }
 0xbc7   : > { %v10931_v6 = vpop.eup %10930  ;;  %8018 = vadd.xlane.f32.xlu0 %v8017_v32 }
 0xbc8   : > { %v8020_v43 = vsel %vm7752_vm4, %v10931_v6, 0.0 }
 0xbc9   : > { %8021 = vadd.xlane.f32.xlu1 %v8020_v43 }
 0xbd3   : > { %v7839_v23 = vpop.xlane.xlu0 %7838 }
 0xbd4   : > { %v14323_v63 = vsub.f32 %v14185_v16, %v7839_v23 }
 0xbd5   : > { %v7842_v1 = vpop.xlane.xlu1 %7841 }
 0xbd6   : > { %v7937_v37 = vmul.f32 1.442695, %v14323_v63  ;;  %v14327_v22 = vsub.f32 %v14201_v59, %v7842_v1 }
 0xbd7   : > { %v7845_v49 = vpop.xlane.xlu0 %7844 }
 0xbd8   : > { %10932 = vpow2.f32 %v7937_v37  ;;  %v7939_v53 = vmul.f32 1.442695, %v14327_v22  ;;  %v14331_v57 = vsub.f32 %v14176_v52, %v7845_v49 }
 0xbd9   : > { %v7848_v13 = vpop.xlane.xlu1 %7847 }
 0xbda   : > { %10934 = vpow2.f32 %v7939_v53  ;;  %v7941_v3 = vmul.f32 1.442695, %v14331_v57  ;;  %v14335_v16 = vsub.f32 %v14190_v24, %v7848_v13 }
 0xbdb   : > { %v7947_v28 = vpop.xlane.xlu0 %7946 }
 0xbdc   : > { %10936 = vpow2.f32 %v7941_v3  ;;  %v7943_v11 = vmul.f32 1.442695, %v14335_v16 }
 0xbdd   : > { %10938 = vlog2.f32 %v7947_v28  ;;  %v7950_v59 = vpop.xlane.xlu1 %7949 }
 0xbde   : > { %10940 = vpow2.f32 %v7943_v11 }
 0xbdf   : > { %10942 = vlog2.f32 %v7950_v59  ;;  %v7953_v50 = vpop.xlane.xlu0 %7952 }
 0xbe0   : > { %10944 = vlog2.f32 %v7953_v50 }
 0xbe1   : > { %v7956_v20 = vpop.xlane.xlu1 %7955 }
 0xbe2   : > { %v10933_v52 = vpop.eup %10932  ;;  %10946 = vlog2.f32 %v7956_v20 }
 0xbe3   : > { %v7959_v31 = vpop.xlane.xlu0 %7958  ;;  %v8029_v41 = vsel %vm7752_vm4, %v10933_v52, 0.0 }
 0xbe4   : > { %v10935_v0 = vpop.eup %10934  ;;  %10948 = vlog2.f32 %v7959_v31  ;;  %8030 = vadd.xlane.f32.xlu0 %v8029_v41 }
 0xbe5   : > { %v7962_v24 = vpop.xlane.xlu1 %7961  ;;  %v8032_v29 = vsel %vm7752_vm4, %v10935_v0, 0.0 }
 0xbe6   : > { %v10937_v30 = vpop.eup %10936  ;;  %10950 = vlog2.f32 %v7962_v24  ;;  %8033 = vadd.xlane.f32.xlu1 %v8032_v29 }
 0xbe7   : > { %v10939_v26 = vpop.eup %10938  ;;  %v7965_v15 = vpop.xlane.xlu0 %7964  ;;  %v8035_v40 = vsel %vm7752_vm4, %v10937_v30, 0.0 }
 0xbe8   : > { %v10941_v39 = vpop.eup %10940  ;;  %v8042_v47 = vmul.f32 0.6931472, %v10939_v26  ;;  %10952 = vlog2.f32 %v7965_v15  ;;  %8036 = vadd.xlane.f32.xlu0 %v8035_v40 }
 0xbe9   : > { %v10943_v58 = vpop.eup %10942  ;;  %v7968_v2 = vpop.xlane.xlu1 %7967  ;;  %v8038_v21 = vsel %vm7752_vm4, %v10941_v39, 0.0 }
 0xbea   : > { %v10945_v35 = vpop.eup %10944  ;;  %v8137_v9 = vsub.f32 %v14155_v33, %v8042_v47  ;;  %v8044_v32 = vmul.f32 0.6931472, %v10943_v58  ;;  %10954 = vlog2.f32 %v7968_v2  ;;  %8039 = vadd.xlane.f32.xlu1 %v8038_v21 }
 0xbeb   : > { %v8046_v6 = vmul.f32 0.6931472, %v10945_v35  ;;  %v7971_v43 = vpop.xlane.xlu0 %7970 }
 0xbec   : > { %v10947_v23 = vpop.eup %10946  ;;  %8169 = vst.msk [vmem:[%s14346_s16] sm:$0xff] %vm7752_vm4, %v8137_v9  ;;  %v8138_v1 = vsub.f32 %v14158_v34, %v8044_v32  ;;  %10956 = vlog2.f32 %v7971_v43 }
 0xbed   : > { %v8139_v37 = vsub.f32 %v14161_v62, %v8046_v6  ;;  %v8048_v49 = vmul.f32 0.6931472, %v10947_v23  ;;  %v7974_v53 = vpop.xlane.xlu1 %7973 }
 0xbee   : > { %v10949_v13 = vpop.eup %10948  ;;  %8170 = vst.msk [vmem:[%s14346_s16 + $0x8] sm:$0xff] %vm7752_vm4, %v8138_v1  ;;  %10958 = vlog2.f32 %v7974_v53 }
 0xbef   : > { %8171 = vst.msk [vmem:[%s14346_s16 + $0x10] sm:$0xff] %vm7752_vm4, %v8139_v37  ;;  %v8140_v33 = vsub.f32 %v14165_v51, %v8048_v49  ;;  %v8050_v3 = vmul.f32 0.6931472, %v10949_v13  ;;  %v7977_v28 = vpop.xlane.xlu0 %7976 }
 0xbf0   : > { %v10951_v11 = vpop.eup %10950  ;;  %10960 = vlog2.f32 %v7977_v28 }
 0xbf1   : > { %8172 = vst.msk [vmem:[%s14346_s16 + $0x18] sm:$0xff] %vm7752_vm4, %v8140_v33  ;;  %v8141_v34 = vsub.f32 %v14170_v56, %v8050_v3  ;;  %v8052_v62 = vmul.f32 0.6931472, %v10951_v11  ;;  %v7980_v59 = vpop.xlane.xlu1 %7979 }
 0xbf2   : > { %v10953_v50 = vpop.eup %10952  ;;  %10962 = vlog2.f32 %v7980_v59 }
 0xbf3   : > { %8173 = vst.msk [vmem:[%s14346_s16 + $0x20] sm:$0xff] %vm7752_vm4, %v8141_v34  ;;  %v8142_v20 = vsub.f32 %v14174_v25, %v8052_v62  ;;  %v8054_v52 = vmul.f32 0.6931472, %v10953_v50  ;;  %v7989_v51 = vpop.xlane.xlu0 %7988 }
 0xbf4   : > { %v10955_v31 = vpop.eup %10954  ;;  %10964 = vlog2.f32 %v7989_v51 }
 0xbf5   : > { %8174 = vst.msk [vmem:[%s14346_s16 + $0x28] sm:$0xff] %vm7752_vm4, %v8142_v20  ;;  %v8143_v41 = vsub.f32 %v14179_v46, %v8054_v52  ;;  %v8056_v0 = vmul.f32 0.6931472, %v10955_v31  ;;  %v7992_v56 = vpop.xlane.xlu1 %7991 }
 0xbf6   : > { %v10957_v24 = vpop.eup %10956  ;;  %10966 = vlog2.f32 %v7992_v56 }
 0xbf7   : > { %8175 = vst.msk [vmem:[%s14346_s16 + $0x30] sm:$0xff] %vm7752_vm4, %v8143_v41  ;;  %v8144_v29 = vsub.f32 %v14195_v44, %v8056_v0  ;;  %v8058_v25 = vmul.f32 0.6931472, %v10957_v24  ;;  %v7983_v30 = vpop.xlane.xlu0 %7982 }
 0xbf8   : > { %v10959_v26 = vpop.eup %10958  ;;  %10968 = vlog2.f32 %v7983_v30 }
 0xbf9   : > { %8176 = vst.msk [vmem:[%s14346_s16 + $0x38] sm:$0xff] %vm7752_vm4, %v8144_v29  ;;  %v8145_v15 = vsub.f32 %v14210_v54, %v8058_v25  ;;  %v8060_v46 = vmul.f32 0.6931472, %v10959_v26  ;;  %v7986_v40 = vpop.xlane.xlu1 %7985 }
 0xbfa   : > { %v10961_v39 = vpop.eup %10960  ;;  %10970 = vlog2.f32 %v7986_v40 }
 0xbfb   : > { %8177 = vst.msk [vmem:[%s14346_s16 + $0x40] sm:$0xff] %vm7752_vm4, %v8145_v15  ;;  %v8146_v47 = vsub.f32 %v14216_v4, %v8060_v46  ;;  %v8062_v44 = vmul.f32 0.6931472, %v10961_v39 }
 0xbfc   : > { %v10963_v58 = vpop.eup %10962 }
 0xbfd   : > { %8178 = vst.msk [vmem:[%s14346_s16 + $0x48] sm:$0xff] %vm7752_vm4, %v8146_v47  ;;  %v8147_v2 = vsub.f32 %v14221_v17, %v8062_v44  ;;  %v8064_v21 = vmul.f32 0.6931472, %v10963_v58 }
 0xbfe   : > { %v10965_v35 = vpop.eup %10964 }
 0xbff   : > { %8179 = vst.msk [vmem:[%s14346_s16 + $0x50] sm:$0xff] %vm7752_vm4, %v8147_v2  ;;  %v8148_v54 = vsub.f32 %v14226_v48, %v8064_v21  ;;  %v8070_v9 = vmul.f32 0.6931472, %v10965_v35 }
 0xc00   : > { %v10967_v32 = vpop.eup %10966 }
 0xc01   : > { %8180 = vst.msk [vmem:[%s14346_s16 + $0x58] sm:$0xff] %vm7752_vm4, %v8148_v54  ;;  %v8151_v4 = vsub.f32 %v14234_v12, %v8070_v9  ;;  %v8072_v6 = vmul.f32 0.6931472, %v10967_v32 }
 0xc02   : > { %v10969_v43 = vpop.eup %10968 }
 0xc03   : > { %8183 = vst.msk [vmem:[%s14346_s16 + $0x70] sm:$0xff] %vm7752_vm4, %v8151_v4  ;;  %v8152_v17 = vsub.f32 %v14239_v5, %v8072_v6  ;;  %v8066_v23 = vmul.f32 0.6931472, %v10969_v43 }
 0xc04   : > { %v10971_v1 = vpop.eup %10970 }
 0xc05   : > { %8184 = vst.msk [vmem:[%s14346_s16 + $0x78] sm:$0xff] %vm7752_vm4, %v8152_v17  ;;  %v8149_v37 = vsub.f32 %v14244_v55, %v8066_v23  ;;  %v8068_v48 = vmul.f32 0.6931472, %v10971_v1 }
 0xc07   : > { %8181 = vst.msk [vmem:[%s14346_s16 + $0x60] sm:$0xff] %vm7752_vm4, %v8149_v37  ;;  %v8150_v49 = vsub.f32 %v14249_v10, %v8068_v48 }
 0xc09   : > { %8182 = vst.msk [vmem:[%s14346_s16 + $0x68] sm:$0xff] %vm7752_vm4, %v8150_v49 }
 0xc10   : > { %v8001_v12 = vpop.xlane.xlu0 %8000 }
 0xc11   : > { %10972 = vlog2.f32 %v8001_v12 }
 0xc12   : > { %v8004_v53 = vpop.xlane.xlu1 %8003 }
 0xc13   : > { %10974 = vlog2.f32 %v8004_v53 }
 0xc14   : > { %v7995_v5 = vpop.xlane.xlu0 %7994 }
 0xc15   : > { %10976 = vlog2.f32 %v7995_v5 }
 0xc16   : > { %v7998_v13 = vpop.xlane.xlu1 %7997 }
 0xc17   : > { %10978 = vlog2.f32 %v7998_v13 }
 0xc1b   : > { %v10973_v55 = vpop.eup %10972 }
 0xc1c   : > { %v8078_v33 = vmul.f32 0.6931472, %v10973_v55 }
 0xc1d   : > { %v10975_v3 = vpop.eup %10974 }
 0xc1e   : > { %v8155_v28 = vsub.f32 %v14263_v27, %v8078_v33  ;;  %v8080_v10 = vmul.f32 0.6931472, %v10975_v3 }
 0xc1f   : > { %v10977_v11 = vpop.eup %10976 }
 0xc20   : > { %8187 = vst.msk [vmem:[%s14346_s16 + $0x90] sm:$0xff] %vm7752_vm4, %v8155_v28  ;;  %v8156_v34 = vsub.f32 %v14267_v14, %v8080_v10  ;;  %v8074_v62 = vmul.f32 0.6931472, %v10977_v11 }
 0xc21   : > { %v10979_v59 = vpop.eup %10978 }
 0xc22   : > { %8188 = vst.msk [vmem:[%s14346_s16 + $0x98] sm:$0xff] %vm7752_vm4, %v8156_v34  ;;  %v8153_v50 = vsub.f32 %v14271_v19, %v8074_v62  ;;  %v8076_v20 = vmul.f32 0.6931472, %v10979_v59 }
 0xc24   : > { %8185 = vst.msk [vmem:[%s14346_s16 + $0x80] sm:$0xff] %vm7752_vm4, %v8153_v50  ;;  %v8154_v52 = vsub.f32 %v14275_v36, %v8076_v20 }
 0xc26   : > { %8186 = vst.msk [vmem:[%s14346_s16 + $0x88] sm:$0xff] %vm7752_vm4, %v8154_v52 }
 0xc30   : > { %v8013_v27 = vpop.xlane.xlu0 %8012 }
 0xc31   : > { %10980 = vlog2.f32 %v8013_v27 }
 0xc32   : > { %v8016_v51 = vpop.xlane.xlu1 %8015 }
 0xc33   : > { %10982 = vlog2.f32 %v8016_v51 }
 0xc34   : > { %v8007_v14 = vpop.xlane.xlu0 %8006 }
 0xc35   : > { %10984 = vlog2.f32 %v8007_v14 }
 0xc36   : > { %v8010_v31 = vpop.xlane.xlu1 %8009 }
 0xc37   : > { %10986 = vlog2.f32 %v8010_v31 }
 0xc3b   : > { %v10981_v19 = vpop.eup %10980 }
 0xc3c   : > { %v8086_v41 = vmul.f32 0.6931472, %v10981_v19 }
 0xc3d   : > { %v10983_v0 = vpop.eup %10982 }
 0xc3e   : > { %v8159_v56 = vsub.f32 %v14283_v60, %v8086_v41  ;;  %v8088_v36 = vmul.f32 0.6931472, %v10983_v0 }
 0xc3f   : > { %v10985_v24 = vpop.eup %10984 }
 0xc40   : > { %8191 = vst.msk [vmem:[%s14346_s16 + $0xb0] sm:$0xff] %vm7752_vm4, %v8159_v56  ;;  %v8160_v29 = vsub.f32 %v14287_v42, %v8088_v36  ;;  %v8082_v25 = vmul.f32 0.6931472, %v10985_v24 }
 0xc41   : > { %v10987_v30 = vpop.eup %10986 }
 0xc42   : > { %8192 = vst.msk [vmem:[%s14346_s16 + $0xb8] sm:$0xff] %vm7752_vm4, %v8160_v29  ;;  %v8157_v26 = vsub.f32 %v14291_v7, %v8082_v25  ;;  %v8084_v15 = vmul.f32 0.6931472, %v10987_v30 }
 0xc44   : > { %8189 = vst.msk [vmem:[%s14346_s16 + $0xa0] sm:$0xff] %vm7752_vm4, %v8157_v26  ;;  %v8158_v46 = vsub.f32 %v14295_v8, %v8084_v15 }
 0xc46   : > { %8190 = vst.msk [vmem:[%s14346_s16 + $0xa8] sm:$0xff] %vm7752_vm4, %v8158_v46 }
 0xc50   : > { %v8025_v60 = vpop.xlane.xlu0 %8024 }
 0xc51   : > { %10988 = vlog2.f32 %v8025_v60 }
 0xc52   : > { %v8028_v40 = vpop.xlane.xlu1 %8027 }
 0xc53   : > { %10990 = vlog2.f32 %v8028_v40 }
 0xc54   : > { %v8019_v42 = vpop.xlane.xlu0 %8018 }
 0xc55   : > { %10992 = vlog2.f32 %v8019_v42 }
 0xc56   : > { %v8022_v39 = vpop.xlane.xlu1 %8021 }
 0xc57   : > { %10994 = vlog2.f32 %v8022_v39 }
 0xc5b   : > { %v10989_v7 = vpop.eup %10988 }
 0xc5c   : > { %v8094_v47 = vmul.f32 0.6931472, %v10989_v7 }
 0xc5d   : > { %v10991_v44 = vpop.eup %10990 }
 0xc5e   : > { %v8163_v58 = vsub.f32 %v14303_v45, %v8094_v47  ;;  %v8096_v8 = vmul.f32 0.6931472, %v10991_v44 }
 0xc5f   : > { %v10993_v2 = vpop.eup %10992 }
 0xc60   : > { %8195 = vst.msk [vmem:[%s14346_s16 + $0xd0] sm:$0xff] %vm7752_vm4, %v8163_v58  ;;  %v8164_v21 = vsub.f32 %v14307_v38, %v8096_v8  ;;  %v8090_v35 = vmul.f32 0.6931472, %v10993_v2 }
 0xc61   : > { %v10995_v54 = vpop.eup %10994 }
 0xc62   : > { %8196 = vst.msk [vmem:[%s14346_s16 + $0xd8] sm:$0xff] %vm7752_vm4, %v8164_v21  ;;  %v8161_v9 = vsub.f32 %v14311_v61, %v8090_v35  ;;  %v8092_v32 = vmul.f32 0.6931472, %v10995_v54 }
 0xc64   : > { %8193 = vst.msk [vmem:[%s14346_s16 + $0xc0] sm:$0xff] %vm7752_vm4, %v8161_v9  ;;  %v8162_v4 = vsub.f32 %v14315_v18, %v8092_v32 }
 0xc66   : > { %8194 = vst.msk [vmem:[%s14346_s16 + $0xc8] sm:$0xff] %vm7752_vm4, %v8162_v4 }
 0xc71   : > { %v8031_v45 = vpop.xlane.xlu0 %8030 }
 0xc72   : > { %10996 = vlog2.f32 %v8031_v45 }
 0xc73   : > { %v8034_v6 = vpop.xlane.xlu1 %8033 }
 0xc74   : > { %10998 = vlog2.f32 %v8034_v6 }
 0xc75   : > { %v8037_v38 = vpop.xlane.xlu0 %8036 }
 0xc76   : > { %11000 = vlog2.f32 %v8037_v38 }
 0xc77   : > { %v8040_v43 = vpop.xlane.xlu1 %8039 }
 0xc78   : > { %11002 = vlog2.f32 %v8040_v43 }
 0xc7c   : > { %v10997_v61 = vpop.eup %10996 }
 0xc7d   : > { %v8098_v17 = vmul.f32 0.6931472, %v10997_v61 }
 0xc7e   : > { %v10999_v23 = vpop.eup %10998 }
 0xc7f   : > { %v8165_v1 = vsub.f32 %v14323_v63, %v8098_v17  ;;  %v8100_v18 = vmul.f32 0.6931472, %v10999_v23 }
 0xc80   : > { %v11001_v37 = vpop.eup %11000 }
 0xc81   : > { %8197 = vst.msk [vmem:[%s14346_s16 + $0xe0] sm:$0xff] %vm7752_vm4, %v8165_v1  ;;  %v8166_v48 = vsub.f32 %v14327_v22, %v8100_v18  ;;  %v8102_v49 = vmul.f32 0.6931472, %v11001_v37 }
 0xc82   : > { %v11003_v12 = vpop.eup %11002 }
 0xc83   : > { %8198 = vst.msk [vmem:[%s14346_s16 + $0xe8] sm:$0xff] %vm7752_vm4, %v8166_v48  ;;  %v8167_v53 = vsub.f32 %v14331_v57, %v8102_v49  ;;  %v8104_v5 = vmul.f32 0.6931472, %v11003_v12 }
 0xc85   : > { %8199 = vst.msk [vmem:[%s14346_s16 + $0xf0] sm:$0xff] %vm7752_vm4, %v8167_v53  ;;  %v8168_v13 = vsub.f32 %v14335_v16, %v8104_v5 }
 0xc87   : > { %8200 = vst.msk [vmem:[%s14346_s16 + $0xf8] sm:$0xff] %vm7752_vm4, %v8168_v13 }
 0xc88 PF: > { %s24_s25 = sadd.s32 1, %s11031_s25  }
 0xc89   : > { %p21_p4 = scmp.ge.s32.totalorder %s24_s25, 4  }
 0xc8b   :  { %23 = sbr.rel (!%p21_p4) target bundleno = 1 (0x1), region = 110 }

</bundles_post_ra>
